<compile_context>
chip_gen: v6e
topology: v6e:2x2x1
jax: 0.10.0
libtpu: 0.0.40
codegen_flags: <defaults>
</compile_context>

<pallas_src>
import functools

import jax
import jax.numpy as jnp
from jax import lax
from jax.experimental import pallas as pl
from jax.experimental.pallas import tpu as pltpu

EPS = 1e-8
LANE = 128


def round_up(x, m):
    return ((x + m - 1) // m) * m


# ----------------------------- JAX glue (interp / unfold) -----------------------------

def interp_nearest_nchw(x, size):
    """PyTorch F.interpolate(mode='nearest') semantics: src = floor(dst * in/out)."""
    B, C, h, w = x.shape
    H, W = size
    ri = (jnp.arange(H) * h) // H
    ci = (jnp.arange(W) * w) // W
    return x[:, :, ri, :][:, :, :, ci]


def interp_bilinear_nchw(x, size):
    """PyTorch F.interpolate(mode='bilinear', align_corners=False) semantics."""
    B, C, h, w = x.shape
    H, W = size
    if (h, w) == (H, W):
        return x

    def coords(out_size, in_size):
        src = (jnp.arange(out_size, dtype=jnp.float32) + 0.5) * (in_size / out_size) - 0.5
        src = jnp.maximum(src, 0.0)
        i0 = jnp.floor(src).astype(jnp.int32)
        i0 = jnp.minimum(i0, in_size - 1)
        i1 = jnp.minimum(i0 + 1, in_size - 1)
        frac = src - i0.astype(jnp.float32)
        return i0, i1, frac

    y0, y1, fy = coords(H, h)
    x0, x1, fx = coords(W, w)
    top = (x[:, :, y0, :] * (1.0 - fy)[None, None, :, None]
           + x[:, :, y1, :] * fy[None, None, :, None])
    out = top[:, :, :, x0] * (1.0 - fx) + top[:, :, :, x1] * fx
    return out


def unfold_nchw(x, kernel_size, dilation):
    """nn.Unfold(kernel_size, padding=k//2*dilation, dilation) -> (B, C, K*K, H, W).

    Only used by the pure-JAX reference; the Pallas path gathers neighbours in-kernel.
    """
    B, C, H, W = x.shape
    K, d = kernel_size, dilation
    p = (K // 2) * d
    xp = jnp.pad(x, ((0, 0), (0, 0), (p, p), (p, p)))
    cols = []
    for ki in range(K):
        for kj in range(K):
            cols.append(xp[:, :, ki * d:ki * d + H, kj * d:kj * d + W])
    return jnp.stack(cols, axis=2)


# ------------------------------ input preparation (glue) -------------------------------

def prepare_inputs(tensors, *, kernel_size, dilation, feat_level, tile_h, store_bf16=True):
    """Interp + mask glue, then lay out halo'd row tiles for the Pallas kernel."""
    logits_trg = tensors['logits_trg'].astype(jnp.float32)                  # (B, C, H, W)
    x_ema = (tensors['x_ema'][feat_level]
             if feat_level is not None else tensors['x_ema'])
    B, C, H, W = logits_trg.shape
    K, d = kernel_size, dilation
    p = (K // 2) * d

    ignore = 1.0 - tensors['mix_masks'].astype(jnp.float32)
    ignore = (interp_nearest_nchw(ignore, (H, W)) > 0.5).astype(jnp.float32)  # (B,1,H,W)

    logits_ema = interp_bilinear_nchw(tensors['logits_ema'].astype(jnp.float32), (H, W))
    feats = interp_nearest_nchw(x_ema.astype(jnp.float32), (H, W))           # (B,Cf,H,W)
    Cf = feats.shape[1]

    io_dtype = jnp.bfloat16 if store_bf16 else jnp.float32
    feats_q = feats.astype(io_dtype)
    logits_ema_q = logits_ema.astype(io_dtype)

    TH = tile_h
    nH = -(-H // TH)
    Hp = nH * TH
    Wo = round_up(W, LANE)
    Wwin = round_up(Wo + 2 * p, LANE)

    def make_windows(x):
        # (B, c, H, W) -> halo'd row tiles (B, nH, c, TH+2p, Wwin); data at [p:p+H, p:p+W].
        c = x.shape[1]
        xp = jnp.zeros((B, c, Hp + 2 * p, Wwin), x.dtype)
        xp = xp.at[:, :, p:p + H, p:p + W].set(x)
        wins = [xp[:, :, t * TH:t * TH + TH + 2 * p, :] for t in range(nH)]
        return jnp.stack(wins, axis=1)

    feat_win = make_windows(feats_q)            # (B, nH, Cf, TH+2p, Wwin)
    log_win = make_windows(logits_ema_q)        # (B, nH, C,  TH+2p, Wwin)

    def pad_out(x):
        c = x.shape[1]
        return jnp.zeros((B, c, Hp, Wo), jnp.float32).at[:, :, :H, :W].set(x)

    lt = pad_out(logits_trg)                     # (B, C, Hp, Wo)
    mk = pad_out(ignore)                         # (B, 1, Hp, Wo)  mask = 0 in padding

    meta = dict(B=B, C=C, Cf=Cf, H=H, W=W, K=K, d=d, p=p,
                TH=TH, nH=nH, Wo=Wo, Wwin=Wwin)
    return feat_win, log_win, lt, mk, meta


def _vmem_estimate(TH, *, C, Cf, K, d, W, io_bytes):
    p = (K // 2) * d
    K2 = K * K
    Wo = round_up(W, LANE)
    Wwin = round_up(Wo + 2 * p, LANE)
    blocks = 2 * ((Cf + C) * (TH + 2 * p) * Wwin * io_bytes + (C + 1) * TH * Wo * 4)
    f32_windows = (Cf + C) * (TH + 2 * p) * Wwin * 4
    temps = (5 * K2 + 8 * C + 2 * Cf + 8) * TH * Wo * 4
    scratch = 3 * TH * Wo * 4
    return blocks + f32_windows + temps + scratch


def choose_tile_h(H, W, C, Cf, K, d, io_bytes, budget_bytes=24 << 20):
    """Largest row-tile (multiple of 8) whose working set fits the VMEM budget.

    The 24 MiB budget keeps double-buffered blocks + temporaries comfortably inside the
    scoped VMEM on v5e/v6e (128 MiB physical) and v7x (64 MiB physical).
    """
    th = round_up(H, 8)
    while th > 8:
        if _vmem_estimate(th, C=C, Cf=Cf, K=K, d=d, W=W, io_bytes=io_bytes) <= budget_bytes:
            break
        th -= 8
    return th


# ----------------------------------- Pallas kernel -------------------------------------

def pfst_kernel(fwin_ref, lwin_ref, lt_ref, m_ref, out_ref, acc_ref, *, K, d, top_k):
    K2 = K * K
    _, C, TH, Wo = lt_ref.shape

    b = pl.program_id(0)
    t = pl.program_id(1)
    is_first = jnp.logical_and(b == 0, t == 0)
    is_last = jnp.logical_and(b == pl.num_programs(0) - 1,
                              t == pl.num_programs(1) - 1)

    @pl.when(is_first)
    def _():
        acc_ref[...] = jnp.zeros_like(acc_ref)
        out_ref[0] = jnp.float32(0.0)
        out_ref[1] = jnp.float32(0.0)
        out_ref[2] = jnp.float32(0.0)

    # cast halo'd windows to f32 once; all compute stays in f32 (bf16 is storage only)
    fwin = fwin_ref[0, 0].astype(jnp.float32)    # (Cf, TH+2p, Wwin)
    lwin = lwin_ref[0, 0].astype(jnp.float32)    # (C,  TH+2p, Wwin)

    def feat_slab(ki, kj):
        return fwin[:, ki * d:ki * d + TH, kj * d:kj * d + Wo]      # (Cf, TH, Wo)

    def logit_slab(ki, kj):
        return lwin[:, ki * d:ki * d + TH, kj * d:kj * d + Wo]      # (C, TH, Wo)

    center = feat_slab(K // 2, K // 2)                               # (Cf, TH, Wo)
    n_c = jnp.sum(center * center, axis=0)                           # (TH, Wo)

    # ---- cosine similarity to each of the K^2 neighbours (in-kernel gather) ----------
    sims = []
    for ki in range(K):
        for kj in range(K):
            nb = center if (ki == K // 2 and kj == K // 2) else feat_slab(ki, kj)
            dots = jnp.sum(nb * center, axis=0)                      # (TH, Wo)
            n_n = jnp.sum(nb * nb, axis=0)
            sims.append(dots * lax.rsqrt(jnp.maximum(n_c * n_n, EPS * EPS)))
    sim = jnp.stack(sims, axis=0)                                    # (K2, TH, Wo)

    # ---- top-k selection; weights folded in (selected entries keep their sim value) ---
    iota = lax.broadcasted_iota(jnp.int32, sim.shape, 0)

    def select_weights(k, largest):
        work = sim
        w = jnp.zeros_like(sim)
        for _ in range(k):
            m = (jnp.max if largest else jnp.min)(work, axis=0, keepdims=True)
            idx = jnp.min(jnp.where(work == m, iota, K2), axis=0, keepdims=True)
            onehot = iota == idx                                     # first-index tie-break
            w = jnp.where(onehot, sim, w)
            work = jnp.where(onehot, -jnp.inf if largest else jnp.inf, work)
        return w

    w_pos = select_weights(top_k + 1, True)                          # (K2, TH, Wo)
    w_neg = select_weights(top_k, False)

    # ---- similarity-weighted pseudo logits (one shared ema-logit slab per k) ----------
    wl_pos = jnp.zeros((C, TH, Wo), jnp.float32)
    wl_neg = jnp.zeros((C, TH, Wo), jnp.float32)
    k = 0
    for ki in range(K):
        for kj in range(K):
            slab = logit_slab(ki, kj)                                # (C, TH, Wo)
            wl_pos = wl_pos + w_pos[k][None] * slab
            wl_neg = wl_neg + w_neg[k][None] * slab
            k += 1

    def softmax_c(z):
        z = z - jnp.max(z, axis=0, keepdims=True)
        e = jnp.exp(z)
        return e / jnp.sum(e, axis=0, keepdims=True)

    p_pos = softmax_c(wl_pos)
    p_neg = softmax_c(wl_neg)

    x = lt_ref[0]                                                    # (C, TH, Wo)
    mask = m_ref[0, 0]                                               # (TH, Wo)

    def bce_with_logits(logit, target):
        return (jnp.maximum(logit, 0.0) - logit * target
                + jnp.log(1.0 + jnp.exp(-jnp.abs(logit))))

    lp = jnp.sum(bce_with_logits(x, p_pos), axis=0) * mask           # (TH, Wo)
    ln = jnp.sum(bce_with_logits(x, p_neg), axis=0) * mask

    # per-lane partial sums; cross-lane reduction only on the last step
    acc_ref[0] += lp
    acc_ref[1] -= ln              # loss_sim_neg uses -BCE
    acc_ref[2] += mask

    @pl.when(is_last)
    def _():
        out_ref[0] = jnp.sum(acc_ref[0])
        out_ref[1] = jnp.sum(acc_ref[1])
        out_ref[2] = jnp.sum(acc_ref[2])


def pfst_pallas(feat_win, log_win, lt, mk, meta, *, top_k):
    B, C, Cf = meta['B'], meta['C'], meta['Cf']
    K, d, p = meta['K'], meta['d'], meta['p']
    TH, nH, Wo, Wwin = meta['TH'], meta['nH'], meta['Wo'], meta['Wwin']
    K2 = K * K
    assert top_k + 1 <= K2, "top_k+1 must not exceed kernel_size**2"

    io_bytes = jnp.dtype(feat_win.dtype).itemsize
    vmem_needed = _vmem_estimate(TH, C=C, Cf=Cf, K=K, d=d, W=meta['W'], io_bytes=io_bytes)
    # floor 32 MiB (<= default scoped on v6e/v7x, < physical everywhere), cap 48 MiB so the
    # request stays safely under v7x's 64 MiB physical VMEM.
    vmem_limit = int(min(max(vmem_needed + (4 << 20), 32 << 20), 48 << 20))

    npix = B * nH * TH * Wo
    flops = int(npix * (6 * K2 * Cf + 6 * K2 * (2 * top_k + 1) + 4 * K2 * C + 24 * C))
    transcendentals = int(npix * (4 * C + K2))
    bytes_accessed = int(feat_win.size * io_bytes + log_win.size * io_bytes
                         + lt.size * 4 + mk.size * 4 + 3 * 4)

    kernel = functools.partial(pfst_kernel, K=K, d=d, top_k=top_k)
    sums = pl.pallas_call(
        kernel,
        out_shape=jax.ShapeDtypeStruct((3,), jnp.float32),
        grid=(B, nH),
        in_specs=[
            pl.BlockSpec((1, 1, Cf, TH + 2 * p, Wwin), lambda b, t: (b, t, 0, 0, 0)),
            pl.BlockSpec((1, 1, C, TH + 2 * p, Wwin), lambda b, t: (b, t, 0, 0, 0)),
            pl.BlockSpec((1, C, TH, Wo), lambda b, t: (b, 0, t, 0)),
            pl.BlockSpec((1, 1, TH, Wo), lambda b, t: (b, 0, t, 0)),
        ],
        out_specs=pl.BlockSpec(memory_space=pltpu.MemorySpace.SMEM),
        scratch_shapes=[pltpu.VMEM((3, TH, Wo), jnp.float32)],
        compiler_params=pltpu.CompilerParams(
            dimension_semantics=("arbitrary", "arbitrary"),
            vmem_limit_bytes=vmem_limit),
        cost_estimate=pl.CostEstimate(flops=flops,
                                      transcendentals=transcendentals,
                                      bytes_accessed=bytes_accessed),
    )(feat_win, log_win, lt, mk)
    return sums   # [sum(bce_pos*mask), sum(-bce_neg*mask), sum(mask)]


def pfst_loss_forward(tensors, *, top_k, dilation, kernel_size, weights,
                      feat_level=2, sim_type='cosine', store_bf16=True, tile_h=None):
    if sim_type != 'cosine':
        raise ValueError("only sim_type='cosine' implemented")  # TODO(synk): gaussian sim_type
    logits_trg = tensors['logits_trg']
    B, C, H, W = logits_trg.shape
    x_ema = tensors['x_ema'][feat_level] if feat_level is not None else tensors['x_ema']
    Cf = x_ema.shape[1]
    io_bytes = 2 if store_bf16 else 4
    if tile_h is None:
        tile_h = choose_tile_h(H, W, C, Cf, kernel_size, dilation, io_bytes)

    feat_win, log_win, lt, mk, meta = prepare_inputs(
        tensors, kernel_size=kernel_size, dilation=dilation, feat_level=feat_level,
        tile_h=tile_h, store_bf16=store_bf16)
    sums = pfst_pallas(feat_win, log_win, lt, mk, meta, top_k=top_k)
    denom = sums[2] * C
    # TODO(synk): 'vis|density_sim_feat' / 'vis|seg_mask_sim_pseudo_labels' visualization
    # outputs (detached, visualization-only) are omitted.
    return {
        'loss_sim_pos': sums[0] / denom * weights['sim_pos'],
        'loss_sim_neg': sums[1] / denom * weights['sim_neg'],
    }


# --------------------------------- pure-JAX reference ----------------------------------

def pfst_reference(tensors, *, top_k, dilation, kernel_size, weights, feat_level,
                   store_bf16=True):
    """Dense reference (no Pallas); element-wise f32 math only (no MXU einsum), same
    bf16-quantized feature/ema-logit inputs as the kernel path."""
    logits_trg = tensors['logits_trg'].astype(jnp.float32)
    B, C, H, W = logits_trg.shape
    x_ema = tensors['x_ema'][feat_level] if feat_level is not None else tensors['x_ema']
    K, d = kernel_size, dilation
    io_dtype = jnp.bfloat16 if store_bf16 else jnp.float32

    ignore = 1.0 - tensors['mix_masks'].astype(jnp.float32)
    ignore = (interp_nearest_nchw(ignore, (H, W)) > 0.5).astype(jnp.float32)

    logits_ema = interp_bilinear_nchw(tensors['logits_ema'].astype(jnp.float32), (H, W))
    feats = interp_nearest_nchw(x_ema.astype(jnp.float32), (H, W))
    feats = feats.astype(io_dtype).astype(jnp.float32)
    logits_ema = logits_ema.astype(io_dtype).astype(jnp.float32)

    unf_f = unfold_nchw(feats, K, d)              # (B, Cf, K2, H, W)
    unf_l = unfold_nchw(logits_ema, K, d)         # (B, C,  K2, H, W)
    K2 = K * K

    dots = jnp.sum(unf_f * feats[:, :, None], axis=1)             # (B, K2, H, W)
    n_c = jnp.sum(feats * feats, axis=1)[:, None]                 # (B, 1, H, W)
    n_n = jnp.sum(unf_f * unf_f, axis=1)                          # (B, K2, H, W)
    sim = dots * lax.rsqrt(jnp.maximum(n_c * n_n, EPS * EPS))

    simt = sim.transpose(0, 2, 3, 1).reshape(-1, K2)              # (N, K2)
    nl = unf_l.transpose(0, 3, 4, 2, 1).reshape(-1, K2, C)        # (N, K2, C)
    x = logits_trg.transpose(0, 2, 3, 1).reshape(-1, C)           # (N, C)
    m = ignore.transpose(0, 2, 3, 1).reshape(-1, 1)               # (N, 1)

    vpos, ipos = lax.top_k(simt, top_k + 1)
    vneg, ineg = lax.top_k(-simt, top_k)
    vneg = -vneg
    gpos = jnp.take_along_axis(nl, ipos[:, :, None], axis=1)
    gneg = jnp.take_along_axis(nl, ineg[:, :, None], axis=1)
    wl_pos = jnp.sum(vpos[:, :, None] * gpos, axis=1)             # (N, C)
    wl_neg = jnp.sum(vneg[:, :, None] * gneg, axis=1)

    def softmax(z):
        z = z - jnp.max(z, axis=1, keepdims=True)
        e = jnp.exp(z)
        return e / jnp.sum(e, axis=1, keepdims=True)

    p_pos = softmax(wl_pos)
    p_neg = softmax(wl_neg)

    def bce(logit, target):
        return (jnp.maximum(logit, 0.0) - logit * target
                + jnp.log(1.0 + jnp.exp(-jnp.abs(logit))))

    lp = bce(x, p_pos)
    ln = -bce(x, p_neg)
    den = jnp.sum(m) * C
    return {
        'loss_sim_pos': jnp.sum(lp * m) / den * weights['sim_pos'],
        'loss_sim_neg': jnp.sum(ln * m) / den * weights['sim_neg'],
    }


# -------------------------------------- main --------------------------------------------

if __name__ == "__main__":
    key = jax.random.PRNGKey(0)
    B, C, H, W = 2, 4, 16, 16
    Cf = 8
    top_k, dilation, kernel_size = 2, 1, 3
    feat_level = 2
    weights = {'sim_pos': 1.0, 'sim_neg': 0.1}

    ks = jax.random.split(key, 10)
    tensors = {
        'logits_trg': jax.random.normal(ks[0], (B, C, H, W), jnp.float32),
        'logits_ema': jax.random.normal(ks[1], (B, C, H // 2, W // 2), jnp.float32),
        'x_ema': [jax.random.normal(ks[2], (B, Cf, 8, 8), jnp.float32),
                  jax.random.normal(ks[3], (B, Cf, 8, 8), jnp.float32),
                  jax.random.normal(ks[4], (B, Cf, 4, 4), jnp.float32)],
        'x_src': [jax.random.normal(ks[5], (B, Cf, 8, 8), jnp.float32),
                  jax.random.normal(ks[5], (B, Cf, 8, 8), jnp.float32),
                  jax.random.normal(ks[5], (B, Cf, 4, 4), jnp.float32)],
        'gt_src': jax.random.randint(ks[6], (B, 1, H, W), 0, C),
        'img_trg': jax.random.normal(ks[7], (B, 3, H, W), jnp.float32),
        'mix_masks': (jax.random.uniform(ks[8], (B, 1, 32, 32)) > 0.5).astype(jnp.float32),
    }

    losses = pfst_loss_forward(tensors, top_k=top_k, dilation=dilation,
                               kernel_size=kernel_size, weights=weights,
                               feat_level=feat_level)
    losses = jax.block_until_ready(losses)

    ref = pfst_reference(tensors, top_k=top_k, dilation=dilation,
                         kernel_size=kernel_size, weights=weights,
                         feat_level=feat_level)
    ref = jax.block_until_ready(ref)

    # Tolerance: both paths use the same bf16-stored inputs and f32 math; remaining
    # differences come from reduction-order / tie effects only.
    for name in ('loss_sim_pos', 'loss_sim_neg'):
        got, want = losses[name], ref[name]
        assert bool(jnp.isfinite(got)), (name, got)
        assert bool(jnp.allclose(got, want, rtol=2e-3, atol=1e-6)), (name, got, want)

    print("KERNEL_OK")
</pallas_src>

<mosaic_0001>
module attributes {stable_mosaic.version = 11 : i64} {
  func.func @pfst_kernel(%arg0: i32, %arg1: i32, %arg2: memref<1x1x8x18x256xbf16, #tpu.memory_space<vmem>>, %arg3: memref<1x1x4x18x256xbf16, #tpu.memory_space<vmem>>, %arg4: memref<1x4x16x128xf32, #tpu.memory_space<vmem>>, %arg5: memref<1x1x16x128xf32, #tpu.memory_space<vmem>>, %arg6: memref<3xf32, #tpu.memory_space<smem>>, %arg7: memref<3x16x128xf32, #tpu.memory_space<vmem>>) attributes {dimension_semantics = [#tpu.dimension_semantics<arbitrary>, #tpu.dimension_semantics<arbitrary>], iteration_bounds = array<i64: 2, 1>, scalar_prefetch = 0 : i64, scratch_operands = 1 : i64, tpu.core_type = #tpu.core_type<tc>, window_params = [{transform_indices = @transform_0, window_bounds = array<i64: 1, 1, 8, 18, 256>}, {transform_indices = @transform_1, window_bounds = array<i64: 1, 1, 4, 18, 256>}, {transform_indices = @transform_2, window_bounds = array<i64: 1, 4, 16, 128>}, {transform_indices = @transform_3, window_bounds = array<i64: 1, 1, 16, 128>}, {transform_indices = @transform_4, window_bounds = array<i64: 3>}]} {
    %c0_i32 = arith.constant 0 : i32
    %0 = arith.cmpi eq, %arg0, %c0_i32 : i32
    %c0_i32_0 = arith.constant 0 : i32
    %1 = arith.cmpi eq, %arg1, %c0_i32_0 : i32
    %2 = arith.andi %0, %1 : i1
    %c1_i32 = arith.constant 1 : i32
    %3 = arith.cmpi eq, %arg0, %c1_i32 : i32
    %c0_i32_1 = arith.constant 0 : i32
    %4 = arith.cmpi eq, %arg1, %c0_i32_1 : i32
    %5 = arith.andi %3, %4 : i1
    %6 = arith.extui %2 : i1 to i32
    %c0_i32_2 = arith.constant 0 : i32
    %7 = arith.cmpi ne, %6, %c0_i32_2 : i32
    scf.if %7 {
      %cst_97 = arith.constant 0.000000e+00 : f32
      %369 = vector.broadcast %cst_97 : f32 to vector<3x16x128xf32>
      %c0_98 = arith.constant 0 : index
      %c0_99 = arith.constant 0 : index
      %c0_100 = arith.constant 0 : index
      %370 = vector.load %arg7[%c0_98, %c0_99, %c0_100] : memref<3x16x128xf32, #tpu.memory_space<vmem>>, vector<3x16x128xf32>
      tpu.vector_store %arg7[%c0_98, %c0_99, %c0_100], %369 {strides = array<i32>} : memref<3x16x128xf32, #tpu.memory_space<vmem>>, vector<3x16x128xf32>,
      %cst_101 = arith.constant 0.000000e+00 : f32
      %c0_102 = arith.constant 0 : index
      %371 = memref.load %arg6[%c0_102] : memref<3xf32, #tpu.memory_space<smem>>
      memref.store %cst_101, %arg6[%c0_102] : memref<3xf32, #tpu.memory_space<smem>>
      %cst_103 = arith.constant 0.000000e+00 : f32
      %c1_104 = arith.constant 1 : index
      %372 = memref.load %arg6[%c1_104] : memref<3xf32, #tpu.memory_space<smem>>
      memref.store %cst_103, %arg6[%c1_104] : memref<3xf32, #tpu.memory_space<smem>>
      %cst_105 = arith.constant 0.000000e+00 : f32
      %c2_106 = arith.constant 2 : index
      %373 = memref.load %arg6[%c2_106] : memref<3xf32, #tpu.memory_space<smem>>
      memref.store %cst_105, %arg6[%c2_106] : memref<3xf32, #tpu.memory_space<smem>>
    } else {
    }
    %c0 = arith.constant 0 : index
    %c0_3 = arith.constant 0 : index
    %c0_4 = arith.constant 0 : index
    %c0_5 = arith.constant 0 : index
    %c0_6 = arith.constant 0 : index
    %8 = vector.load %arg2[%c0, %c0_3, %c0_4, %c0_5, %c0_6] : memref<1x1x8x18x256xbf16, #tpu.memory_space<vmem>>, vector<1x1x8x18x256xbf16>
    %9 = vector.shape_cast %8 : vector<1x1x8x18x256xbf16> to vector<8x18x256xbf16>
    %10 = arith.extf %9 : vector<8x18x256xbf16> to vector<8x18x256xf32>
    %c0_7 = arith.constant 0 : index
    %c0_8 = arith.constant 0 : index
    %c0_9 = arith.constant 0 : index
    %c0_10 = arith.constant 0 : index
    %c0_11 = arith.constant 0 : index
    %11 = vector.load %arg3[%c0_7, %c0_8, %c0_9, %c0_10, %c0_11] : memref<1x1x4x18x256xbf16, #tpu.memory_space<vmem>>, vector<1x1x4x18x256xbf16>
    %12 = vector.shape_cast %11 : vector<1x1x4x18x256xbf16> to vector<4x18x256xbf16>
    %13 = arith.extf %12 : vector<4x18x256xbf16> to vector<4x18x256xf32>
    %14 = vector.extract_strided_slice %10 {offsets = [0, 1, 1], sizes = [8, 16, 128], strides = [1, 1, 1]} : vector<8x18x256xf32> to vector<8x16x128xf32>
    %15 = arith.mulf %14, %14 : vector<8x16x128xf32>
    %cst = arith.constant dense<0.000000e+00> : vector<16x128xf32>
    %16 = vector.multi_reduction <add>, %15, %cst [0] : vector<8x16x128xf32> to vector<16x128xf32>
    %17 = vector.extract_strided_slice %10 {offsets = [0, 0, 0], sizes = [8, 16, 128], strides = [1, 1, 1]} : vector<8x18x256xf32> to vector<8x16x128xf32>
    %18 = arith.mulf %17, %14 : vector<8x16x128xf32>
    %cst_12 = arith.constant dense<0.000000e+00> : vector<16x128xf32>
    %19 = vector.multi_reduction <add>, %18, %cst_12 [0] : vector<8x16x128xf32> to vector<16x128xf32>
    %20 = arith.mulf %17, %17 : vector<8x16x128xf32>
    %cst_13 = arith.constant dense<0.000000e+00> : vector<16x128xf32>
    %21 = vector.multi_reduction <add>, %20, %cst_13 [0] : vector<8x16x128xf32> to vector<16x128xf32>
    %22 = arith.mulf %16, %21 : vector<16x128xf32>
    %cst_14 = arith.constant 1.000000e-16 : f32
    %23 = vector.broadcast %cst_14 : f32 to vector<16x128xf32>
    %24 = arith.maximumf %22, %23 : vector<16x128xf32>
    %25 = math.rsqrt %24 : vector<16x128xf32>
    %26 = arith.mulf %19, %25 : vector<16x128xf32>
    %27 = vector.extract_strided_slice %10 {offsets = [0, 0, 1], sizes = [8, 16, 128], strides = [1, 1, 1]} : vector<8x18x256xf32> to vector<8x16x128xf32>
    %28 = arith.mulf %27, %14 : vector<8x16x128xf32>
    %cst_15 = arith.constant dense<0.000000e+00> : vector<16x128xf32>
    %29 = vector.multi_reduction <add>, %28, %cst_15 [0] : vector<8x16x128xf32> to vector<16x128xf32>
    %30 = arith.mulf %27, %27 : vector<8x16x128xf32>
    %cst_16 = arith.constant dense<0.000000e+00> : vector<16x128xf32>
    %31 = vector.multi_reduction <add>, %30, %cst_16 [0] : vector<8x16x128xf32> to vector<16x128xf32>
    %32 = arith.mulf %16, %31 : vector<16x128xf32>
    %cst_17 = arith.constant 1.000000e-16 : f32
    %33 = vector.broadcast %cst_17 : f32 to vector<16x128xf32>
    %34 = arith.maximumf %32, %33 : vector<16x128xf32>
    %35 = math.rsqrt %34 : vector<16x128xf32>
    %36 = arith.mulf %29, %35 : vector<16x128xf32>
    %37 = vector.extract_strided_slice %10 {offsets = [0, 0, 2], sizes = [8, 16, 128], strides = [1, 1, 1]} : vector<8x18x256xf32> to vector<8x16x128xf32>
    %38 = arith.mulf %37, %14 : vector<8x16x128xf32>
    %cst_18 = arith.constant dense<0.000000e+00> : vector<16x128xf32>
    %39 = vector.multi_reduction <add>, %38, %cst_18 [0] : vector<8x16x128xf32> to vector<16x128xf32>
    %40 = arith.mulf %37, %37 : vector<8x16x128xf32>
    %cst_19 = arith.constant dense<0.000000e+00> : vector<16x128xf32>
    %41 = vector.multi_reduction <add>, %40, %cst_19 [0] : vector<8x16x128xf32> to vector<16x128xf32>
    %42 = arith.mulf %16, %41 : vector<16x128xf32>
    %cst_20 = arith.constant 1.000000e-16 : f32
    %43 = vector.broadcast %cst_20 : f32 to vector<16x128xf32>
    %44 = arith.maximumf %42, %43 : vector<16x128xf32>
    %45 = math.rsqrt %44 : vector<16x128xf32>
    %46 = arith.mulf %39, %45 : vector<16x128xf32>
    %47 = vector.extract_strided_slice %10 {offsets = [0, 1, 0], sizes = [8, 16, 128], strides = [1, 1, 1]} : vector<8x18x256xf32> to vector<8x16x128xf32>
    %48 = arith.mulf %47, %14 : vector<8x16x128xf32>
    %cst_21 = arith.constant dense<0.000000e+00> : vector<16x128xf32>
    %49 = vector.multi_reduction <add>, %48, %cst_21 [0] : vector<8x16x128xf32> to vector<16x128xf32>
    %50 = arith.mulf %47, %47 : vector<8x16x128xf32>
    %cst_22 = arith.constant dense<0.000000e+00> : vector<16x128xf32>
    %51 = vector.multi_reduction <add>, %50, %cst_22 [0] : vector<8x16x128xf32> to vector<16x128xf32>
    %52 = arith.mulf %16, %51 : vector<16x128xf32>
    %cst_23 = arith.constant 1.000000e-16 : f32
    %53 = vector.broadcast %cst_23 : f32 to vector<16x128xf32>
    %54 = arith.maximumf %52, %53 : vector<16x128xf32>
    %55 = math.rsqrt %54 : vector<16x128xf32>
    %56 = arith.mulf %49, %55 : vector<16x128xf32>
    %57 = arith.mulf %14, %14 : vector<8x16x128xf32>
    %cst_24 = arith.constant dense<0.000000e+00> : vector<16x128xf32>
    %58 = vector.multi_reduction <add>, %57, %cst_24 [0] : vector<8x16x128xf32> to vector<16x128xf32>
    %59 = arith.mulf %14, %14 : vector<8x16x128xf32>
    %cst_25 = arith.constant dense<0.000000e+00> : vector<16x128xf32>
    %60 = vector.multi_reduction <add>, %59, %cst_25 [0] : vector<8x16x128xf32> to vector<16x128xf32>
    %61 = arith.mulf %16, %60 : vector<16x128xf32>
    %cst_26 = arith.constant 1.000000e-16 : f32
    %62 = vector.broadcast %cst_26 : f32 to vector<16x128xf32>
    %63 = arith.maximumf %61, %62 : vector<16x128xf32>
    %64 = math.rsqrt %63 : vector<16x128xf32>
    %65 = arith.mulf %58, %64 : vector<16x128xf32>
    %66 = vector.extract_strided_slice %10 {offsets = [0, 1, 2], sizes = [8, 16, 128], strides = [1, 1, 1]} : vector<8x18x256xf32> to vector<8x16x128xf32>
    %67 = arith.mulf %66, %14 : vector<8x16x128xf32>
    %cst_27 = arith.constant dense<0.000000e+00> : vector<16x128xf32>
    %68 = vector.multi_reduction <add>, %67, %cst_27 [0] : vector<8x16x128xf32> to vector<16x128xf32>
    %69 = arith.mulf %66, %66 : vector<8x16x128xf32>
    %cst_28 = arith.constant dense<0.000000e+00> : vector<16x128xf32>
    %70 = vector.multi_reduction <add>, %69, %cst_28 [0] : vector<8x16x128xf32> to vector<16x128xf32>
    %71 = arith.mulf %16, %70 : vector<16x128xf32>
    %cst_29 = arith.constant 1.000000e-16 : f32
    %72 = vector.broadcast %cst_29 : f32 to vector<16x128xf32>
    %73 = arith.maximumf %71, %72 : vector<16x128xf32>
    %74 = math.rsqrt %73 : vector<16x128xf32>
    %75 = arith.mulf %68, %74 : vector<16x128xf32>
    %76 = vector.extract_strided_slice %10 {offsets = [0, 2, 0], sizes = [8, 16, 128], strides = [1, 1, 1]} : vector<8x18x256xf32> to vector<8x16x128xf32>
    %77 = arith.mulf %76, %14 : vector<8x16x128xf32>
    %cst_30 = arith.constant dense<0.000000e+00> : vector<16x128xf32>
    %78 = vector.multi_reduction <add>, %77, %cst_30 [0] : vector<8x16x128xf32> to vector<16x128xf32>
    %79 = arith.mulf %76, %76 : vector<8x16x128xf32>
    %cst_31 = arith.constant dense<0.000000e+00> : vector<16x128xf32>
    %80 = vector.multi_reduction <add>, %79, %cst_31 [0] : vector<8x16x128xf32> to vector<16x128xf32>
    %81 = arith.mulf %16, %80 : vector<16x128xf32>
    %cst_32 = arith.constant 1.000000e-16 : f32
    %82 = vector.broadcast %cst_32 : f32 to vector<16x128xf32>
    %83 = arith.maximumf %81, %82 : vector<16x128xf32>
    %84 = math.rsqrt %83 : vector<16x128xf32>
    %85 = arith.mulf %78, %84 : vector<16x128xf32>
    %86 = vector.extract_strided_slice %10 {offsets = [0, 2, 1], sizes = [8, 16, 128], strides = [1, 1, 1]} : vector<8x18x256xf32> to vector<8x16x128xf32>
    %87 = arith.mulf %86, %14 : vector<8x16x128xf32>
    %cst_33 = arith.constant dense<0.000000e+00> : vector<16x128xf32>
    %88 = vector.multi_reduction <add>, %87, %cst_33 [0] : vector<8x16x128xf32> to vector<16x128xf32>
    %89 = arith.mulf %86, %86 : vector<8x16x128xf32>
    %cst_34 = arith.constant dense<0.000000e+00> : vector<16x128xf32>
    %90 = vector.multi_reduction <add>, %89, %cst_34 [0] : vector<8x16x128xf32> to vector<16x128xf32>
    %91 = arith.mulf %16, %90 : vector<16x128xf32>
    %cst_35 = arith.constant 1.000000e-16 : f32
    %92 = vector.broadcast %cst_35 : f32 to vector<16x128xf32>
    %93 = arith.maximumf %91, %92 : vector<16x128xf32>
    %94 = math.rsqrt %93 : vector<16x128xf32>
    %95 = arith.mulf %88, %94 : vector<16x128xf32>
    %96 = vector.extract_strided_slice %10 {offsets = [0, 2, 2], sizes = [8, 16, 128], strides = [1, 1, 1]} : vector<8x18x256xf32> to vector<8x16x128xf32>
    %97 = arith.mulf %96, %14 : vector<8x16x128xf32>
    %cst_36 = arith.constant dense<0.000000e+00> : vector<16x128xf32>
    %98 = vector.multi_reduction <add>, %97, %cst_36 [0] : vector<8x16x128xf32> to vector<16x128xf32>
    %99 = arith.mulf %96, %96 : vector<8x16x128xf32>
    %cst_37 = arith.constant dense<0.000000e+00> : vector<16x128xf32>
    %100 = vector.multi_reduction <add>, %99, %cst_37 [0] : vector<8x16x128xf32> to vector<16x128xf32>
    %101 = arith.mulf %16, %100 : vector<16x128xf32>
    %cst_38 = arith.constant 1.000000e-16 : f32
    %102 = vector.broadcast %cst_38 : f32 to vector<16x128xf32>
    %103 = arith.maximumf %101, %102 : vector<16x128xf32>
    %104 = math.rsqrt %103 : vector<16x128xf32>
    %105 = arith.mulf %98, %104 : vector<16x128xf32>
    %106 = vector.shape_cast %26 : vector<16x128xf32> to vector<1x16x128xf32>
    %107 = vector.shape_cast %36 : vector<16x128xf32> to vector<1x16x128xf32>
    %108 = vector.shape_cast %46 : vector<16x128xf32> to vector<1x16x128xf32>
    %109 = vector.shape_cast %56 : vector<16x128xf32> to vector<1x16x128xf32>
    %110 = vector.shape_cast %65 : vector<16x128xf32> to vector<1x16x128xf32>
    %111 = vector.shape_cast %75 : vector<16x128xf32> to vector<1x16x128xf32>
    %112 = vector.shape_cast %85 : vector<16x128xf32> to vector<1x16x128xf32>
    %113 = vector.shape_cast %95 : vector<16x128xf32> to vector<1x16x128xf32>
    %114 = vector.shape_cast %105 : vector<16x128xf32> to vector<1x16x128xf32>
    %115 = tpu.concatenate %106, %107, %108, %109, %110, %111, %112, %113, %114 in 0 : vector<1x16x128xf32>, vector<1x16x128xf32>, vector<1x16x128xf32>, vector<1x16x128xf32>, vector<1x16x128xf32>, vector<1x16x128xf32>, vector<1x16x128xf32>, vector<1x16x128xf32>, vector<1x16x128xf32> -> vector<9x16x128xf32>
    %116 = tpu.iota {dimensions = array<i32: 0>} : vector<9x16x128xi32>
    %cst_39 = arith.constant 0.000000e+00 : f32
    %117 = vector.broadcast %cst_39 : f32 to vector<9x16x128xf32>
    %cst_40 = arith.constant dense<0xFF800000> : vector<16x128xf32>
    %118 = vector.multi_reduction <maximumf>, %115, %cst_40 [0] : vector<9x16x128xf32> to vector<16x128xf32>
    %119 = vector.shape_cast %118 : vector<16x128xf32> to vector<1x16x128xf32>
    %120 = vector.broadcast %119 : vector<1x16x128xf32> to vector<9x16x128xf32>
    %121 = arith.cmpf oeq, %115, %120 : vector<9x16x128xf32>
    %c9_i32 = arith.constant 9 : i32
    %122 = vector.broadcast %c9_i32 : i32 to vector<9x16x128xi32>
    %123 = arith.select %121, %116, %122 : vector<9x16x128xi1>, vector<9x16x128xi32>
    %cst_41 = arith.constant dense<2147483647> : vector<16x128xi32>
    %124 = vector.multi_reduction <minsi>, %123, %cst_41 [0] : vector<9x16x128xi32> to vector<16x128xi32>
    %125 = vector.shape_cast %124 : vector<16x128xi32> to vector<1x16x128xi32>
    %126 = vector.broadcast %125 : vector<1x16x128xi32> to vector<9x16x128xi32>
    %127 = arith.cmpi eq, %116, %126 : vector<9x16x128xi32>
    %128 = arith.select %127, %115, %117 : vector<9x16x128xi1>, vector<9x16x128xf32>
    %cst_42 = arith.constant 0xFF800000 : f32
    %129 = vector.broadcast %cst_42 : f32 to vector<9x16x128xf32>
    %130 = arith.select %127, %129, %115 : vector<9x16x128xi1>, vector<9x16x128xf32>
    %cst_43 = arith.constant dense<0xFF800000> : vector<16x128xf32>
    %131 = vector.multi_reduction <maximumf>, %130, %cst_43 [0] : vector<9x16x128xf32> to vector<16x128xf32>
    %132 = vector.shape_cast %131 : vector<16x128xf32> to vector<1x16x128xf32>
    %133 = vector.broadcast %132 : vector<1x16x128xf32> to vector<9x16x128xf32>
    %134 = arith.cmpf oeq, %130, %133 : vector<9x16x128xf32>
    %c9_i32_44 = arith.constant 9 : i32
    %135 = vector.broadcast %c9_i32_44 : i32 to vector<9x16x128xi32>
    %136 = arith.select %134, %116, %135 : vector<9x16x128xi1>, vector<9x16x128xi32>
    %cst_45 = arith.constant dense<2147483647> : vector<16x128xi32>
    %137 = vector.multi_reduction <minsi>, %136, %cst_45 [0] : vector<9x16x128xi32> to vector<16x128xi32>
    %138 = vector.shape_cast %137 : vector<16x128xi32> to vector<1x16x128xi32>
    %139 = vector.broadcast %138 : vector<1x16x128xi32> to vector<9x16x128xi32>
    %140 = arith.cmpi eq, %116, %139 : vector<9x16x128xi32>
    %141 = arith.select %140, %115, %128 : vector<9x16x128xi1>, vector<9x16x128xf32>
    %cst_46 = arith.constant 0xFF800000 : f32
    %142 = vector.broadcast %cst_46 : f32 to vector<9x16x128xf32>
    %143 = arith.select %140, %142, %130 : vector<9x16x128xi1>, vector<9x16x128xf32>
    %cst_47 = arith.constant dense<0xFF800000> : vector<16x128xf32>
    %144 = vector.multi_reduction <maximumf>, %143, %cst_47 [0] : vector<9x16x128xf32> to vector<16x128xf32>
    %145 = vector.shape_cast %144 : vector<16x128xf32> to vector<1x16x128xf32>
    %146 = vector.broadcast %145 : vector<1x16x128xf32> to vector<9x16x128xf32>
    %147 = arith.cmpf oeq, %143, %146 : vector<9x16x128xf32>
    %c9_i32_48 = arith.constant 9 : i32
    %148 = vector.broadcast %c9_i32_48 : i32 to vector<9x16x128xi32>
    %149 = arith.select %147, %116, %148 : vector<9x16x128xi1>, vector<9x16x128xi32>
    %cst_49 = arith.constant dense<2147483647> : vector<16x128xi32>
    %150 = vector.multi_reduction <minsi>, %149, %cst_49 [0] : vector<9x16x128xi32> to vector<16x128xi32>
    %151 = vector.shape_cast %150 : vector<16x128xi32> to vector<1x16x128xi32>
    %152 = vector.broadcast %151 : vector<1x16x128xi32> to vector<9x16x128xi32>
    %153 = arith.cmpi eq, %116, %152 : vector<9x16x128xi32>
    %154 = arith.select %153, %115, %141 : vector<9x16x128xi1>, vector<9x16x128xf32>
    %cst_50 = arith.constant 0.000000e+00 : f32
    %155 = vector.broadcast %cst_50 : f32 to vector<9x16x128xf32>
    %cst_51 = arith.constant dense<0x7F800000> : vector<16x128xf32>
    %156 = vector.multi_reduction <minimumf>, %115, %cst_51 [0] : vector<9x16x128xf32> to vector<16x128xf32>
    %157 = vector.shape_cast %156 : vector<16x128xf32> to vector<1x16x128xf32>
    %158 = vector.broadcast %157 : vector<1x16x128xf32> to vector<9x16x128xf32>
    %159 = arith.cmpf oeq, %115, %158 : vector<9x16x128xf32>
    %c9_i32_52 = arith.constant 9 : i32
    %160 = vector.broadcast %c9_i32_52 : i32 to vector<9x16x128xi32>
    %161 = arith.select %159, %116, %160 : vector<9x16x128xi1>, vector<9x16x128xi32>
    %cst_53 = arith.constant dense<2147483647> : vector<16x128xi32>
    %162 = vector.multi_reduction <minsi>, %161, %cst_53 [0] : vector<9x16x128xi32> to vector<16x128xi32>
    %163 = vector.shape_cast %162 : vector<16x128xi32> to vector<1x16x128xi32>
    %164 = vector.broadcast %163 : vector<1x16x128xi32> to vector<9x16x128xi32>
    %165 = arith.cmpi eq, %116, %164 : vector<9x16x128xi32>
    %166 = arith.select %165, %115, %155 : vector<9x16x128xi1>, vector<9x16x128xf32>
    %cst_54 = arith.constant 0x7F800000 : f32
    %167 = vector.broadcast %cst_54 : f32 to vector<9x16x128xf32>
    %168 = arith.select %165, %167, %115 : vector<9x16x128xi1>, vector<9x16x128xf32>
    %cst_55 = arith.constant dense<0x7F800000> : vector<16x128xf32>
    %169 = vector.multi_reduction <minimumf>, %168, %cst_55 [0] : vector<9x16x128xf32> to vector<16x128xf32>
    %170 = vector.shape_cast %169 : vector<16x128xf32> to vector<1x16x128xf32>
    %171 = vector.broadcast %170 : vector<1x16x128xf32> to vector<9x16x128xf32>
    %172 = arith.cmpf oeq, %168, %171 : vector<9x16x128xf32>
    %c9_i32_56 = arith.constant 9 : i32
    %173 = vector.broadcast %c9_i32_56 : i32 to vector<9x16x128xi32>
    %174 = arith.select %172, %116, %173 : vector<9x16x128xi1>, vector<9x16x128xi32>
    %cst_57 = arith.constant dense<2147483647> : vector<16x128xi32>
    %175 = vector.multi_reduction <minsi>, %174, %cst_57 [0] : vector<9x16x128xi32> to vector<16x128xi32>
    %176 = vector.shape_cast %175 : vector<16x128xi32> to vector<1x16x128xi32>
    %177 = vector.broadcast %176 : vector<1x16x128xi32> to vector<9x16x128xi32>
    %178 = arith.cmpi eq, %116, %177 : vector<9x16x128xi32>
    %179 = arith.select %178, %115, %166 : vector<9x16x128xi1>, vector<9x16x128xf32>
    %cst_58 = arith.constant 0.000000e+00 : f32
    %180 = vector.broadcast %cst_58 : f32 to vector<4x16x128xf32>
    %cst_59 = arith.constant 0.000000e+00 : f32
    %181 = vector.broadcast %cst_59 : f32 to vector<4x16x128xf32>
    %182 = vector.extract_strided_slice %13 {offsets = [0, 0, 0], sizes = [4, 16, 128], strides = [1, 1, 1]} : vector<4x18x256xf32> to vector<4x16x128xf32>
    %183 = vector.extract_strided_slice %154 {offsets = [0, 0, 0], sizes = [1, 16, 128], strides = [1, 1, 1]} : vector<9x16x128xf32> to vector<1x16x128xf32>
    %184 = vector.shape_cast %183 : vector<1x16x128xf32> to vector<16x128xf32>
    %185 = vector.shape_cast %184 : vector<16x128xf32> to vector<1x16x128xf32>
    %186 = vector.broadcast %185 : vector<1x16x128xf32> to vector<4x16x128xf32>
    %187 = arith.mulf %186, %182 : vector<4x16x128xf32>
    %188 = arith.addf %180, %187 : vector<4x16x128xf32>
    %189 = vector.extract_strided_slice %179 {offsets = [0, 0, 0], sizes = [1, 16, 128], strides = [1, 1, 1]} : vector<9x16x128xf32> to vector<1x16x128xf32>
    %190 = vector.shape_cast %189 : vector<1x16x128xf32> to vector<16x128xf32>
    %191 = vector.shape_cast %190 : vector<16x128xf32> to vector<1x16x128xf32>
    %192 = vector.broadcast %191 : vector<1x16x128xf32> to vector<4x16x128xf32>
    %193 = arith.mulf %192, %182 : vector<4x16x128xf32>
    %194 = arith.addf %181, %193 : vector<4x16x128xf32>
    %195 = vector.extract_strided_slice %13 {offsets = [0, 0, 1], sizes = [4, 16, 128], strides = [1, 1, 1]} : vector<4x18x256xf32> to vector<4x16x128xf32>
    %196 = vector.extract_strided_slice %154 {offsets = [1, 0, 0], sizes = [1, 16, 128], strides = [1, 1, 1]} : vector<9x16x128xf32> to vector<1x16x128xf32>
    %197 = vector.shape_cast %196 : vector<1x16x128xf32> to vector<16x128xf32>
    %198 = vector.shape_cast %197 : vector<16x128xf32> to vector<1x16x128xf32>
    %199 = vector.broadcast %198 : vector<1x16x128xf32> to vector<4x16x128xf32>
    %200 = arith.mulf %199, %195 : vector<4x16x128xf32>
    %201 = arith.addf %188, %200 : vector<4x16x128xf32>
    %202 = vector.extract_strided_slice %179 {offsets = [1, 0, 0], sizes = [1, 16, 128], strides = [1, 1, 1]} : vector<9x16x128xf32> to vector<1x16x128xf32>
    %203 = vector.shape_cast %202 : vector<1x16x128xf32> to vector<16x128xf32>
    %204 = vector.shape_cast %203 : vector<16x128xf32> to vector<1x16x128xf32>
    %205 = vector.broadcast %204 : vector<1x16x128xf32> to vector<4x16x128xf32>
    %206 = arith.mulf %205, %195 : vector<4x16x128xf32>
    %207 = arith.addf %194, %206 : vector<4x16x128xf32>
    %208 = vector.extract_strided_slice %13 {offsets = [0, 0, 2], sizes = [4, 16, 128], strides = [1, 1, 1]} : vector<4x18x256xf32> to vector<4x16x128xf32>
    %209 = vector.extract_strided_slice %154 {offsets = [2, 0, 0], sizes = [1, 16, 128], strides = [1, 1, 1]} : vector<9x16x128xf32> to vector<1x16x128xf32>
    %210 = vector.shape_cast %209 : vector<1x16x128xf32> to vector<16x128xf32>
    %211 = vector.shape_cast %210 : vector<16x128xf32> to vector<1x16x128xf32>
    %212 = vector.broadcast %211 : vector<1x16x128xf32> to vector<4x16x128xf32>
    %213 = arith.mulf %212, %208 : vector<4x16x128xf32>
    %214 = arith.addf %201, %213 : vector<4x16x128xf32>
    %215 = vector.extract_strided_slice %179 {offsets = [2, 0, 0], sizes = [1, 16, 128], strides = [1, 1, 1]} : vector<9x16x128xf32> to vector<1x16x128xf32>
    %216 = vector.shape_cast %215 : vector<1x16x128xf32> to vector<16x128xf32>
    %217 = vector.shape_cast %216 : vector<16x128xf32> to vector<1x16x128xf32>
    %218 = vector.broadcast %217 : vector<1x16x128xf32> to vector<4x16x128xf32>
    %219 = arith.mulf %218, %208 : vector<4x16x128xf32>
    %220 = arith.addf %207, %219 : vector<4x16x128xf32>
    %221 = vector.extract_strided_slice %13 {offsets = [0, 1, 0], sizes = [4, 16, 128], strides = [1, 1, 1]} : vector<4x18x256xf32> to vector<4x16x128xf32>
    %222 = vector.extract_strided_slice %154 {offsets = [3, 0, 0], sizes = [1, 16, 128], strides = [1, 1, 1]} : vector<9x16x128xf32> to vector<1x16x128xf32>
    %223 = vector.shape_cast %222 : vector<1x16x128xf32> to vector<16x128xf32>
    %224 = vector.shape_cast %223 : vector<16x128xf32> to vector<1x16x128xf32>
    %225 = vector.broadcast %224 : vector<1x16x128xf32> to vector<4x16x128xf32>
    %226 = arith.mulf %225, %221 : vector<4x16x128xf32>
    %227 = arith.addf %214, %226 : vector<4x16x128xf32>
    %228 = vector.extract_strided_slice %179 {offsets = [3, 0, 0], sizes = [1, 16, 128], strides = [1, 1, 1]} : vector<9x16x128xf32> to vector<1x16x128xf32>
    %229 = vector.shape_cast %228 : vector<1x16x128xf32> to vector<16x128xf32>
    %230 = vector.shape_cast %229 : vector<16x128xf32> to vector<1x16x128xf32>
    %231 = vector.broadcast %230 : vector<1x16x128xf32> to vector<4x16x128xf32>
    %232 = arith.mulf %231, %221 : vector<4x16x128xf32>
    %233 = arith.addf %220, %232 : vector<4x16x128xf32>
    %234 = vector.extract_strided_slice %13 {offsets = [0, 1, 1], sizes = [4, 16, 128], strides = [1, 1, 1]} : vector<4x18x256xf32> to vector<4x16x128xf32>
    %235 = vector.extract_strided_slice %154 {offsets = [4, 0, 0], sizes = [1, 16, 128], strides = [1, 1, 1]} : vector<9x16x128xf32> to vector<1x16x128xf32>
    %236 = vector.shape_cast %235 : vector<1x16x128xf32> to vector<16x128xf32>
    %237 = vector.shape_cast %236 : vector<16x128xf32> to vector<1x16x128xf32>
    %238 = vector.broadcast %237 : vector<1x16x128xf32> to vector<4x16x128xf32>
    %239 = arith.mulf %238, %234 : vector<4x16x128xf32>
    %240 = arith.addf %227, %239 : vector<4x16x128xf32>
    %241 = vector.extract_strided_slice %179 {offsets = [4, 0, 0], sizes = [1, 16, 128], strides = [1, 1, 1]} : vector<9x16x128xf32> to vector<1x16x128xf32>
    %242 = vector.shape_cast %241 : vector<1x16x128xf32> to vector<16x128xf32>
    %243 = vector.shape_cast %242 : vector<16x128xf32> to vector<1x16x128xf32>
    %244 = vector.broadcast %243 : vector<1x16x128xf32> to vector<4x16x128xf32>
    %245 = arith.mulf %244, %234 : vector<4x16x128xf32>
    %246 = arith.addf %233, %245 : vector<4x16x128xf32>
    %247 = vector.extract_strided_slice %13 {offsets = [0, 1, 2], sizes = [4, 16, 128], strides = [1, 1, 1]} : vector<4x18x256xf32> to vector<4x16x128xf32>
    %248 = vector.extract_strided_slice %154 {offsets = [5, 0, 0], sizes = [1, 16, 128], strides = [1, 1, 1]} : vector<9x16x128xf32> to vector<1x16x128xf32>
    %249 = vector.shape_cast %248 : vector<1x16x128xf32> to vector<16x128xf32>
    %250 = vector.shape_cast %249 : vector<16x128xf32> to vector<1x16x128xf32>
    %251 = vector.broadcast %250 : vector<1x16x128xf32> to vector<4x16x128xf32>
    %252 = arith.mulf %251, %247 : vector<4x16x128xf32>
    %253 = arith.addf %240, %252 : vector<4x16x128xf32>
    %254 = vector.extract_strided_slice %179 {offsets = [5, 0, 0], sizes = [1, 16, 128], strides = [1, 1, 1]} : vector<9x16x128xf32> to vector<1x16x128xf32>
    %255 = vector.shape_cast %254 : vector<1x16x128xf32> to vector<16x128xf32>
    %256 = vector.shape_cast %255 : vector<16x128xf32> to vector<1x16x128xf32>
    %257 = vector.broadcast %256 : vector<1x16x128xf32> to vector<4x16x128xf32>
    %258 = arith.mulf %257, %247 : vector<4x16x128xf32>
    %259 = arith.addf %246, %258 : vector<4x16x128xf32>
    %260 = vector.extract_strided_slice %13 {offsets = [0, 2, 0], sizes = [4, 16, 128], strides = [1, 1, 1]} : vector<4x18x256xf32> to vector<4x16x128xf32>
    %261 = vector.extract_strided_slice %154 {offsets = [6, 0, 0], sizes = [1, 16, 128], strides = [1, 1, 1]} : vector<9x16x128xf32> to vector<1x16x128xf32>
    %262 = vector.shape_cast %261 : vector<1x16x128xf32> to vector<16x128xf32>
    %263 = vector.shape_cast %262 : vector<16x128xf32> to vector<1x16x128xf32>
    %264 = vector.broadcast %263 : vector<1x16x128xf32> to vector<4x16x128xf32>
    %265 = arith.mulf %264, %260 : vector<4x16x128xf32>
    %266 = arith.addf %253, %265 : vector<4x16x128xf32>
    %267 = vector.extract_strided_slice %179 {offsets = [6, 0, 0], sizes = [1, 16, 128], strides = [1, 1, 1]} : vector<9x16x128xf32> to vector<1x16x128xf32>
    %268 = vector.shape_cast %267 : vector<1x16x128xf32> to vector<16x128xf32>
    %269 = vector.shape_cast %268 : vector<16x128xf32> to vector<1x16x128xf32>
    %270 = vector.broadcast %269 : vector<1x16x128xf32> to vector<4x16x128xf32>
    %271 = arith.mulf %270, %260 : vector<4x16x128xf32>
    %272 = arith.addf %259, %271 : vector<4x16x128xf32>
    %273 = vector.extract_strided_slice %13 {offsets = [0, 2, 1], sizes = [4, 16, 128], strides = [1, 1, 1]} : vector<4x18x256xf32> to vector<4x16x128xf32>
    %274 = vector.extract_strided_slice %154 {offsets = [7, 0, 0], sizes = [1, 16, 128], strides = [1, 1, 1]} : vector<9x16x128xf32> to vector<1x16x128xf32>
    %275 = vector.shape_cast %274 : vector<1x16x128xf32> to vector<16x128xf32>
    %276 = vector.shape_cast %275 : vector<16x128xf32> to vector<1x16x128xf32>
    %277 = vector.broadcast %276 : vector<1x16x128xf32> to vector<4x16x128xf32>
    %278 = arith.mulf %277, %273 : vector<4x16x128xf32>
    %279 = arith.addf %266, %278 : vector<4x16x128xf32>
    %280 = vector.extract_strided_slice %179 {offsets = [7, 0, 0], sizes = [1, 16, 128], strides = [1, 1, 1]} : vector<9x16x128xf32> to vector<1x16x128xf32>
    %281 = vector.shape_cast %280 : vector<1x16x128xf32> to vector<16x128xf32>
    %282 = vector.shape_cast %281 : vector<16x128xf32> to vector<1x16x128xf32>
    %283 = vector.broadcast %282 : vector<1x16x128xf32> to vector<4x16x128xf32>
    %284 = arith.mulf %283, %273 : vector<4x16x128xf32>
    %285 = arith.addf %272, %284 : vector<4x16x128xf32>
    %286 = vector.extract_strided_slice %13 {offsets = [0, 2, 2], sizes = [4, 16, 128], strides = [1, 1, 1]} : vector<4x18x256xf32> to vector<4x16x128xf32>
    %287 = vector.extract_strided_slice %154 {offsets = [8, 0, 0], sizes = [1, 16, 128], strides = [1, 1, 1]} : vector<9x16x128xf32> to vector<1x16x128xf32>
    %288 = vector.shape_cast %287 : vector<1x16x128xf32> to vector<16x128xf32>
    %289 = vector.shape_cast %288 : vector<16x128xf32> to vector<1x16x128xf32>
    %290 = vector.broadcast %289 : vector<1x16x128xf32> to vector<4x16x128xf32>
    %291 = arith.mulf %290, %286 : vector<4x16x128xf32>
    %292 = arith.addf %279, %291 : vector<4x16x128xf32>
    %293 = vector.extract_strided_slice %179 {offsets = [8, 0, 0], sizes = [1, 16, 128], strides = [1, 1, 1]} : vector<9x16x128xf32> to vector<1x16x128xf32>
    %294 = vector.shape_cast %293 : vector<1x16x128xf32> to vector<16x128xf32>
    %295 = vector.shape_cast %294 : vector<16x128xf32> to vector<1x16x128xf32>
    %296 = vector.broadcast %295 : vector<1x16x128xf32> to vector<4x16x128xf32>
    %297 = arith.mulf %296, %286 : vector<4x16x128xf32>
    %298 = arith.addf %285, %297 : vector<4x16x128xf32>
    %cst_60 = arith.constant dense<0xFF800000> : vector<16x128xf32>
    %299 = vector.multi_reduction <maximumf>, %292, %cst_60 [0] : vector<4x16x128xf32> to vector<16x128xf32>
    %300 = vector.shape_cast %299 : vector<16x128xf32> to vector<1x16x128xf32>
    %301 = vector.broadcast %300 : vector<1x16x128xf32> to vector<4x16x128xf32>
    %302 = arith.subf %292, %301 : vector<4x16x128xf32>
    %303 = math.exp %302 : vector<4x16x128xf32>
    %cst_61 = arith.constant dense<0.000000e+00> : vector<16x128xf32>
    %304 = vector.multi_reduction <add>, %303, %cst_61 [0] : vector<4x16x128xf32> to vector<16x128xf32>
    %305 = vector.shape_cast %304 : vector<16x128xf32> to vector<1x16x128xf32>
    %306 = vector.broadcast %305 : vector<1x16x128xf32> to vector<4x16x128xf32>
    %307 = arith.divf %303, %306 : vector<4x16x128xf32>
    %cst_62 = arith.constant dense<0xFF800000> : vector<16x128xf32>
    %308 = vector.multi_reduction <maximumf>, %298, %cst_62 [0] : vector<4x16x128xf32> to vector<16x128xf32>
    %309 = vector.shape_cast %308 : vector<16x128xf32> to vector<1x16x128xf32>
    %310 = vector.broadcast %309 : vector<1x16x128xf32> to vector<4x16x128xf32>
    %311 = arith.subf %298, %310 : vector<4x16x128xf32>
    %312 = math.exp %311 : vector<4x16x128xf32>
    %cst_63 = arith.constant dense<0.000000e+00> : vector<16x128xf32>
    %313 = vector.multi_reduction <add>, %312, %cst_63 [0] : vector<4x16x128xf32> to vector<16x128xf32>
    %314 = vector.shape_cast %313 : vector<16x128xf32> to vector<1x16x128xf32>
    %315 = vector.broadcast %314 : vector<1x16x128xf32> to vector<4x16x128xf32>
    %316 = arith.divf %312, %315 : vector<4x16x128xf32>
    %c0_64 = arith.constant 0 : index
    %c0_65 = arith.constant 0 : index
    %c0_66 = arith.constant 0 : index
    %c0_67 = arith.constant 0 : index
    %317 = vector.load %arg4[%c0_64, %c0_65, %c0_66, %c0_67] : memref<1x4x16x128xf32, #tpu.memory_space<vmem>>, vector<1x4x16x128xf32>
    %318 = vector.shape_cast %317 : vector<1x4x16x128xf32> to vector<4x16x128xf32>
    %c0_68 = arith.constant 0 : index
    %c0_69 = arith.constant 0 : index
    %c0_70 = arith.constant 0 : index
    %c0_71 = arith.constant 0 : index
    %319 = vector.load %arg5[%c0_68, %c0_69, %c0_70, %c0_71] : memref<1x1x16x128xf32, #tpu.memory_space<vmem>>, vector<1x1x16x128xf32>
    %320 = vector.shape_cast %319 : vector<1x1x16x128xf32> to vector<16x128xf32>
    %cst_72 = arith.constant 0.000000e+00 : f32
    %321 = vector.broadcast %cst_72 : f32 to vector<4x16x128xf32>
    %322 = arith.maximumf %318, %321 : vector<4x16x128xf32>
    %323 = arith.mulf %318, %307 : vector<4x16x128xf32>
    %324 = arith.subf %322, %323 : vector<4x16x128xf32>
    %325 = math.absf %318 : vector<4x16x128xf32>
    %cst_73 = arith.constant 0.000000e+00 : f32
    %326 = vector.broadcast %cst_73 : f32 to vector<4x16x128xf32>
    %327 = arith.subf %326, %325 : vector<4x16x128xf32>
    %328 = math.exp %327 : vector<4x16x128xf32>
    %cst_74 = arith.constant 1.000000e+00 : f32
    %329 = vector.broadcast %cst_74 : f32 to vector<4x16x128xf32>
    %330 = arith.addf %329, %328 : vector<4x16x128xf32>
    %331 = math.log %330 : vector<4x16x128xf32>
    %332 = arith.addf %324, %331 : vector<4x16x128xf32>
    %cst_75 = arith.constant dense<0.000000e+00> : vector<16x128xf32>
    %333 = vector.multi_reduction <add>, %332, %cst_75 [0] : vector<4x16x128xf32> to vector<16x128xf32>
    %334 = arith.mulf %333, %320 : vector<16x128xf32>
    %cst_76 = arith.constant 0.000000e+00 : f32
    %335 = vector.broadcast %cst_76 : f32 to vector<4x16x128xf32>
    %336 = arith.maximumf %318, %335 : vector<4x16x128xf32>
    %337 = arith.mulf %318, %316 : vector<4x16x128xf32>
    %338 = arith.subf %336, %337 : vector<4x16x128xf32>
    %339 = math.absf %318 : vector<4x16x128xf32>
    %cst_77 = arith.constant 0.000000e+00 : f32
    %340 = vector.broadcast %cst_77 : f32 to vector<4x16x128xf32>
    %341 = arith.subf %340, %339 : vector<4x16x128xf32>
    %342 = math.exp %341 : vector<4x16x128xf32>
    %cst_78 = arith.constant 1.000000e+00 : f32
    %343 = vector.broadcast %cst_78 : f32 to vector<4x16x128xf32>
    %344 = arith.addf %343, %342 : vector<4x16x128xf32>
    %345 = math.log %344 : vector<4x16x128xf32>
    %346 = arith.addf %338, %345 : vector<4x16x128xf32>
    %cst_79 = arith.constant dense<0.000000e+00> : vector<16x128xf32>
    %347 = vector.multi_reduction <add>, %346, %cst_79 [0] : vector<4x16x128xf32> to vector<16x128xf32>
    %348 = arith.mulf %347, %320 : vector<16x128xf32>
    %c0_80 = arith.constant 0 : index
    %c0_81 = arith.constant 0 : index
    %c0_82 = arith.constant 0 : index
    %349 = vector.load %arg7[%c0_80, %c0_81, %c0_82] : memref<3x16x128xf32, #tpu.memory_space<vmem>>, vector<1x16x128xf32>
    %350 = vector.shape_cast %349 : vector<1x16x128xf32> to vector<16x128xf32>
    %351 = arith.addf %350, %334 : vector<16x128xf32>
    %c0_83 = arith.constant 0 : index
    %c0_84 = arith.constant 0 : index
    %c0_85 = arith.constant 0 : index
    %352 = vector.load %arg7[%c0_83, %c0_84, %c0_85] : memref<3x16x128xf32, #tpu.memory_space<vmem>>, vector<1x16x128xf32>
    %353 = vector.shape_cast %352 : vector<1x16x128xf32> to vector<16x128xf32>
    %354 = vector.shape_cast %351 : vector<16x128xf32> to vector<1x16x128xf32>
    tpu.vector_store %arg7[%c0_83, %c0_84, %c0_85], %354 {strides = array<i32>} : memref<3x16x128xf32, #tpu.memory_space<vmem>>, vector<1x16x128xf32>,
    %c1 = arith.constant 1 : index
    %c0_86 = arith.constant 0 : index
    %c0_87 = arith.constant 0 : index
    %355 = vector.load %arg7[%c1, %c0_86, %c0_87] : memref<3x16x128xf32, #tpu.memory_space<vmem>>, vector<1x16x128xf32>
    %356 = vector.shape_cast %355 : vector<1x16x128xf32> to vector<16x128xf32>
    %357 = arith.subf %356, %348 : vector<16x128xf32>
    %c1_88 = arith.constant 1 : index
    %c0_89 = arith.constant 0 : index
    %c0_90 = arith.constant 0 : index
    %358 = vector.load %arg7[%c1_88, %c0_89, %c0_90] : memref<3x16x128xf32, #tpu.memory_space<vmem>>, vector<1x16x128xf32>
    %359 = vector.shape_cast %358 : vector<1x16x128xf32> to vector<16x128xf32>
    %360 = vector.shape_cast %357 : vector<16x128xf32> to vector<1x16x128xf32>
    tpu.vector_store %arg7[%c1_88, %c0_89, %c0_90], %360 {strides = array<i32>} : memref<3x16x128xf32, #tpu.memory_space<vmem>>, vector<1x16x128xf32>,
    %c2 = arith.constant 2 : index
    %c0_91 = arith.constant 0 : index
    %c0_92 = arith.constant 0 : index
    %361 = vector.load %arg7[%c2, %c0_91, %c0_92] : memref<3x16x128xf32, #tpu.memory_space<vmem>>, vector<1x16x128xf32>
    %362 = vector.shape_cast %361 : vector<1x16x128xf32> to vector<16x128xf32>
    %363 = arith.addf %362, %320 : vector<16x128xf32>
    %c2_93 = arith.constant 2 : index
    %c0_94 = arith.constant 0 : index
    %c0_95 = arith.constant 0 : index
    %364 = vector.load %arg7[%c2_93, %c0_94, %c0_95] : memref<3x16x128xf32, #tpu.memory_space<vmem>>, vector<1x16x128xf32>
    %365 = vector.shape_cast %364 : vector<1x16x128xf32> to vector<16x128xf32>
    %366 = vector.shape_cast %363 : vector<16x128xf32> to vector<1x16x128xf32>
    tpu.vector_store %arg7[%c2_93, %c0_94, %c0_95], %366 {strides = array<i32>} : memref<3x16x128xf32, #tpu.memory_space<vmem>>, vector<1x16x128xf32>,
    %367 = arith.extui %5 : i1 to i32
    %c0_i32_96 = arith.constant 0 : i32
    %368 = arith.cmpi ne, %367, %c0_i32_96 : i32
    scf.if %368 {
      %c0_97 = arith.constant 0 : index
      %c0_98 = arith.constant 0 : index
      %c0_99 = arith.constant 0 : index
      %369 = vector.load %arg7[%c0_97, %c0_98, %c0_99] : memref<3x16x128xf32, #tpu.memory_space<vmem>>, vector<1x16x128xf32>
      %370 = vector.shape_cast %369 : vector<1x16x128xf32> to vector<16x128xf32>
      %371 = vector.shape_cast %370 : vector<16x128xf32> to vector<1x16x128xf32>
      %cst_100 = arith.constant dense<0.000000e+00> : vector<1xf32>
      %372 = vector.multi_reduction <add>, %371, %cst_100 [1, 2] : vector<1x16x128xf32> to vector<1xf32>
      %373 = vector.shape_cast %372 : vector<1xf32> to vector<1x1x1xf32>
      %374 = vector.extract %373[0, 0, 0] : f32 from vector<1x1x1xf32>
      %c0_101 = arith.constant 0 : index
      %375 = memref.load %arg6[%c0_101] : memref<3xf32, #tpu.memory_space<smem>>
      memref.store %374, %arg6[%c0_101] : memref<3xf32, #tpu.memory_space<smem>>
      %c1_102 = arith.constant 1 : index
      %c0_103 = arith.constant 0 : index
      %c0_104 = arith.constant 0 : index
      %376 = vector.load %arg7[%c1_102, %c0_103, %c0_104] : memref<3x16x128xf32, #tpu.memory_space<vmem>>, vector<1x16x128xf32>
      %377 = vector.shape_cast %376 : vector<1x16x128xf32> to vector<16x128xf32>
      %378 = vector.shape_cast %377 : vector<16x128xf32> to vector<1x16x128xf32>
      %cst_105 = arith.constant dense<0.000000e+00> : vector<1xf32>
      %379 = vector.multi_reduction <add>, %378, %cst_105 [1, 2] : vector<1x16x128xf32> to vector<1xf32>
      %380 = vector.shape_cast %379 : vector<1xf32> to vector<1x1x1xf32>
      %381 = vector.extract %380[0, 0, 0] : f32 from vector<1x1x1xf32>
      %c1_106 = arith.constant 1 : index
      %382 = memref.load %arg6[%c1_106] : memref<3xf32, #tpu.memory_space<smem>>
      memref.store %381, %arg6[%c1_106] : memref<3xf32, #tpu.memory_space<smem>>
      %c2_107 = arith.constant 2 : index
      %c0_108 = arith.constant 0 : index
      %c0_109 = arith.constant 0 : index
      %383 = vector.load %arg7[%c2_107, %c0_108, %c0_109] : memref<3x16x128xf32, #tpu.memory_space<vmem>>, vector<1x16x128xf32>
      %384 = vector.shape_cast %383 : vector<1x16x128xf32> to vector<16x128xf32>
      %385 = vector.shape_cast %384 : vector<16x128xf32> to vector<1x16x128xf32>
      %cst_110 = arith.constant dense<0.000000e+00> : vector<1xf32>
      %386 = vector.multi_reduction <add>, %385, %cst_110 [1, 2] : vector<1x16x128xf32> to vector<1xf32>
      %387 = vector.shape_cast %386 : vector<1xf32> to vector<1x1x1xf32>
      %388 = vector.extract %387[0, 0, 0] : f32 from vector<1x1x1xf32>
      %c2_111 = arith.constant 2 : index
      %389 = memref.load %arg6[%c2_111] : memref<3xf32, #tpu.memory_space<smem>>
      memref.store %388, %arg6[%c2_111] : memref<3xf32, #tpu.memory_space<smem>>
    } else {
    }
    return
  }
  func.func @transform_0(%arg0: i32, %arg1: i32) -> (i32, i32, i32, i32, i32) {
    %c0_i32 = arith.constant 0 : i32
    %c0_i32_0 = arith.constant 0 : i32
    %c0_i32_1 = arith.constant 0 : i32
    %c0_i32_2 = arith.constant 0 : i32
    return %arg0, %arg1, %c0_i32, %c0_i32_0, %c0_i32_1 : i32, i32, i32, i32, i32
  }
  func.func @transform_1(%arg0: i32, %arg1: i32) -> (i32, i32, i32, i32, i32) {
    %c0_i32 = arith.constant 0 : i32
    %c0_i32_0 = arith.constant 0 : i32
    %c0_i32_1 = arith.constant 0 : i32
    %c0_i32_2 = arith.constant 0 : i32
    return %arg0, %arg1, %c0_i32, %c0_i32_0, %c0_i32_1 : i32, i32, i32, i32, i32
  }
  func.func @transform_2(%arg0: i32, %arg1: i32) -> (i32, i32, i32, i32) {
    %c0_i32 = arith.constant 0 : i32
    %c0_i32_0 = arith.constant 0 : i32
    %c0_i32_1 = arith.constant 0 : i32
    return %arg0, %c0_i32, %arg1, %c0_i32_0 : i32, i32, i32, i32
  }
  func.func @transform_3(%arg0: i32, %arg1: i32) -> (i32, i32, i32, i32) {
    %c0_i32 = arith.constant 0 : i32
    %c0_i32_0 = arith.constant 0 : i32
    %c0_i32_1 = arith.constant 0 : i32
    return %arg0, %c0_i32, %arg1, %c0_i32_0 : i32, i32, i32, i32
  }
  func.func @transform_4(%arg0: i32, %arg1: i32) -> i32 {
    %c0_i32 = arith.constant 0 : i32
    %c0_i32_0 = arith.constant 0 : i32
    return %c0_i32 : i32
  }
}

</mosaic_0001>

<bundles_post_ra>
// kernel: tpu_custom_call.1
= control target key start
LH: loop header
LB: loop body
LE: loop exit
PB: predicated region body
PF: predicated region fallthrough
CT: control target
= control target key end

     0   :  { %9 = vsyncpa [#allocation4], 0  ;;  %s6540_s15 = smov 0   ;;  %s6542_s16 = smov 0   ;;  %s12258_s0 = inlined_call_operand.vmem [shape: bf16[2,1,8,18,256], index: 0, kind: input, shape index: {}]   ;;  %s12259_s1 = inlined_call_operand.vmem [shape: bf16[2,1,4,18,256], index: 1, kind: input, shape index: {}]   ;;  %s12260_s2 = inlined_call_operand.vmem [shape: f32[2,4,16,128], index: 2, kind: input, shape index: {}]   ;;  %s12261_s3 = inlined_call_operand.vmem [shape: f32[2,1,16,128], index: 3, kind: input, shape index: {}]   ;;  %s12262_s4 = inlined_call_operand.hbm [shape: f32[3], index: 4, kind: output, shape index: {}]  }
   0x1   :  { %s6544_s17 = smov 0  }
   0x2 LB: > { %s5345_s18 = sadd.s32 4294967295, %s6506_s17   ;;  %s27_s19 = sadd.s32 1, %s6502_s16  ;;  %s6506_s17 = sphi %s6544_s17, %s15_s17   ;;  %s6502_s16 = sphi %s6542_s16, %s13984_s16   ;;  %s6498_s15 = sphi %s6540_s15, %s13983_s15  }
   0x3   : > { %p29_p0 = scmp.ge.s32.totalorder %s27_s19, 2  ;;  %p5348_p1 = scmp.ge.s32.totalorder %s6506_s17, 1 }
   0x4   : > { %p226_p2 = scmp.lt.s32.totalorder %s6506_s17, 3 }
   0x5   : > { %s13986_s19 = smov (%p29_p0, %s27_s19), 0 }
   0x6   : > { %p227_p3 = pnand %p5348_p1, %p226_p2 }
   0x8   : > { %230 = sbr.rel (%p227_p3) target bundleno = 1719 (0x6b7), region = 36 }
   0xd   : > { %p278_p4 = scmp.lt.s32.totalorder %s6498_s15, 1  ;;  %p316_p5 = scmp.eq.s32.totalorder %s6498_s15, 0 }
   0xe   : > { %p320_p6 = scmp.eq.s32.totalorder %s6498_s15, 1  ;;  %v6508_v0 = vmov (%p316_p5), 0.0   ;;  %s6509_s11 = smov (%p316_p5), 0.0  }
   0xf   : > { %s279_s20 = scalar_select %p278_p4, %s6498_s15, 1  ;;  %325 = vst [vmem:[#allocation2 + $0x28] sm:$0xff] (%p316_p5), %v6508_v0  ;;  %326 = vst [vmem:[#allocation2 + $0x10] sm:$0xff] (%p316_p5), %v6508_v0 }
  0x10   : > { %324 = sbr.rel (!%p316_p5) target bundleno = 23 (0x17), region = 40  ;;  %327 = vst [vmem:[#allocation2 + $0x8] sm:$0xff] (%p316_p5), %v6508_v0  ;;  %328 = vst [vmem:[#allocation2] sm:$0xff] (%p316_p5), %v6508_v0  ;;  %332 = sst [smem:[#allocation3]] (%p316_p5), %s6509_s11 }
  0x11   : > { %s5365_s21 = smul.u32 192, %s279_s20  ;;  %s5361_s22 = sshll.u32 %s279_s20, 6  ;;  %329 = vst [vmem:[#allocation2 + $0x18] sm:$0xff] (%p316_p5), %v6508_v0  ;;  %330 = vst [vmem:[#allocation2 + $0x20] sm:$0xff] (%p316_p5), %v6508_v0 }
  0x12   : > { %s5366_s23 = smul.u32 96, %s279_s20  ;;  %s6568_s26 = scalar_lea.vmem %s12260_s2, %s5361_s22 }
  0x13   : > { %s6573_s29 = scalar_lea.vmem %s12258_s0, %s5365_s21  ;;  %s5362_s30 = sshll.u32 %s279_s20, 4 }
  0x14   : > { %s6578_s7 = scalar_lea.vmem %s12259_s1, %s5366_s23  ;;  %s6583_s10 = scalar_lea.vmem %s12261_s3, %s5362_s30 }
  0x15   : > { %334 = sst [smem:[#allocation3 + $0x1]] %s6509_s11 }
  0x16   : > { %336 = sst [smem:[#allocation3 + $0x2]] %s6509_s11 }
  0x17 PF: > { %v340_v1 = vld [vmem:[%s6573_s29 + $0x18] sm:$0xff]  ;;  %v341_v2 = vld [vmem:[%s6573_s29 + $0x20] sm:$0xff]  ;;  %vm525_vm0 = vcmask 1047560   ;;  %vm541_vm1 = vcmask 7168   ;;  %vm637_vm2 = vcmask 1046528   ;;  %v338_v8 = vld [vmem:[%s6573_s29 + $0x8] sm:$0xff] }
  0x18   : > { %v6587_v3 = vunpack.c.l.bf16 %v340_v1  ;;  %v6589_v4 = vunpack.c.h.bf16 %v340_v1  ;;  %v6591_v5 = vunpack.c.l.bf16 %v341_v2  ;;  %v6593_v6 = vunpack.c.h.bf16 %v341_v2  ;;  %v337_v7 = vld [vmem:[%s6573_s29] sm:$0xff]  ;;  %v342_v13 = vld [vmem:[%s6573_s29 + $0x28] sm:$0x11]  ;;  %v339_v30 = vld [vmem:[%s6573_s29 + $0x10] sm:$0x11]  ;;  %s6510_s12 = smov 127  }
  0x19   : > { %v6597_v9 = vunpack.c.l.bf16 %v337_v7  ;;  %v6599_v10 = vunpack.c.h.bf16 %v337_v7  ;;  %v6601_v11 = vunpack.c.l.bf16 %v338_v8  ;;  %v6603_v12 = vunpack.c.h.bf16 %v338_v8  ;;  %v344_v43 = vld [vmem:[%s6573_s29 + $0x38] sm:$0xff]  ;;  %v345_v44 = vld [vmem:[%s6573_s29 + $0x40] sm:$0x11]  ;;  %v343_v57 = vld [vmem:[%s6573_s29 + $0x30] sm:$0xff]  ;;  %s6511_s13 = smov 1   ;;  %s6512_s14 = smov 126  }
  0x1a   : > { %12860 = vst [vmem:[#allocation6_spill] sm:$0xff] %v6587_v3  ;;  %12861 = vst [vmem:[#allocation7_spill] sm:$0xff] %v6589_v4  ;;  %v648_v14 = vrot.slane %v6587_v3, 1  ;;  %v649_v15 = vrot.slane %v6591_v5, 1  ;;  %v651_v16 = vrot.slane %v6589_v4, 1  ;;  %v652_v17 = vrot.slane %v6593_v6, 1 }
  0x1b   : > { %12862 = vst [vmem:[#allocation8_spill] sm:$0xff] %v6591_v5  ;;  %12863 = vst [vmem:[#allocation9_spill] sm:$0xff] %v6593_v6  ;;  %v638_v18 = vrot.slane %v6597_v9, 1  ;;  %v639_v19 = vrot.slane %v6601_v11, 1  ;;  %v641_v20 = vrot.slane %v6599_v10, 1  ;;  %v642_v21 = vrot.slane %v6603_v12, 1 }
  0x1c   : > { %12864 = vst [vmem:[#allocation10_spill] sm:$0xff] %v6597_v9  ;;  %12865 = vst [vmem:[#allocation11_spill] sm:$0xff] %v6599_v10  ;;  %v650_v22 = vsel %vm637_vm2, %v648_v14, %v649_v15  ;;  %v653_v23 = vsel %vm637_vm2, %v651_v16, %v652_v17  ;;  %v6616_v24 = vunpack.c.l.bf16 %v342_v13  ;;  %v6618_v25 = vunpack.c.h.bf16 %v342_v13 }
  0x1d   : > { %12866 = vst [vmem:[#allocation12_spill] sm:$0xff] %v6601_v11  ;;  %12867 = vst [vmem:[#allocation13_spill] sm:$0xff] %v6603_v12  ;;  %v959_v26 = vmul.f32 %v653_v23, %v6589_v4  ;;  %v6621_v27 = vpack.i.bf16 %v653_v23, %v650_v22  ;;  %v958_v28 = vmul.f32 %v650_v22, %v6587_v3  ;;  %v6640_v42 = vunpack.c.l.bf16 %v339_v30 }
  0x1e   : > { %12868 = vst [vmem:[#allocation14_spill] sm:$0xff] %v6616_v24  ;;  %12869 = vst [vmem:[#allocation15_spill] sm:$0xff] %v6618_v25  ;;  %v640_v29 = vsel %vm637_vm2, %v638_v18, %v639_v19  ;;  %v643_v31 = vsel %vm637_vm2, %v641_v20, %v642_v21  ;;  %v654_v33 = vrot.slane %v6616_v24, 1  ;;  %v656_v34 = vrot.slane %v6618_v25, 1  ;;  %v347_v18 = vld [vmem:[%s6573_s29 + $0x50] sm:$0xff] }
  0x1f   : > { %v954_v32 = vmul.f32 %v640_v29, %v6597_v9  ;;  %v1002_v35 = vsel %vm541_vm1, %v959_v26, 0.0  ;;  %5421 = vrot.lane.b32.xlu1 %v6621_v27, %s6510_s12  ;;  %v987_v36 = vsel %vm525_vm0, %v958_v28, 0.0  ;;  %v955_v37 = vmul.f32 %v643_v31, %v6599_v10  ;;  %12870 = vst [vmem:[#allocation16_spill] sm:$0xff] %v6640_v42 }
  0x20   : > { %v6635_v38 = vpack.i.bf16 %v643_v31, %v640_v29  ;;  %v655_v40 = vsel %vm637_vm2, %v649_v15, %v654_v33  ;;  %v657_v41 = vsel %vm637_vm2, %v652_v17, %v656_v34  ;;  %v6651_v51 = vunpack.c.h.bf16 %v339_v30  ;;  %v348_v33 = vld [vmem:[%s6573_s29 + $0x58] sm:$0x11] }
  0x21   : > { %v986_v39 = vsel %vm525_vm0, %v954_v32, 0.0  ;;  %v1001_v45 = vsel %vm541_vm1, %v955_v37, 0.0  ;;  %v961_v47 = vmul.f32 %v657_v41, %v6593_v6  ;;  %v6648_v48 = vpack.i.bf16 %v657_v41, %v655_v40 }
  0x22   : > { %5411 = vrot.lane.b32.xlu0 %v6635_v38, %s6510_s12  ;;  %v988_v46 = vadd.f32 %v987_v36, %v986_v39  ;;  %v1003_v49 = vadd.f32 %v1002_v35, %v1001_v45  ;;  %v960_v50 = vmul.f32 %v655_v40, %v6591_v5  ;;  %12871 = vst [vmem:[#allocation17_spill] sm:$0xff] %v6651_v51  ;;  %v644_v52 = vrot.slane %v6640_v42, 1  ;;  %v346_v40 = vld [vmem:[%s6573_s29 + $0x48] sm:$0xff] }
  0x23   : > { %v1032_v53 = vsel %vm541_vm1, %v961_v47, 0.0  ;;  %5426 = vrot.lane.b32.xlu1 %v6648_v48, %s6510_s12  ;;  %v6657_v54 = vunpack.c.l.bf16 %v344_v43  ;;  %v6659_v55 = vunpack.c.h.bf16 %v344_v43  ;;  %v6661_v56 = vunpack.c.l.bf16 %v345_v44 }
  0x24   : > { %v1017_v58 = vsel %vm525_vm0, %v960_v50, 0.0  ;;  %v645_v59 = vsel %vm637_vm2, %v639_v19, %v644_v52  ;;  %v646_v60 = vrot.slane %v6651_v51, 1  ;;  %v6667_v61 = vunpack.c.h.bf16 %v345_v44 }
  0x25   : > { %12872 = vst [vmem:[#allocation18_spill] sm:$0xff] %v6657_v54  ;;  %12873 = vst [vmem:[#allocation19_spill] sm:$0xff] %v6659_v55  ;;  %v956_v62 = vmul.f32 %v645_v59, %v6601_v11  ;;  %v659_v63 = vrot.slane %v6657_v54, 1  ;;  %v662_v0 = vrot.slane %v6659_v55, 1  ;;  %v664_v1 = vrot.slane %v6661_v56, 1 }
  0x26   : > { %12874 = vst [vmem:[#allocation20_spill] sm:$0xff] %v6661_v56  ;;  %12875 = vst [vmem:[#allocation21_spill] sm:$0xff] %v6667_v61  ;;  %v647_v2 = vsel %vm637_vm2, %v642_v21, %v646_v60  ;;  %v666_v7 = vrot.slane %v6667_v61, 1  ;;  %v6675_v8 = vunpack.c.l.bf16 %v343_v57  ;;  %v6677_v13 = vunpack.c.h.bf16 %v343_v57  ;;  %v350_v57 = vld [vmem:[%s6573_s29 + $0x68] sm:$0xff] }
  0x27   : > { %v957_v14 = vmul.f32 %v647_v2, %v6603_v12  ;;  %v6680_v15 = vpack.i.bf16 %v647_v2, %v645_v59  ;;  %v1016_v16 = vsel %vm525_vm0, %v956_v62, 0.0  ;;  %v665_v17 = vsel %vm637_vm2, %v659_v63, %v664_v1 }
  0x28   : > { %12876 = vst [vmem:[#allocation22_spill] sm:$0xff] %v6675_v8  ;;  %12877 = vst [vmem:[#allocation23_spill] sm:$0xff] %v6677_v13  ;;  %v1018_v19 = vadd.f32 %v1017_v58, %v1016_v16  ;;  %v667_v20 = vsel %vm637_vm2, %v662_v0, %v666_v7  ;;  %v964_v21 = vmul.f32 %v665_v17, %v6657_v54  ;;  %v658_v22 = vrot.slane %v6675_v8, 1  ;;  %v351_v58 = vld [vmem:[%s6573_s29 + $0x70] sm:$0x11] }
  0x29   : > { %v1031_v23 = vsel %vm541_vm1, %v957_v14, 0.0  ;;  %5416 = vrot.lane.b32.xlu0 %v6680_v15, %s6510_s12  ;;  %v965_v26 = vmul.f32 %v667_v20, %v6659_v55  ;;  %v6692_v28 = vpack.i.bf16 %v667_v20, %v665_v17  ;;  %v661_v29 = vrot.slane %v6677_v13, 1 }
  0x2a   : > { %v1033_v30 = vadd.f32 %v1032_v53, %v1031_v23  ;;  %v1019_v31 = vsel %vm525_vm0, %v964_v21, 0.0  ;;  %v660_v32 = vsel %vm637_vm2, %v658_v22, %v659_v63  ;;  %v6698_v34 = vunpack.c.l.bf16 %v347_v18 }
  0x2b   : > { %v1034_v35 = vsel %vm541_vm1, %v965_v26, 0.0  ;;  %5436 = vrot.lane.b32.xlu1 %v6692_v28, %s6510_s12  ;;  %v1020_v36 = vadd.f32 %v1019_v31, %v1018_v19  ;;  %v663_v37 = vsel %vm637_vm2, %v661_v29, %v662_v0  ;;  %v962_v39 = vmul.f32 %v660_v32, %v6675_v8 }
  0x2c   : > { %12878 = vst [vmem:[#allocation24_spill] sm:$0xff] %v6698_v34  ;;  %v1035_v41 = vadd.f32 %v1034_v35, %v1033_v30  ;;  %v963_v43 = vmul.f32 %v663_v37, %v6677_v13  ;;  %v6707_v44 = vpack.i.bf16 %v663_v37, %v660_v32  ;;  %v6709_v45 = vunpack.c.h.bf16 %v347_v18 }
  0x2d   : > { %v989_v47 = vsel %vm525_vm0, %v962_v39, 0.0  ;;  %v6712_v50 = vunpack.c.l.bf16 %v348_v33  ;;  %v6714_v52 = vunpack.c.h.bf16 %v348_v33  ;;  %v669_v53 = vrot.slane %v6698_v34, 1  ;;  %v349_v33 = vld [vmem:[%s6573_s29 + $0x60] sm:$0xff] }
  0x2e   : > { %12879 = vst [vmem:[#allocation25_spill] sm:$0xff] %v6709_v45  ;;  %v1004_v59 = vsel %vm541_vm1, %v963_v43, 0.0  ;;  %5431 = vrot.lane.b32.xlu0 %v6707_v44, %s6510_s12  ;;  %v990_v60 = vadd.f32 %v989_v47, %v988_v46  ;;  %v672_v62 = vrot.slane %v6709_v45, 1  ;;  %v6723_v63 = vunpack.c.l.bf16 %v346_v40  ;;  %v353_v43 = vld [vmem:[%s6573_s29 + $0x80] sm:$0xff] }
  0x2f   : > { %12880 = vst [vmem:[#allocation26_spill] sm:$0xff] %v6712_v50  ;;  %12881 = vst [vmem:[#allocation27_spill] sm:$0xff] %v6714_v52  ;;  %v1005_v0 = vadd.f32 %v1004_v59, %v1003_v49  ;;  %v674_v1 = vrot.slane %v6712_v50, 1  ;;  %v676_v2 = vrot.slane %v6714_v52, 1  ;;  %v6727_v7 = vunpack.c.h.bf16 %v346_v40  ;;  %v355_v52 = vld [vmem:[%s6573_s29 + $0x90] sm:$0xff] }
  0x30   : > { %12882 = vst [vmem:[#allocation28_spill] sm:$0xff] %v6723_v63  ;;  %v668_v14 = vrot.slane %v6723_v63, 1  ;;  %v6730_v16 = vunpack.c.l.bf16 %v350_v57  ;;  %v6732_v17 = vunpack.c.h.bf16 %v350_v57  ;;  %v6734_v18 = vunpack.c.l.bf16 %v351_v58 }
  0x31   : > { %12883 = vst [vmem:[#allocation29_spill] sm:$0xff] %v6727_v7  ;;  %v675_v46 = vsel %vm637_vm2, %v669_v53, %v674_v1  ;;  %v677_v19 = vsel %vm637_vm2, %v672_v62, %v676_v2  ;;  %v671_v49 = vrot.slane %v6727_v7, 1  ;;  %v6739_v20 = vunpack.c.h.bf16 %v351_v58 }
  0x32   : > { %12884 = vst [vmem:[#allocation30_spill] sm:$0xff] %v6730_v16  ;;  %12885 = vst [vmem:[#allocation31_spill] sm:$0xff] %v6732_v17  ;;  %v969_v21 = vmul.f32 %v677_v19, %v6709_v45  ;;  %v6742_v22 = vpack.i.bf16 %v677_v19, %v675_v46  ;;  %v968_v23 = vmul.f32 %v675_v46, %v6698_v34  ;;  %v679_v31 = vrot.slane %v6730_v16, 1 }
  0x33   : > { %12886 = vst [vmem:[#allocation32_spill] sm:$0xff] %v6734_v18  ;;  %12887 = vst [vmem:[#allocation33_spill] sm:$0xff] %v6739_v20  ;;  %v670_v26 = vsel %vm637_vm2, %v668_v14, %v669_v53  ;;  %v673_v29 = vsel %vm637_vm2, %v671_v49, %v672_v62  ;;  %v682_v32 = vrot.slane %v6732_v17, 1  ;;  %v684_v58 = vrot.slane %v6734_v18, 1  ;;  %v354_v14 = vld [vmem:[%s6573_s29 + $0x88] sm:$0x11] }
  0x34   : > { %v966_v30 = vmul.f32 %v670_v26, %v6723_v63  ;;  %v1036_v35 = vsel %vm541_vm1, %v969_v21, 0.0  ;;  %v1021_v37 = vsel %vm525_vm0, %v968_v23, 0.0  ;;  %5446 = vrot.lane.b32.xlu1 %v6742_v22, %s6510_s12  ;;  %v967_v39 = vmul.f32 %v673_v29, %v6727_v7 }
  0x35   : > { %v6756_v40 = vpack.i.bf16 %v673_v29, %v670_v26  ;;  %v1022_v47 = vadd.f32 %v1021_v37, %v1020_v36  ;;  %v1037_v53 = vadd.f32 %v1036_v35, %v1035_v41  ;;  %v686_v1 = vrot.slane %v6739_v20, 1 }
  0x36   : > { %v991_v57 = vsel %vm525_vm0, %v966_v30, 0.0  ;;  %v1006_v59 = vsel %vm541_vm1, %v967_v39, 0.0  ;;  %v6765_v2 = vunpack.c.l.bf16 %v349_v33  ;;  %v685_v36 = vsel %vm637_vm2, %v679_v31, %v684_v58 }
  0x37   : > { %5441 = vrot.lane.b32.xlu0 %v6756_v40, %s6510_s12  ;;  %v992_v62 = vadd.f32 %v991_v57, %v990_v60  ;;  %v1007_v46 = vadd.f32 %v1006_v59, %v1005_v0  ;;  %v6769_v41 = vunpack.c.h.bf16 %v349_v33  ;;  %v6771_v19 = vunpack.c.l.bf16 %v353_v43  ;;  %v352_v57 = vld [vmem:[%s6573_s29 + $0x78] sm:$0xff] }
  0x38   : > { %12888 = vst [vmem:[#allocation34_spill] sm:$0xff] %v6765_v2  ;;  %v687_v49 = vsel %vm637_vm2, %v682_v32, %v686_v1  ;;  %v972_v21 = vmul.f32 %v685_v36, %v6730_v16  ;;  %v678_v23 = vrot.slane %v6765_v2, 1  ;;  %v6776_v60 = vunpack.c.h.bf16 %v353_v43 }
  0x39   : > { %12889 = vst [vmem:[#allocation35_spill] sm:$0xff] %v6769_v41  ;;  %12890 = vst [vmem:[#allocation36_spill] sm:$0xff] %v6771_v19  ;;  %v973_v26 = vmul.f32 %v687_v49, %v6732_v17  ;;  %v6779_v29 = vpack.i.bf16 %v687_v49, %v685_v36  ;;  %v681_v0 = vrot.slane %v6769_v41, 1  ;;  %v6782_v30 = vunpack.c.l.bf16 %v354_v14  ;;  %v356_v36 = vld [vmem:[%s6573_s29 + $0x98] sm:$0xff] }
  0x3a   : > { %12891 = vst [vmem:[#allocation37_spill] sm:$0xff] %v6776_v60  ;;  %v1023_v33 = vsel %vm525_vm0, %v972_v21, 0.0  ;;  %v680_v35 = vsel %vm637_vm2, %v678_v23, %v679_v31  ;;  %v6786_v37 = vunpack.c.h.bf16 %v354_v14  ;;  %v689_v39 = vrot.slane %v6771_v19, 1 }
  0x3b   : > { %12892 = vst [vmem:[#allocation38_spill] sm:$0xff] %v6782_v30  ;;  %v1038_v43 = vsel %vm541_vm1, %v973_v26, 0.0  ;;  %5456 = vrot.lane.b32.xlu1 %v6779_v29, %s6510_s12  ;;  %v1024_v58 = vadd.f32 %v1023_v33, %v1022_v47  ;;  %v683_v59 = vsel %vm637_vm2, %v681_v0, %v682_v32  ;;  %v970_v1 = vmul.f32 %v680_v35, %v6765_v2  ;;  %v357_v33 = vld [vmem:[%s6573_s29 + $0xa0] sm:$0x11] }
  0x3c   : > { %12893 = vst [vmem:[#allocation39_spill] sm:$0xff] %v6786_v37  ;;  %v1039_v49 = vadd.f32 %v1038_v43, %v1037_v53  ;;  %v971_v31 = vmul.f32 %v683_v59, %v6769_v41  ;;  %v6797_v14 = vpack.i.bf16 %v683_v59, %v680_v35  ;;  %v692_v21 = vrot.slane %v6776_v60, 1 }
  0x3d   : > { %v993_v23 = vsel %vm525_vm0, %v970_v1, 0.0  ;;  %v694_v26 = vrot.slane %v6782_v30, 1  ;;  %v696_v20 = vrot.slane %v6786_v37, 1  ;;  %v6803_v47 = vunpack.c.l.bf16 %v352_v57 }
  0x3e   : > { %v1008_v32 = vsel %vm541_vm1, %v971_v31, 0.0  ;;  %5451 = vrot.lane.b32.xlu0 %v6797_v14, %s6510_s12  ;;  %v994_v53 = vadd.f32 %v993_v23, %v992_v62  ;;  %v6808_v0 = vunpack.c.h.bf16 %v352_v57  ;;  %v6811_v35 = vunpack.c.l.bf16 %v356_v36 }
  0x3f   : > { %12894 = vst [vmem:[#allocation40_spill] sm:$0xff] %v6803_v47  ;;  %v1009_v43 = vadd.f32 %v1008_v32, %v1007_v46  ;;  %v695_v59 = vsel %vm637_vm2, %v689_v39, %v694_v26  ;;  %v697_v1 = vsel %vm637_vm2, %v692_v21, %v696_v20  ;;  %v688_v37 = vrot.slane %v6803_v47, 1 }
  0x40   : > { %12895 = vst [vmem:[#allocation41_spill] sm:$0xff] %v6808_v0  ;;  %12896 = vst [vmem:[#allocation42_spill] sm:$0xff] %v6811_v35  ;;  %v977_v30 = vmul.f32 %v697_v1, %v6776_v60  ;;  %v6817_v31 = vpack.i.bf16 %v697_v1, %v695_v59  ;;  %v976_v18 = vmul.f32 %v695_v59, %v6771_v19  ;;  %v691_v62 = vrot.slane %v6808_v0, 1 }
  0x41   : > { %v690_v57 = vsel %vm637_vm2, %v688_v37, %v689_v39  ;;  %v6822_v23 = vunpack.c.h.bf16 %v356_v36  ;;  %v6824_v46 = vunpack.c.l.bf16 %v357_v33  ;;  %v6826_v26 = vunpack.c.h.bf16 %v357_v33 }
  0x42   : > { %v1040_v20 = vsel %vm541_vm1, %v977_v30, 0.0  ;;  %v1025_v32 = vsel %vm525_vm0, %v976_v18, 0.0  ;;  %5466 = vrot.lane.b32.xlu1 %v6817_v31, %s6510_s12  ;;  %v693_v59 = vsel %vm637_vm2, %v691_v62, %v692_v21  ;;  %v974_v1 = vmul.f32 %v690_v57, %v6803_v47  ;;  %v359_v30 = vld [vmem:[%s6573_s29 + $0xb0] sm:$0xff] }
  0x43   : > { %12897 = vst [vmem:[#allocation43_spill] sm:$0xff] %v6822_v23  ;;  %12898 = vst [vmem:[#allocation44_spill] sm:$0xff] %v6824_v46  ;;  %v6835_v37 = vadd.f32 %v1025_v32, %v1024_v58  ;;  %v6837_v39 = vadd.f32 %v1040_v20, %v1039_v49  ;;  %v975_v36 = vmul.f32 %v693_v59, %v6808_v0  ;;  %v699_v50 = vrot.slane %v6811_v35, 1  ;;  %v360_v20 = vld [vmem:[%s6573_s29 + $0xb8] sm:$0x11] }
  0x44   : > { %12899 = vst [vmem:[#allocation45_spill] sm:$0xff] %v6826_v26  ;;  %v6840_v33 = vpack.i.bf16 %v693_v59, %v690_v57  ;;  %v995_v18 = vsel %vm525_vm0, %v974_v1, 0.0  ;;  %v702_v61 = vrot.slane %v6822_v23, 1  ;;  %v704_v21 = vrot.slane %v6824_v46, 1 }
  0x45   : > { %12900 = vst [vmem:[#allocation46_spill] sm:$0xff] %v6835_v37  ;;  %12901 = vst [vmem:[#allocation47_spill] sm:$0xff] %v6837_v39  ;;  %v1010_v62 = vsel %vm541_vm1, %v975_v36, 0.0  ;;  %v6850_v58 = vadd.f32 %v995_v18, %v994_v53  ;;  %v706_v49 = vrot.slane %v6826_v26, 1  ;;  %v6853_v57 = vunpack.c.l.bf16 %v355_v52 }
  0x46   : > { %5461 = vrot.lane.b32.xlu0 %v6840_v33, %s6510_s12  ;;  %v6856_v32 = vadd.f32 %v1010_v62, %v1009_v43  ;;  %v6859_v59 = vsel %vm637_vm2, %v699_v50, %v704_v21  ;;  %v6861_v1 = vunpack.c.h.bf16 %v355_v52  ;;  %v6863_v37 = vunpack.c.l.bf16 %v359_v30 }
  0x47   : > { %12902 = vst [vmem:[#allocation48_spill] sm:$0xff] %v6850_v58  ;;  %12903 = vst [vmem:[#allocation49_spill] sm:$0xff] %v6853_v57  ;;  %v6866_v36 = vsel %vm637_vm2, %v702_v61, %v706_v49  ;;  %v698_v53 = vrot.slane %v6853_v57, 1  ;;  %v6869_v18 = vunpack.c.h.bf16 %v359_v30  ;;  %v6876_v62 = vunpack.c.l.bf16 %v360_v20  ;;  %v358_v58 = vld [vmem:[%s6573_s29 + $0xa8] sm:$0xff] }
  0x48   : > { %12904 = vst [vmem:[#allocation50_spill] sm:$0xff] %v6856_v32  ;;  %12905 = vst [vmem:[#allocation51_spill] sm:$0xff] %v6859_v59  ;;  %v6873_v39 = vpack.i.bf16 %v6866_v36, %v6859_v59  ;;  %v701_v43 = vrot.slane %v6861_v1, 1  ;;  %v6881_v21 = vunpack.c.h.bf16 %v360_v20  ;;  %v709_v49 = vrot.slane %v6863_v37, 1 }
  0x49   : > { %12906 = vst [vmem:[#allocation52_spill] sm:$0xff] %v6861_v1  ;;  %12907 = vst [vmem:[#allocation53_spill] sm:$0xff] %v6863_v37  ;;  %v6879_v52 = vsel %vm637_vm2, %v698_v53, %v699_v50  ;;  %v712_v32 = vrot.slane %v6869_v18, 1  ;;  %v714_v50 = vrot.slane %v6876_v62, 1  ;;  %v6897_v53 = vunpack.c.l.bf16 %v358_v58 }
  0x4a   : > { %12908 = vst [vmem:[#allocation54_spill] sm:$0xff] %v6866_v36  ;;  %12909 = vst [vmem:[#allocation55_spill] sm:$0xff] %v6869_v18  ;;  %5476 = vrot.lane.b32.xlu1 %v6873_v39, %s6510_s12  ;;  %v6888_v30 = vsel %vm637_vm2, %v701_v43, %v702_v61  ;;  %v716_v20 = vrot.slane %v6881_v21, 1  ;;  %v6899_v59 = vunpack.c.h.bf16 %v358_v58  ;;  %v447_v56 = vmul.f32 %v6601_v11, %v6601_v11 }
  0x4b   : > { %12910 = vst [vmem:[#allocation56_spill] sm:$0xff] %v6876_v62  ;;  %12911 = vst [vmem:[#allocation57_spill] sm:$0xff] %v6879_v52  ;;  %v6893_v36 = vpack.i.bf16 %v6888_v30, %v6879_v52  ;;  %v6904_v61 = vsel %vm637_vm2, %v709_v49, %v714_v50  ;;  %v6911_v52 = vmul.f32 %v6597_v9, %v6597_v9  ;;  %vm861_vm3 = vcmask 1040384  }
  0x4c   : > { %12912 = vst [vmem:[#allocation58_spill] sm:$0xff] %v6881_v21  ;;  %12913 = vst [vmem:[#allocation59_spill] sm:$0xff] %v6888_v30  ;;  %v6907_v43 = vsel %vm637_vm2, %v712_v32, %v716_v20  ;;  %v6915_v30 = vmul.f32 %v6587_v3, %v6587_v3  ;;  %v708_v21 = vrot.slane %v6897_v53, 1  ;;  %v711_v50 = vrot.slane %v6899_v59, 1 }
  0x4d   : > { %12914 = vst [vmem:[#allocation60_spill] sm:$0xff] %v6897_v53  ;;  %12915 = vst [vmem:[#allocation61_spill] sm:$0xff] %v6899_v59  ;;  %5471 = vrot.lane.b32.xlu0 %v6893_v36, %s6510_s12  ;;  %v6919_v58 = vpack.i.bf16 %v6907_v43, %v6904_v61  ;;  %v6925_v20 = vmul.f32 %v6675_v8, %v6675_v8  ;;  %v6980_v8 = vmul.f32 %v6730_v16, %v6730_v16  ;;  %vm1294_vm4 = vcmask 15360  }
  0x4e   : > { %12916 = vst [vmem:[#allocation62_spill] sm:$0xff] %v6904_v61  ;;  %12917 = vst [vmem:[#allocation63_spill] sm:$0xff] %v6907_v43  ;;  %v6930_v62 = vsel %vm637_vm2, %v708_v21, %v709_v49  ;;  %v6933_v26 = vsel %vm637_vm2, %v711_v50, %v712_v32  ;;  %v6937_v61 = vmul.f32 %v6723_v63, %v6723_v63  ;;  %vm1278_vm5 = vcmask 1047568  }
  0x4f   : > { %12918 = vst [vmem:[#allocation64_spill] sm:$0xff] %v6911_v52  ;;  %12919 = vst [vmem:[#allocation65_spill] sm:$0xff] %v6915_v30  ;;  %5486 = vrot.lane.b32.xlu1 %v6919_v58, %s6510_s12  ;;  %v845_v43 = vadd.f32 %v6915_v30, %v6911_v52  ;;  %v6943_v46 = vpack.i.bf16 %v6933_v26, %v6930_v62  ;;  %v6949_v21 = vmul.f32 %v6591_v5, %v6591_v5  ;;  %vm12672_vm6 = vcmask 1047553  }
  0x50   : > { %12920 = vst [vmem:[#allocation66_spill] sm:$0xff] %v6925_v20  ;;  %12921 = vst [vmem:[#allocation67_spill] sm:$0xff] %v6930_v62  ;;  %v6953_v32 = vmul.f32 %v6765_v2, %v6765_v2  ;;  %v6957_v49 = vmul.f32 %v6803_v47, %v6803_v47  ;;  %v6968_v62 = vmul.f32 %v6853_v57, %v6853_v57  ;;  %v526_v47 = vsel %vm525_vm0, %v447_v56, 0.0 }
  0x51   : > { %12922 = vst [vmem:[#allocation68_spill] sm:$0xff] %v6933_v26  ;;  %12923 = vst [vmem:[#allocation69_spill] sm:$0xff] %v6937_v61  ;;  %v846_v50 = vadd.f32 %v845_v43, %v6925_v20  ;;  %v6962_v26 = vmul.f32 %v6657_v54, %v6657_v54  ;;  %5481 = vrot.lane.b32.xlu0 %v6943_v46, %s6510_s12  ;;  %v6972_v2 = vmul.f32 %v6698_v34, %v6698_v34  ;;  %vm493_vm7 = vcmask 1047561  }
  0x52   : > { %12924 = vst [vmem:[#allocation70_spill] sm:$0xff] %v6953_v32  ;;  %12925 = vst [vmem:[#allocation71_spill] sm:$0xff] %v6957_v49  ;;  %v527_v43 = vsel %vm525_vm0, %v6949_v21, 0.0  ;;  %v6986_v5 = vmul.f32 %v6897_v53, %v6897_v53  ;;  %v6990_v34 = vmul.f32 %v6771_v19, %v6771_v19  ;;  %v6994_v25 = vmul.f32 %v6811_v35, %v6811_v35 }
  0x53   : > { %12926 = vst [vmem:[#allocation72_spill] sm:$0xff] %v6968_v62  ;;  %v847_v63 = vadd.f32 %v846_v50, %v6937_v61  ;;  %v528_v54 = vadd.f32 %v527_v43, %v526_v47  ;;  %v529_v57 = vsel %vm525_vm0, %v6962_v26, 0.0  ;;  %v531_v50 = vsel %vm525_vm0, %v6972_v2, 0.0 }
  0x54   : > { %12927 = vst [vmem:[#allocation73_spill] sm:$0xff] %v6986_v5  ;;  %v533_v16 = vsel %vm525_vm0, %v6980_v8, 0.0  ;;  %v852_v53 = vadd.f32 %v6949_v21, %v447_v56  ;;  %v535_v35 = vsel %vm525_vm0, %v6990_v34, 0.0  ;;  %vm509_vm8 = vcmask 7169  }
  0x55   : > { %v848_v47 = vadd.f32 %v847_v63, %v6953_v32  ;;  %v530_v43 = vadd.f32 %v529_v57, %v528_v54  ;;  %v7010_v54 = vmul.f32 %v6863_v37, %v6863_v37  ;;  %v537_v63 = vsel %vm525_vm0, %v6994_v25, 0.0 }
  0x56   : > { %v853_v19 = vadd.f32 %v852_v53, %v6962_v26  ;;  %vm573_vm9 = vcmask 0   ;;  %vm557_vm10 = vcmask 1040392   ;;  %vm12799_vm11 = vcmask 1039360  }
  0x57   : > { %v849_v24 = vadd.f32 %v848_v47, %v6957_v49  ;;  %v532_v51 = vadd.f32 %v531_v50, %v530_v43  ;;  %v539_v47 = vsel %vm525_vm0, %v7010_v54, 0.0  ;;  %vm2015_vm12 = vcmask 1047569  }
  0x58   : > { %v854_v9 = vadd.f32 %v853_v19, %v6972_v2  ;;  %vm2031_vm13 = vcmask 15361   ;;  %vm2077_vm14 = vcmask 1040400   ;;  %vm2093_vm15 = vcmask 8192  }
  0x59   : > { %v850_v42 = vadd.f32 %v849_v24, %v6968_v62  ;;  %v534_v3 = vadd.f32 %v533_v16, %v532_v51 }
  0x5a   : > { %v855_v53 = vadd.f32 %v854_v9, %v6980_v8  ;;  %v7032_v9 = vmul.f32 %v6589_v4, %v6589_v4 }
  0x5b   : > { %v851_v57 = vadd.f32 %v850_v42, %v6986_v5  ;;  %v536_v50 = vadd.f32 %v535_v35, %v534_v3  ;;  %v7028_v3 = vmul.f32 %v6599_v10, %v6599_v10 }
  0x5c   : > { %v856_v51 = vadd.f32 %v855_v53, %v6990_v34  ;;  %12931 = vst [vmem:[#allocation77_spill] sm:$0xff] %v7032_v9  ;;  %v1340_v53 = vsel %vm1278_vm5, %v6911_v52, 0.0 }
  0x5d   : > { %v862_v43 = vrot.slane %v851_v57, 7  ;;  %v538_v24 = vadd.f32 %v537_v63, %v536_v50  ;;  %12930 = vst [vmem:[#allocation76_spill] sm:$0xff] %v7028_v3  ;;  %v7040_v63 = vmul.f32 %v6677_v13, %v6677_v13  ;;  %v1355_v57 = vsel %vm1294_vm4, %v7028_v3, 0.0 }
  0x5e   : > { %v857_v19 = vadd.f32 %v856_v51, %v6994_v25  ;;  %v1356_v50 = vsel %vm1294_vm4, %v7032_v9, 0.0  ;;  %v472_v3 = vmul.f32 %v6732_v17, %v6732_v17 }
  0x5f   : > { %865 = vrot.lane.b32.xlu0 %v862_v43, %s6511_s13  ;;  %v7020_v16 = vadd.f32 %v539_v47, %v538_v24  ;;  %12932 = vst [vmem:[#allocation78_spill] sm:$0xff] %v7040_v63  ;;  %v1341_v47 = vsel %vm1278_vm5, %v6915_v30, 0.0  ;;  %v1370_v24 = vsel %vm1278_vm5, %v447_v56, 0.0  ;;  %v1373_v56 = vsel %vm1278_vm5, %v6962_v26, 0.0 }
  0x60   : > { %v7024_v37 = vadd.f32 %v857_v19, %v7010_v54  ;;  %v1342_v51 = vadd.f32 %v1341_v47, %v1340_v53  ;;  %v7057_v19 = vmul.f32 %v6727_v7, %v6727_v7  ;;  %v448_v26 = vmul.f32 %v6603_v12, %v6603_v12 }
  0x61   : > { %12928 = vst [vmem:[#allocation74_spill] sm:$0xff] %v7020_v16 }
  0x62   : > { %12929 = vst [vmem:[#allocation75_spill] sm:$0xff] %v7024_v37  ;;  %v863_v42 = vrot.slane %v7024_v37, 7  ;;  %12933 = vst [vmem:[#allocation79_spill] sm:$0xff] %v7057_v19  ;;  %v1360_v47 = vsel %vm1294_vm4, %v7057_v19, 0.0 }
  0x64   : > { %v864_v35 = vsel %vm861_vm3, %v862_v43, %v863_v42  ;;  %869 = vrot.lane.b32.xlu0 %v863_v42, %s6511_s13  ;;  %v1357_v43 = vadd.f32 %v1356_v50, %v1355_v57  ;;  %v1358_v42 = vsel %vm1294_vm4, %v7040_v63, 0.0 }
  0x65   : > { %867 = vrot.lane.b32.xlu1 %v864_v35, %s6511_s13  ;;  %v1371_v35 = vsel %vm1278_vm5, %v6949_v21, 0.0  ;;  %v7075_v21 = vmul.f32 %v6769_v41, %v6769_v41 }
  0x66   : > { %v1372_v57 = vadd.f32 %v1371_v35, %v1370_v24  ;;  %v1359_v50 = vadd.f32 %v1358_v42, %v1357_v43  ;;  %v454_v43 = vmul.f32 %v6593_v6, %v6593_v6  ;;  %v7091_v42 = vmul.f32 %v6808_v0, %v6808_v0 }
  0x67   : > { %12934 = vst [vmem:[#allocation80_spill] sm:$0xff] %v7075_v21  ;;  %v1375_v35 = vsel %vm1278_vm5, %v6972_v2, 0.0  ;;  %v7106_v2 = vmul.f32 %v6861_v1, %v6861_v1  ;;  %v1362_v9 = vsel %vm1294_vm4, %v7075_v21, 0.0 }
  0x68   : > { %5496 = vrot.lane.b32.xlu0 %v6680_v15, %s6511_s13  ;;  %v1343_v15 = vsel %vm1278_vm5, %v6925_v20, 0.0  ;;  %v1374_v24 = vadd.f32 %v1373_v56, %v1372_v57  ;;  %12935 = vst [vmem:[#allocation81_spill] sm:$0xff] %v7091_v42  ;;  %v1361_v57 = vadd.f32 %v1360_v47, %v1359_v50  ;;  %v466_v56 = vmul.f32 %v6709_v45, %v6709_v45 }
  0x69   : > { %5491 = vrot.lane.b32.xlu1 %v6635_v38, %s6511_s13  ;;  %v1345_v38 = vsel %vm1278_vm5, %v6937_v61, 0.0  ;;  %v1344_v53 = vadd.f32 %v1343_v15, %v1342_v51  ;;  %v1349_v51 = vsel %vm1278_vm5, %v6957_v49, 0.0  ;;  %v542_v15 = vsel %vm541_vm1, %v448_v26, 0.0  ;;  %12936 = vst [vmem:[#allocation82_spill] sm:$0xff] %v7106_v2 }
  0x6a   : > { %v543_v16 = vsel %vm541_vm1, %v454_v43, 0.0  ;;  %v1376_v50 = vadd.f32 %v1375_v35, %v1374_v24  ;;  %v1377_v47 = vsel %vm1278_vm5, %v6980_v8, 0.0  ;;  %v547_v37 = vsel %vm541_vm1, %v466_v56, 0.0 }
  0x6b   : > { %v1346_v63 = vadd.f32 %v1345_v38, %v1344_v53  ;;  %v1386_v38 = vsel %vm1294_vm4, %v454_v43, 0.0  ;;  %v478_v24 = vmul.f32 %v6776_v60, %v6776_v60  ;;  %v549_v8 = vsel %vm541_vm1, %v472_v3, 0.0 }
  0x6c   : > { %5506 = vrot.lane.b32.xlu0 %v6648_v48, %s6511_s13  ;;  %v1347_v48 = vsel %vm1278_vm5, %v6953_v32, 0.0 }
  0x6d   : > { %5501 = vrot.lane.b32.xlu1 %v6621_v27, %s6511_s13  ;;  %v460_v27 = vmul.f32 %v6659_v55, %v6659_v55 }
  0x6f   : > { %v545_v19 = vsel %vm541_vm1, %v460_v27, 0.0  ;;  %v1388_v53 = vsel %vm1294_vm4, %v460_v27, 0.0  ;;  %v1390_v27 = vsel %vm1294_vm4, %v466_v56, 0.0 }
  0x70   : > { %5516 = vrot.lane.b32.xlu0 %v6692_v28, %s6511_s13  ;;  %v544_v28 = vadd.f32 %v543_v16, %v542_v15  ;;  %v1363_v16 = vadd.f32 %v1362_v9, %v1361_v57  ;;  %v1378_v15 = vadd.f32 %v1377_v47, %v1376_v50  ;;  %v551_v9 = vsel %vm541_vm1, %v478_v24, 0.0 }
  0x71   : > { %5511 = vrot.lane.b32.xlu1 %v6707_v44, %s6511_s13  ;;  %v1385_v44 = vsel %vm1294_vm4, %v448_v26, 0.0  ;;  %v1364_v26 = vsel %vm1294_vm4, %v7091_v42, 0.0 }
  0x72   : > { %v546_v49 = vadd.f32 %v545_v19, %v544_v28  ;;  %v1387_v35 = vadd.f32 %v1386_v38, %v1385_v44  ;;  %v1348_v19 = vadd.f32 %v1347_v48, %v1346_v63  ;;  %v7133_v28 = vmul.f32 %v6899_v59, %v6899_v59 }
  0x73   : > { %v1392_v48 = vsel %vm1294_vm4, %v472_v3, 0.0  ;;  %v1394_v3 = vsel %vm1294_vm4, %v478_v24, 0.0 }
  0x74   : > { %5526 = vrot.lane.b32.xlu0 %v6742_v22, %s6511_s13  ;;  %v548_v43 = vadd.f32 %v547_v37, %v546_v49  ;;  %v484_v22 = vmul.f32 %v6822_v23, %v6822_v23  ;;  %v1389_v57 = vadd.f32 %v1388_v53, %v1387_v35  ;;  %12937 = vst [vmem:[#allocation83_spill] sm:$0xff] %v7133_v28 }
  0x75   : > { %5521 = vrot.lane.b32.xlu1 %v6756_v40, %s6511_s13  ;;  %v1379_v40 = vsel %vm1278_vm5, %v6990_v34, 0.0  ;;  %v1365_v37 = vadd.f32 %v1364_v26, %v1363_v16  ;;  %v490_v49 = vmul.f32 %v6869_v18, %v6869_v18  ;;  %v1350_v47 = vadd.f32 %v1349_v51, %v1348_v19 }
  0x76   : > { %v550_v63 = vadd.f32 %v549_v8, %v548_v43  ;;  %v553_v56 = vsel %vm541_vm1, %v484_v22, 0.0  ;;  %v1391_v50 = vadd.f32 %v1390_v27, %v1389_v57  ;;  %v1366_v34 = vsel %vm1294_vm4, %v7106_v2, 0.0 }
  0x77   : > { %v1380_v38 = vadd.f32 %v1379_v40, %v1378_v15  ;;  %v555_v53 = vsel %vm541_vm1, %v490_v49, 0.0  ;;  %v1381_v8 = vsel %vm1278_vm5, %v6994_v25, 0.0  ;;  %v1367_v51 = vadd.f32 %v1366_v34, %v1365_v37  ;;  %v12944_v34 = vld [vmem:[#allocation17_spill] sm:$0xff] }
  0x78   : > { %5536 = vrot.lane.b32.xlu0 %v6779_v29, %s6511_s13  ;;  %v552_v44 = vadd.f32 %v551_v9, %v550_v63  ;;  %v1351_v29 = vsel %vm1278_vm5, %v6968_v62, 0.0  ;;  %v1393_v16 = vadd.f32 %v1392_v48, %v1391_v50  ;;  %v1368_v26 = vsel %vm1294_vm4, %v7133_v28, 0.0 }
  0x79   : > { %5531 = vrot.lane.b32.xlu1 %v6797_v14, %s6511_s13  ;;  %v1396_v14 = vsel %vm1294_vm4, %v484_v22, 0.0  ;;  %v1352_v24 = vadd.f32 %v1351_v29, %v1350_v47  ;;  %v1353_v25 = vsel %vm1278_vm5, %v6986_v5, 0.0  ;;  %v1382_v27 = vadd.f32 %v1381_v8, %v1380_v38  ;;  %v12943_v47 = vld [vmem:[#allocation16_spill] sm:$0xff]  ;;  %v12946_v29 = vld [vmem:[#allocation15_spill] sm:$0xff]  ;;  %v12948_v8 = vld [vmem:[#allocation18_spill] sm:$0xff] }
  0x7a   : > { %v554_v35 = vadd.f32 %v553_v56, %v552_v44  ;;  %v1395_v19 = vadd.f32 %v1394_v3, %v1393_v16  ;;  %v1398_v22 = vsel %vm1294_vm4, %v490_v49, 0.0  ;;  %v12942_v56 = vld [vmem:[#allocation6_spill] sm:$0xff]  ;;  %v7207_v44 = vpack.i.bf16 %v12944_v34, %v12943_v47 }
  0x7b   : > { %v1354_v9 = vadd.f32 %v1353_v25, %v1352_v24  ;;  %v7201_v50 = vpack.i.bf16 %v6589_v4, %v12942_v56  ;;  %v12945_v3 = vld [vmem:[#allocation14_spill] sm:$0xff]  ;;  %v12952_v25 = vld [vmem:[#allocation20_spill] sm:$0xff] }
  0x7c   : > { %5546 = vrot.lane.b32.xlu0 %v6817_v31, %s6511_s13  ;;  %v7160_v43 = vadd.f32 %v555_v53, %v554_v35  ;;  %v1397_v15 = vadd.f32 %v1396_v14, %v1395_v19  ;;  %v1383_v31 = vsel %vm1278_vm5, %v7010_v54, 0.0  ;;  %v7213_v38 = vpack.i.bf16 %v12946_v29, %v12945_v3  ;;  %v12947_v53 = vld [vmem:[#allocation8_spill] sm:$0xff]  ;;  %v12949_v14 = vld [vmem:[#allocation22_spill] sm:$0xff] }
  0x7d   : > { %5541 = vrot.lane.b32.xlu1 %v6840_v33, %s6511_s13  ;;  %v1369_v33 = vadd.f32 %v1368_v26, %v1367_v51  ;;  %v7173_v40 = vadd.f32 %v1383_v31, %v1382_v27  ;;  %v1404_v54 = vrot.slane %v1354_v9, 7  ;;  %v7219_v16 = vpack.i.bf16 %v6593_v6, %v12947_v53  ;;  %v12950_v19 = vld [vmem:[#allocation28_spill] sm:$0xff]  ;;  %v12953_v27 = vld [vmem:[#allocation21_spill] sm:$0xff]  ;;  %v12955_v31 = vld [vmem:[#allocation27_spill] sm:$0xff] }
  0x7e   : > { %12938 = vst [vmem:[#allocation84_spill] sm:$0xff] %v7160_v43  ;;  %v7171_v57 = vadd.f32 %v1398_v22, %v1397_v15  ;;  %v7225_v35 = vpack.i.bf16 %v6659_v55, %v12948_v8  ;;  %v7231_v51 = vpack.i.bf16 %v6677_v13, %v12949_v14  ;;  %v7237_v24 = vpack.i.bf16 %v6727_v7, %v12950_v19  ;;  %v12954_v22 = vld [vmem:[#allocation26_spill] sm:$0xff]  ;;  %v12957_v9 = vld [vmem:[#allocation24_spill] sm:$0xff]  ;;  %v12976_v53 = vld [vmem:[#allocation39_spill] sm:$0xff] }
  0x7f   : > { %12940 = vst [vmem:[#allocation86_spill] sm:$0xff] %v7173_v40  ;;  %v1405_v63 = vrot.slane %v1369_v33, 7  ;;  %v7245_v15 = vpack.i.bf16 %v12953_v27, %v12952_v25  ;;  %v7251_v33 = vpack.i.bf16 %v12955_v31, %v12954_v22  ;;  %v1692_v55 = vsel %vm12672_vm6, %v6925_v20, 0.0 }
  0x80   : > { %5556 = vrot.lane.b32.xlu0 %v6873_v39, %s6511_s13  ;;  %12939 = vst [vmem:[#allocation85_spill] sm:$0xff] %v7171_v57  ;;  %v1408_v48 = vrot.slane %v7171_v57, 7  ;;  %v1406_v39 = vrot.slane %v7173_v40, 7  ;;  %v1694_v6 = vsel %vm12672_vm6, %v6937_v61, 0.0 }
  0x81   : > { %5551 = vrot.lane.b32.xlu1 %v6893_v36, %s6511_s13  ;;  %12956 = vst [vmem:[#allocation88_spill] sm:$0xff] %v7251_v33 }
  0x82   : > { %v1409_v36 = vsel %vm861_vm3, %v1405_v63, %v1408_v48  ;;  %v1407_v37 = vsel %vm861_vm3, %v1404_v54, %v1406_v39 }
  0x84   : > { %5566 = vrot.lane.b32.xlu0 %v6919_v58, %s6511_s13  ;;  %v12941_v58 = vld [vmem:[#allocation10_spill] sm:$0xff] }
  0x85   : > { %5561 = vrot.lane.b32.xlu1 %v6943_v46, %s6511_s13  ;;  %v7190_v46 = vpack.i.bf16 %v6603_v12, %v6601_v11  ;;  %v7195_v49 = vpack.i.bf16 %v6599_v10, %v12941_v58  ;;  %v1700_v10 = vsel %vm12672_vm6, %v6968_v62, 0.0  ;;  %v12998_v58 = vld [vmem:[#allocation58_spill] sm:$0xff] }
  0x88   : > { %1412 = vrot.lane.b32.xlu0 %v1405_v63, %s6510_s12  ;;  %v7257_v63 = vpack.i.bf16 %v6709_v45, %v12957_v9  ;;  %v12964_v9 = vld [vmem:[#allocation34_spill] sm:$0xff] }
  0x89   : > { %1410 = vrot.lane.b32.xlu1 %v1404_v54, %s6510_s12  ;;  %v7285_v7 = vpack.i.bf16 %v6769_v41, %v12964_v9  ;;  %v12971_v9 = vld [vmem:[#allocation33_spill] sm:$0xff] }
  0x8b   : > { %12965 = vst [vmem:[#allocation94_spill] sm:$0xff] %v7285_v7 }
  0x8c   : > { %1416 = vrot.lane.b32.xlu0 %v1409_v36, %s6510_s12  ;;  %v7267_v36 = vmul.f32 %v12943_v47, %v12943_v47 }
  0x8d   : > { %1414 = vrot.lane.b32.xlu1 %v1407_v37, %s6510_s12  ;;  %v7271_v37 = vmul.f32 %v12945_v3, %v12945_v3 }
  0x8e   : > { %12959 = vst [vmem:[#allocation90_spill] sm:$0xff] %v7267_v36  ;;  %v1704_v8 = vsel %vm861_vm3, %v7267_v36, 0.0 }
  0x8f   : > { %12960 = vst [vmem:[#allocation91_spill] sm:$0xff] %v7271_v37 }
  0x90   : > { %1420 = vrot.lane.b32.xlu0 %v1408_v48, %s6510_s12  ;;  %v1689_v48 = vsel %vm12672_vm6, %v6911_v52, 0.0 }
  0x91   : > { %1418 = vrot.lane.b32.xlu1 %v1406_v39, %s6510_s12  ;;  %v1690_v39 = vsel %vm12672_vm6, %v6915_v30, 0.0 }
  0x92   : > { %v1691_v19 = vadd.f32 %v1690_v39, %v1689_v48  ;;  %v12970_v39 = vld [vmem:[#allocation32_spill] sm:$0xff] }
  0x93   : > { %v7339_v56 = vmul.f32 %v12970_v39, %v12970_v39 }
  0x94   : > { %5576 = vrot.lane.b32.xlu0 %v7190_v46, %s6510_s12  ;;  %v7239_v26 = vpop.permute.xlu0 %5411  ;;  %v1693_v14 = vadd.f32 %v1692_v55, %v1691_v19  ;;  %v12978_v55 = vld [vmem:[#allocation36_spill] sm:$0xff] }
  0x95   : > { %5571 = vrot.lane.b32.xlu1 %v7195_v49, %s6510_s12  ;;  %12951 = vst [vmem:[#allocation87_spill] sm:$0xff] %v7239_v26  ;;  %v7273_v26 = vpop.permute.xlu1 %5421  ;;  %12981 = vst [vmem:[#allocation104_spill] sm:$0xff] %v7339_v56 }
  0x96   : > { %12961 = vst [vmem:[#allocation92_spill] sm:$0xff] %v7273_v26  ;;  %v7291_v26 = vmul.f32 %v12952_v25, %v12952_v25  ;;  %v7309_v25 = vpack.i.bf16 %v12971_v9, %v12970_v39 }
  0x98   : > { %5586 = vrot.lane.b32.xlu0 %v7201_v50, %s6510_s12  ;;  %12966 = vst [vmem:[#allocation95_spill] sm:$0xff] %v7291_v26  ;;  %12972 = vst [vmem:[#allocation98_spill] sm:$0xff] %v7309_v25 }
  0x99   : > { %5581 = vrot.lane.b32.xlu1 %v7207_v44, %s6510_s12  ;;  %v7311_v13 = vpop.permute.xlu1 %5426 }
  0x9a   : > { %12973 = vst [vmem:[#allocation99_spill] sm:$0xff] %v7311_v13 }
  0x9b   : > { %v7259_v54 = vpop.permute.xlu0 %5416 }
  0x9c   : > { %5596 = vrot.lane.b32.xlu0 %v7213_v38, %s6510_s12  ;;  %12958 = vst [vmem:[#allocation89_spill] sm:$0xff] %v7259_v54  ;;  %v12962_v54 = vld [vmem:[#allocation30_spill] sm:$0xff] }
  0x9d   : > { %5591 = vrot.lane.b32.xlu1 %v7219_v16, %s6510_s12  ;;  %v7279_v45 = vpack.i.bf16 %v6732_v17, %v12962_v54  ;;  %v1705_v17 = vsel %vm861_vm3, %v7271_v37, 0.0  ;;  %v12967_v54 = vld [vmem:[#allocation40_spill] sm:$0xff]  ;;  %v7343_v12 = vpop.permute.xlu1 %5436 }
  0x9e   : > { %v7301_v41 = vpack.i.bf16 %v6808_v0, %v12967_v54  ;;  %v1706_v3 = vadd.f32 %v1705_v17, %v1704_v8  ;;  %v7317_v0 = vmul.f32 %v12954_v22, %v12954_v22  ;;  %v12975_v54 = vld [vmem:[#allocation38_spill] sm:$0xff]  ;;  %v7331_v17 = vpack.i.bf16 %v6776_v60, %v12978_v55  ;;  %12982 = vst [vmem:[#allocation105_spill] sm:$0xff] %v7343_v12  ;;  %v12987_v55 = vld [vmem:[#allocation71_spill] sm:$0xff] }
  0x9f   : > { %12963 = vst [vmem:[#allocation93_spill] sm:$0xff] %v7279_v45  ;;  %v7325_v4 = vpack.i.bf16 %v12976_v53, %v12975_v54  ;;  %v1695_v8 = vadd.f32 %v1694_v6, %v1693_v14  ;;  %v1696_v22 = vsel %vm12672_vm6, %v6953_v32, 0.0  ;;  %v12983_v60 = vld [vmem:[#allocation42_spill] sm:$0xff]  ;;  %v1698_v39 = vsel %vm12672_vm6, %v12987_v55, 0.0 }
  0xa0   : > { %5606 = vrot.lane.b32.xlu0 %v7225_v35, %s6510_s12  ;;  %12968 = vst [vmem:[#allocation96_spill] sm:$0xff] %v7301_v41  ;;  %v7303_v48 = vpop.permute.xlu0 %5431  ;;  %12974 = vst [vmem:[#allocation100_spill] sm:$0xff] %v7317_v0  ;;  %v1709_v47 = vsel %vm861_vm3, %v7317_v0, 0.0  ;;  %v7349_v6 = vpack.i.bf16 %v6822_v23, %v12983_v60  ;;  %v7361_v12 = vmul.f32 %v12975_v54, %v12975_v54  ;;  %v1711_v23 = vsel %vm861_vm3, %v7339_v56, 0.0  ;;  %v12989_v60 = vld [vmem:[#allocation60_spill] sm:$0xff] }
  0xa1   : > { %5601 = vrot.lane.b32.xlu1 %v7231_v51, %s6510_s12  ;;  %12969 = vst [vmem:[#allocation97_spill] sm:$0xff] %v7303_v48  ;;  %v1707_v48 = vsel %vm861_vm3, %v7291_v26, 0.0  ;;  %12977 = vst [vmem:[#allocation101_spill] sm:$0xff] %v7325_v4  ;;  %v7369_v11 = vpack.i.bf16 %v6899_v59, %v12989_v60  ;;  %v12997_v60 = vld [vmem:[#allocation56_spill] sm:$0xff] }
  0xa2   : > { %12979 = vst [vmem:[#allocation102_spill] sm:$0xff] %v7331_v17  ;;  %v1708_v19 = vadd.f32 %v1707_v48, %v1706_v3  ;;  %12984 = vst [vmem:[#allocation106_spill] sm:$0xff] %v7349_v6  ;;  %v12985_v3 = vld [vmem:[#allocation49_spill] sm:$0xff]  ;;  %v1697_v48 = vadd.f32 %v1696_v22, %v1695_v8  ;;  %v7393_v57 = vpack.i.bf16 %v12998_v58, %v12997_v60 }
  0xa3   : > { %v7355_v14 = vpack.i.bf16 %v6861_v1, %v12985_v3  ;;  %12988 = vst [vmem:[#allocation108_spill] sm:$0xff] %v7361_v12  ;;  %12990 = vst [vmem:[#allocation109_spill] sm:$0xff] %v7369_v11  ;;  %v12993_v22 = vld [vmem:[#allocation45_spill] sm:$0xff]  ;;  %v7407_v40 = vmul.f32 %v12997_v60, %v12997_v60 }
  0xa4   : > { %5616 = vrot.lane.b32.xlu0 %v7237_v24, %s6510_s12  ;;  %v1699_v3 = vadd.f32 %v1698_v39, %v1697_v48  ;;  %12999 = vst [vmem:[#allocation114_spill] sm:$0xff] %v7393_v57 }
  0xa5   : > { %5611 = vrot.lane.b32.xlu1 %v7245_v15, %s6510_s12  ;;  %12986 = vst [vmem:[#allocation107_spill] sm:$0xff] %v7355_v14  ;;  %13003 = vst [vmem:[#allocation117_spill] sm:$0xff] %v7407_v40 }
  0xa6   : > { %v1701_v39 = vadd.f32 %v1700_v10, %v1699_v3  ;;  %v13005_v3 = vld [vmem:[#allocation75_spill] sm:$0xff] }
  0xa8   : > { %5626 = vrot.lane.b32.xlu0 %v7251_v33, %s6510_s12  ;;  %v7517_v33 = vmul.f32 %v12946_v29, %v12946_v29 }
  0xa9   : > { %5621 = vrot.lane.b32.xlu1 %v7257_v63, %s6510_s12  ;;  %v7333_v13 = vpop.permute.xlu0 %5441 }
  0xaa   : > { %12980 = vst [vmem:[#allocation103_spill] sm:$0xff] %v7333_v13  ;;  %v1710_v13 = vadd.f32 %v1709_v47, %v1708_v19  ;;  %v12992_v47 = vld [vmem:[#allocation44_spill] sm:$0xff]  ;;  %v7379_v19 = vpop.permute.xlu1 %5446  ;;  %13039 = vst [vmem:[#allocation149_spill] sm:$0xff] %v7517_v33 }
  0xab   : > { %v7377_v8 = vpack.i.bf16 %v12993_v22, %v12992_v47  ;;  %12995 = vst [vmem:[#allocation112_spill] sm:$0xff] %v7379_v19  ;;  %v7385_v59 = vmul.f32 %v12992_v47, %v12992_v47  ;;  %v1702_v47 = vsel %vm12672_vm6, %v6986_v5, 0.0  ;;  %vm2807_vm6 = vcmask 1024  }
  0xac   : > { %5636 = vrot.lane.b32.xlu0 %v7279_v45, %s6510_s12  ;;  %v1712_v54 = vadd.f32 %v1711_v23, %v1710_v13  ;;  %v13000_v13 = vld [vmem:[#allocation53_spill] sm:$0xff]  ;;  %v1703_v10 = vadd.f32 %v1702_v47, %v1701_v39 }
  0xad   : > { %5631 = vrot.lane.b32.xlu1 %v7285_v7, %s6510_s12  ;;  %12994 = vst [vmem:[#allocation111_spill] sm:$0xff] %v7377_v8  ;;  %12996 = vst [vmem:[#allocation113_spill] sm:$0xff] %v7385_v59  ;;  %v7399_v23 = vpack.i.bf16 %v6869_v18, %v13000_v13  ;;  %v7513_v7 = vmul.f32 %v12944_v34, %v12944_v34  ;;  %v7529_v34 = vmul.f32 %v12953_v27, %v12953_v27 }
  0xae   : > { %v501_v27 = vsel %vm493_vm7, %v6953_v32, 0.0 }
  0xaf   : > { %13001 = vst [vmem:[#allocation115_spill] sm:$0xff] %v7399_v23  ;;  %13038 = vst [vmem:[#allocation148_spill] sm:$0xff] %v7513_v7  ;;  %v574_v29 = vsel %vm573_vm9, %v7513_v7, 0.0  ;;  %v517_v7 = vsel %vm509_vm8, %v7075_v21, 0.0 }
  0xb0   : > { %5646 = vrot.lane.b32.xlu0 %v7301_v41, %s6510_s12  ;;  %v7371_v1 = vpop.permute.xlu0 %5451  ;;  %13043 = vst [vmem:[#allocation152_spill] sm:$0xff] %v7529_v34 }
  0xb1   : > { %5641 = vrot.lane.b32.xlu1 %v7309_v25, %s6510_s12  ;;  %12991 = vst [vmem:[#allocation110_spill] sm:$0xff] %v7371_v1  ;;  %v1713_v1 = vsel %vm861_vm3, %v7361_v12, 0.0  ;;  %v13037_v25 = vld [vmem:[#allocation78_spill] sm:$0xff] }
  0xb2   : > { %v1714_v48 = vadd.f32 %v1713_v1, %v1712_v54  ;;  %v1717_v54 = vsel %vm861_vm3, %v7407_v40, 0.0  ;;  %v513_v45 = vsel %vm509_vm8, %v13037_v25, 0.0 }
  0xb4   : > { %5656 = vrot.lane.b32.xlu0 %v7325_v4, %s6510_s12  ;;  %v13033_v4 = vld [vmem:[#allocation76_spill] sm:$0xff] }
  0xb5   : > { %5651 = vrot.lane.b32.xlu1 %v7331_v17, %s6510_s12 }
  0xb8   : > { %5666 = vrot.lane.b32.xlu0 %v7349_v6, %s6510_s12  ;;  %v7401_v19 = vpop.permute.xlu0 %5461  ;;  %v7411_v6 = vpop.permute.xlu1 %5456 }
  0xb9   : > { %5661 = vrot.lane.b32.xlu1 %v7355_v14, %s6510_s12  ;;  %13002 = vst [vmem:[#allocation116_spill] sm:$0xff] %v7401_v19  ;;  %13004 = vst [vmem:[#allocation118_spill] sm:$0xff] %v7411_v6  ;;  %v494_v14 = vsel %vm493_vm7, %v6911_v52, 0.0 }
  0xbc   : > { %5676 = vrot.lane.b32.xlu0 %v7369_v11, %s6510_s12  ;;  %v1715_v11 = vsel %vm861_vm3, %v7385_v59, 0.0  ;;  %v7423_v60 = vpop.permute.xlu1 %5466 }
  0xbd   : > { %5671 = vrot.lane.b32.xlu1 %v7377_v8, %s6510_s12  ;;  %v1716_v1 = vadd.f32 %v1715_v11, %v1714_v48  ;;  %13007 = vst [vmem:[#allocation120_spill] sm:$0xff] %v7423_v60  ;;  %v495_v8 = vsel %vm493_vm7, %v6915_v30, 0.0 }
  0xbf   : > { %v7421_v19 = vpop.permute.xlu0 %5471  ;;  %v1718_v6 = vadd.f32 %v1717_v54, %v1716_v1 }
  0xc0   : > { %5686 = vrot.lane.b32.xlu0 %v7393_v57, %s6510_s12  ;;  %13006 = vst [vmem:[#allocation119_spill] sm:$0xff] %v7421_v19  ;;  %v7429_v13 = vpop.permute.xlu1 %5476 }
  0xc1   : > { %5681 = vrot.lane.b32.xlu1 %v7399_v23, %s6510_s12  ;;  %13009 = vst [vmem:[#allocation122_spill] sm:$0xff] %v7429_v13 }
  0xc3   : > { %v7427_v18 = vpop.permute.xlu0 %5481 }
  0xc4   : > { %1723 = vrot.lane.b32.xlu0 %v13005_v3, %s6511_s13  ;;  %13008 = vst [vmem:[#allocation121_spill] sm:$0xff] %v7427_v18  ;;  %v7433_v47 = vpop.permute.xlu1 %5486 }
  0xc5   : > { %1721 = vrot.lane.b32.xlu1 %v1703_v10, %s6511_s13  ;;  %13010 = vst [vmem:[#allocation123_spill] sm:$0xff] %v7433_v47 }
  0xc9   : > { %1725 = vrot.lane.b32.xlu1 %v1718_v6, %s6511_s13 }
  0xd1   : > { %v7431_v11 = vpop.permute.xlu0 %865 }
  0xd6   : > { %v7435_v39 = vpop.permute.xlu0 %869 }
  0xd7   : > { %v7437_v48 = vpop.permute.xlu1 %867 }
  0xda   : > { %v7439_v19 = vpop.permute.xlu0 %5496 }
  0xdb   : > { %13011 = vst [vmem:[#allocation124_spill] sm:$0xff] %v7439_v19  ;;  %v7441_v60 = vpop.permute.xlu1 %5491 }
  0xdc   : > { %13012 = vst [vmem:[#allocation125_spill] sm:$0xff] %v7441_v60 }
  0xde   : > { %v7443_v10 = vpop.permute.xlu0 %5506 }
  0xdf   : > { %13013 = vst [vmem:[#allocation126_spill] sm:$0xff] %v7443_v10  ;;  %v7445_v1 = vpop.permute.xlu1 %5501 }
  0xe0   : > { %13014 = vst [vmem:[#allocation127_spill] sm:$0xff] %v7445_v1 }
  0xe2   : > { %v7447_v6 = vpop.permute.xlu0 %5516 }
  0xe3   : > { %13015 = vst [vmem:[#allocation128_spill] sm:$0xff] %v7447_v6  ;;  %v7449_v54 = vpop.permute.xlu1 %5511 }
  0xe4   : > { %13016 = vst [vmem:[#allocation129_spill] sm:$0xff] %v7449_v54 }
  0xe6   : > { %v7451_v18 = vpop.permute.xlu0 %5526 }
  0xe7   : > { %13017 = vst [vmem:[#allocation130_spill] sm:$0xff] %v7451_v18  ;;  %v7453_v13 = vpop.permute.xlu1 %5521 }
  0xe8   : > { %13018 = vst [vmem:[#allocation131_spill] sm:$0xff] %v7453_v13 }
  0xea   : > { %v7455_v47 = vpop.permute.xlu0 %5536 }
  0xeb   : > { %13019 = vst [vmem:[#allocation132_spill] sm:$0xff] %v7455_v47  ;;  %v7457_v3 = vpop.permute.xlu1 %5531 }
  0xec   : > { %13020 = vst [vmem:[#allocation133_spill] sm:$0xff] %v7457_v3 }
  0xee   : > { %v7459_v57 = vpop.permute.xlu0 %5546 }
  0xef   : > { %13021 = vst [vmem:[#allocation134_spill] sm:$0xff] %v7459_v57  ;;  %v7461_v19 = vpop.permute.xlu1 %5541 }
  0xf0   : > { %13022 = vst [vmem:[#allocation135_spill] sm:$0xff] %v7461_v19 }
  0xf2   : > { %v7463_v60 = vpop.permute.xlu0 %5556 }
  0xf3   : > { %13023 = vst [vmem:[#allocation136_spill] sm:$0xff] %v7463_v60  ;;  %v7465_v10 = vpop.permute.xlu1 %5551 }
  0xf4   : > { %13024 = vst [vmem:[#allocation137_spill] sm:$0xff] %v7465_v10 }
  0xf6   : > { %v7467_v1 = vpop.permute.xlu0 %5566 }
  0xf7   : > { %13025 = vst [vmem:[#allocation138_spill] sm:$0xff] %v7467_v1  ;;  %v7469_v6 = vpop.permute.xlu1 %5561 }
  0xf8   : > { %13026 = vst [vmem:[#allocation139_spill] sm:$0xff] %v7469_v6 }
  0xfa   : > { %v7471_v54 = vpop.permute.xlu0 %1412 }
  0xfb   : > { %v7473_v18 = vpop.permute.xlu1 %1410 }
  0xfe   : > { %v7475_v13 = vpop.permute.xlu0 %1416 }
  0xff   : > { %v7477_v47 = vpop.permute.xlu1 %1414 }
 0x102   : > { %v7479_v3 = vpop.permute.xlu0 %1420 }
 0x103   : > { %v7481_v57 = vpop.permute.xlu1 %1418 }
 0x106   : > { %v7483_v19 = vpop.permute.xlu0 %5576 }
 0x107   : > { %13027 = vst [vmem:[#allocation140_spill] sm:$0xff] %v7483_v19  ;;  %v7485_v60 = vpop.permute.xlu1 %5571  ;;  %v510_v19 = vsel %vm509_vm8, %v13033_v4, 0.0 }
 0x108   : > { %13028 = vst [vmem:[#allocation141_spill] sm:$0xff] %v7485_v60  ;;  %v13034_v60 = vld [vmem:[#allocation77_spill] sm:$0xff] }
 0x10a   : > { %v7487_v10 = vpop.permute.xlu0 %5586 }
 0x10b   : > { %13029 = vst [vmem:[#allocation142_spill] sm:$0xff] %v7487_v10  ;;  %v7489_v1 = vpop.permute.xlu1 %5581  ;;  %v511_v10 = vsel %vm509_vm8, %v13034_v60, 0.0 }
 0x10c   : > { %13030 = vst [vmem:[#allocation143_spill] sm:$0xff] %v7489_v1  ;;  %v496_v1 = vadd.f32 %v495_v8, %v494_v14 }
 0x10e   : > { %v7491_v6 = vpop.permute.xlu0 %5596 }
 0x10f   : > { %13031 = vst [vmem:[#allocation144_spill] sm:$0xff] %v7491_v6  ;;  %v7493_v23 = vpop.permute.xlu1 %5591  ;;  %v512_v6 = vadd.f32 %v511_v10, %v510_v19  ;;  %v499_v10 = vsel %vm493_vm7, %v6937_v61, 0.0 }
 0x110   : > { %13032 = vst [vmem:[#allocation145_spill] sm:$0xff] %v7493_v23  ;;  %v497_v23 = vsel %vm493_vm7, %v6925_v20, 0.0 }
 0x111   : > { %v498_v14 = vadd.f32 %v497_v23, %v496_v1  ;;  %v514_v19 = vadd.f32 %v513_v45, %v512_v6  ;;  %v575_v23 = vsel %vm573_vm9, %v7517_v33, 0.0  ;;  %v558_v1 = vsel %vm557_vm10, %v7267_v36, 0.0 }
 0x112   : > { %v7503_v17 = vpop.permute.xlu0 %5606  ;;  %v559_v45 = vsel %vm557_vm10, %v7271_v37, 0.0  ;;  %v576_v61 = vadd.f32 %v575_v23, %v574_v29  ;;  %v7549_v36 = vmul.f32 %v12955_v31, %v12955_v31  ;;  %v577_v37 = vsel %vm573_vm9, %v7529_v34, 0.0 }
 0x113   : > { %13035 = vst [vmem:[#allocation146_spill] sm:$0xff] %v7503_v17  ;;  %v7505_v41 = vpop.permute.xlu1 %5601  ;;  %v560_v33 = vadd.f32 %v559_v45, %v558_v1  ;;  %v503_v23 = vsel %vm493_vm7, %v12987_v55, 0.0  ;;  %v519_v45 = vsel %vm509_vm8, %v7091_v42, 0.0 }
 0x114   : > { %13036 = vst [vmem:[#allocation147_spill] sm:$0xff] %v7505_v41  ;;  %v13042_v41 = vld [vmem:[#allocation79_spill] sm:$0xff]  ;;  %13046 = vst [vmem:[#allocation155_spill] sm:$0xff] %v7549_v36  ;;  %v578_v1 = vadd.f32 %v577_v37, %v576_v61  ;;  %v579_v31 = vsel %vm573_vm9, %v7549_v36, 0.0  ;;  %v505_v37 = vsel %vm493_vm7, %v6968_v62, 0.0 }
 0x115   : > { %v515_v25 = vsel %vm509_vm8, %v13042_v41, 0.0 }
 0x116   : > { %v7519_v17 = vpop.permute.xlu0 %5616  ;;  %v516_v41 = vadd.f32 %v515_v25, %v514_v19 }
 0x117   : > { %13040 = vst [vmem:[#allocation150_spill] sm:$0xff] %v7519_v17  ;;  %v7521_v8 = vpop.permute.xlu1 %5611  ;;  %v500_v17 = vadd.f32 %v499_v10, %v498_v14  ;;  %v561_v14 = vsel %vm557_vm10, %v7291_v26, 0.0 }
 0x118   : > { %13041 = vst [vmem:[#allocation151_spill] sm:$0xff] %v7521_v8  ;;  %v518_v29 = vadd.f32 %v517_v7, %v516_v41 }
 0x119   : > { %v502_v25 = vadd.f32 %v501_v27, %v500_v17  ;;  %v563_v27 = vsel %vm557_vm10, %v7317_v0, 0.0 }
 0x11a   : > { %v7539_v6 = vpop.permute.xlu0 %5626  ;;  %v520_v61 = vadd.f32 %v519_v45, %v518_v29 }
 0x11b   : > { %13044 = vst [vmem:[#allocation153_spill] sm:$0xff] %v7539_v6  ;;  %v7541_v8 = vpop.permute.xlu1 %5621  ;;  %v562_v6 = vadd.f32 %v561_v14, %v560_v33  ;;  %v504_v7 = vadd.f32 %v503_v23, %v502_v25  ;;  %v580_v33 = vadd.f32 %v579_v31, %v578_v1  ;;  %v521_v14 = vsel %vm509_vm8, %v7106_v2, 0.0 }
 0x11c   : > { %13045 = vst [vmem:[#allocation154_spill] sm:$0xff] %v7541_v8  ;;  %v7565_v8 = vmul.f32 %v12971_v9, %v12971_v9  ;;  %v565_v25 = vsel %vm557_vm10, %v7339_v56, 0.0  ;;  %v522_v31 = vadd.f32 %v521_v14, %v520_v61  ;;  %v507_v1 = vsel %vm493_vm7, %v6986_v5, 0.0 }
 0x11d   : > { %v506_v29 = vadd.f32 %v505_v37, %v504_v7  ;;  %v567_v7 = vsel %vm557_vm10, %v7361_v12, 0.0  ;;  %vm12635_vm7 = vcmask 1047554  }
 0x11e   : > { %v7555_v10 = vpop.permute.xlu0 %5636  ;;  %13049 = vst [vmem:[#allocation158_spill] sm:$0xff] %v7565_v8  ;;  %v581_v9 = vsel %vm573_vm9, %v7565_v8, 0.0 }
 0x11f   : > { %13047 = vst [vmem:[#allocation156_spill] sm:$0xff] %v7555_v10  ;;  %v7557_v19 = vpop.permute.xlu1 %5631  ;;  %v564_v10 = vadd.f32 %v563_v27, %v562_v6  ;;  %v582_v6 = vadd.f32 %v581_v9, %v580_v33  ;;  %v523_v27 = vsel %vm509_vm8, %v7133_v28, 0.0  ;;  %v7605_v61 = vadd.f32 %v507_v1, %v506_v29 }
 0x120   : > { %13048 = vst [vmem:[#allocation157_spill] sm:$0xff] %v7557_v19  ;;  %v7581_v19 = vmul.f32 %v12976_v53, %v12976_v53  ;;  %v7609_v9 = vadd.f32 %v523_v27, %v522_v31  ;;  %v13063_v31 = vld [vmem:[#allocation74_spill] sm:$0xff]  ;;  %vm12628_vm8 = vcmask 1041408  }
 0x121   : > { %13057 = vst [vmem:[#allocation166_spill] sm:$0xff] %v7605_v61  ;;  %v874_v29 = vmul.f32 %v7431_v11, %v7605_v61 }
 0x122   : > { %v7571_v17 = vpop.permute.xlu0 %5646  ;;  %13052 = vst [vmem:[#allocation161_spill] sm:$0xff] %v7581_v19  ;;  %v583_v53 = vsel %vm573_vm9, %v7581_v19, 0.0  ;;  %13059 = vst [vmem:[#allocation168_spill] sm:$0xff] %v7609_v9 }
 0x123   : > { %13050 = vst [vmem:[#allocation159_spill] sm:$0xff] %v7571_v17  ;;  %v7573_v41 = vpop.permute.xlu1 %5641  ;;  %v7597_v17 = vmul.f32 %v12993_v22, %v12993_v22  ;;  %v584_v33 = vadd.f32 %v583_v53, %v582_v6  ;;  %v875_v53 = vmul.f32 %v7431_v11, %v7609_v9  ;;  %v876_v6 = vmul.f32 %v7437_v48, %v13063_v31 }
 0x124   : > { %13051 = vst [vmem:[#allocation160_spill] sm:$0xff] %v7573_v41  ;;  %v566_v41 = vadd.f32 %v565_v25, %v564_v10  ;;  %v7613_v25 = vmul.f32 %v12998_v58, %v12998_v58 }
 0x125   : > { %13055 = vst [vmem:[#allocation164_spill] sm:$0xff] %v7597_v17  ;;  %v881_v11 = vmax.f32 %v875_v53, 1e-16 }
 0x126   : > { %v7587_v23 = vpop.permute.xlu0 %5656  ;;  %v568_v10 = vadd.f32 %v567_v7, %v566_v41  ;;  %13060 = vst [vmem:[#allocation169_spill] sm:$0xff] %v7613_v25  ;;  %v587_v7 = vsel %vm573_vm9, %v7613_v25, 0.0 }
 0x127   : > { %13053 = vst [vmem:[#allocation162_spill] sm:$0xff] %v7587_v23  ;;  %v7589_v45 = vpop.permute.xlu1 %5651  ;;  %v585_v23 = vsel %vm573_vm9, %v7597_v17, 0.0  ;;  %vm3181_vm9 = vcmask 15362  }
 0x128   : > { %13054 = vst [vmem:[#allocation163_spill] sm:$0xff] %v7589_v45  ;;  %v569_v45 = vsel %vm557_vm10, %v7385_v59, 0.0  ;;  %v586_v41 = vadd.f32 %v585_v23, %v584_v33  ;;  %v882_v33 = vmax.f32 %v876_v6, 1e-16 }
 0x129   : > { %v570_v27 = vadd.f32 %v569_v45, %v568_v10 }
 0x12a   : > { %v7603_v37 = vpop.permute.xlu0 %5666  ;;  %v7639_v23 = vadd.f32 %v587_v7, %v586_v41  ;;  %v1434_v7 = vmul.f32 %v7475_v13, %v7160_v43 }
 0x12b   : > { %13056 = vst [vmem:[#allocation165_spill] sm:$0xff] %v7603_v37  ;;  %v7607_v14 = vpop.permute.xlu1 %5661 }
 0x12c   : > { %13058 = vst [vmem:[#allocation167_spill] sm:$0xff] %v7607_v14  ;;  %v877_v14 = vmul.f32 %v7437_v48, %v7160_v43  ;;  %13066 = vst [vmem:[#allocation174_spill] sm:$0xff] %v7639_v23 }
 0x12e   : > { %v7619_v22 = vpop.permute.xlu0 %5676  ;;  %v883_v45 = vmax.f32 %v877_v14, 1e-16 }
 0x12f   : > { %13061 = vst [vmem:[#allocation170_spill] sm:$0xff] %v7619_v22  ;;  %v7623_v1 = vpop.permute.xlu1 %5671  ;;  %v571_v22 = vsel %vm557_vm10, %v7407_v40, 0.0  ;;  %vm3165_vm10 = vcmask 1047570  }
 0x130   : > { %13062 = vst [vmem:[#allocation171_spill] sm:$0xff] %v7623_v1  ;;  %v880_v1 = vmax.f32 %v874_v29, 1e-16  ;;  %v7641_v17 = vadd.f32 %v571_v22, %v570_v27  ;;  %v879_v29 = vmul.f32 %v7435_v39, %v7639_v23 }
 0x132   : > { %v7635_v37 = vpop.permute.xlu0 %5686  ;;  %13067 = vst [vmem:[#allocation175_spill] sm:$0xff] %v7641_v17  ;;  %6290 = vrsqrt.f32 %v880_v1  ;;  %v878_v22 = vmul.f32 %v7435_v39, %v7641_v17  ;;  %v885_v27 = vmax.f32 %v879_v29, 1e-16  ;;  %v1423_v39 = vsel %vm12799_vm11, %v7477_v47, %v7475_v13 }
 0x133   : > { %13064 = vst [vmem:[#allocation172_spill] sm:$0xff] %v7635_v37  ;;  %v7637_v58 = vpop.permute.xlu1 %5681  ;;  %6292 = vrsqrt.f32 %v881_v11  ;;  %v1424_v29 = vsel %vm12799_vm11, %v7481_v57, %v7479_v3 }
 0x134   : > { %13065 = vst [vmem:[#allocation173_spill] sm:$0xff] %v7637_v58  ;;  %6294 = vrsqrt.f32 %v882_v33  ;;  %v884_v11 = vmax.f32 %v878_v22, 1e-16  ;;  %v1440_v33 = vmax.f32 %v1434_v7, 1e-16 }
 0x135   : > { %6296 = vrsqrt.f32 %v883_v45  ;;  %v1436_v45 = vmul.f32 %v7479_v3, %v7639_v23 }
 0x136   : > { %v1724_v10 = vpop.permute.xlu0 %1723 }
 0x137   : > { %v1732_v25 = vmul.f32 %v1724_v10, %v13063_v31  ;;  %v1733_v48 = vmul.f32 %v1724_v10, %v7160_v43  ;;  %v1722_v59 = vpop.permute.xlu1 %1721  ;;  %v1433_v10 = vmul.f32 %v1423_v39, %v13063_v31  ;;  %v1442_v22 = vmax.f32 %v1436_v45, 1e-16 }
 0x138   : > { %v1730_v37 = vmul.f32 %v1722_v59, %v7605_v61  ;;  %v1731_v53 = vmul.f32 %v1722_v59, %v7609_v9  ;;  %v1432_v59 = vmul.f32 %v7471_v54, %v7609_v9 }
 0x139   : > { %v1738_v14 = vmax.f32 %v1732_v25, 1e-16  ;;  %v1739_v41 = vmax.f32 %v1733_v48, 1e-16 }
 0x13a   : > { %v1736_v1 = vmax.f32 %v1730_v37, 1e-16  ;;  %v1737_v6 = vmax.f32 %v1731_v53, 1e-16  ;;  %v1422_v37 = vsel %vm12799_vm11, %v7473_v18, %v7471_v54  ;;  %v1438_v48 = vmax.f32 %v1432_v59, 1e-16 }
 0x13b   : > { %6298 = vrsqrt.f32 %v1738_v14  ;;  %v1726_v25 = vpop.permute.xlu1 %1725  ;;  %v1431_v47 = vmul.f32 %v1422_v37, %v7605_v61  ;;  %v1439_v54 = vmax.f32 %v1433_v10, 1e-16  ;;  %v1435_v14 = vmul.f32 %v1424_v29, %v7641_v17 }
 0x13c   : > { %6300 = vrsqrt.f32 %v1739_v41  ;;  %v1735_v13 = vmul.f32 %v1726_v25, %v7639_v23  ;;  %v1734_v39 = vmul.f32 %v1726_v25, %v7641_v17 }
 0x13d   : > { %6302 = vrsqrt.f32 %v1736_v1  ;;  %v1441_v57 = vmax.f32 %v1435_v14, 1e-16 }
 0x13e   : > { %6304 = vrsqrt.f32 %v1737_v6  ;;  %v1741_v1 = vmax.f32 %v1735_v13, 1e-16  ;;  %v1740_v13 = vmax.f32 %v1734_v39, 1e-16 }
 0x13f   : > { %6306 = vrsqrt.f32 %v885_v27  ;;  %v6291_v53 = vpop.eup %6290  ;;  %v1437_v27 = vmax.f32 %v1431_v47, 1e-16 }
 0x140   : > { %6308 = vrsqrt.f32 %v884_v11  ;;  %v6293_v18 = vpop.eup %6292  ;;  %v898_v10 = vrot.slane %v6291_v53, 1 }
 0x141   : > { %6310 = vrsqrt.f32 %v1440_v33  ;;  %v6295_v41 = vpop.eup %6294  ;;  %v901_v37 = vrot.slane %v6293_v18, 1 }
 0x142   : > { %6312 = vrsqrt.f32 %v1438_v48  ;;  %v6297_v6 = vpop.eup %6296  ;;  %v899_v48 = vrot.slane %v6295_v41, 1 }
 0x143   : > { %6314 = vrsqrt.f32 %v1442_v22  ;;  %v902_v33 = vrot.slane %v6297_v6, 1 }
 0x144   : > { %6316 = vrsqrt.f32 %v1439_v54  ;;  %v900_v25 = vsel %vm637_vm2, %v898_v10, %v899_v48 }
 0x145   : > { %6318 = vrsqrt.f32 %v1741_v1  ;;  %v903_v47 = vsel %vm637_vm2, %v901_v37, %v902_v33 }
 0x146   : > { %6320 = vrsqrt.f32 %v1437_v27 }
 0x147   : > { %6322 = vrsqrt.f32 %v1441_v57 }
 0x148   : > { %v6299_v7 = vpop.eup %6298  ;;  %6324 = vrsqrt.f32 %v1740_v13 }
 0x149   : > { %v6301_v11 = vpop.eup %6300  ;;  %1758 = vrot.lane.b32.xlu0 %v6299_v7, %s6510_s12 }
 0x14a   : > { %v6303_v3 = vpop.eup %6302  ;;  %1760 = vrot.lane.b32.xlu1 %v6301_v11, %s6510_s12 }
 0x14b   : > { %v6305_v59 = vpop.eup %6304 }
 0x14c   : > { %v6307_v45 = vpop.eup %6306 }
 0x14d   : > { %1754 = vrot.lane.b32.xlu0 %v6303_v3, %s6510_s12  ;;  %v6309_v29 = vpop.eup %6308  ;;  %v906_v22 = vrot.slane %v6307_v45, 1 }
 0x14e   : > { %1756 = vrot.lane.b32.xlu1 %v6305_v59, %s6510_s12  ;;  %v6311_v54 = vpop.eup %6310  ;;  %v904_v18 = vrot.slane %v6309_v29, 1 }
 0x14f   : > { %v6313_v14 = vpop.eup %6312  ;;  %v907_v53 = vsel %vm637_vm2, %v902_v33, %v906_v22  ;;  %v1459_v41 = vrot.slane %v6311_v54, 1  ;;  %v13071_v54 = vld [vmem:[#allocation93_spill] sm:$0xff] }
 0x150   : > { %v6315_v1 = vpop.eup %6314  ;;  %v905_v6 = vsel %vm637_vm2, %v899_v48, %v904_v18  ;;  %v1458_v7 = vrot.slane %v6313_v14, 1  ;;  %v13073_v14 = vld [vmem:[#allocation90_spill] sm:$0xff] }
 0x151   : > { %910 = vrot.lane.b32.xlu0 %v903_v47, %s6510_s12  ;;  %v6317_v27 = vpop.eup %6316  ;;  %v1463_v59 = vrot.slane %v6315_v1, 1  ;;  %v13070_v47 = vld [vmem:[#allocation94_spill] sm:$0xff] }
 0x152   : > { %908 = vrot.lane.b32.xlu1 %v900_v25, %s6510_s12  ;;  %v6319_v11 = vpop.eup %6318  ;;  %v1460_v3 = vsel %vm637_vm2, %v1458_v7, %v1459_v41  ;;  %v1456_v39 = vrot.slane %v6317_v27, 1  ;;  %v13076_v7 = vld [vmem:[#allocation148_spill] sm:$0xff] }
 0x153   : > { %v6321_v57 = vpop.eup %6320  ;;  %v1464_v45 = vsel %vm637_vm2, %v1459_v41, %v1463_v59  ;;  %v13074_v41 = vld [vmem:[#allocation91_spill] sm:$0xff]  ;;  %v13078_v59 = vld [vmem:[#allocation98_spill] sm:$0xff] }
 0x154   : > { %v6323_v37 = vpop.eup %6322  ;;  %v1455_v33 = vrot.slane %v6321_v57, 1  ;;  %v2140_v1 = vsel %vm2077_vm14, %v13074_v41, 0.0  ;;  %v13077_v57 = vld [vmem:[#allocation149_spill] sm:$0xff] }
 0x155   : > { %914 = vrot.lane.b32.xlu0 %v907_v53, %s6510_s12  ;;  %v1461_v48 = vrot.slane %v6323_v37, 1  ;;  %v6325_v29 = vpop.eup %6324  ;;  %v2139_v53 = vsel %vm2077_vm14, %v13073_v14, 0.0 }
 0x156   : > { %912 = vrot.lane.b32.xlu1 %v905_v6, %s6510_s12  ;;  %v1457_v10 = vsel %vm637_vm2, %v1455_v33, %v1456_v39  ;;  %v13075_v6 = vld [vmem:[#allocation79_spill] sm:$0xff]  ;;  %v2141_v37 = vadd.f32 %v2140_v1, %v2139_v53  ;;  %v13079_v33 = vld [vmem:[#allocation96_spill] sm:$0xff]  ;;  %v13083_v53 = vld [vmem:[#allocation106_spill] sm:$0xff]  ;;  %v2120_v1 = vsel %vm2015_vm12, %v6968_v62, 0.0 }
 0x157   : > { %v1462_v13 = vsel %vm637_vm2, %v1456_v39, %v1461_v48  ;;  %v2129_v27 = vsel %vm2031_vm13, %v13075_v6, 0.0  ;;  %v2142_v48 = vsel %vm2077_vm14, %v7291_v26, 0.0 }
 0x159   : > { %1467 = vrot.lane.b32.xlu0 %v1460_v3, %s6511_s13  ;;  %v2155_v3 = vsel %vm2093_vm15, %v13077_v57, 0.0 }
 0x15a   : > { %1764 = vrot.lane.b32.xlu1 %v6319_v11, %s6510_s12  ;;  %v2154_v11 = vsel %vm2093_vm15, %v13076_v7, 0.0 }
 0x15d   : > { %1471 = vrot.lane.b32.xlu0 %v1464_v45, %s6511_s13  ;;  %v2116_v45 = vsel %vm2015_vm12, %v6953_v32, 0.0 }
 0x15e   : > { %1465 = vrot.lane.b32.xlu1 %v1457_v10, %s6511_s13 }
 0x161   : > { %1762 = vrot.lane.b32.xlu0 %v6325_v29, %s6510_s12  ;;  %v2156_v29 = vadd.f32 %v2155_v3, %v2154_v11  ;;  %v2146_v11 = vsel %vm2077_vm14, %v7339_v56, 0.0 }
 0x162   : > { %1469 = vrot.lane.b32.xlu1 %v1462_v13, %s6511_s13  ;;  %v2131_v13 = vsel %vm2031_vm13, %v7075_v21, 0.0 }
 0x165   : > { %5691 = vrot.lane.b32.xlu0 %v7195_v49, %s6511_s13  ;;  %v2110_v49 = vsel %vm2015_vm12, %v6915_v30, 0.0 }
 0x166   : > { %5696 = vrot.lane.b32.xlu1 %v7190_v46, %s6511_s13  ;;  %v2109_v46 = vsel %vm2015_vm12, %v6911_v52, 0.0 }
 0x169   : > { %5701 = vrot.lane.b32.xlu0 %v7207_v44, %s6511_s13  ;;  %v2125_v44 = vsel %vm2031_vm13, %v13034_v60, 0.0 }
 0x16a   : > { %5706 = vrot.lane.b32.xlu1 %v7201_v50, %s6511_s13  ;;  %v2124_v50 = vsel %vm2031_vm13, %v13033_v4, 0.0 }
 0x16d   : > { %5711 = vrot.lane.b32.xlu0 %v7219_v16, %s6511_s13  ;;  %v13068_v16 = vld [vmem:[#allocation88_spill] sm:$0xff] }
 0x16e   : > { %5716 = vrot.lane.b32.xlu1 %v7213_v38, %s6511_s13  ;;  %v2111_v38 = vadd.f32 %v2110_v49, %v2109_v46  ;;  %v2157_v46 = vsel %vm2093_vm15, %v7529_v34, 0.0  ;;  %v13080_v49 = vld [vmem:[#allocation102_spill] sm:$0xff] }
 0x171   : > { %5721 = vrot.lane.b32.xlu0 %v7231_v51, %s6511_s13  ;;  %v2126_v51 = vadd.f32 %v2125_v44, %v2124_v50  ;;  %v2143_v44 = vadd.f32 %v2142_v48, %v2141_v37  ;;  %v13084_v37 = vld [vmem:[#allocation111_spill] sm:$0xff]  ;;  %v2122_v48 = vsel %vm2015_vm12, %v6986_v5, 0.0 }
 0x172   : > { %5726 = vrot.lane.b32.xlu1 %v7225_v35, %s6511_s13  ;;  %v2112_v35 = vsel %vm2015_vm12, %v6925_v20, 0.0 }
 0x173   : > { %v2113_v22 = vadd.f32 %v2112_v35, %v2111_v38  ;;  %v13081_v38 = vld [vmem:[#allocation101_spill] sm:$0xff] }
 0x175   : > { %5731 = vrot.lane.b32.xlu0 %v7245_v15, %s6511_s13 }
 0x176   : > { %5736 = vrot.lane.b32.xlu1 %v7237_v24, %s6511_s13  ;;  %v13069_v24 = vld [vmem:[#allocation78_spill] sm:$0xff] }
 0x177   : > { %v2127_v15 = vsel %vm2031_vm13, %v13069_v24, 0.0 }
 0x178   : > { %v2128_v18 = vadd.f32 %v2127_v15, %v2126_v51  ;;  %v2144_v51 = vsel %vm2077_vm14, %v7317_v0, 0.0  ;;  %v2158_v15 = vadd.f32 %v2157_v46, %v2156_v29 }
 0x179   : > { %5741 = vrot.lane.b32.xlu0 %v7257_v63, %s6511_s13  ;;  %v13072_v63 = vld [vmem:[#allocation69_spill] sm:$0xff] }
 0x17a   : > { %5746 = vrot.lane.b32.xlu1 %v13068_v16, %s6511_s13  ;;  %v2114_v25 = vsel %vm2015_vm12, %v13072_v63, 0.0  ;;  %v2130_v10 = vadd.f32 %v2129_v27, %v2128_v18  ;;  %v2118_v16 = vsel %vm2015_vm12, %v12987_v55, 0.0  ;;  %v2145_v18 = vadd.f32 %v2144_v51, %v2143_v44  ;;  %v13086_v44 = vld [vmem:[#allocation115_spill] sm:$0xff] }
 0x17b   : > { %v2115_v39 = vadd.f32 %v2114_v25, %v2113_v22  ;;  %v2159_v22 = vsel %vm2093_vm15, %v7549_v36, 0.0 }
 0x17c   : > { %v2132_v35 = vadd.f32 %v2131_v13, %v2130_v10  ;;  %v2160_v3 = vadd.f32 %v2159_v22, %v2158_v15  ;;  %v13085_v10 = vld [vmem:[#allocation109_spill] sm:$0xff]  ;;  %v2148_v13 = vsel %vm2077_vm14, %v7361_v12, 0.0 }
 0x17d   : > { %5751 = vrot.lane.b32.xlu0 %v13070_v47, %s6511_s13  ;;  %v2117_v50 = vadd.f32 %v2116_v45, %v2115_v39  ;;  %v2133_v47 = vsel %vm2031_vm13, %v7091_v42, 0.0  ;;  %v2161_v39 = vsel %vm2093_vm15, %v7565_v8, 0.0  ;;  %v2147_v45 = vadd.f32 %v2146_v11, %v2145_v18  ;;  %v13088_v15 = vld [vmem:[#allocation113_spill] sm:$0xff] }
 0x17e   : > { %5756 = vrot.lane.b32.xlu1 %v13071_v54, %s6511_s13  ;;  %v13082_v54 = vld [vmem:[#allocation107_spill] sm:$0xff]  ;;  %v2134_v27 = vadd.f32 %v2133_v47, %v2132_v35  ;;  %v2162_v46 = vadd.f32 %v2161_v39, %v2160_v3  ;;  %v13087_v35 = vld [vmem:[#allocation114_spill] sm:$0xff]  ;;  %v2150_v47 = vsel %vm2077_vm14, %v13088_v15, 0.0  ;;  %v13092_v39 = vld [vmem:[#allocation85_spill] sm:$0xff] }
 0x17f   : > { %v2119_v25 = vadd.f32 %v2118_v16, %v2117_v50  ;;  %v2163_v50 = vsel %vm2093_vm15, %v7581_v19, 0.0  ;;  %v2149_v16 = vadd.f32 %v2148_v13, %v2147_v45  ;;  %v13091_v3 = vld [vmem:[#allocation86_spill] sm:$0xff] }
 0x180   : > { %v2164_v22 = vadd.f32 %v2163_v50, %v2162_v46 }
 0x181   : > { %5761 = vrot.lane.b32.xlu0 %v13078_v59, %s6511_s13  ;;  %v2135_v59 = vsel %vm2031_vm13, %v7106_v2, 0.0  ;;  %v2151_v18 = vadd.f32 %v2150_v47, %v2149_v16  ;;  %v13179_v2 = vld [vmem:[#allocation27_spill] sm:$0xff] }
 0x182   : > { %5766 = vrot.lane.b32.xlu1 %v13079_v33, %s6511_s13  ;;  %v2121_v33 = vadd.f32 %v2120_v1, %v2119_v25  ;;  %v2136_v29 = vadd.f32 %v2135_v59, %v2134_v27  ;;  %v13090_v27 = vld [vmem:[#allocation169_spill] sm:$0xff] }
 0x183   : > { %v2167_v11 = vsel %vm2093_vm15, %v13090_v27, 0.0 }
 0x185   : > { %5771 = vrot.lane.b32.xlu0 %v13080_v49, %s6511_s13  ;;  %v2137_v49 = vsel %vm2031_vm13, %v7133_v28, 0.0 }
 0x186   : > { %5776 = vrot.lane.b32.xlu1 %v13081_v38, %s6511_s13  ;;  %v2123_v38 = vadd.f32 %v2122_v48, %v2121_v33  ;;  %v2138_v51 = vadd.f32 %v2137_v49, %v2136_v29 }
 0x189   : > { %5781 = vrot.lane.b32.xlu0 %v13082_v54, %s6511_s13  ;;  %v13089_v54 = vld [vmem:[#allocation164_spill] sm:$0xff] }
 0x18a   : > { %5786 = vrot.lane.b32.xlu1 %v13083_v53, %s6511_s13  ;;  %v2165_v25 = vsel %vm2093_vm15, %v13089_v54, 0.0  ;;  %v2152_v53 = vsel %vm2077_vm14, %v7407_v40, 0.0  ;;  %v13177_v54 = vld [vmem:[#allocation25_spill] sm:$0xff] }
 0x18b   : > { %v2166_v1 = vadd.f32 %v2165_v25, %v2164_v22  ;;  %v2153_v59 = vadd.f32 %v2152_v53, %v2151_v18  ;;  %v2279_v28 = vrot.slane %v13177_v54, 7 }
 0x18d   : > { %5791 = vrot.lane.b32.xlu0 %v13084_v37, %s6511_s13  ;;  %v2168_v37 = vadd.f32 %v2167_v11, %v2166_v1 }
 0x18e   : > { %5796 = vrot.lane.b32.xlu1 %v13085_v10, %s6511_s13 }
 0x191   : > { %5801 = vrot.lane.b32.xlu0 %v13086_v44, %s6511_s13 }
 0x192   : > { %5806 = vrot.lane.b32.xlu1 %v13087_v35, %s6511_s13 }
 0x195   : > { %2173 = vrot.lane.b32.xlu0 %v2123_v38, %s6510_s12 }
 0x196   : > { %2175 = vrot.lane.b32.xlu1 %v2138_v51, %s6510_s12 }
 0x199   : > { %2177 = vrot.lane.b32.xlu0 %v13091_v3, %s6510_s12 }
 0x19a   : > { %2179 = vrot.lane.b32.xlu1 %v13092_v39, %s6510_s12 }
 0x19d   : > { %2181 = vrot.lane.b32.xlu0 %v2153_v59, %s6510_s12 }
 0x19e   : > { %2183 = vrot.lane.b32.xlu1 %v2168_v37, %s6510_s12 }
 0x1bb   : > { %v7813_v33 = vpop.permute.xlu0 %1758 }
 0x1bc   : > { %13093 = vst [vmem:[#allocation88_spill] sm:$0xff] %v7813_v33  ;;  %v7815_v45 = vpop.permute.xlu1 %1760 }
 0x1bd   : > { %13094 = vst [vmem:[#allocation94_spill] sm:$0xff] %v7815_v45 }
 0x1bf   : > { %v7817_v10 = vpop.permute.xlu0 %1754 }
 0x1c0   : > { %13095 = vst [vmem:[#allocation93_spill] sm:$0xff] %v7817_v10  ;;  %v7819_v48 = vpop.permute.xlu1 %1756 }
 0x1c1   : > { %13096 = vst [vmem:[#allocation98_spill] sm:$0xff] %v7819_v48 }
 0x1c3   : > { %v7821_v29 = vpop.permute.xlu0 %910 }
 0x1c4   : > { %13097 = vst [vmem:[#allocation96_spill] sm:$0xff] %v7821_v29  ;;  %v7823_v13 = vpop.permute.xlu1 %908 }
 0x1c5   : > { %13098 = vst [vmem:[#allocation102_spill] sm:$0xff] %v7823_v13 }
 0x1c7   : > { %v7825_v46 = vpop.permute.xlu0 %914 }
 0x1c8   : > { %13099 = vst [vmem:[#allocation101_spill] sm:$0xff] %v7825_v46  ;;  %v7827_v49 = vpop.permute.xlu1 %912 }
 0x1c9   : > { %13100 = vst [vmem:[#allocation107_spill] sm:$0xff] %v7827_v49 }
 0x1cb   : > { %v7829_v50 = vpop.permute.xlu0 %1467 }
 0x1cc   : > { %13101 = vst [vmem:[#allocation106_spill] sm:$0xff] %v7829_v50  ;;  %v7831_v44 = vpop.permute.xlu1 %1764 }
 0x1cd   : > { %13102 = vst [vmem:[#allocation111_spill] sm:$0xff] %v7831_v44 }
 0x1cf   : > { %v7833_v38 = vpop.permute.xlu0 %1471 }
 0x1d0   : > { %13103 = vst [vmem:[#allocation109_spill] sm:$0xff] %v7833_v38  ;;  %v7835_v16 = vpop.permute.xlu1 %1465 }
 0x1d1   : > { %13104 = vst [vmem:[#allocation115_spill] sm:$0xff] %v7835_v16  ;;  %v13147_v16 = vld [vmem:[#allocation8_spill] sm:$0xff] }
 0x1d2   : > { %v2257_v50 = vrot.slane %v13147_v16, 7 }
 0x1d3   : > { %v7837_v35 = vpop.permute.xlu0 %1762 }
 0x1d4   : > { %13105 = vst [vmem:[#allocation114_spill] sm:$0xff] %v7837_v35  ;;  %v7839_v51 = vpop.permute.xlu1 %1469 }
 0x1d5   : > { %13106 = vst [vmem:[#allocation176_spill] sm:$0xff] %v7839_v51 }
 0x1d7   : > { %v7841_v47 = vpop.permute.xlu0 %5691 }
 0x1d8   : > { %13107 = vst [vmem:[#allocation177_spill] sm:$0xff] %v7841_v47  ;;  %v7843_v22 = vpop.permute.xlu1 %5696 }
 0x1d9   : > { %13108 = vst [vmem:[#allocation178_spill] sm:$0xff] %v7843_v22 }
 0x1db   : > { %v7845_v25 = vpop.permute.xlu0 %5701 }
 0x1dc   : > { %13109 = vst [vmem:[#allocation179_spill] sm:$0xff] %v7845_v25  ;;  %v7847_v18 = vpop.permute.xlu1 %5706  ;;  %v13140_v25 = vld [vmem:[#allocation17_spill] sm:$0xff] }
 0x1dd   : > { %13110 = vst [vmem:[#allocation180_spill] sm:$0xff] %v7847_v18  ;;  %v13143_v18 = vld [vmem:[#allocation6_spill] sm:$0xff] }
 0x1de   : > { %v7930_v22 = vrot.slane %v13143_v18, 7 }
 0x1df   : > { %v7849_v53 = vpop.permute.xlu0 %5711 }
 0x1e0   : > { %13111 = vst [vmem:[#allocation181_spill] sm:$0xff] %v7849_v53  ;;  %v7851_v1 = vpop.permute.xlu1 %5716  ;;  %v2253_v53 = vrot.slane %v13140_v25, 7  ;;  %13144 = vst [vmem:[#allocation207_spill] sm:$0xff] %v7930_v22 }
 0x1e1   : > { %13112 = vst [vmem:[#allocation182_spill] sm:$0xff] %v7851_v1 }
 0x1e3   : > { %v7853_v11 = vpop.permute.xlu0 %5721 }
 0x1e4   : > { %13113 = vst [vmem:[#allocation183_spill] sm:$0xff] %v7853_v11  ;;  %v7855_v59 = vpop.permute.xlu1 %5726 }
 0x1e5   : > { %13114 = vst [vmem:[#allocation184_spill] sm:$0xff] %v7855_v59 }
 0x1e7   : > { %v7857_v37 = vpop.permute.xlu0 %5731 }
 0x1e8   : > { %13115 = vst [vmem:[#allocation185_spill] sm:$0xff] %v7857_v37  ;;  %v7859_v49 = vpop.permute.xlu1 %5736 }
 0x1e9   : > { %13116 = vst [vmem:[#allocation186_spill] sm:$0xff] %v7859_v49 }
 0x1eb   : > { %v7861_v46 = vpop.permute.xlu0 %5741 }
 0x1ec   : > { %13117 = vst [vmem:[#allocation187_spill] sm:$0xff] %v7861_v46  ;;  %v7863_v35 = vpop.permute.xlu1 %5746 }
 0x1ed   : > { %13118 = vst [vmem:[#allocation188_spill] sm:$0xff] %v7863_v35 }
 0x1ef   : > { %v7865_v44 = vpop.permute.xlu0 %5751 }
 0x1f0   : > { %13119 = vst [vmem:[#allocation189_spill] sm:$0xff] %v7865_v44  ;;  %v7867_v13 = vpop.permute.xlu1 %5756 }
 0x1f1   : > { %13120 = vst [vmem:[#allocation190_spill] sm:$0xff] %v7867_v13 }
 0x1f3   : > { %v7869_v29 = vpop.permute.xlu0 %5761 }
 0x1f4   : > { %13121 = vst [vmem:[#allocation191_spill] sm:$0xff] %v7869_v29  ;;  %v7871_v10 = vpop.permute.xlu1 %5766 }
 0x1f5   : > { %13122 = vst [vmem:[#allocation192_spill] sm:$0xff] %v7871_v10 }
 0x1f7   : > { %v7873_v48 = vpop.permute.xlu0 %5771 }
 0x1f8   : > { %13123 = vst [vmem:[#allocation193_spill] sm:$0xff] %v7873_v48  ;;  %v7875_v33 = vpop.permute.xlu1 %5776 }
 0x1f9   : > { %13124 = vst [vmem:[#allocation194_spill] sm:$0xff] %v7875_v33 }
 0x1fb   : > { %v7877_v45 = vpop.permute.xlu0 %5781 }
 0x1fc   : > { %13125 = vst [vmem:[#allocation195_spill] sm:$0xff] %v7877_v45  ;;  %v7879_v58 = vpop.permute.xlu1 %5786 }
 0x1fd   : > { %13126 = vst [vmem:[#allocation196_spill] sm:$0xff] %v7879_v58 }
 0x1ff   : > { %v7881_v49 = vpop.permute.xlu0 %5791 }
 0x200   : > { %13127 = vst [vmem:[#allocation197_spill] sm:$0xff] %v7881_v49  ;;  %v7883_v46 = vpop.permute.xlu1 %5796 }
 0x201   : > { %13128 = vst [vmem:[#allocation198_spill] sm:$0xff] %v7883_v46 }
 0x203   : > { %v7885_v35 = vpop.permute.xlu0 %5801 }
 0x204   : > { %13129 = vst [vmem:[#allocation199_spill] sm:$0xff] %v7885_v35  ;;  %v7887_v44 = vpop.permute.xlu1 %5806 }
 0x205   : > { %13130 = vst [vmem:[#allocation200_spill] sm:$0xff] %v7887_v44 }
 0x207   : > { %v2174_v13 = vpop.permute.xlu0 %2173 }
 0x208   : > { %v2176_v29 = vpop.permute.xlu1 %2175 }
 0x209   : > { %v2185_v10 = vsel %vm12799_vm11, %v2174_v13, %v2176_v29  ;;  %v2195_v33 = vmul.f32 %v2176_v29, %v7609_v9 }
 0x20a   : > { %v2194_v48 = vmul.f32 %v2185_v10, %v7605_v61 }
 0x20b   : > { %v2178_v37 = vpop.permute.xlu0 %2177  ;;  %v2201_v59 = vmax.f32 %v2195_v33, 1e-16 }
 0x20c   : > { %v2200_v45 = vmax.f32 %v2194_v48, 1e-16  ;;  %v2180_v58 = vpop.permute.xlu1 %2179 }
 0x20d   : > { %v2186_v49 = vsel %vm12799_vm11, %v2178_v37, %v2180_v58  ;;  %v2197_v46 = vmul.f32 %v2180_v58, %v7160_v43 }
 0x20e   : > { %6326 = vrsqrt.f32 %v2200_v45  ;;  %v2196_v35 = vmul.f32 %v2186_v49, %v13063_v31 }
 0x20f   : > { %6328 = vrsqrt.f32 %v2201_v59  ;;  %v2203_v44 = vmax.f32 %v2197_v46, 1e-16  ;;  %v2182_v11 = vpop.permute.xlu0 %2181  ;;  %v13131_v46 = vld [vmem:[#allocation10_spill] sm:$0xff] }
 0x210   : > { %v2202_v1 = vmax.f32 %v2196_v35, 1e-16  ;;  %v2184_v13 = vpop.permute.xlu1 %2183  ;;  %v7900_v49 = vrot.slane %v13131_v46, 7  ;;  %v13133_v35 = vld [vmem:[#allocation11_spill] sm:$0xff] }
 0x211   : > { %6330 = vrsqrt.f32 %v2203_v44  ;;  %v2187_v10 = vsel %vm12799_vm11, %v2182_v11, %v2184_v13  ;;  %v2199_v29 = vmul.f32 %v2184_v13, %v7639_v23  ;;  %v7903_v44 = vrot.slane %v13133_v35, 7  ;;  %v13135_v11 = vld [vmem:[#allocation12_spill] sm:$0xff]  ;;  %v13136_v13 = vld [vmem:[#allocation13_spill] sm:$0xff] }
 0x212   : > { %6332 = vrsqrt.f32 %v2202_v1  ;;  %v2198_v33 = vmul.f32 %v2187_v10, %v7641_v17  ;;  %13132 = vst [vmem:[#allocation201_spill] sm:$0xff] %v7900_v49  ;;  %v2247_v59 = vrot.slane %v13135_v11, 7  ;;  %v2249_v1 = vrot.slane %v13136_v13, 7 }
 0x213   : > { %v2205_v48 = vmax.f32 %v2199_v29, 1e-16  ;;  %13134 = vst [vmem:[#allocation202_spill] sm:$0xff] %v7903_v44 }
 0x214   : > { %v2204_v37 = vmax.f32 %v2198_v33, 1e-16  ;;  %v7911_v33 = vsel %vm861_vm3, %v7900_v49, %v2247_v59 }
 0x215   : > { %6334 = vrsqrt.f32 %v2205_v48  ;;  %13137 = vst [vmem:[#allocation203_spill] sm:$0xff] %v7911_v33  ;;  %v7915_v48 = vsel %vm861_vm3, %v7903_v44, %v2249_v1 }
 0x216   : > { %6336 = vrsqrt.f32 %v2204_v37  ;;  %13138 = vst [vmem:[#allocation204_spill] sm:$0xff] %v7915_v48  ;;  %v13139_v37 = vld [vmem:[#allocation16_spill] sm:$0xff]  ;;  %v7922_v38 = vpack.i.bf16 %v7915_v48, %v7911_v33  ;;  %v13152_v33 = vld [vmem:[#allocation15_spill] sm:$0xff] }
 0x217   : > { %v2263_v39 = vrot.slane %v13152_v33, 7 }
 0x218   : > { %13141 = vst [vmem:[#allocation205_spill] sm:$0xff] %v7922_v38 }
 0x21b   : > { %v6327_v58 = vpop.eup %6326 }
 0x21c   : > { %v6329_v45 = vpop.eup %6328  ;;  %2218 = vrot.lane.b32.xlu0 %v6327_v58, %s6511_s13  ;;  %v2251_v58 = vrot.slane %v13139_v37, 7  ;;  %v13148_v37 = vld [vmem:[#allocation9_spill] sm:$0xff] }
 0x21d   : > { %2220 = vrot.lane.b32.xlu1 %v6329_v45, %s6511_s13  ;;  %v2259_v25 = vrot.slane %v13148_v37, 7 }
 0x21e   : > { %v6331_v10 = vpop.eup %6330  ;;  %v7939_v48 = vsel %vm861_vm3, %v2247_v59, %v2251_v58 }
 0x21f   : > { %v6333_v29 = vpop.eup %6332  ;;  %13149 = vst [vmem:[#allocation209_spill] sm:$0xff] %v7939_v48  ;;  %v7962_v59 = vsel %vm861_vm3, %v2259_v25, %v2263_v39 }
 0x220   : > { %2222 = vrot.lane.b32.xlu0 %v6333_v29, %s6511_s13  ;;  %v7926_v29 = vpack.i.bf16 %v7903_v44, %v7900_v49  ;;  %v7942_v44 = vsel %vm861_vm3, %v2249_v1, %v2253_v53  ;;  %v13151_v49 = vld [vmem:[#allocation14_spill] sm:$0xff]  ;;  %13156 = vst [vmem:[#allocation214_spill] sm:$0xff] %v7962_v59  ;;  %v7966_v1 = vsel %vm861_vm3, %v7930_v22, %v2257_v50 }
 0x221   : > { %2224 = vrot.lane.b32.xlu1 %v6331_v10, %s6511_s13  ;;  %v13145_v10 = vld [vmem:[#allocation7_spill] sm:$0xff]  ;;  %13150 = vst [vmem:[#allocation210_spill] sm:$0xff] %v7942_v44  ;;  %13157 = vst [vmem:[#allocation215_spill] sm:$0xff] %v7966_v1 }
 0x222   : > { %v6335_v51 = vpop.eup %6334  ;;  %13142 = vst [vmem:[#allocation206_spill] sm:$0xff] %v7926_v29  ;;  %v7933_v47 = vrot.slane %v13145_v10, 7 }
 0x223   : > { %v6337_v45 = vpop.eup %6336 }
 0x224   : > { %2226 = vrot.lane.b32.xlu0 %v6337_v45, %s6511_s13  ;;  %13146 = vst [vmem:[#allocation208_spill] sm:$0xff] %v7933_v47  ;;  %v2261_v45 = vrot.slane %v13151_v49, 7  ;;  %v7950_v3 = vpack.i.bf16 %v7933_v47, %v7930_v22  ;;  %v7970_v58 = vsel %vm861_vm3, %v7933_v47, %v2259_v25  ;;  %v13159_v49 = vld [vmem:[#allocation22_spill] sm:$0xff]  ;;  %v13167_v25 = vld [vmem:[#allocation20_spill] sm:$0xff]  ;;  %v13168_v47 = vld [vmem:[#allocation21_spill] sm:$0xff] }
 0x225   : > { %2228 = vrot.lane.b32.xlu1 %v6335_v51, %s6511_s13  ;;  %v7954_v51 = vpack.i.bf16 %v7942_v44, %v7939_v48  ;;  %13158 = vst [vmem:[#allocation216_spill] sm:$0xff] %v7970_v58  ;;  %v7973_v33 = vrot.slane %v13159_v49, 7  ;;  %v13161_v48 = vld [vmem:[#allocation23_spill] sm:$0xff]  ;;  %v7984_v39 = vpack.i.bf16 %v7970_v58, %v7966_v1  ;;  %v2271_v22 = vrot.slane %v13167_v25, 7  ;;  %v13172_v1 = vld [vmem:[#allocation28_spill] sm:$0xff]  ;;  %v13178_v49 = vld [vmem:[#allocation26_spill] sm:$0xff] }
 0x226   : > { %13153 = vst [vmem:[#allocation211_spill] sm:$0xff] %v7950_v3  ;;  %v7959_v53 = vsel %vm861_vm3, %v2257_v50, %v2261_v45  ;;  %v7976_v44 = vrot.slane %v13161_v48, 7  ;;  %v2273_v48 = vrot.slane %v13168_v47, 7  ;;  %v13176_v25 = vld [vmem:[#allocation24_spill] sm:$0xff]  ;;  %v2281_v19 = vrot.slane %v13178_v49, 7 }
 0x227   : > { %13154 = vst [vmem:[#allocation212_spill] sm:$0xff] %v7954_v51  ;;  %13155 = vst [vmem:[#allocation213_spill] sm:$0xff] %v7959_v53  ;;  %v7990_v50 = vpack.i.bf16 %v7962_v59, %v7959_v53  ;;  %v13174_v53 = vld [vmem:[#allocation29_spill] sm:$0xff]  ;;  %v2277_v47 = vrot.slane %v13176_v25, 7  ;;  %v2533_v49 = vsel %vm12635_vm7, %v6915_v30, 0.0 }
 0x228   : > { %5811 = vrot.lane.b32.xlu0 %v7926_v29, %s6510_s12  ;;  %13160 = vst [vmem:[#allocation217_spill] sm:$0xff] %v7973_v33  ;;  %13162 = vst [vmem:[#allocation218_spill] sm:$0xff] %v7976_v44  ;;  %v13164_v29 = vld [vmem:[#allocation19_spill] sm:$0xff]  ;;  %v8004_v58 = vpack.i.bf16 %v7976_v44, %v7973_v33  ;;  %v8010_v59 = vrot.slane %v13174_v53, 7 }
 0x229   : > { %5816 = vrot.lane.b32.xlu1 %v7922_v38, %s6510_s12  ;;  %v13163_v38 = vld [vmem:[#allocation18_spill] sm:$0xff]  ;;  %v2269_v27 = vrot.slane %v13164_v29, 7  ;;  %13165 = vst [vmem:[#allocation219_spill] sm:$0xff] %v7984_v39  ;;  %13166 = vst [vmem:[#allocation220_spill] sm:$0xff] %v7990_v50  ;;  %v13192_v53 = vld [vmem:[#allocation35_spill] sm:$0xff] }
 0x22a   : > { %v2267_v45 = vrot.slane %v13163_v38, 7  ;;  %13171 = vst [vmem:[#allocation223_spill] sm:$0xff] %v8004_v58  ;;  %13175 = vst [vmem:[#allocation225_spill] sm:$0xff] %v8010_v59  ;;  %v2283_v38 = vrot.slane %v13179_v2, 7 }
 0x22b   : > { %v8028_v25 = vsel %vm861_vm3, %v2269_v27, %v2273_v48  ;;  %v8049_v48 = vsel %vm861_vm3, %v2277_v47, %v2281_v19 }
 0x22c   : > { %5821 = vrot.lane.b32.xlu0 %v7954_v51, %s6510_s12  ;;  %v7996_v29 = vsel %vm861_vm3, %v7973_v33, %v2267_v45  ;;  %v8000_v51 = vsel %vm861_vm3, %v7976_v44, %v2269_v27  ;;  %v8025_v33 = vsel %vm861_vm3, %v2267_v45, %v2271_v22  ;;  %13182 = vst [vmem:[#allocation228_spill] sm:$0xff] %v8028_v25  ;;  %v2548_v22 = vsel %vm12628_vm8, %v13074_v41, 0.0 }
 0x22d   : > { %5826 = vrot.lane.b32.xlu1 %v7950_v3, %s6510_s12  ;;  %13169 = vst [vmem:[#allocation221_spill] sm:$0xff] %v7996_v29  ;;  %13170 = vst [vmem:[#allocation222_spill] sm:$0xff] %v8000_v51  ;;  %v8007_v3 = vrot.slane %v13172_v1, 7  ;;  %v8022_v44 = vpack.i.bf16 %v8000_v51, %v7996_v29  ;;  %v2547_v29 = vsel %vm12628_vm8, %v13073_v14, 0.0  ;;  %v8046_v27 = vpack.i.bf16 %v8028_v25, %v8025_v33  ;;  %v13194_v1 = vld [vmem:[#allocation31_spill] sm:$0xff] }
 0x22e   : > { %13181 = vst [vmem:[#allocation227_spill] sm:$0xff] %v8025_v33  ;;  %13185 = vst [vmem:[#allocation231_spill] sm:$0xff] %v8049_v48  ;;  %v8052_v45 = vsel %vm861_vm3, %v2279_v28, %v2283_v38  ;;  %v13191_v33 = vld [vmem:[#allocation30_spill] sm:$0xff]  ;;  %v8069_v38 = vrot.slane %v13192_v53, 7  ;;  %v2289_v8 = vrot.slane %v13194_v1, 7  ;;  %v13206_v53 = vld [vmem:[#allocation36_spill] sm:$0xff] }
 0x22f   : > { %13173 = vst [vmem:[#allocation224_spill] sm:$0xff] %v8007_v3  ;;  %13180 = vst [vmem:[#allocation226_spill] sm:$0xff] %v8022_v44  ;;  %v8036_v2 = vpack.i.bf16 %v8010_v59, %v8007_v3  ;;  %v8056_v51 = vsel %vm861_vm3, %v8007_v3, %v2277_v47  ;;  %v2287_v19 = vrot.slane %v13191_v33, 7  ;;  %v2549_v47 = vadd.f32 %v2548_v22, %v2547_v29 }
 0x230   : > { %5831 = vrot.lane.b32.xlu0 %v7984_v39, %s6510_s12  ;;  %v2532_v39 = vsel %vm12635_vm7, %v6911_v52, 0.0  ;;  %13184 = vst [vmem:[#allocation230_spill] sm:$0xff] %v8046_v27  ;;  %13186 = vst [vmem:[#allocation232_spill] sm:$0xff] %v8052_v45  ;;  %v2535_v3 = vsel %vm12635_vm7, %v6925_v20, 0.0  ;;  %v8088_v29 = vpack.i.bf16 %v8052_v45, %v8049_v48  ;;  %v2537_v48 = vsel %vm12635_vm7, %v13072_v63, 0.0  ;;  %v13204_v45 = vld [vmem:[#allocation41_spill] sm:$0xff] }
 0x231   : > { %5836 = vrot.lane.b32.xlu1 %v7990_v50, %s6510_s12  ;;  %13183 = vst [vmem:[#allocation229_spill] sm:$0xff] %v8036_v2  ;;  %13187 = vst [vmem:[#allocation233_spill] sm:$0xff] %v8056_v51  ;;  %v13189_v50 = vld [vmem:[#allocation34_spill] sm:$0xff]  ;;  %v2534_v54 = vadd.f32 %v2533_v49, %v2532_v39  ;;  %v13196_v49 = vld [vmem:[#allocation32_spill] sm:$0xff] }
 0x232   : > { %v8065_v25 = vrot.slane %v13189_v50, 7  ;;  %13193 = vst [vmem:[#allocation236_spill] sm:$0xff] %v8069_v38  ;;  %v2291_v39 = vrot.slane %v13196_v49, 7  ;;  %13198 = vst [vmem:[#allocation238_spill] sm:$0xff] %v8088_v29  ;;  %v8099_v49 = vsel %vm861_vm3, %v8069_v38, %v2289_v8  ;;  %v2297_v50 = vrot.slane %v13206_v53, 7 }
 0x233   : > { %13202 = vst [vmem:[#allocation241_spill] sm:$0xff] %v8099_v49 }
 0x234   : > { %5841 = vrot.lane.b32.xlu0 %v8004_v58, %s6510_s12  ;;  %v8062_v58 = vsel %vm861_vm3, %v8010_v59, %v2279_v28  ;;  %13190 = vst [vmem:[#allocation235_spill] sm:$0xff] %v8065_v25  ;;  %v13197_v59 = vld [vmem:[#allocation33_spill] sm:$0xff]  ;;  %v8092_v22 = vsel %vm861_vm3, %v8065_v25, %v2287_v19 }
 0x235   : > { %5846 = vrot.lane.b32.xlu1 %v8022_v44, %s6510_s12  ;;  %13188 = vst [vmem:[#allocation234_spill] sm:$0xff] %v8062_v58  ;;  %v2550_v44 = vsel %vm12628_vm8, %v7291_v26, 0.0  ;;  %v8080_v28 = vpack.i.bf16 %v8062_v58, %v8056_v51  ;;  %v2293_v33 = vrot.slane %v13197_v59, 7  ;;  %13199 = vst [vmem:[#allocation239_spill] sm:$0xff] %v8092_v22  ;;  %v2536_v51 = vadd.f32 %v2535_v3, %v2534_v54 }
 0x236   : > { %v8103_v59 = vpack.i.bf16 %v8069_v38, %v8065_v25  ;;  %v2551_v58 = vadd.f32 %v2550_v44, %v2549_v47  ;;  %v2552_v54 = vsel %vm12628_vm8, %v7317_v0, 0.0  ;;  %v8117_v3 = vsel %vm861_vm3, %v2287_v19, %v2291_v39  ;;  %v13210_v47 = vld [vmem:[#allocation38_spill] sm:$0xff]  ;;  %v13211_v25 = vld [vmem:[#allocation39_spill] sm:$0xff] }
 0x237   : > { %13195 = vst [vmem:[#allocation237_spill] sm:$0xff] %v8080_v28  ;;  %13208 = vst [vmem:[#allocation244_spill] sm:$0xff] %v8117_v3  ;;  %v8120_v44 = vsel %vm861_vm3, %v2289_v8, %v2293_v33  ;;  %v2301_v38 = vrot.slane %v13210_v47, 7  ;;  %v2538_v53 = vadd.f32 %v2537_v48, %v2536_v51  ;;  %v2539_v19 = vsel %vm12635_vm7, %v6953_v32, 0.0 }
 0x238   : > { %5851 = vrot.lane.b32.xlu0 %v8046_v27, %s6510_s12  ;;  %v13200_v27 = vld [vmem:[#allocation40_spill] sm:$0xff]  ;;  %13203 = vst [vmem:[#allocation242_spill] sm:$0xff] %v8103_v59  ;;  %13209 = vst [vmem:[#allocation245_spill] sm:$0xff] %v8120_v44  ;;  %v2553_v36 = vadd.f32 %v2552_v54, %v2551_v58  ;;  %v8138_v33 = vpack.i.bf16 %v8120_v44, %v8117_v3  ;;  %v2554_v47 = vsel %vm12628_vm8, %v7339_v56, 0.0  ;;  %v13219_v54 = vld [vmem:[#allocation49_spill] sm:$0xff] }
 0x239   : > { %5856 = vrot.lane.b32.xlu1 %v8036_v2, %s6510_s12  ;;  %v8095_v1 = vrot.slane %v13200_v27, 7  ;;  %v8108_v2 = vrot.slane %v13204_v45, 7  ;;  %v13207_v27 = vld [vmem:[#allocation37_spill] sm:$0xff]  ;;  %v2303_v45 = vrot.slane %v13211_v25, 7  ;;  %v8149_v51 = vsel %vm861_vm3, %v2297_v50, %v2301_v38  ;;  %v13223_v44 = vld [vmem:[#allocation42_spill] sm:$0xff] }
 0x23a   : > { %v2299_v42 = vrot.slane %v13207_v27, 7  ;;  %v8128_v27 = vpack.i.bf16 %v8099_v49, %v8092_v22  ;;  %13214 = vst [vmem:[#allocation248_spill] sm:$0xff] %v8138_v33  ;;  %13216 = vst [vmem:[#allocation250_spill] sm:$0xff] %v8149_v51  ;;  %v8159_v25 = vrot.slane %v13219_v54, 7  ;;  %v2307_v22 = vrot.slane %v13223_v44, 7 }
 0x23b   : > { %13201 = vst [vmem:[#allocation240_spill] sm:$0xff] %v8095_v1  ;;  %13205 = vst [vmem:[#allocation243_spill] sm:$0xff] %v8108_v2  ;;  %v8134_v8 = vpack.i.bf16 %v8108_v2, %v8095_v1  ;;  %v8142_v39 = vsel %vm861_vm3, %v8095_v1, %v2297_v50  ;;  %v13221_v1 = vld [vmem:[#allocation52_spill] sm:$0xff]  ;;  %v13224_v50 = vld [vmem:[#allocation43_spill] sm:$0xff]  ;;  %v2540_v49 = vadd.f32 %v2539_v19, %v2538_v53 }
 0x23c   : > { %5861 = vrot.lane.b32.xlu0 %v8080_v28, %s6510_s12  ;;  %13212 = vst [vmem:[#allocation246_spill] sm:$0xff] %v8128_v27  ;;  %13215 = vst [vmem:[#allocation249_spill] sm:$0xff] %v8142_v39  ;;  %v8152_v58 = vsel %vm861_vm3, %v2299_v42, %v2303_v45  ;;  %v8156_v48 = vsel %vm861_vm3, %v8108_v2, %v2299_v42  ;;  %v8164_v3 = vrot.slane %v13221_v1, 7  ;;  %v2309_v38 = vrot.slane %v13224_v50, 7  ;;  %v13229_v19 = vld [vmem:[#allocation45_spill] sm:$0xff] }
 0x23d   : > { %5866 = vrot.lane.b32.xlu1 %v8088_v29, %s6510_s12  ;;  %13213 = vst [vmem:[#allocation247_spill] sm:$0xff] %v8134_v8  ;;  %13217 = vst [vmem:[#allocation251_spill] sm:$0xff] %v8152_v58  ;;  %v2555_v45 = vadd.f32 %v2554_v47, %v2553_v36  ;;  %v2556_v42 = vsel %vm12628_vm8, %v7361_v12, 0.0  ;;  %v8176_v2 = vpack.i.bf16 %v8152_v58, %v8149_v51  ;;  %v13226_v29 = vld [vmem:[#allocation44_spill] sm:$0xff]  ;;  %v2313_v51 = vrot.slane %v13229_v19, 7 }
 0x23e   : > { %13218 = vst [vmem:[#allocation252_spill] sm:$0xff] %v8156_v48  ;;  %13220 = vst [vmem:[#allocation253_spill] sm:$0xff] %v8159_v25  ;;  %v2311_v53 = vrot.slane %v13226_v29, 7  ;;  %v8187_v36 = vsel %vm861_vm3, %v8159_v25, %v2307_v22  ;;  %v8191_v47 = vsel %vm861_vm3, %v8164_v3, %v2309_v38  ;;  %v13239_v12 = vld [vmem:[#allocation56_spill] sm:$0xff] }
 0x23f   : > { %13222 = vst [vmem:[#allocation254_spill] sm:$0xff] %v8164_v3  ;;  %13227 = vst [vmem:[#allocation256_spill] sm:$0xff] %v8187_v36  ;;  %v8205_v28 = vpack.i.bf16 %v8191_v47, %v8187_v36  ;;  %v8220_v19 = vsel %vm861_vm3, %v2309_v38, %v2313_v51  ;;  %v13238_v36 = vld [vmem:[#allocation55_spill] sm:$0xff] }
 0x240   : > { %5871 = vrot.lane.b32.xlu0 %v8103_v59, %s6510_s12  ;;  %v2541_v59 = vsel %vm12635_vm7, %v12987_v55, 0.0  ;;  %13228 = vst [vmem:[#allocation257_spill] sm:$0xff] %v8191_v47  ;;  %13236 = vst [vmem:[#allocation262_spill] sm:$0xff] %v8220_v19  ;;  %v2319_v47 = vrot.slane %v13238_v36, 7 }
 0x241   : > { %5876 = vrot.lane.b32.xlu1 %v8128_v27, %s6510_s12  ;;  %v8180_v27 = vpack.i.bf16 %v8156_v48, %v8142_v39  ;;  %v2542_v58 = vadd.f32 %v2541_v59, %v2540_v49  ;;  %v2543_v48 = vsel %vm12635_vm7, %v6968_v62, 0.0  ;;  %v13230_v39 = vld [vmem:[#allocation60_spill] sm:$0xff]  ;;  %13232 = vst [vmem:[#allocation259_spill] sm:$0xff] %v8205_v28  ;;  %v8209_v59 = vpack.i.bf16 %v8164_v3, %v8159_v25  ;;  %v13233_v49 = vld [vmem:[#allocation61_spill] sm:$0xff]  ;;  %v13240_v25 = vld [vmem:[#allocation58_spill] sm:$0xff] }
 0x242   : > { %v8197_v29 = vrot.slane %v13230_v39, 7  ;;  %v2321_v3 = vrot.slane %v13239_v12, 7  ;;  %v2323_v62 = vrot.slane %v13240_v25, 7 }
 0x243   : > { %13225 = vst [vmem:[#allocation255_spill] sm:$0xff] %v8180_v27 }
 0x244   : > { %5881 = vrot.lane.b32.xlu0 %v8138_v33, %s6510_s12  ;;  %v2557_v33 = vadd.f32 %v2556_v42, %v2555_v45  ;;  %13231 = vst [vmem:[#allocation258_spill] sm:$0xff] %v8197_v29  ;;  %v8212_v45 = vrot.slane %v13233_v49, 7  ;;  %v8215_v42 = vsel %vm861_vm3, %v2307_v22, %v2311_v53  ;;  %v2545_v22 = vsel %vm12635_vm7, %v6986_v5, 0.0 }
 0x245   : > { %5886 = vrot.lane.b32.xlu1 %v8134_v8, %s6510_s12  ;;  %v2558_v8 = vsel %vm12628_vm8, %v13088_v15, 0.0  ;;  %13235 = vst [vmem:[#allocation261_spill] sm:$0xff] %v8215_v42  ;;  %v2544_v15 = vadd.f32 %v2543_v48, %v2542_v58  ;;  %v2560_v53 = vsel %vm12628_vm8, %v7407_v40, 0.0  ;;  %v8234_v51 = vpack.i.bf16 %v8220_v19, %v8215_v42 }
 0x246   : > { %13234 = vst [vmem:[#allocation260_spill] sm:$0xff] %v8212_v45  ;;  %v2559_v49 = vadd.f32 %v2558_v8, %v2557_v33  ;;  %v8240_v58 = vpack.i.bf16 %v8212_v45, %v8197_v29  ;;  %v8248_v33 = vsel %vm861_vm3, %v8212_v45, %v2319_v47  ;;  %v8254_v12 = vsel %vm861_vm3, %v2319_v47, %v2323_v62 }
 0x247   : > { %13241 = vst [vmem:[#allocation263_spill] sm:$0xff] %v8234_v51  ;;  %13244 = vst [vmem:[#allocation266_spill] sm:$0xff] %v8248_v33  ;;  %v2546_v48 = vadd.f32 %v2545_v22, %v2544_v15  ;;  %vm12705_vm8 = vcmask 1041424   ;;  %vm12673_vm7 = vcmask 9216  }
 0x248   : > { %5891 = vrot.lane.b32.xlu0 %v8180_v27, %s6510_s12  ;;  %v13237_v27 = vld [vmem:[#allocation53_spill] sm:$0xff]  ;;  %13242 = vst [vmem:[#allocation264_spill] sm:$0xff] %v8240_v58  ;;  %13246 = vst [vmem:[#allocation268_spill] sm:$0xff] %v8254_v12  ;;  %v2561_v25 = vadd.f32 %v2560_v53, %v2559_v49 }
 0x249   : > { %5896 = vrot.lane.b32.xlu1 %v8176_v2, %s6510_s12  ;;  %v2317_v39 = vrot.slane %v13237_v27, 7  ;;  %v2564_v22 = vrot.slane %v2546_v48, 1 }
 0x24a   : > { %v2567_v62 = vrot.slane %v2561_v25, 1 }
 0x24b   : > { %v8244_v8 = vsel %vm861_vm3, %v8197_v29, %v2317_v39  ;;  %v8251_v38 = vsel %vm861_vm3, %v2317_v39, %v2321_v3  ;;  %v13249_v3 = vld [vmem:[#allocation75_spill] sm:$0xff] }
 0x24c   : > { %5901 = vrot.lane.b32.xlu0 %v8209_v59, %s6510_s12  ;;  %13243 = vst [vmem:[#allocation265_spill] sm:$0xff] %v8244_v8  ;;  %13245 = vst [vmem:[#allocation267_spill] sm:$0xff] %v8251_v38  ;;  %v8260_v42 = vpack.i.bf16 %v8248_v33, %v8244_v8  ;;  %v8266_v15 = vpack.i.bf16 %v8254_v12, %v8251_v38  ;;  %v2565_v39 = vrot.slane %v13249_v3, 1 }
 0x24d   : > { %5906 = vrot.lane.b32.xlu1 %v8205_v28, %s6510_s12 }
 0x24e   : > { %13247 = vst [vmem:[#allocation269_spill] sm:$0xff] %v8260_v42  ;;  %13248 = vst [vmem:[#allocation270_spill] sm:$0xff] %v8266_v15  ;;  %v2566_v47 = vsel %vm637_vm2, %v2564_v22, %v2565_v39  ;;  %v2568_v49 = vsel %vm637_vm2, %v2565_v39, %v2567_v62 }
 0x250   : > { %5911 = vrot.lane.b32.xlu0 %v8234_v51, %s6510_s12 }
 0x251   : > { %5916 = vrot.lane.b32.xlu1 %v8240_v58, %s6510_s12 }
 0x254   : > { %5921 = vrot.lane.b32.xlu0 %v8260_v42, %s6510_s12 }
 0x255   : > { %5926 = vrot.lane.b32.xlu1 %v8266_v15, %s6510_s12 }
 0x258   : > { %2569 = vrot.lane.b32.xlu0 %v2566_v47, %s6511_s13 }
 0x259   : > { %2571 = vrot.lane.b32.xlu1 %v2568_v49, %s6511_s13 }
 0x25c   : > { %2573 = vrot.lane.b32.xlu0 %v2567_v62, %s6511_s13 }
 0x28e   : > { %v8278_v53 = vpop.permute.xlu0 %2218 }
 0x28f   : > { %13250 = vst [vmem:[#allocation75_spill] sm:$0xff] %v8278_v53  ;;  %v8280_v48 = vpop.permute.xlu1 %2220 }
 0x290   : > { %13251 = vst [vmem:[#allocation271_spill] sm:$0xff] %v8280_v48 }
 0x292   : > { %v8282_v25 = vpop.permute.xlu0 %2222 }
 0x293   : > { %13252 = vst [vmem:[#allocation272_spill] sm:$0xff] %v8282_v25  ;;  %v8284_v3 = vpop.permute.xlu1 %2224 }
 0x294   : > { %13253 = vst [vmem:[#allocation273_spill] sm:$0xff] %v8284_v3 }
 0x296   : > { %v8286_v45 = vpop.permute.xlu0 %2226 }
 0x297   : > { %13254 = vst [vmem:[#allocation274_spill] sm:$0xff] %v8286_v45  ;;  %v8288_v29 = vpop.permute.xlu1 %2228 }
 0x298   : > { %13255 = vst [vmem:[#allocation275_spill] sm:$0xff] %v8288_v29 }
 0x29a   : > { %v8290_v22 = vpop.permute.xlu0 %5811 }
 0x29b   : > { %13256 = vst [vmem:[#allocation276_spill] sm:$0xff] %v8290_v22  ;;  %v8292_v39 = vpop.permute.xlu1 %5816 }
 0x29c   : > { %13257 = vst [vmem:[#allocation277_spill] sm:$0xff] %v8292_v39 }
 0x29e   : > { %v8294_v47 = vpop.permute.xlu0 %5821 }
 0x29f   : > { %13258 = vst [vmem:[#allocation278_spill] sm:$0xff] %v8294_v47  ;;  %v8296_v49 = vpop.permute.xlu1 %5826 }
 0x2a0   : > { %13259 = vst [vmem:[#allocation279_spill] sm:$0xff] %v8296_v49 }
 0x2a2   : > { %v8298_v62 = vpop.permute.xlu0 %5831 }
 0x2a3   : > { %13260 = vst [vmem:[#allocation280_spill] sm:$0xff] %v8298_v62  ;;  %v8300_v53 = vpop.permute.xlu1 %5836 }
 0x2a4   : > { %13261 = vst [vmem:[#allocation281_spill] sm:$0xff] %v8300_v53 }
 0x2a6   : > { %v8302_v48 = vpop.permute.xlu0 %5841 }
 0x2a7   : > { %13262 = vst [vmem:[#allocation282_spill] sm:$0xff] %v8302_v48  ;;  %v8304_v25 = vpop.permute.xlu1 %5846 }
 0x2a8   : > { %13263 = vst [vmem:[#allocation283_spill] sm:$0xff] %v8304_v25 }
 0x2aa   : > { %v8306_v3 = vpop.permute.xlu0 %5851 }
 0x2ab   : > { %13264 = vst [vmem:[#allocation284_spill] sm:$0xff] %v8306_v3  ;;  %v8308_v45 = vpop.permute.xlu1 %5856 }
 0x2ac   : > { %13265 = vst [vmem:[#allocation285_spill] sm:$0xff] %v8308_v45 }
 0x2ae   : > { %v8310_v29 = vpop.permute.xlu0 %5861 }
 0x2af   : > { %13266 = vst [vmem:[#allocation286_spill] sm:$0xff] %v8310_v29  ;;  %v8312_v22 = vpop.permute.xlu1 %5866  ;;  %v13276_v29 = vld [vmem:[#allocation51_spill] sm:$0xff] }
 0x2b0   : > { %13267 = vst [vmem:[#allocation287_spill] sm:$0xff] %v8312_v22  ;;  %v980_v45 = vmul.f32 %v13276_v29, %v13223_v44  ;;  %v13283_v29 = vld [vmem:[#allocation57_spill] sm:$0xff] }
 0x2b1   : > { %v978_v12 = vmul.f32 %v13283_v29, %v13219_v54  ;;  %v13287_v29 = vld [vmem:[#allocation63_spill] sm:$0xff] }
 0x2b2   : > { %v8314_v39 = vpop.permute.xlu0 %5871  ;;  %v8349_v15 = vsel %vm525_vm0, %v980_v45, 0.0  ;;  %v8366_v45 = vmul.f32 %v13287_v29, %v13238_v36 }
 0x2b3   : > { %13268 = vst [vmem:[#allocation288_spill] sm:$0xff] %v8314_v39  ;;  %v8316_v47 = vpop.permute.xlu1 %5876  ;;  %v13278_v39 = vld [vmem:[#allocation125_spill] sm:$0xff] }
 0x2b4   : > { %13269 = vst [vmem:[#allocation289_spill] sm:$0xff] %v8316_v47  ;;  %v5494_v8 = vunpack.i.h.bf16 %v13278_v39  ;;  %v5493_v47 = vunpack.i.l.bf16 %v13278_v39  ;;  %13288 = vst [vmem:[#allocation57_spill] sm:$0xff] %v8366_v45 }
 0x2b6   : > { %v8318_v49 = vpop.permute.xlu0 %5881  ;;  %v1198_v39 = vsel %vm541_vm1, %v5493_v47, %v5494_v8  ;;  %v1246_v8 = vmul.f32 %v5493_v47, %v13131_v46  ;;  %v3274_v47 = vsel %vm3181_vm9, %v13033_v4, 0.0  ;;  %v13290_v46 = vld [vmem:[#allocation127_spill] sm:$0xff] }
 0x2b7   : > { %13270 = vst [vmem:[#allocation290_spill] sm:$0xff] %v8318_v49  ;;  %v8320_v62 = vpop.permute.xlu1 %5886  ;;  %v13279_v49 = vld [vmem:[#allocation124_spill] sm:$0xff] }
 0x2b8   : > { %13271 = vst [vmem:[#allocation291_spill] sm:$0xff] %v8320_v62  ;;  %v5499_v33 = vunpack.i.h.bf16 %v13279_v49  ;;  %v5498_v62 = vunpack.i.l.bf16 %v13279_v49 }
 0x2ba   : > { %v8322_v53 = vpop.permute.xlu0 %5891  ;;  %v1199_v49 = vsel %vm541_vm1, %v5498_v62, %v5499_v33  ;;  %v1248_v33 = vmul.f32 %v5498_v62, %v13135_v11  ;;  %v3275_v62 = vsel %vm3181_vm9, %v13034_v60, 0.0 }
 0x2bb   : > { %13272 = vst [vmem:[#allocation292_spill] sm:$0xff] %v8322_v53  ;;  %v8324_v48 = vpop.permute.xlu1 %5896  ;;  %v3276_v45 = vadd.f32 %v3275_v62, %v3274_v47 }
 0x2bc   : > { %13273 = vst [vmem:[#allocation293_spill] sm:$0xff] %v8324_v48  ;;  %v13281_v48 = vld [vmem:[#allocation54_spill] sm:$0xff]  ;;  %v1310_v47 = vsel %vm1278_vm5, %v1248_v33, 0.0  ;;  %v1279_v33 = vsel %vm1278_vm5, %v1246_v8, 0.0  ;;  %v13291_v8 = vld [vmem:[#allocation128_spill] sm:$0xff] }
 0x2bd   : > { %13285 = vst [vmem:[#allocation54_spill] sm:$0xff] %v8349_v15 }
 0x2be   : > { %v8326_v25 = vpop.permute.xlu0 %5901 }
 0x2bf   : > { %13274 = vst [vmem:[#allocation294_spill] sm:$0xff] %v8326_v25  ;;  %v8328_v3 = vpop.permute.xlu1 %5906  ;;  %v981_v25 = vmul.f32 %v13281_v48, %v13224_v50 }
 0x2c0   : > { %13275 = vst [vmem:[#allocation295_spill] sm:$0xff] %v8328_v3  ;;  %v13282_v3 = vld [vmem:[#allocation59_spill] sm:$0xff] }
 0x2c1   : > { %v979_v38 = vmul.f32 %v13282_v3, %v13221_v1  ;;  %v8362_v3 = vsel %vm525_vm0, %v978_v12, 0.0 }
 0x2c2   : > { %v8332_v22 = vpop.permute.xlu0 %5911 }
 0x2c3   : > { %13277 = vst [vmem:[#allocation51_spill] sm:$0xff] %v8332_v22  ;;  %v8338_v53 = vpop.permute.xlu1 %5916  ;;  %v8359_v48 = vsel %vm541_vm1, %v979_v38, 0.0 }
 0x2c4   : > { %13280 = vst [vmem:[#allocation125_spill] sm:$0xff] %v8338_v53  ;;  %v8356_v53 = vsel %vm541_vm1, %v981_v25, 0.0  ;;  %v1249_v25 = vmul.f32 %v1199_v49, %v13136_v13 }
 0x2c6   : > { %v8346_v22 = vpop.permute.xlu0 %5921 }
 0x2c7   : > { %13284 = vst [vmem:[#allocation124_spill] sm:$0xff] %v8346_v22  ;;  %v8353_v19 = vpop.permute.xlu1 %5926  ;;  %v13289_v22 = vld [vmem:[#allocation126_spill] sm:$0xff] }
 0x2c8   : > { %13286 = vst [vmem:[#allocation59_spill] sm:$0xff] %v8353_v19  ;;  %v1247_v19 = vmul.f32 %v1198_v39, %v13133_v35  ;;  %v5509_v38 = vunpack.i.h.bf16 %v13289_v22  ;;  %v5508_v42 = vunpack.i.l.bf16 %v13289_v22  ;;  %v5504_v39 = vunpack.i.h.bf16 %v13290_v46 }
 0x2c9   : > { %v3259_v22 = vsel %vm3165_vm10, %v6911_v52, 0.0 }
 0x2ca   : > { %v2570_v12 = vpop.permute.xlu0 %2569  ;;  %v1201_v62 = vsel %vm541_vm1, %v5508_v42, %v5509_v38 }
 0x2cb   : > { %v2578_v58 = vmul.f32 %v2570_v12, %v7605_v61  ;;  %v2579_v51 = vmul.f32 %v2570_v12, %v7609_v9  ;;  %v2572_v29 = vpop.permute.xlu1 %2571  ;;  %v3260_v12 = vsel %vm3165_vm10, %v6915_v30, 0.0  ;;  %v5503_v9 = vunpack.i.l.bf16 %v13290_v46  ;;  %v13332_v30 = vld [vmem:[#allocation68_spill] sm:$0xff] }
 0x2cc   : > { %v2580_v49 = vmul.f32 %v2572_v29, %v13063_v31  ;;  %v2581_v35 = vmul.f32 %v2572_v29, %v7160_v43  ;;  %v3261_v43 = vadd.f32 %v3260_v12, %v3259_v22 }
 0x2cd   : > { %v2584_v15 = vmax.f32 %v2578_v58, 1e-16  ;;  %v2585_v61 = vmax.f32 %v2579_v51, 1e-16  ;;  %v3262_v51 = vsel %vm3165_vm10, %v6925_v20, 0.0  ;;  %v3289_v58 = vsel %vm12705_vm8, %v13073_v14, 0.0 }
 0x2ce   : > { %v2586_v4 = vmax.f32 %v2580_v49, 1e-16  ;;  %v2587_v28 = vmax.f32 %v2581_v35, 1e-16  ;;  %v2574_v60 = vpop.permute.xlu0 %2573  ;;  %v3290_v35 = vsel %vm12705_vm8, %v13074_v41, 0.0  ;;  %v1250_v38 = vmul.f32 %v5503_v9, %v13143_v18  ;;  %v13294_v41 = vld [vmem:[#allocation81_spill] sm:$0xff] }
 0x2cf   : > { %6338 = vrsqrt.f32 %v2584_v15  ;;  %v2582_v31 = vmul.f32 %v2574_v60, %v7641_v17  ;;  %v2583_v29 = vmul.f32 %v2574_v60, %v7639_v23  ;;  %v3277_v15 = vsel %vm3181_vm9, %v13069_v24, 0.0 }
 0x2d0   : > { %6340 = vrsqrt.f32 %v2585_v61  ;;  %v3304_v60 = vsel %vm12673_vm7, %v13076_v7, 0.0  ;;  %v3305_v61 = vsel %vm12673_vm7, %v13077_v57, 0.0  ;;  %v3291_v22 = vadd.f32 %v3290_v35, %v3289_v58 }
 0x2d1   : > { %6342 = vrsqrt.f32 %v2586_v4  ;;  %v2588_v46 = vmax.f32 %v2582_v31, 1e-16  ;;  %v2589_v49 = vmax.f32 %v2583_v29, 1e-16  ;;  %v1252_v4 = vmul.f32 %v5508_v42, %v13147_v16 }
 0x2d2   : > { %6344 = vrsqrt.f32 %v2587_v28  ;;  %v1200_v31 = vsel %vm541_vm1, %v5503_v9, %v5504_v39  ;;  %v3263_v28 = vadd.f32 %v3262_v51, %v3261_v43  ;;  %v3278_v12 = vadd.f32 %v3277_v15, %v3276_v45 }
 0x2d3   : > { %6346 = vrsqrt.f32 %v2588_v46  ;;  %v3264_v29 = vsel %vm3165_vm10, %v13072_v63, 0.0  ;;  %v3306_v7 = vadd.f32 %v3305_v61, %v3304_v60  ;;  %v3292_v57 = vsel %vm12705_vm8, %v7291_v26, 0.0 }
 0x2d4   : > { %6348 = vrsqrt.f32 %v2589_v49  ;;  %v3279_v42 = vsel %vm3181_vm9, %v13075_v6, 0.0  ;;  %v3307_v39 = vsel %vm12673_vm7, %v7529_v34, 0.0  ;;  %v1295_v43 = vsel %vm1294_vm4, %v1247_v19, 0.0  ;;  %v13319_v6 = vld [vmem:[#allocation25_spill] sm:$0xff] }
 0x2d5   : > { %v8418_v45 = vsel %vm1294_vm4, %v1249_v25, 0.0  ;;  %v1251_v51 = vmul.f32 %v1200_v31, %v13145_v10  ;;  %v1253_v58 = vmul.f32 %v1201_v62, %v13148_v37  ;;  %v1311_v46 = vsel %vm1278_vm5, %v1252_v4, 0.0  ;;  %v13292_v4 = vld [vmem:[#allocation155_spill] sm:$0xff] }
 0x2d6   : > { %v5519_v49 = vunpack.i.h.bf16 %v13291_v8  ;;  %v3265_v9 = vadd.f32 %v3264_v29, %v3263_v28  ;;  %v3293_v35 = vadd.f32 %v3292_v57, %v3291_v22  ;;  %v3280_v15 = vadd.f32 %v3279_v42, %v3278_v12 }
 0x2d7   : > { %v3266_v60 = vsel %vm3165_vm10, %v6953_v32, 0.0  ;;  %v3308_v61 = vadd.f32 %v3307_v39, %v3306_v7  ;;  %v3294_v19 = vsel %vm12705_vm8, %v7317_v0, 0.0  ;;  %v1280_v25 = vsel %vm1278_vm5, %v1250_v38, 0.0  ;;  %v13293_v7 = vld [vmem:[#allocation129_spill] sm:$0xff]  ;;  %v13299_v32 = vld [vmem:[#allocation82_spill] sm:$0xff] }
 0x2d8   : > { %v5518_v31 = vunpack.i.l.bf16 %v13291_v8  ;;  %v3281_v62 = vsel %vm3181_vm9, %v7075_v21, 0.0  ;;  %v3309_v34 = vsel %vm12673_vm7, %v13292_v4, 0.0  ;;  %v1296_v57 = vsel %vm1294_vm4, %v1251_v51, 0.0 }
 0x2d9   : > { %v8435_v28 = vadd.f32 %v1311_v46, %v1310_v47  ;;  %v8438_v22 = vsel %vm1294_vm4, %v1253_v58, 0.0  ;;  %v5514_v12 = vunpack.i.h.bf16 %v13293_v7  ;;  %v5513_v38 = vunpack.i.l.bf16 %v13293_v7  ;;  %v13295_v7 = vld [vmem:[#allocation158_spill] sm:$0xff] }
 0x2da   : > { %v3267_v42 = vadd.f32 %v3266_v60, %v3265_v9  ;;  %v3268_v39 = vsel %vm3165_vm10, %v12987_v55, 0.0  ;;  %v3295_v8 = vadd.f32 %v3294_v19, %v3293_v35  ;;  %v3282_v4 = vadd.f32 %v3281_v62, %v3280_v15  ;;  %v13296_v15 = vld [vmem:[#allocation18_spill] sm:$0xff] }
 0x2db   : > { %v3310_v17 = vadd.f32 %v3309_v34, %v3308_v61  ;;  %v3296_v47 = vsel %vm12705_vm8, %v7339_v56, 0.0  ;;  %v8446_v58 = vadd.f32 %v1280_v25, %v1279_v33  ;;  %v3283_v14 = vsel %vm3181_vm9, %v13294_v41, 0.0  ;;  %v13297_v56 = vld [vmem:[#allocation72_spill] sm:$0xff]  ;;  %v13300_v41 = vld [vmem:[#allocation161_spill] sm:$0xff] }
 0x2dc   : > { %v6339_v29 = vpop.eup %6338  ;;  %v3311_v9 = vsel %vm12673_vm7, %v13295_v7, 0.0  ;;  %v8452_v23 = vadd.f32 %v1296_v57, %v1295_v43  ;;  %v1203_v35 = vsel %vm541_vm1, %v5518_v31, %v5519_v49  ;;  %v1256_v34 = vmul.f32 %v5518_v31, %v13296_v15  ;;  %v13298_v49 = vld [vmem:[#allocation108_spill] sm:$0xff] }
 0x2dd   : > { %v6341_v0 = vpop.eup %6340  ;;  %v2602_v26 = vrot.slane %v6339_v29, 7  ;;  %v1202_v33 = vsel %vm541_vm1, %v5513_v38, %v5514_v12  ;;  %v3269_v25 = vadd.f32 %v3268_v39, %v3267_v42  ;;  %v3297_v62 = vadd.f32 %v3296_v47, %v3295_v8  ;;  %v13301_v42 = vld [vmem:[#allocation22_spill] sm:$0xff]  ;;  %v13303_v47 = vld [vmem:[#allocation131_spill] sm:$0xff] }
 0x2de   : > { %v6343_v51 = vpop.eup %6342  ;;  %v2603_v46 = vrot.slane %v6341_v0, 7  ;;  %v3284_v7 = vadd.f32 %v3283_v14, %v3282_v4  ;;  %v3270_v43 = vsel %vm3165_vm10, %v13297_v56, 0.0  ;;  %v3312_v57 = vadd.f32 %v3311_v9, %v3310_v17  ;;  %v13302_v8 = vld [vmem:[#allocation130_spill] sm:$0xff] }
 0x2df   : > { %v6345_v60 = vpop.eup %6344  ;;  %2612 = vrot.lane.b32.xlu1 %v2602_v26, %s6510_s12  ;;  %v2604_v61 = vrot.slane %v6343_v51, 7  ;;  %v3298_v31 = vsel %vm12705_vm8, %v13298_v49, 0.0  ;;  %v3285_v12 = vsel %vm3181_vm9, %v13299_v32, 0.0  ;;  %v1254_v39 = vmul.f32 %v5513_v38, %v13301_v42  ;;  %v13304_v32 = vld [vmem:[#allocation113_spill] sm:$0xff] }
 0x2e0   : > { %v6347_v19 = vpop.eup %6346  ;;  %2614 = vrot.lane.b32.xlu0 %v2603_v46, %s6510_s12  ;;  %v2606_v0 = vrot.slane %v6345_v60, 7  ;;  %v3313_v60 = vsel %vm12673_vm7, %v13300_v41, 0.0  ;;  %v5529_v14 = vunpack.i.h.bf16 %v13302_v8  ;;  %v5524_v9 = vunpack.i.h.bf16 %v13303_v47 }
 0x2e1   : > { %v6349_v29 = vpop.eup %6348  ;;  %v2605_v55 = vsel %vm861_vm3, %v2602_v26, %v2604_v61  ;;  %v2608_v51 = vrot.slane %v6347_v19, 7  ;;  %v5523_v26 = vunpack.i.l.bf16 %v13303_v47  ;;  %v3271_v19 = vadd.f32 %v3270_v43, %v3269_v25  ;;  %v13306_v47 = vld [vmem:[#allocation164_spill] sm:$0xff]  ;;  %v13307_v25 = vld [vmem:[#allocation23_spill] sm:$0xff] }
 0x2e2   : > { %v2607_v4 = vsel %vm861_vm3, %v2603_v46, %v2606_v0  ;;  %v2610_v17 = vrot.slane %v6349_v29, 7  ;;  %v3299_v49 = vadd.f32 %v3298_v31, %v3297_v62  ;;  %v3286_v56 = vadd.f32 %v3285_v12, %v3284_v7  ;;  %v13305_v29 = vld [vmem:[#allocation83_spill] sm:$0xff] }
 0x2e3   : > { %2616 = vrot.lane.b32.xlu1 %v2605_v55, %s6510_s12  ;;  %v3272_v41 = vsel %vm3165_vm10, %v6986_v5, 0.0  ;;  %v3314_v38 = vadd.f32 %v3313_v60, %v3312_v57  ;;  %v3300_v63 = vsel %vm12705_vm8, %v13304_v32, 0.0  ;;  %v5528_v46 = vunpack.i.l.bf16 %v13302_v8  ;;  %v13308_v7 = vld [vmem:[#allocation19_spill] sm:$0xff]  ;;  %v13317_v5 = vld [vmem:[#allocation29_spill] sm:$0xff] }
 0x2e4   : > { %2618 = vrot.lane.b32.xlu0 %v2607_v4, %s6510_s12  ;;  %v2609_v55 = vsel %vm861_vm3, %v2604_v61, %v2608_v51  ;;  %v3287_v21 = vsel %vm3181_vm9, %v13305_v29, 0.0  ;;  %v3315_v4 = vsel %vm12673_vm7, %v13306_v47, 0.0  ;;  %v1255_v62 = vmul.f32 %v1202_v33, %v13307_v25  ;;  %v13364_v25 = vld [vmem:[#allocation228_spill] sm:$0xff] }
 0x2e5   : > { %v1257_v43 = vmul.f32 %v1203_v35, %v13308_v7  ;;  %v2611_v31 = vsel %vm861_vm3, %v2606_v0, %v2610_v17  ;;  %v1313_v57 = vsel %vm1278_vm5, %v1256_v34, 0.0  ;;  %v3273_v12 = vadd.f32 %v3272_v41, %v3271_v19  ;;  %v13309_v0 = vld [vmem:[#allocation133_spill] sm:$0xff]  ;;  %v13311_v41 = vld [vmem:[#allocation132_spill] sm:$0xff] }
 0x2e6   : > { %v3301_v61 = vadd.f32 %v3300_v63, %v3299_v49  ;;  %v1282_v51 = vsel %vm1278_vm5, %v1254_v39, 0.0  ;;  %v3288_v60 = vadd.f32 %v3287_v21, %v3286_v56  ;;  %v3316_v8 = vadd.f32 %v3315_v4, %v3314_v38  ;;  %v13312_v21 = vld [vmem:[#allocation206_spill] sm:$0xff]  ;;  %v13313_v56 = vld [vmem:[#allocation205_spill] sm:$0xff]  ;;  %v13315_v38 = vld [vmem:[#allocation28_spill] sm:$0xff] }
 0x2e7   : > { %2620 = vrot.lane.b32.xlu1 %v2609_v55, %s6510_s12  ;;  %v3302_v47 = vsel %vm12705_vm8, %v7407_v40, 0.0  ;;  %v1204_v33 = vsel %vm541_vm1, %v5523_v26, %v5524_v9  ;;  %v1205_v35 = vsel %vm541_vm1, %v5528_v46, %v5529_v14  ;;  %v5534_v17 = vunpack.i.h.bf16 %v13309_v0  ;;  %v13310_v55 = vld [vmem:[#allocation169_spill] sm:$0xff]  ;;  %v13314_v9 = vld [vmem:[#allocation86_spill] sm:$0xff] }
 0x2e8   : > { %2622 = vrot.lane.b32.xlu0 %v2611_v31, %s6510_s12  ;;  %v3317_v34 = vsel %vm12673_vm7, %v13310_v55, 0.0  ;;  %v5533_v31 = vunpack.i.l.bf16 %v13309_v0  ;;  %v5539_v63 = vunpack.i.h.bf16 %v13311_v41  ;;  %v5538_v49 = vunpack.i.l.bf16 %v13311_v41  ;;  %v13316_v40 = vld [vmem:[#allocation85_spill] sm:$0xff] }
 0x2e9   : > { %v3323_v39 = vrot.slane %v3273_v12, 1  ;;  %v3324_v14 = vrot.slane %v13314_v9, 1  ;;  %v8507_v19 = vadd.f32 %v3302_v47, %v3301_v61  ;;  %v1258_v4 = vmul.f32 %v5523_v26, %v13315_v38 }
 0x2ea   : > { %v3326_v55 = vrot.slane %v3288_v60, 1  ;;  %v3327_v0 = vrot.slane %v13316_v40, 1  ;;  %v8511_v32 = vadd.f32 %v3317_v34, %v3316_v8  ;;  %v1298_v41 = vsel %vm1294_vm4, %v1255_v62, 0.0  ;;  %v13320_v40 = vld [vmem:[#allocation212_spill] sm:$0xff]  ;;  %v13323_v34 = vld [vmem:[#allocation35_spill] sm:$0xff] }
 0x2eb   : > { %5931 = vrot.lane.b32.xlu1 %v13312_v21, %s6511_s13  ;;  %v1259_v29 = vmul.f32 %v1204_v33, %v13317_v5  ;;  %v13318_v21 = vld [vmem:[#allocation24_spill] sm:$0xff]  ;;  %v1327_v12 = vadd.f32 %v8438_v22, %v8418_v45  ;;  %v1283_v47 = vadd.f32 %v1282_v51, %v8446_v58  ;;  %v1314_v26 = vadd.f32 %v1313_v57, %v8435_v28  ;;  %v13362_v5 = vld [vmem:[#allocation227_spill] sm:$0xff] }
 0x2ec   : > { %5936 = vrot.lane.b32.xlu0 %v13313_v56, %s6511_s13  ;;  %v1260_v20 = vmul.f32 %v5528_v46, %v13318_v21  ;;  %v1261_v56 = vmul.f32 %v1205_v35, %v13319_v6  ;;  %v1328_v61 = vsel %vm1294_vm4, %v1257_v43, 0.0  ;;  %v1206_v62 = vsel %vm541_vm1, %v5533_v31, %v5534_v17  ;;  %v13321_v46 = vld [vmem:[#allocation211_spill] sm:$0xff]  ;;  %v13322_v35 = vld [vmem:[#allocation34_spill] sm:$0xff] }
 0x2ed   : > { %v1207_v60 = vsel %vm541_vm1, %v5538_v49, %v5539_v63  ;;  %v3325_v8 = vsel %vm637_vm2, %v3323_v39, %v3324_v14  ;;  %v3329_v45 = vrot.slane %v8507_v19, 1  ;;  %v1299_v22 = vadd.f32 %v1298_v41, %v8452_v23  ;;  %v13324_v39 = vld [vmem:[#allocation30_spill] sm:$0xff]  ;;  %v13325_v19 = vld [vmem:[#allocation31_spill] sm:$0xff] }
 0x2ee   : > { %v1284_v28 = vsel %vm1278_vm5, %v1258_v4, 0.0  ;;  %v3328_v58 = vsel %vm637_vm2, %v3326_v55, %v3327_v0  ;;  %v3331_v43 = vrot.slane %v8511_v32, 1  ;;  %v1300_v57 = vsel %vm1294_vm4, %v1259_v29, 0.0  ;;  %v13326_v41 = vld [vmem:[#allocation135_spill] sm:$0xff]  ;;  %v13327_v55 = vld [vmem:[#allocation134_spill] sm:$0xff] }
 0x2ef   : > { %5941 = vrot.lane.b32.xlu1 %v13320_v40, %s6511_s13  ;;  %v1315_v51 = vsel %vm1278_vm5, %v1260_v20, 0.0  ;;  %v1330_v33 = vsel %vm1294_vm4, %v1261_v56, 0.0  ;;  %v1262_v17 = vmul.f32 %v5533_v31, %v13322_v35  ;;  %v1263_v63 = vmul.f32 %v1206_v62, %v13323_v34  ;;  %v13328_v56 = vld [vmem:[#allocation62_spill] sm:$0xff]  ;;  %v13330_v62 = vld [vmem:[#allocation67_spill] sm:$0xff] }
 0x2f0   : > { %5946 = vrot.lane.b32.xlu0 %v13321_v46, %s6511_s13  ;;  %v1264_v9 = vmul.f32 %v5538_v49, %v13324_v39  ;;  %v1265_v23 = vmul.f32 %v1207_v60, %v13325_v19  ;;  %v5544_v4 = vunpack.i.h.bf16 %v13326_v41  ;;  %v5543_v32 = vunpack.i.l.bf16 %v13326_v41  ;;  %v13329_v49 = vld [vmem:[#allocation60_spill] sm:$0xff]  ;;  %v13331_v41 = vld [vmem:[#allocation61_spill] sm:$0xff] }
 0x2f1   : > { %v5549_v29 = vunpack.i.h.bf16 %v13327_v55  ;;  %v5548_v20 = vunpack.i.l.bf16 %v13327_v55  ;;  %v3330_v31 = vsel %vm637_vm2, %v3324_v14, %v3329_v45  ;;  %v8550_v40 = vmul.f32 %v13328_v56, %v13237_v27 }
 0x2f2   : > { %v8554_v60 = vmul.f32 %v13330_v62, %v13329_v49  ;;  %v1329_v46 = vadd.f32 %v1328_v61, %v1327_v12  ;;  %v8559_v52 = vmul.f32 %v13332_v30, %v13331_v41  ;;  %v1285_v55 = vadd.f32 %v1284_v28, %v1283_v47  ;;  %v13333_v61 = vld [vmem:[#allocation40_spill] sm:$0xff] }
 0x2f3   : > { %3333 = vrot.lane.b32.xlu1 %v3325_v8, %s6510_s12  ;;  %v3332_v8 = vsel %vm637_vm2, %v3327_v0, %v3331_v43  ;;  %v1301_v24 = vadd.f32 %v1300_v57, %v1299_v22  ;;  %v1286_v14 = vsel %vm1278_vm5, %v1262_v17, 0.0  ;;  %v1302_v56 = vsel %vm1294_vm4, %v1263_v63, 0.0  ;;  %v13334_v47 = vld [vmem:[#allocation36_spill] sm:$0xff]  ;;  %v13335_v22 = vld [vmem:[#allocation137_spill] sm:$0xff] }
 0x2f4   : > { %3335 = vrot.lane.b32.xlu0 %v3328_v58, %s6510_s12  ;;  %v1316_v58 = vadd.f32 %v1315_v51, %v1314_v26  ;;  %v1331_v34 = vadd.f32 %v1330_v33, %v1329_v46  ;;  %v1317_v35 = vsel %vm1278_vm5, %v1264_v9, 0.0  ;;  %v1332_v12 = vsel %vm1294_vm4, %v1265_v23, 0.0  ;;  %v13336_v51 = vld [vmem:[#allocation136_spill] sm:$0xff]  ;;  %v13337_v9 = vld [vmem:[#allocation139_spill] sm:$0xff]  ;;  %v13339_v46 = vld [vmem:[#allocation37_spill] sm:$0xff] }
 0x2f5   : > { %v1208_v0 = vsel %vm541_vm1, %v5543_v32, %v5544_v4  ;;  %v1266_v62 = vmul.f32 %v5543_v32, %v13333_v61  ;;  %v1209_v30 = vsel %vm541_vm1, %v5548_v20, %v5549_v29  ;;  %v1268_v26 = vmul.f32 %v5548_v20, %v13334_v47 }
 0x2f6   : > { %v5554_v28 = vunpack.i.h.bf16 %v13335_v22  ;;  %v5553_v57 = vunpack.i.l.bf16 %v13335_v22  ;;  %v5558_v33 = vunpack.i.l.bf16 %v13336_v51  ;;  %v1287_v17 = vadd.f32 %v1286_v14, %v1285_v55 }
 0x2f7   : > { %3337 = vrot.lane.b32.xlu1 %v3330_v31, %s6510_s12  ;;  %v5559_v63 = vunpack.i.h.bf16 %v13336_v51  ;;  %v5564_v23 = vunpack.i.h.bf16 %v13337_v9  ;;  %v5563_v4 = vunpack.i.l.bf16 %v13337_v9  ;;  %v1303_v32 = vadd.f32 %v1302_v56, %v1301_v24  ;;  %v13338_v31 = vld [vmem:[#allocation41_spill] sm:$0xff] }
 0x2f8   : > { %3339 = vrot.lane.b32.xlu0 %v3332_v8, %s6510_s12  ;;  %v1267_v29 = vmul.f32 %v1208_v0, %v13338_v31  ;;  %v1269_v8 = vmul.f32 %v1209_v30, %v13339_v46  ;;  %v1318_v20 = vadd.f32 %v1317_v35, %v1316_v58  ;;  %v8580_v61 = vadd.f32 %v1332_v12, %v1331_v34 }
 0x2f9   : > { %v1288_v22 = vsel %vm1278_vm5, %v1266_v62, 0.0  ;;  %v1319_v55 = vsel %vm1278_vm5, %v1268_v26, 0.0  ;;  %v1210_v14 = vsel %vm541_vm1, %v5553_v57, %v5554_v28  ;;  %v1270_v51 = vmul.f32 %v5553_v57, %v13219_v54  ;;  %v13341_v62 = vld [vmem:[#allocation219_spill] sm:$0xff]  ;;  %v13342_v57 = vld [vmem:[#allocation220_spill] sm:$0xff] }
 0x2fa   : > { %v1272_v24 = vmul.f32 %v5558_v33, %v13223_v44  ;;  %v1211_v56 = vsel %vm541_vm1, %v5558_v33, %v5559_v63  ;;  %v1212_v0 = vsel %vm541_vm1, %v5563_v4, %v5564_v23  ;;  %v1289_v58 = vadd.f32 %v1288_v22, %v1287_v17  ;;  %v13344_v22 = vld [vmem:[#allocation17_spill] sm:$0xff] }
 0x2fb   : > { %3341 = vrot.lane.b32.xlu1 %v3329_v45, %s6510_s12  ;;  %v13340_v45 = vld [vmem:[#allocation138_spill] sm:$0xff]  ;;  %v1304_v12 = vsel %vm1294_vm4, %v1267_v29, 0.0  ;;  %v1320_v30 = vadd.f32 %v1319_v55, %v1318_v20  ;;  %v1271_v26 = vmul.f32 %v1210_v14, %v13221_v1  ;;  %v1274_v28 = vmul.f32 %v5563_v4, %v13329_v49  ;;  %v13346_v14 = vld [vmem:[#allocation16_spill] sm:$0xff] }
 0x2fc   : > { %3343 = vrot.lane.b32.xlu0 %v3331_v43, %s6510_s12  ;;  %v5569_v35 = vunpack.i.h.bf16 %v13340_v45  ;;  %v5568_v34 = vunpack.i.l.bf16 %v13340_v45  ;;  %v8594_v43 = vsel %vm1294_vm4, %v1269_v8, 0.0  ;;  %v1290_v33 = vsel %vm1278_vm5, %v1270_v51, 0.0  ;;  %v13343_v8 = vld [vmem:[#allocation203_spill] sm:$0xff]  ;;  %v13345_v4 = vld [vmem:[#allocation210_spill] sm:$0xff]  ;;  %v13347_v45 = vld [vmem:[#allocation209_spill] sm:$0xff] }
 0x2fd   : > { %v1273_v17 = vmul.f32 %v1211_v56, %v13224_v50  ;;  %v1321_v63 = vsel %vm1278_vm5, %v1272_v24, 0.0  ;;  %v1275_v9 = vmul.f32 %v1212_v0, %v13331_v41  ;;  %v2683_v20 = vmul.f32 %v13343_v8, %v13135_v11  ;;  %v13348_v51 = vld [vmem:[#allocation15_spill] sm:$0xff]  ;;  %v13350_v49 = vld [vmem:[#allocation14_spill] sm:$0xff]  ;;  %v13351_v24 = vld [vmem:[#allocation213_spill] sm:$0xff] }
 0x2fe   : > { %v1213_v23 = vsel %vm541_vm1, %v5568_v34, %v5569_v35  ;;  %v1276_v29 = vmul.f32 %v5568_v34, %v13237_v27  ;;  %v2686_v55 = vmul.f32 %v13345_v4, %v13344_v22  ;;  %v2691_v1 = vmul.f32 %v13351_v24, %v13350_v49  ;;  %v13352_v0 = vld [vmem:[#allocation223_spill] sm:$0xff]  ;;  %v13354_v4 = vld [vmem:[#allocation226_spill] sm:$0xff] }
 0x2ff   : > { %5951 = vrot.lane.b32.xlu1 %v13341_v62, %s6511_s13  ;;  %v2685_v62 = vmul.f32 %v13347_v45, %v13346_v14  ;;  %v1291_v35 = vadd.f32 %v1290_v33, %v1289_v58  ;;  %v1292_v34 = vsel %vm1278_vm5, %v1274_v28, 0.0  ;;  %v13353_v8 = vld [vmem:[#allocation215_spill] sm:$0xff]  ;;  %v1305_v41 = vadd.f32 %v1304_v12, %v1303_v32  ;;  %v13355_v45 = vld [vmem:[#allocation204_spill] sm:$0xff]  ;;  %v13357_v12 = vld [vmem:[#allocation230_spill] sm:$0xff] }
 0x300   : > { %5956 = vrot.lane.b32.xlu0 %v13342_v57, %s6511_s13  ;;  %v13349_v57 = vld [vmem:[#allocation214_spill] sm:$0xff]  ;;  %v2689_v27 = vmul.f32 %v13353_v8, %v13147_v16  ;;  %v2684_v54 = vmul.f32 %v13355_v45, %v13136_v13  ;;  %v1306_v31 = vsel %vm1294_vm4, %v1271_v26, 0.0  ;;  %v2761_v58 = vsel %vm525_vm0, %v2683_v20, 0.0  ;;  %v13359_v26 = vld [vmem:[#allocation221_spill] sm:$0xff] }
 0x301   : > { %v2692_v56 = vmul.f32 %v13349_v57, %v13348_v51  ;;  %v13356_v57 = vld [vmem:[#allocation216_spill] sm:$0xff]  ;;  %vm2791_vm7 = vcmask 1041416   ;;  %v2808_v28 = vsel %vm2807_vm6, %v2686_v55, 0.0  ;;  %v2695_v20 = vmul.f32 %v13359_v26, %v13296_v15 }
 0x302   : > { %v2690_v24 = vmul.f32 %v13356_v57, %v13148_v37  ;;  %v2792_v33 = vsel %vm2791_vm7, %v2685_v62, 0.0  ;;  %v2793_v32 = vsel %vm2791_vm7, %v2691_v1, 0.0  ;;  %v2762_v8 = vsel %vm525_vm0, %v2689_v27, 0.0  ;;  %v13360_v57 = vld [vmem:[#allocation229_spill] sm:$0xff] }
 0x303   : > { %5961 = vrot.lane.b32.xlu1 %v13352_v0, %s6511_s13  ;;  %v2809_v0 = vsel %vm2807_vm6, %v2692_v56, 0.0  ;;  %v1277_v55 = vmul.f32 %v1213_v23, %v13238_v36  ;;  %v2776_v62 = vsel %vm541_vm1, %v2684_v54, 0.0  ;;  %v13361_v56 = vld [vmem:[#allocation20_spill] sm:$0xff]  ;;  %v8649_v38 = vadd.f32 %v1292_v34, %v1291_v35  ;;  %v13365_v23 = vld [vmem:[#allocation237_spill] sm:$0xff]  ;;  %v13370_v34 = vld [vmem:[#allocation231_spill] sm:$0xff] }
 0x304   : > { %5966 = vrot.lane.b32.xlu0 %v13354_v4, %s6511_s13  ;;  %v13358_v4 = vld [vmem:[#allocation222_spill] sm:$0xff]  ;;  %v2777_v1 = vsel %vm541_vm1, %v2690_v24, 0.0  ;;  %v1307_v27 = vadd.f32 %v1306_v31, %v1305_v41  ;;  %v2794_v15 = vadd.f32 %v2793_v32, %v2792_v33  ;;  %v2810_v42 = vadd.f32 %v2809_v0, %v2808_v28  ;;  %v13367_v31 = vld [vmem:[#allocation27_spill] sm:$0xff] }
 0x305   : > { %v2696_v45 = vmul.f32 %v13358_v4, %v13308_v7  ;;  %v1308_v4 = vsel %vm1294_vm4, %v1275_v9, 0.0  ;;  %v13363_v7 = vld [vmem:[#allocation21_spill] sm:$0xff]  ;;  %v2778_v54 = vadd.f32 %v2777_v1, %v2776_v62  ;;  %v2764_v36 = vsel %vm525_vm0, %v2695_v20, 0.0  ;;  %v13368_v9 = vld [vmem:[#allocation232_spill] sm:$0xff] }
 0x306   : > { %v2698_v26 = vmul.f32 %v13364_v25, %v13363_v7  ;;  %v2704_v35 = vmul.f32 %v13368_v9, %v13367_v31  ;;  %v13369_v25 = vld [vmem:[#allocation26_spill] sm:$0xff]  ;;  %v8667_v0 = vadd.f32 %v1308_v4, %v1307_v27  ;;  %v1322_v32 = vadd.f32 %v1321_v63, %v1320_v30 }
 0x307   : > { %5971 = vrot.lane.b32.xlu1 %v13357_v12, %s6511_s13  ;;  %v2697_v12 = vmul.f32 %v13362_v5, %v13361_v56  ;;  %v2779_v24 = vsel %vm541_vm1, %v2696_v45, 0.0  ;;  %v13366_v5 = vld [vmem:[#allocation238_spill] sm:$0xff]  ;;  %v2703_v28 = vmul.f32 %v13370_v34, %v13369_v25  ;;  %v13372_v45 = vld [vmem:[#allocation233_spill] sm:$0xff]  ;;  %v1323_v62 = vsel %vm1278_vm5, %v1276_v29, 0.0  ;;  %v13376_v34 = vld [vmem:[#allocation239_spill] sm:$0xff] }
 0x308   : > { %5976 = vrot.lane.b32.xlu0 %v13360_v57, %s6511_s13  ;;  %v2763_v57 = vadd.f32 %v2762_v8, %v2761_v58  ;;  %v13371_v58 = vld [vmem:[#allocation234_spill] sm:$0xff]  ;;  %v2811_v8 = vsel %vm2807_vm6, %v2698_v26, 0.0  ;;  %v2701_v20 = vmul.f32 %v13372_v45, %v13318_v21  ;;  %v1335_v1 = vadd.f32 %v8594_v43, %v8580_v61  ;;  %v13375_v43 = vld [vmem:[#allocation241_spill] sm:$0xff] }
 0x309   : > { %v2795_v41 = vsel %vm2791_vm7, %v2697_v12, 0.0  ;;  %v2702_v33 = vmul.f32 %v13371_v58, %v13319_v6  ;;  %v1336_v12 = vsel %vm1294_vm4, %v1273_v17, 0.0  ;;  %v2780_v9 = vadd.f32 %v2779_v24, %v2778_v54  ;;  %v13374_v30 = vld [vmem:[#allocation246_spill] sm:$0xff] }
 0x30a   : > { %v2796_v27 = vadd.f32 %v2795_v41, %v2794_v15  ;;  %v2812_v63 = vadd.f32 %v2811_v8, %v2810_v42  ;;  %v2813_v4 = vsel %vm2807_vm6, %v2704_v35, 0.0  ;;  %v2797_v26 = vsel %vm2791_vm7, %v2703_v28, 0.0  ;;  %v13378_v15 = vld [vmem:[#allocation245_spill] sm:$0xff]  ;;  %v13379_v41 = vld [vmem:[#allocation32_spill] sm:$0xff]  ;;  %v13382_v8 = vld [vmem:[#allocation247_spill] sm:$0xff] }
 0x30b   : > { %5981 = vrot.lane.b32.xlu1 %v13365_v23, %s6511_s13  ;;  %v13373_v23 = vld [vmem:[#allocation242_spill] sm:$0xff]  ;;  %v2781_v29 = vsel %vm541_vm1, %v2702_v33, 0.0  ;;  %v2766_v61 = vsel %vm525_vm0, %v2701_v20, 0.0  ;;  %v2708_v17 = vmul.f32 %v13375_v43, %v13325_v19  ;;  %v1324_v24 = vadd.f32 %v1323_v62, %v1322_v32  ;;  %v13380_v35 = vld [vmem:[#allocation244_spill] sm:$0xff] }
 0x30c   : > { %5986 = vrot.lane.b32.xlu0 %v13366_v5, %s6511_s13  ;;  %v2765_v5 = vadd.f32 %v2764_v36, %v2763_v57  ;;  %v2707_v36 = vmul.f32 %v13376_v34, %v13324_v39  ;;  %v13377_v57 = vld [vmem:[#allocation33_spill] sm:$0xff]  ;;  %v1338_v42 = vsel %vm1294_vm4, %v1277_v55, 0.0  ;;  %v2709_v58 = vmul.f32 %v13380_v35, %v13379_v41  ;;  %v13381_v28 = vld [vmem:[#allocation248_spill] sm:$0xff]  ;;  %v13383_v45 = vld [vmem:[#allocation50_spill] sm:$0xff] }
 0x30d   : > { %v2710_v54 = vmul.f32 %v13378_v15, %v13377_v57  ;;  %v1337_v33 = vadd.f32 %v1336_v12, %v1335_v1  ;;  %v1013_v20 = vadd.f32 %v8359_v48, %v13383_v45  ;;  %v2814_v32 = vadd.f32 %v2813_v4, %v2812_v63  ;;  %v13385_v35 = vld [vmem:[#allocation255_spill] sm:$0xff]  ;;  %v13386_v48 = vld [vmem:[#allocation48_spill] sm:$0xff] }
 0x30e   : > { %v2767_v62 = vadd.f32 %v2766_v61, %v2765_v5  ;;  %v2782_v55 = vadd.f32 %v2781_v29, %v2780_v9  ;;  %v2783_v43 = vsel %vm541_vm1, %v2708_v17, 0.0  ;;  %v2768_v34 = vsel %vm525_vm0, %v2707_v36, 0.0  ;;  %v13389_v4 = vld [vmem:[#allocation39_spill] sm:$0xff]  ;;  %v13400_v45 = vld [vmem:[#allocation252_spill] sm:$0xff] }
 0x30f   : > { %5991 = vrot.lane.b32.xlu1 %v13373_v23, %s6511_s13  ;;  %v1014_v23 = vsel %vm541_vm1, %v8559_v52, 0.0  ;;  %v2815_v15 = vsel %vm2807_vm6, %v2710_v54, 0.0  ;;  %v2799_v12 = vsel %vm2791_vm7, %v2709_v58, 0.0  ;;  %v998_v52 = vadd.f32 %v8362_v3, %v13386_v48  ;;  %v13391_v61 = vld [vmem:[#allocation207_spill] sm:$0xff]  ;;  %v13393_v3 = vld [vmem:[#allocation249_spill] sm:$0xff]  ;;  %v13407_v48 = vld [vmem:[#allocation106_spill] sm:$0xff] }
 0x310   : > { %5996 = vrot.lane.b32.xlu0 %v13374_v30, %s6511_s13  ;;  %v2798_v30 = vadd.f32 %v2797_v26, %v2796_v27  ;;  %v8704_v1 = vadd.f32 %v1014_v23, %v1013_v20  ;;  %v999_v5 = vsel %vm525_vm0, %v8554_v60, 0.0  ;;  %v1339_v9 = vadd.f32 %v1338_v42, %v1337_v33  ;;  %v13387_v27 = vld [vmem:[#allocation208_spill] sm:$0xff]  ;;  %v13390_v26 = vld [vmem:[#allocation251_spill] sm:$0xff]  ;;  %v13398_v33 = vld [vmem:[#allocation38_spill] sm:$0xff] }
 0x311   : > { %v8715_v63 = vmul.f32 %v13387_v27, %v13145_v10  ;;  %v2716_v29 = vmul.f32 %v13390_v26, %v13389_v4  ;;  %v8723_v17 = vmul.f32 %v13391_v61, %v13143_v18  ;;  %v8725_v36 = vadd.f32 %v2768_v34, %v2767_v62  ;;  %v13401_v23 = vld [vmem:[#allocation47_spill] sm:$0xff]  ;;  %v13402_v34 = vld [vmem:[#allocation57_spill] sm:$0xff]  ;;  %v13412_v61 = vld [vmem:[#allocation178_spill] sm:$0xff] }
 0x312   : > { %13384 = vst [vmem:[#allocation63_spill] sm:$0xff] %v8704_v1  ;;  %v2713_v60 = vmul.f32 %v13393_v3, %v13334_v47  ;;  %v8729_v54 = vadd.f32 %v999_v5, %v998_v52  ;;  %v8731_v42 = vadd.f32 %v2783_v43, %v2782_v55  ;;  %v8733_v58 = vadd.f32 %v2799_v12, %v2798_v30  ;;  %v13405_v43 = vld [vmem:[#allocation46_spill] sm:$0xff] }
 0x313   : > { %6001 = vrot.lane.b32.xlu1 %v13381_v28, %s6511_s13  ;;  %13388 = vst [vmem:[#allocation126_spill] sm:$0xff] %v8715_v63  ;;  %13392 = vst [vmem:[#allocation127_spill] sm:$0xff] %v8725_v36  ;;  %v8735_v28 = vadd.f32 %v2815_v15, %v2814_v32  ;;  %v2714_v20 = vmul.f32 %v13400_v45, %v13339_v46  ;;  %v1043_v62 = vadd.f32 %v8356_v53, %v13401_v23  ;;  %v13404_v32 = vld [vmem:[#allocation259_spill] sm:$0xff]  ;;  %v13406_v15 = vld [vmem:[#allocation54_spill] sm:$0xff]  ;;  %vm2745_vm8 = vcmask 7170  }
 0x314   : > { %6006 = vrot.lane.b32.xlu0 %v13382_v8, %s6511_s13  ;;  %13394 = vst [vmem:[#allocation128_spill] sm:$0xff] %v8729_v54  ;;  %13395 = vst [vmem:[#allocation129_spill] sm:$0xff] %v8731_v42  ;;  %v13399_v8 = vld [vmem:[#allocation250_spill] sm:$0xff]  ;;  %v1044_v55 = vsel %vm541_vm1, %v13402_v34, 0.0  ;;  %v8748_v30 = vsel %vm2807_vm6, %v2716_v29, 0.0  ;;  %v1028_v12 = vadd.f32 %v13406_v15, %v13405_v43  ;;  %v13409_v53 = vld [vmem:[#allocation177_spill] sm:$0xff]  ;;  %v5699_v3 = vunpack.i.h.bf16 %v13412_v61 }
 0x315   : > { %13396 = vst [vmem:[#allocation130_spill] sm:$0xff] %v8733_v58  ;;  %13397 = vst [vmem:[#allocation131_spill] sm:$0xff] %v8735_v28  ;;  %v5694_v5 = vunpack.i.h.bf16 %v13409_v53  ;;  %v8761_v27 = vsel %vm525_vm0, %v2713_v60, 0.0  ;;  %v8763_v26 = vadd.f32 %v1044_v55, %v1043_v62  ;;  %v5693_v29 = vunpack.i.l.bf16 %v13409_v53  ;;  %v13415_v23 = vld [vmem:[#allocation180_spill] sm:$0xff]  ;;  %v13416_v60 = vld [vmem:[#allocation263_spill] sm:$0xff] }
 0x316   : > { %13403 = vst [vmem:[#allocation133_spill] sm:$0xff] %v8748_v30  ;;  %13410 = vst [vmem:[#allocation132_spill] sm:$0xff] %v8761_v27  ;;  %v5709_v34 = vunpack.i.h.bf16 %v13415_v23  ;;  %v8785_v43 = vsel %vm541_vm1, %v2714_v20, 0.0  ;;  %v13420_v15 = vld [vmem:[#allocation264_spill] sm:$0xff]  ;;  %v13425_v20 = vld [vmem:[#allocation179_spill] sm:$0xff] }
 0x317   : > { %6011 = vrot.lane.b32.xlu1 %v13385_v35, %s6511_s13  ;;  %v1029_v35 = vsel %vm525_vm0, %v8550_v40, 0.0  ;;  %13411 = vst [vmem:[#allocation206_spill] sm:$0xff] %v8763_v26  ;;  %13419 = vst [vmem:[#allocation211_spill] sm:$0xff] %v8785_v43  ;;  %v13435_v58 = vld [vmem:[#allocation262_spill] sm:$0xff]  ;;  %v13489_v54 = vld [vmem:[#allocation60_spill] sm:$0xff] }
 0x318   : > { %6016 = vrot.lane.b32.xlu0 %v8176_v2, %s6511_s13  ;;  %v2715_v2 = vmul.f32 %v13399_v8, %v13398_v33  ;;  %v5698_v8 = vunpack.i.l.bf16 %v13412_v61  ;;  %v8768_v45 = vadd.f32 %v1029_v35, %v1028_v12  ;;  %v13422_v12 = vld [vmem:[#allocation176_spill] sm:$0xff]  ;;  %v5704_v61 = vunpack.i.h.bf16 %v13425_v20 }
 0x31a   : > { %13413 = vst [vmem:[#allocation205_spill] sm:$0xff] %v8768_v45  ;;  %v8782_v55 = vsel %vm2791_vm7, %v2715_v2, 0.0  ;;  %v1895_v2 = vsel %vm541_vm1, %v5693_v29, %v5694_v5  ;;  %v1969_v43 = vmul.f32 %v5698_v8, %v13135_v11  ;;  %v13441_v11 = vld [vmem:[#allocation44_spill] sm:$0xff] }
 0x31b   : > { %6021 = vrot.lane.b32.xlu1 %v8209_v59, %s6511_s13  ;;  %v13408_v59 = vld [vmem:[#allocation115_spill] sm:$0xff]  ;;  %13418 = vst [vmem:[#allocation212_spill] sm:$0xff] %v8782_v55  ;;  %v13432_v55 = vld [vmem:[#allocation256_spill] sm:$0xff] }
 0x31c   : > { %6026 = vrot.lane.b32.xlu0 %v13404_v32, %s6511_s13  ;;  %v1473_v52 = vsel %vm541_vm1, %v13408_v59, %v13407_v48  ;;  %v8772_v40 = vmul.f32 %v13408_v59, %v8649_v38  ;;  %v5708_v32 = vunpack.i.l.bf16 %v13415_v23  ;;  %v13421_v38 = vld [vmem:[#allocation109_spill] sm:$0xff]  ;;  %v8793_v48 = vmul.f32 %v13422_v12, %v1324_v24 }
 0x31d   : > { %v8779_v62 = vmul.f32 %v1473_v52, %v8667_v0  ;;  %v1474_v35 = vsel %vm541_vm1, %v13422_v12, %v13421_v38  ;;  %v13424_v59 = vld [vmem:[#allocation181_spill] sm:$0xff]  ;;  %v1896_v52 = vsel %vm541_vm1, %v5698_v8, %v5699_v3  ;;  %v5703_v23 = vunpack.i.l.bf16 %v13425_v20  ;;  %v13431_v3 = vld [vmem:[#allocation10_spill] sm:$0xff] }
 0x31e   : > { %13414 = vst [vmem:[#allocation86_spill] sm:$0xff] %v8772_v40  ;;  %13423 = vst [vmem:[#allocation135_spill] sm:$0xff] %v8793_v48  ;;  %v5714_v53 = vunpack.i.h.bf16 %v13424_v59  ;;  %v5713_v0 = vunpack.i.l.bf16 %v13424_v59  ;;  %v13427_v24 = vld [vmem:[#allocation257_spill] sm:$0xff]  ;;  %v8810_v5 = vmul.f32 %v1474_v35, %v1339_v9  ;;  %v1967_v28 = vmul.f32 %v5693_v29, %v13431_v3 }
 0x31f   : > { %6031 = vrot.lane.b32.xlu1 %v13416_v60, %s6511_s13  ;;  %13417 = vst [vmem:[#allocation85_spill] sm:$0xff] %v8779_v62  ;;  %v1898_v60 = vsel %vm541_vm1, %v5708_v32, %v5709_v34  ;;  %v8806_v12 = vmul.f32 %v13427_v24, %v13224_v50  ;;  %v13429_v59 = vld [vmem:[#allocation269_spill] sm:$0xff]  ;;  %v8815_v20 = vmul.f32 %v13432_v55, %v13223_v44  ;;  %v13438_v24 = vld [vmem:[#allocation11_spill] sm:$0xff] }
 0x320   : > { %6036 = vrot.lane.b32.xlu0 %v13420_v15, %s6511_s13  ;;  %v13426_v15 = vld [vmem:[#allocation182_spill] sm:$0xff]  ;;  %13430 = vst [vmem:[#allocation62_spill] sm:$0xff] %v8810_v5  ;;  %v13434_v34 = vld [vmem:[#allocation45_spill] sm:$0xff]  ;;  %v1970_v9 = vmul.f32 %v1896_v52, %v13136_v13  ;;  %v1899_v35 = vsel %vm541_vm1, %v5713_v0, %v5714_v53  ;;  %v1897_v29 = vsel %vm541_vm1, %v5703_v23, %v5704_v61  ;;  %v13439_v5 = vld [vmem:[#allocation183_spill] sm:$0xff] }
 0x321   : > { %v5719_v30 = vunpack.i.h.bf16 %v13426_v15  ;;  %v5718_v38 = vunpack.i.l.bf16 %v13426_v15  ;;  %13428 = vst [vmem:[#allocation134_spill] sm:$0xff] %v8806_v12  ;;  %13433 = vst [vmem:[#allocation67_spill] sm:$0xff] %v8815_v20  ;;  %v8819_v48 = vmul.f32 %v13435_v58, %v13434_v34  ;;  %v13437_v15 = vld [vmem:[#allocation270_spill] sm:$0xff]  ;;  %v1968_v12 = vmul.f32 %v1895_v2, %v13438_v24  ;;  %v13440_v13 = vld [vmem:[#allocation184_spill] sm:$0xff] }
 0x322   : > { %v1971_v55 = vmul.f32 %v5703_v23, %v13346_v14  ;;  %v1974_v58 = vmul.f32 %v1898_v60, %v13145_v10  ;;  %v5724_v2 = vunpack.i.h.bf16 %v13439_v5  ;;  %v5723_v8 = vunpack.i.l.bf16 %v13439_v5  ;;  %v13442_v23 = vld [vmem:[#allocation261_spill] sm:$0xff]  ;;  %v13450_v62 = vld [vmem:[#allocation19_spill] sm:$0xff] }
 0x323   : > { %6041 = vrot.lane.b32.xlu1 %v13429_v59, %s6511_s13  ;;  %13436 = vst [vmem:[#allocation68_spill] sm:$0xff] %v8819_v48  ;;  %v1973_v59 = vmul.f32 %v5708_v32, %v13143_v18  ;;  %v1975_v48 = vmul.f32 %v5713_v0, %v13147_v16  ;;  %v1976_v52 = vmul.f32 %v1899_v35, %v13148_v37  ;;  %v5729_v53 = vunpack.i.h.bf16 %v13440_v13  ;;  %v13444_v18 = vld [vmem:[#allocation185_spill] sm:$0xff]  ;;  %v13448_v16 = vld [vmem:[#allocation23_spill] sm:$0xff] }
 0x324   : > { %6046 = vrot.lane.b32.xlu0 %v13437_v15, %s6511_s13  ;;  %v1900_v15 = vsel %vm541_vm1, %v5718_v38, %v5719_v30  ;;  %v5728_v61 = vunpack.i.l.bf16 %v13440_v13  ;;  %v8840_v14 = vmul.f32 %v13442_v23, %v13441_v11  ;;  %v2016_v32 = vsel %vm2015_vm12, %v1967_v28, 0.0 }
 0x325   : > { %v2032_v0 = vsel %vm2031_vm13, %v1968_v12, 0.0  ;;  %v2047_v30 = vsel %vm1278_vm5, %v1969_v43, 0.0  ;;  %v2062_v60 = vsel %vm1294_vm4, %v1970_v9, 0.0  ;;  %v1972_v5 = vmul.f32 %v1897_v29, %v13344_v22  ;;  %v13445_v22 = vld [vmem:[#allocation186_spill] sm:$0xff] }
 0x326   : > { %13443 = vst [vmem:[#allocation137_spill] sm:$0xff] %v8840_v14  ;;  %v2078_v35 = vsel %vm2077_vm14, %v1971_v55, 0.0  ;;  %v1977_v37 = vmul.f32 %v5718_v38, %v13350_v49  ;;  %v1978_v13 = vmul.f32 %v1900_v15, %v13348_v51  ;;  %v2017_v10 = vsel %vm2015_vm12, %v1973_v59, 0.0  ;;  %v13446_v51 = vld [vmem:[#allocation187_spill] sm:$0xff]  ;;  %v13447_v49 = vld [vmem:[#allocation22_spill] sm:$0xff] }
 0x327   : > { %v2033_v23 = vsel %vm2031_vm13, %v1974_v58, 0.0  ;;  %v2048_v28 = vsel %vm1278_vm5, %v1975_v48, 0.0  ;;  %v1901_v12 = vsel %vm541_vm1, %v5723_v8, %v5724_v2  ;;  %v2063_v43 = vsel %vm1294_vm4, %v1976_v52, 0.0 }
 0x328   : > { %v1902_v9 = vsel %vm541_vm1, %v5728_v61, %v5729_v53  ;;  %v5734_v29 = vunpack.i.h.bf16 %v13444_v18  ;;  %v5733_v55 = vunpack.i.l.bf16 %v13444_v18  ;;  %v5739_v38 = vunpack.i.h.bf16 %v13445_v22  ;;  %v13449_v18 = vld [vmem:[#allocation18_spill] sm:$0xff] }
 0x329   : > { %v5738_v15 = vunpack.i.l.bf16 %v13445_v22  ;;  %v5744_v59 = vunpack.i.h.bf16 %v13446_v51  ;;  %v5743_v58 = vunpack.i.l.bf16 %v13446_v51  ;;  %v2079_v48 = vsel %vm2077_vm14, %v1977_v37, 0.0 }
 0x32a   : > { %v2095_v2 = vsel %vm2093_vm15, %v1978_v13, 0.0  ;;  %v1979_v52 = vmul.f32 %v5723_v8, %v13447_v49  ;;  %v1980_v53 = vmul.f32 %v1901_v12, %v13448_v16  ;;  %v2094_v14 = vsel %vm2093_vm15, %v1972_v5, 0.0 }
 0x32b   : > { %v2018_v42 = vadd.f32 %v2017_v10, %v2016_v32  ;;  %v1981_v40 = vmul.f32 %v5728_v61, %v13449_v18  ;;  %v1982_v20 = vmul.f32 %v1902_v9, %v13450_v62  ;;  %v2034_v22 = vadd.f32 %v2033_v23, %v2032_v0  ;;  %v13451_v10 = vld [vmem:[#allocation188_spill] sm:$0xff] }
 0x32c   : > { %v2049_v27 = vadd.f32 %v2048_v28, %v2047_v30  ;;  %v2064_v36 = vadd.f32 %v2063_v43, %v2062_v60  ;;  %v1903_v51 = vsel %vm541_vm1, %v5733_v55, %v5734_v29  ;;  %v2080_v45 = vadd.f32 %v2079_v48, %v2078_v35  ;;  %v13452_v35 = vld [vmem:[#allocation28_spill] sm:$0xff]  ;;  %v13453_v28 = vld [vmem:[#allocation29_spill] sm:$0xff] }
 0x32d   : > { %v2096_v37 = vadd.f32 %v2095_v2, %v2094_v14  ;;  %v1904_v13 = vsel %vm541_vm1, %v5738_v15, %v5739_v38  ;;  %v1905_v8 = vsel %vm541_vm1, %v5743_v58, %v5744_v59  ;;  %v2019_v12 = vsel %vm2015_vm12, %v1979_v52, 0.0  ;;  %v13454_v59 = vld [vmem:[#allocation189_spill] sm:$0xff]  ;;  %v13456_v52 = vld [vmem:[#allocation268_spill] sm:$0xff] }
 0x32e   : > { %v2035_v5 = vsel %vm2031_vm13, %v1980_v53, 0.0  ;;  %v5749_v32 = vunpack.i.h.bf16 %v13451_v10  ;;  %v5748_v61 = vunpack.i.l.bf16 %v13451_v10  ;;  %v2050_v0 = vsel %vm1278_vm5, %v1981_v40, 0.0  ;;  %v13455_v40 = vld [vmem:[#allocation58_spill] sm:$0xff] }
 0x32f   : > { %v2065_v30 = vsel %vm1294_vm4, %v1982_v20, 0.0  ;;  %v1983_v60 = vmul.f32 %v5733_v55, %v13361_v56  ;;  %v1984_v14 = vmul.f32 %v1903_v51, %v13363_v7  ;;  %v1985_v23 = vmul.f32 %v5738_v15, %v13452_v35  ;;  %v13458_v10 = vld [vmem:[#allocation190_spill] sm:$0xff] }
 0x330   : > { %v1986_v43 = vmul.f32 %v1904_v13, %v13453_v28  ;;  %v1987_v9 = vmul.f32 %v5743_v58, %v13318_v21  ;;  %v1988_v29 = vmul.f32 %v1905_v8, %v13319_v6  ;;  %v2020_v38 = vadd.f32 %v2019_v12, %v2018_v42 }
 0x331   : > { %v5754_v48 = vunpack.i.h.bf16 %v13454_v59  ;;  %v5753_v2 = vunpack.i.l.bf16 %v13454_v59  ;;  %v8888_v20 = vmul.f32 %v13456_v52, %v13455_v40  ;;  %v2036_v55 = vadd.f32 %v2035_v5, %v2034_v22 }
 0x332   : > { %v2051_v53 = vadd.f32 %v2050_v0, %v2049_v27  ;;  %v2066_v51 = vadd.f32 %v2065_v30, %v2064_v36  ;;  %v1906_v15 = vsel %vm541_vm1, %v5748_v61, %v5749_v32  ;;  %v2081_v13 = vsel %vm2077_vm14, %v1983_v60, 0.0  ;;  %v13459_v32 = vld [vmem:[#allocation34_spill] sm:$0xff]  ;;  %v13460_v30 = vld [vmem:[#allocation191_spill] sm:$0xff] }
 0x333   : > { %13457 = vst [vmem:[#allocation136_spill] sm:$0xff] %v8888_v20  ;;  %v2097_v58 = vsel %vm2093_vm15, %v1984_v14, 0.0  ;;  %v5759_v8 = vunpack.i.h.bf16 %v13458_v10  ;;  %v5758_v42 = vunpack.i.l.bf16 %v13458_v10  ;;  %v2021_v12 = vsel %vm2015_vm12, %v1985_v23, 0.0  ;;  %v13461_v10 = vld [vmem:[#allocation76_spill] sm:$0xff] }
 0x334   : > { %v2037_v59 = vsel %vm2031_vm13, %v1986_v43, 0.0  ;;  %v2052_v52 = vsel %vm1278_vm5, %v1987_v9, 0.0  ;;  %v2067_v22 = vsel %vm1294_vm4, %v1988_v29, 0.0  ;;  %v1989_v36 = vmul.f32 %v5748_v61, %v13369_v25  ;;  %v13462_v43 = vld [vmem:[#allocation77_spill] sm:$0xff]  ;;  %v13463_v25 = vld [vmem:[#allocation35_spill] sm:$0xff] }
 0x335   : > { %v1990_v27 = vmul.f32 %v1906_v15, %v13367_v31  ;;  %v1907_v5 = vsel %vm541_vm1, %v5753_v2, %v5754_v48  ;;  %v1991_v0 = vmul.f32 %v5753_v2, %v13459_v32  ;;  %v5764_v60 = vunpack.i.h.bf16 %v13460_v30 }
 0x336   : > { %v5763_v14 = vunpack.i.l.bf16 %v13460_v30  ;;  %v1061_v23 = vsel %vm541_vm1, %v13461_v10, 0.0  ;;  %v1062_v9 = vsel %vm541_vm1, %v13462_v43, 0.0  ;;  %v2082_v6 = vadd.f32 %v2081_v13, %v2080_v45 }
 0x337   : > { %v2098_v29 = vadd.f32 %v2097_v58, %v2096_v37  ;;  %v2022_v7 = vadd.f32 %v2021_v12, %v2020_v38  ;;  %v1908_v61 = vsel %vm541_vm1, %v5758_v42, %v5759_v8  ;;  %v2038_v15 = vadd.f32 %v2037_v59, %v2036_v55  ;;  %v13464_v38 = vld [vmem:[#allocation78_spill] sm:$0xff]  ;;  %v13466_v58 = vld [vmem:[#allocation64_spill] sm:$0xff]  ;;  %v13467_v12 = vld [vmem:[#allocation65_spill] sm:$0xff] }
 0x338   : > { %v2053_v31 = vadd.f32 %v2052_v52, %v2051_v53  ;;  %v2068_v48 = vadd.f32 %v2067_v22, %v2066_v51  ;;  %v1992_v2 = vmul.f32 %v1907_v5, %v13463_v25  ;;  %v2083_v62 = vsel %vm2077_vm14, %v1989_v36, 0.0  ;;  %v13465_v53 = vld [vmem:[#allocation192_spill] sm:$0xff]  ;;  %v13468_v22 = vld [vmem:[#allocation193_spill] sm:$0xff] }
 0x339   : > { %v2099_v30 = vsel %vm2093_vm15, %v1990_v27, 0.0  ;;  %v2023_v56 = vsel %vm2015_vm12, %v1991_v0, 0.0  ;;  %v1063_v21 = vadd.f32 %v1062_v9, %v1061_v23  ;;  %v1993_v18 = vmul.f32 %v5758_v42, %v13324_v39 }
 0x33a   : > { %v1994_v45 = vmul.f32 %v1908_v61, %v13325_v19  ;;  %v1909_v37 = vsel %vm541_vm1, %v5763_v14, %v5764_v60  ;;  %v1064_v55 = vsel %vm541_vm1, %v13464_v38, 0.0  ;;  %v5769_v51 = vunpack.i.h.bf16 %v13465_v53 }
 0x33b   : > { %v5768_v13 = vunpack.i.l.bf16 %v13465_v53  ;;  %v1046_v8 = vsel %vm525_vm0, %v13466_v58, 0.0  ;;  %v1047_v59 = vsel %vm525_vm0, %v13467_v12, 0.0  ;;  %v2084_v52 = vadd.f32 %v2083_v62, %v2082_v6  ;;  %v13469_v53 = vld [vmem:[#allocation79_spill] sm:$0xff] }
 0x33c   : > { %v1995_v42 = vmul.f32 %v5763_v14, %v13379_v41  ;;  %v5774_v36 = vunpack.i.h.bf16 %v13468_v22  ;;  %v5773_v27 = vunpack.i.l.bf16 %v13468_v22  ;;  %v2100_v5 = vadd.f32 %v2099_v30, %v2098_v29  ;;  %v13470_v14 = vld [vmem:[#allocation40_spill] sm:$0xff]  ;;  %v13471_v22 = vld [vmem:[#allocation66_spill] sm:$0xff] }
 0x33d   : > { %v2024_v0 = vadd.f32 %v2023_v56, %v2022_v7  ;;  %v2039_v60 = vsel %vm2031_vm13, %v1992_v2, 0.0  ;;  %v1065_v23 = vadd.f32 %v1064_v55, %v1063_v21  ;;  %v2054_v9 = vsel %vm1278_vm5, %v1993_v18, 0.0  ;;  %v13472_v29 = vld [vmem:[#allocation194_spill] sm:$0xff] }
 0x33e   : > { %v1996_v61 = vmul.f32 %v1909_v37, %v13377_v57  ;;  %v1066_v19 = vsel %vm541_vm1, %v13469_v53, 0.0  ;;  %v1048_v39 = vadd.f32 %v1047_v59, %v1046_v8  ;;  %v2069_v6 = vsel %vm1294_vm4, %v1994_v45, 0.0  ;;  %v13473_v37 = vld [vmem:[#allocation195_spill] sm:$0xff]  ;;  %v13474_v8 = vld [vmem:[#allocation41_spill] sm:$0xff]  ;;  %v13475_v57 = vld [vmem:[#allocation80_spill] sm:$0xff] }
 0x33f   : > { %v1910_v62 = vsel %vm541_vm1, %v5768_v13, %v5769_v51  ;;  %v1997_v41 = vmul.f32 %v5768_v13, %v13470_v14  ;;  %v1049_v7 = vsel %vm525_vm0, %v13471_v22, 0.0  ;;  %v2085_v56 = vsel %vm2077_vm14, %v1995_v42, 0.0 }
 0x340   : > { %v1911_v21 = vsel %vm541_vm1, %v5773_v27, %v5774_v36  ;;  %v1999_v18 = vmul.f32 %v5773_v27, %v13334_v47  ;;  %v5779_v2 = vunpack.i.h.bf16 %v13472_v29  ;;  %v5778_v30 = vunpack.i.l.bf16 %v13472_v29  ;;  %v13476_v29 = vld [vmem:[#allocation69_spill] sm:$0xff] }
 0x341   : > { %v5784_v55 = vunpack.i.h.bf16 %v13473_v37  ;;  %v5783_v45 = vunpack.i.l.bf16 %v13473_v37  ;;  %v1067_v51 = vadd.f32 %v1066_v19, %v1065_v23  ;;  %v2101_v13 = vsel %vm2093_vm15, %v1996_v61, 0.0 }
 0x342   : > { %v1998_v59 = vmul.f32 %v1910_v62, %v13474_v8  ;;  %v1068_v42 = vsel %vm541_vm1, %v13475_v57, 0.0  ;;  %v1050_v20 = vadd.f32 %v1049_v7, %v1048_v39  ;;  %v8949_v36 = vadd.f32 %v2039_v60, %v2038_v15  ;;  %v13477_v7 = vld [vmem:[#allocation81_spill] sm:$0xff] }
 0x343   : > { %v2025_v27 = vsel %vm2015_vm12, %v1997_v41, 0.0  ;;  %v2000_v47 = vmul.f32 %v1911_v21, %v13339_v46  ;;  %v1051_v26 = vsel %vm525_vm0, %v13476_v29, 0.0  ;;  %v2055_v14 = vadd.f32 %v2054_v9, %v2053_v31  ;;  %v13478_v9 = vld [vmem:[#allocation70_spill] sm:$0xff] }
 0x344   : > { %v8955_v37 = vadd.f32 %v2069_v6, %v2068_v48  ;;  %v2086_v19 = vadd.f32 %v2085_v56, %v2084_v52  ;;  %v2056_v23 = vsel %vm1278_vm5, %v1999_v18, 0.0  ;;  %v8958_v61 = vadd.f32 %v2101_v13, %v2100_v5 }
 0x345   : > { %v1912_v62 = vsel %vm541_vm1, %v5778_v30, %v5779_v2  ;;  %v1913_v39 = vsel %vm541_vm1, %v5783_v45, %v5784_v55  ;;  %v1069_v15 = vadd.f32 %v1068_v42, %v1067_v51  ;;  %v2026_v60 = vadd.f32 %v2025_v27, %v2024_v0  ;;  %v13479_v0 = vld [vmem:[#allocation49_spill] sm:$0xff]  ;;  %v13480_v2 = vld [vmem:[#allocation52_spill] sm:$0xff]  ;;  %v13483_v42 = vld [vmem:[#allocation198_spill] sm:$0xff] }
 0x346   : > { %v8963_v41 = vsel %vm2031_vm13, %v1998_v59, 0.0  ;;  %v1070_v21 = vsel %vm541_vm1, %v13477_v7, 0.0  ;;  %v1052_v31 = vadd.f32 %v1051_v26, %v1050_v20  ;;  %v8967_v48 = vadd.f32 %v2056_v23, %v2055_v14  ;;  %v13481_v51 = vld [vmem:[#allocation196_spill] sm:$0xff]  ;;  %v13482_v20 = vld [vmem:[#allocation197_spill] sm:$0xff]  ;;  %v13484_v23 = vld [vmem:[#allocation82_spill] sm:$0xff] }
 0x347   : > { %v8970_v52 = vsel %vm1294_vm4, %v2000_v47, 0.0  ;;  %v2001_v5 = vmul.f32 %v5778_v30, %v13398_v33  ;;  %v1053_v6 = vsel %vm525_vm0, %v13478_v9, 0.0  ;;  %v2002_v56 = vmul.f32 %v1912_v62, %v13389_v4 }
 0x348   : > { %v2003_v18 = vmul.f32 %v5783_v45, %v13479_v0  ;;  %v2004_v55 = vmul.f32 %v1913_v39, %v13480_v2  ;;  %v5788_v13 = vunpack.i.l.bf16 %v13481_v51  ;;  %v5789_v26 = vunpack.i.h.bf16 %v13481_v51  ;;  %v13485_v39 = vld [vmem:[#allocation199_spill] sm:$0xff] }
 0x349   : > { %v5794_v14 = vunpack.i.h.bf16 %v13482_v20  ;;  %v5793_v47 = vunpack.i.l.bf16 %v13482_v20  ;;  %v1071_v59 = vadd.f32 %v1070_v21, %v1069_v15  ;;  %v5799_v30 = vunpack.i.h.bf16 %v13483_v42  ;;  %v13486_v51 = vld [vmem:[#allocation71_spill] sm:$0xff]  ;;  %v13487_v21 = vld [vmem:[#allocation200_spill] sm:$0xff] }
 0x34a   : > { %v5798_v27 = vunpack.i.l.bf16 %v13483_v42  ;;  %v1072_v62 = vsel %vm541_vm1, %v13484_v23, 0.0  ;;  %v1054_v46 = vadd.f32 %v1053_v6, %v1052_v31  ;;  %v2087_v45 = vsel %vm2077_vm14, %v2001_v5, 0.0 }
 0x34b   : > { %v5804_v4 = vunpack.i.h.bf16 %v13485_v39  ;;  %v5803_v33 = vunpack.i.l.bf16 %v13485_v39  ;;  %v1055_v2 = vsel %vm525_vm0, %v13486_v51, 0.0  ;;  %v8992_v20 = vsel %vm2093_vm15, %v2002_v56, 0.0 }
 0x34c   : > { %v2005_v15 = vmul.f32 %v5788_v13, %v13223_v44  ;;  %v5809_v42 = vunpack.i.h.bf16 %v13487_v21  ;;  %v5808_v0 = vunpack.i.l.bf16 %v13487_v21  ;;  %v1914_v31 = vsel %vm541_vm1, %v5788_v13, %v5789_v26  ;;  %v13491_v44 = vld [vmem:[#allocation83_spill] sm:$0xff] }
 0x34d   : > { %v1915_v5 = vsel %vm541_vm1, %v5793_v47, %v5794_v14  ;;  %v2007_v6 = vmul.f32 %v5793_v47, %v13441_v11  ;;  %v1073_v39 = vadd.f32 %v1072_v62, %v1071_v59  ;;  %v1916_v25 = vsel %vm541_vm1, %v5798_v27, %v5799_v30  ;;  %v13492_v14 = vld [vmem:[#allocation72_spill] sm:$0xff]  ;;  %v13498_v11 = vld [vmem:[#allocation53_spill] sm:$0xff] }
 0x34e   : > { %v2009_v56 = vmul.f32 %v5798_v27, %v13489_v54  ;;  %v1074_v28 = vsel %vm541_vm1, %v13491_v44, 0.0  ;;  %v1056_v63 = vadd.f32 %v1055_v2, %v1054_v46  ;;  %v2088_v21 = vadd.f32 %v2087_v45, %v2086_v19  ;;  %v13494_v19 = vld [vmem:[#allocation56_spill] sm:$0xff]  ;;  %v13495_v2 = vld [vmem:[#allocation267_spill] sm:$0xff] }
 0x34f   : > { %v2027_v13 = vsel %vm2015_vm12, %v2003_v18, 0.0  ;;  %v1917_v26 = vsel %vm541_vm1, %v5803_v33, %v5804_v4  ;;  %v1057_v47 = vsel %vm525_vm0, %v13492_v14, 0.0  ;;  %v2006_v59 = vmul.f32 %v1914_v31, %v13224_v50  ;;  %v13499_v31 = vld [vmem:[#allocation55_spill] sm:$0xff] }
 0x350   : > { %v2058_v30 = vsel %vm1278_vm5, %v2005_v15, 0.0  ;;  %v2008_v27 = vmul.f32 %v1915_v5, %v13434_v34  ;;  %v1918_v62 = vsel %vm541_vm1, %v5808_v0, %v5809_v42  ;;  %v9020_v18 = vmul.f32 %v13495_v2, %v13494_v19  ;;  %v13501_v34 = vld [vmem:[#allocation73_spill] sm:$0xff] }
 0x351   : > { %v9000_v8 = vpop.permute.xlu1 %2612  ;;  %v1075_v45 = vadd.f32 %v1074_v28, %v1073_v39  ;;  %v2011_v54 = vmul.f32 %v5803_v33, %v13498_v11  ;;  %v2012_v50 = vmul.f32 %v1917_v26, %v13499_v31  ;;  %v2029_v15 = vsel %vm2015_vm12, %v2009_v56, 0.0  ;;  %v13502_v28 = vld [vmem:[#allocation266_spill] sm:$0xff]  ;;  %v13504_v39 = vld [vmem:[#allocation265_spill] sm:$0xff] }
 0x352   : > { %13488 = vst [vmem:[#allocation139_spill] sm:$0xff] %v9000_v8  ;;  %v9004_v1 = vpop.permute.xlu0 %2614  ;;  %v2089_v8 = vsel %vm2077_vm14, %v2007_v6, 0.0  ;;  %13496 = vst [vmem:[#allocation219_spill] sm:$0xff] %v9020_v18  ;;  %v1058_v42 = vadd.f32 %v1057_v47, %v1056_v63  ;;  %v9030_v6 = vmul.f32 %v5808_v0, %v13494_v19  ;;  %v2028_v2 = vadd.f32 %v2027_v13, %v2026_v60  ;;  %v13508_v47 = vld [vmem:[#allocation84_spill] sm:$0xff]  ;;  %v13516_v19 = vld [vmem:[#allocation175_spill] sm:$0xff] }
 0x353   : > { %13490 = vst [vmem:[#allocation138_spill] sm:$0xff] %v9004_v1  ;;  %v13493_v1 = vld [vmem:[#allocation61_spill] sm:$0xff]  ;;  %v9039_v33 = vmul.f32 %v13502_v28, %v13499_v31  ;;  %v9043_v56 = vmul.f32 %v13504_v39, %v13498_v11  ;;  %v2043_v63 = vsel %vm2031_vm13, %v2004_v55, 0.0  ;;  %vm2729_vm12 = vcmask 1047562  }
 0x354   : > { %v2010_v46 = vmul.f32 %v1916_v25, %v13493_v1  ;;  %v9033_v25 = vmul.f32 %v1918_v62, %v13455_v40  ;;  %v9046_v0 = vadd.f32 %v2029_v15, %v2028_v2  ;;  %v2042_v26 = vadd.f32 %v8963_v41, %v8949_v36 }
 0x355   : > { %v9022_v4 = vpop.permute.xlu1 %2616  ;;  %13503 = vst [vmem:[#allocation210_spill] sm:$0xff] %v9039_v33  ;;  %13505 = vst [vmem:[#allocation209_spill] sm:$0xff] %v9043_v56  ;;  %v1081_v13 = vrot.slane %v1075_v45, 7  ;;  %v1084_v62 = vrot.slane %v13508_v47, 7  ;;  %v9060_v39 = vsel %vm1294_vm4, %v2012_v50, 0.0  ;;  %v2823_v36 = vsel %vm2729_vm12, %v13466_v58, 0.0 }
 0x356   : > { %13497 = vst [vmem:[#allocation220_spill] sm:$0xff] %v9022_v4  ;;  %v9027_v5 = vpop.permute.xlu0 %2618  ;;  %v1059_v4 = vsel %vm525_vm0, %v13501_v34, 0.0  ;;  %13506 = vst [vmem:[#allocation214_spill] sm:$0xff] %v9046_v0  ;;  %v9054_v28 = vsel %vm2031_vm13, %v2010_v46, 0.0  ;;  %v9064_v2 = vadd.f32 %v2043_v63, %v2042_v26  ;;  %v2824_v41 = vsel %vm2729_vm12, %v13467_v12, 0.0  ;;  %v13512_v63 = vld [vmem:[#allocation174_spill] sm:$0xff] }
 0x357   : > { %13500 = vst [vmem:[#allocation203_spill] sm:$0xff] %v9027_v5  ;;  %v9057_v5 = vsel %vm1278_vm5, %v2011_v54, 0.0  ;;  %v1060_v15 = vadd.f32 %v1059_v4, %v1058_v42  ;;  %v9071_v46 = vadd.f32 %v2058_v30, %v8967_v48  ;;  %v9075_v54 = vadd.f32 %v8970_v52, %v8955_v37  ;;  %v13510_v4 = vld [vmem:[#allocation74_spill] sm:$0xff]  ;;  %v13514_v48 = vld [vmem:[#allocation91_spill] sm:$0xff] }
 0x358   : > { %v9078_v50 = vsel %vm1294_vm4, %v2006_v59, 0.0  ;;  %v1082_v45 = vrot.slane %v13510_v4, 7  ;;  %v1085_v58 = vsel %vm861_vm3, %v1081_v13, %v1084_v62  ;;  %v1097_v26 = vmul.f32 %v1084_v62, %v13512_v63  ;;  %v13513_v12 = vld [vmem:[#allocation90_spill] sm:$0xff] }
 0x359   : > { %v9050_v60 = vpop.permute.xlu1 %2620  ;;  %v2854_v30 = vsel %vm2791_vm7, %v13514_v48, 0.0  ;;  %v1080_v37 = vrot.slane %v1060_v15, 7  ;;  %v2825_v52 = vadd.f32 %v2824_v41, %v2823_v36  ;;  %v2838_v59 = vsel %vm2745_vm8, %v13461_v10, 0.0  ;;  %v13518_v48 = vld [vmem:[#allocation149_spill] sm:$0xff]  ;;  %v13520_v10 = vld [vmem:[#allocation168_spill] sm:$0xff] }
 0x35a   : > { %13507 = vst [vmem:[#allocation213_spill] sm:$0xff] %v9050_v60  ;;  %v9062_v55 = vpop.permute.xlu0 %2622  ;;  %v2853_v60 = vsel %vm2791_vm7, %v13513_v12, 0.0  ;;  %v2839_v40 = vsel %vm2745_vm8, %v13462_v43, 0.0  ;;  %v9096_v31 = vmul.f32 %v1082_v45, %v13516_v19  ;;  %v2826_v62 = vsel %vm2729_vm12, %v13471_v22, 0.0  ;;  %v13517_v12 = vld [vmem:[#allocation148_spill] sm:$0xff]  ;;  %v13522_v22 = vld [vmem:[#allocation95_spill] sm:$0xff] }
 0x35b   : > { %13509 = vst [vmem:[#allocation223_spill] sm:$0xff] %v9062_v55  ;;  %v2868_v11 = vsel %vm2807_vm6, %v13517_v12, 0.0  ;;  %v9105_v15 = vsel %vm2093_vm15, %v2008_v27, 0.0  ;;  %v9107_v36 = vadd.f32 %v2089_v8, %v2088_v21  ;;  %v1093_v41 = vmul.f32 %v1081_v13, %v13520_v10 }
 0x35c   : > { %13519 = vst [vmem:[#allocation204_spill] sm:$0xff] %v9105_v15  ;;  %v2855_v43 = vadd.f32 %v2854_v30, %v2853_v60  ;;  %v1095_v18 = vmul.f32 %v1085_v58, %v13508_v47  ;;  %v1103_v33 = vmax.f32 %v1097_v26, 1e-16  ;;  %v2856_v56 = vsel %vm2791_vm7, %v13522_v22, 0.0  ;;  %v13524_v26 = vld [vmem:[#allocation152_spill] sm:$0xff] }
 0x35d   : > { %v9081_v42 = vpop.permute.xlu1 %5931  ;;  %v2840_v12 = vadd.f32 %v2839_v40, %v2838_v59  ;;  %v2827_v27 = vadd.f32 %v2826_v62, %v2825_v52  ;;  %v2841_v8 = vsel %vm2745_vm8, %v13464_v38, 0.0  ;;  %v9123_v13 = vmul.f32 %v13520_v10, %v13520_v10  ;;  %v13525_v59 = vld [vmem:[#allocation166_spill] sm:$0xff]  ;;  %v13526_v62 = vld [vmem:[#allocation100_spill] sm:$0xff] }
 0x35e   : > { %13511 = vst [vmem:[#allocation215_spill] sm:$0xff] %v9081_v42  ;;  %v9089_v55 = vpop.permute.xlu0 %5936  ;;  %v2828_v58 = vsel %vm2729_vm12, %v13476_v29, 0.0  ;;  %v2871_v40 = vsel %vm2807_vm6, %v13524_v26, 0.0  ;;  %v1099_v30 = vmax.f32 %v1093_v41, 1e-16  ;;  %v9132_v52 = vmul.f32 %v13508_v47, %v13508_v47 }
 0x35f   : > { %13515 = vst [vmem:[#allocation226_spill] sm:$0xff] %v9089_v55  ;;  %v2869_v55 = vsel %vm2807_vm6, %v13518_v48, 0.0  ;;  %v1083_v48 = vsel %vm861_vm3, %v1080_v37, %v1082_v45  ;;  %v1092_v45 = vmul.f32 %v1080_v37, %v13525_v59  ;;  %6350 = vrsqrt.f32 %v1103_v33 }
 0x360   : > { %v2870_v21 = vadd.f32 %v2869_v55, %v2868_v11  ;;  %v2857_v11 = vadd.f32 %v2856_v56, %v2855_v43  ;;  %v1094_v55 = vmul.f32 %v1083_v48, %v13510_v4  ;;  %v2858_v22 = vsel %vm2791_vm7, %v13526_v62, 0.0  ;;  %v13527_v43 = vld [vmem:[#allocation155_spill] sm:$0xff] }
 0x361   : > { %v9110_v42 = vpop.permute.xlu1 %5941  ;;  %v2842_v60 = vadd.f32 %v2841_v8, %v2840_v12  ;;  %v2843_v41 = vsel %vm2745_vm8, %v13469_v53, 0.0  ;;  %v2830_v56 = vsel %vm2729_vm12, %v13478_v9, 0.0  ;;  %v2873_v33 = vsel %vm2807_vm6, %v13527_v43, 0.0  ;;  %v13528_v53 = vld [vmem:[#allocation104_spill] sm:$0xff] }
 0x362   : > { %13521 = vst [vmem:[#allocation216_spill] sm:$0xff] %v9110_v42  ;;  %v9115_v1 = vpop.permute.xlu0 %5946  ;;  %v2829_v42 = vadd.f32 %v2828_v58, %v2827_v27  ;;  %v2872_v37 = vadd.f32 %v2871_v40, %v2870_v21  ;;  %6352 = vrsqrt.f32 %v1099_v30  ;;  %v1098_v12 = vmax.f32 %v1092_v45, 1e-16  ;;  %v13529_v45 = vld [vmem:[#allocation158_spill] sm:$0xff] }
 0x363   : > { %13523 = vst [vmem:[#allocation230_spill] sm:$0xff] %v9115_v1  ;;  %v1101_v1 = vmax.f32 %v1095_v18, 1e-16  ;;  %v2859_v18 = vadd.f32 %v2858_v22, %v2857_v11  ;;  %v1100_v58 = vmax.f32 %v1094_v55, 1e-16  ;;  %v2860_v21 = vsel %vm2791_vm7, %v13528_v53, 0.0 }
 0x364   : > { %v2844_v40 = vadd.f32 %v2843_v41, %v2842_v60  ;;  %v2845_v9 = vsel %vm2745_vm8, %v13475_v57, 0.0  ;;  %v2874_v15 = vadd.f32 %v2873_v33, %v2872_v37  ;;  %v2875_v11 = vsel %vm2807_vm6, %v13529_v45, 0.0  ;;  %v13530_v57 = vld [vmem:[#allocation108_spill] sm:$0xff] }
 0x365   : > { %v3334_v38 = vpop.permute.xlu1 %3333  ;;  %v2832_v60 = vsel %vm2729_vm12, %v13486_v51, 0.0  ;;  %v2861_v22 = vadd.f32 %v2860_v21, %v2859_v18  ;;  %v2862_v37 = vsel %vm2791_vm7, %v13530_v57, 0.0  ;;  %v2847_v33 = vsel %vm2745_vm8, %v13477_v7, 0.0  ;;  %v13531_v51 = vld [vmem:[#allocation161_spill] sm:$0xff]  ;;  %v13534_v45 = vld [vmem:[#allocation164_spill] sm:$0xff] }
 0x366   : > { %v3336_v29 = vpop.permute.xlu0 %3335  ;;  %v2877_v18 = vsel %vm2807_vm6, %v13531_v51, 0.0  ;;  %v2834_v21 = vsel %vm2729_vm12, %v13492_v14, 0.0  ;;  %v1775_v7 = vmul.f32 %v13525_v59, %v13525_v59  ;;  %v1777_v14 = vmul.f32 %v13510_v4, %v13510_v4 }
 0x367   : > { %v3355_v26 = vmul.f32 %v3336_v29, %v13520_v10  ;;  %v3345_v0 = vsel %vm12799_vm11, %v3334_v38, %v3336_v29  ;;  %v2831_v29 = vadd.f32 %v2830_v56, %v2829_v42  ;;  %vm13625_vm13 = vcmask 9216  }
 0x368   : > { %v3354_v48 = vmul.f32 %v3345_v0, %v13525_v59 }
 0x369   : > { %v3361_v27 = vmax.f32 %v3355_v26, 1e-16  ;;  %v3338_v8 = vpop.permute.xlu1 %3337  ;;  %v2846_v26 = vadd.f32 %v2845_v9, %v2844_v40  ;;  %v2863_v40 = vadd.f32 %v2862_v37, %v2861_v22 }
 0x36a   : > { %v3360_v62 = vmax.f32 %v3354_v48, 1e-16  ;;  %v3340_v38 = vpop.permute.xlu0 %3339  ;;  %v2876_v48 = vadd.f32 %v2875_v11, %v2874_v15  ;;  %v13532_v15 = vld [vmem:[#allocation113_spill] sm:$0xff]  ;;  %v2879_v11 = vsel %vm2807_vm6, %v13534_v45, 0.0 }
 0x36b   : > { %6354 = vrsqrt.f32 %v3361_v27  ;;  %v3357_v0 = vmul.f32 %v3340_v38, %v13508_v47  ;;  %v3346_v30 = vsel %vm12799_vm11, %v3338_v8, %v3340_v38  ;;  %v2833_v8 = vadd.f32 %v2832_v60, %v2831_v29 }
 0x36c   : > { %6356 = vrsqrt.f32 %v3360_v62  ;;  %v3356_v55 = vmul.f32 %v3346_v30, %v13510_v4  ;;  %v9172_v62 = vpop.eup %6350  ;;  %v2849_v29 = vsel %vm2745_vm8, %v13484_v23, 0.0  ;;  %v2878_v9 = vadd.f32 %v2877_v18, %v2876_v48 }
 0x36d   : > { %v3363_v42 = vmax.f32 %v3357_v0, 1e-16  ;;  %v3342_v41 = vpop.permute.xlu1 %3341  ;;  %6358 = vrsqrt.f32 %v1101_v1  ;;  %v13533_v0 = vmax.f32 %v9096_v31, 1e-16  ;;  %v2835_v30 = vadd.f32 %v2834_v21, %v2833_v8 }
 0x36e   : > { %v3362_v56 = vmax.f32 %v3356_v55, 1e-16  ;;  %v3344_v43 = vpop.permute.xlu0 %3343  ;;  %6360 = vrsqrt.f32 %v1098_v12  ;;  %v2864_v12 = vsel %vm2791_vm7, %v13532_v15, 0.0  ;;  %v2836_v60 = vsel %vm2729_vm12, %v13501_v34, 0.0 }
 0x36f   : > { %v3347_v27 = vsel %vm12799_vm11, %v3342_v41, %v3344_v43  ;;  %6362 = vrsqrt.f32 %v1100_v58  ;;  %v3359_v1 = vmul.f32 %v3344_v43, %v13512_v63  ;;  %v2848_v58 = vadd.f32 %v2847_v33, %v2846_v26  ;;  %v13535_v41 = vld [vmem:[#allocation117_spill] sm:$0xff] }
 0x370   : > { %v3358_v53 = vmul.f32 %v3347_v27, %v13516_v19  ;;  %6364 = vrsqrt.f32 %v3363_v42  ;;  %v2865_v22 = vadd.f32 %v2864_v12, %v2863_v40  ;;  %v9184_v42 = vpop.eup %6352  ;;  %v1782_v23 = vmax.f32 %v9123_v13, 1e-16  ;;  %v13536_v27 = vld [vmem:[#allocation169_spill] sm:$0xff] }
 0x371   : > { %6366 = vrsqrt.f32 %v3362_v56  ;;  %v3365_v55 = vmax.f32 %v3359_v1, 1e-16  ;;  %v1780_v31 = vmul.f32 %v13512_v63, %v13512_v63  ;;  %v2866_v57 = vsel %vm2791_vm7, %v13535_v41, 0.0 }
 0x372   : > { %v3364_v38 = vmax.f32 %v3358_v53, 1e-16  ;;  %6368 = vrsqrt.f32 %v13533_v0  ;;  %v2850_v37 = vadd.f32 %v2849_v29, %v2848_v58  ;;  %v1784_v26 = vmax.f32 %v9132_v52, 1e-16 }
 0x373   : > { %v1779_v56 = vmul.f32 %v13516_v19, %v13516_v19  ;;  %v2851_v34 = vsel %vm2745_vm8, %v13491_v44, 0.0  ;;  %v2880_v43 = vadd.f32 %v2879_v11, %v2878_v9  ;;  %v9198_v33 = vadd.f32 %v9054_v28, %v9064_v2 }
 0x374   : > { %6370 = vrsqrt.f32 %v3364_v38  ;;  %v1781_v13 = vmax.f32 %v1775_v7, 1e-16  ;;  %v2837_v48 = vadd.f32 %v2836_v60, %v2835_v30  ;;  %v2881_v8 = vsel %vm2807_vm6, %v13536_v27, 0.0 }
 0x375   : > { %v9206_v52 = vadd.f32 %v9057_v5, %v9071_v46  ;;  %6372 = vrsqrt.f32 %v3365_v55  ;;  %v1783_v18 = vmax.f32 %v1777_v14, 1e-16  ;;  %v9208_v1 = vadd.f32 %v2866_v57, %v2865_v22  ;;  %v13537_v46 = vld [vmem:[#allocation201_spill] sm:$0xff] }
 0x376   : > { %6374 = vrsqrt.f32 %v1782_v23  ;;  %v1786_v2 = vmax.f32 %v1780_v31, 1e-16  ;;  %v2852_v53 = vadd.f32 %v2851_v34, %v2850_v37  ;;  %v1785_v7 = vmax.f32 %v1779_v56, 1e-16  ;;  %v13539_v23 = vld [vmem:[#allocation224_spill] sm:$0xff]  ;;  %v13541_v34 = vld [vmem:[#allocation202_spill] sm:$0xff] }
 0x377   : > { %6376 = vrsqrt.f32 %v1784_v26  ;;  %v9216_v15 = vadd.f32 %v2881_v8, %v2880_v43  ;;  %v2681_v12 = vmul.f32 %v13537_v46, %v13431_v3  ;;  %v2887_v58 = vrot.slane %v2837_v48, 1 }
 0x378   : > { %v9202_v51 = vpop.eup %6354  ;;  %6378 = vrsqrt.f32 %v1781_v13  ;;  %v2888_v38 = vrot.slane %v13510_v4, 1  ;;  %v9226_v9 = vadd.f32 %v9078_v50, %v9075_v54  ;;  %v9230_v0 = vsel %vm2077_vm14, %v9030_v6, 0.0  ;;  %v13538_v6 = vld [vmem:[#allocation217_spill] sm:$0xff] }
 0x379   : > { %v9210_v44 = vpop.eup %6356  ;;  %v3379_v28 = vrot.slane %v9202_v51, 7  ;;  %6380 = vrsqrt.f32 %v1783_v18  ;;  %v2893_v14 = vrot.slane %v9208_v1, 1  ;;  %v9236_v30 = vadd.f32 %v8992_v20, %v8958_v61  ;;  %v13540_v20 = vld [vmem:[#allocation235_spill] sm:$0xff] }
 0x37a   : > { %v9213_v21 = vpop.eup %6358  ;;  %v3378_v40 = vrot.slane %v9210_v44, 7  ;;  %6382 = vrsqrt.f32 %v1786_v2  ;;  %v2890_v45 = vrot.slane %v2852_v53, 1  ;;  %v2891_v11 = vrot.slane %v13508_v47, 1 }
 0x37b   : > { %v6361_v5 = vpop.eup %6360  ;;  %3390 = vrot.lane.b32.xlu0 %v3379_v28, %s6511_s13  ;;  %v9241_v54 = vsel %vm2093_vm15, %v9033_v25, 0.0  ;;  %6384 = vrsqrt.f32 %v1785_v7  ;;  %v2693_v50 = vmul.f32 %v13538_v6, %v13447_v49  ;;  %v2895_v60 = vrot.slane %v9216_v15, 1  ;;  %v13542_v7 = vld [vmem:[#allocation218_spill] sm:$0xff]  ;;  %vm13627_vm15 = vmmov %vm13625_vm13 }
 0x37c   : > { %v9222_v29 = vpop.eup %6362  ;;  %3388 = vrot.lane.b32.xlu1 %v3378_v40, %s6511_s13  ;;  %v2699_v61 = vmul.f32 %v13539_v23, %v13452_v35  ;;  %v9250_v31 = vmul.f32 %v13540_v20, %v13459_v32  ;;  %v2730_v41 = vsel %vm2729_vm12, %v2681_v12, 0.0  ;;  %v2889_v57 = vsel %vm637_vm2, %v2887_v58, %v2888_v38 }
 0x37d   : > { %v6365_v55 = vpop.eup %6364  ;;  %v1119_v37 = vrot.slane %v9184_v42, 1  ;;  %v2731_v26 = vsel %vm2729_vm12, %v8723_v17, 0.0  ;;  %v2894_v56 = vsel %vm637_vm2, %v2888_v38, %v2893_v14  ;;  %v2682_v43 = vmul.f32 %v13541_v34, %v13438_v24 }
 0x37e   : > { %v6367_v22 = vpop.eup %6366  ;;  %v3382_v48 = vrot.slane %v6365_v55, 7  ;;  %v1120_v27 = vrot.slane %v9213_v21, 1  ;;  %v1116_v8 = vrot.slane %v6361_v5, 1  ;;  %v2892_v51 = vsel %vm637_vm2, %v2890_v45, %v2891_v11  ;;  %v13543_v5 = vld [vmem:[#allocation126_spill] sm:$0xff] }
 0x37f   : > { %v6369_v25 = vpop.eup %6368  ;;  %v3380_v18 = vrot.slane %v6367_v22, 7  ;;  %v1117_v1 = vrot.slane %v9222_v29, 1  ;;  %v2903_v42 = vmul.f32 %v2889_v57, %v13525_v59  ;;  %v2896_v44 = vsel %vm637_vm2, %v2891_v11, %v2895_v60 }
 0x380   : > { %v1124_v17 = vrot.slane %v9172_v62, 1  ;;  %v1122_v2 = vrot.slane %v6369_v25, 1  ;;  %v2905_v53 = vmul.f32 %v2894_v56, %v13510_v4  ;;  %v2694_v15 = vmul.f32 %v13542_v7, %v13448_v16 }
 0x381   : > { %v6371_v13 = vpop.eup %6370  ;;  %v2746_v21 = vsel %vm2745_vm8, %v2682_v43, 0.0  ;;  %v2747_v12 = vsel %vm2745_vm8, %v13543_v5, 0.0  ;;  %v2904_v58 = vmul.f32 %v2892_v51, %v13520_v10  ;;  %v3383_v29 = vsel %vm861_vm3, %v3379_v28, %v3382_v48  ;;  %v13544_v28 = vld [vmem:[#allocation29_spill] sm:$0xff] }
 0x382   : > { %v3384_v46 = vrot.slane %v6371_v13, 7  ;;  %v6373_v38 = vpop.eup %6372  ;;  %v2732_v45 = vadd.f32 %v2731_v26, %v2730_v41  ;;  %v2733_v62 = vsel %vm2729_vm12, %v2693_v50, 0.0  ;;  %v2906_v11 = vmul.f32 %v2896_v44, %v13508_v47  ;;  %3394 = vrot.lane.b32.xlu0 %v3383_v29, %s6511_s13  ;;  %v13545_v41 = vld [vmem:[#allocation225_spill] sm:$0xff] }
 0x383   : > { %v6375_v55 = vpop.eup %6374  ;;  %v3381_v6 = vsel %vm861_vm3, %v3378_v40, %v3380_v18  ;;  %v1121_v22 = vsel %vm637_vm2, %v1119_v37, %v1120_v27  ;;  %v1118_v23 = vsel %vm637_vm2, %v1116_v8, %v1117_v1  ;;  %v2909_v20 = vmax.f32 %v2903_v42, 1e-16 }
 0x384   : > { %v6377_v57 = vpop.eup %6376  ;;  %3392 = vrot.lane.b32.xlu1 %v3381_v6, %s6511_s13  ;;  %v2911_v25 = vmax.f32 %v2905_v53, 1e-16  ;;  %v2700_v26 = vmul.f32 %v13545_v41, %v13544_v28  ;;  %v2748_v50 = vadd.f32 %v2747_v12, %v2746_v21  ;;  %v2749_v56 = vsel %vm2745_vm8, %v2694_v15, 0.0  ;;  %v13546_v21 = vld [vmem:[#allocation63_spill] sm:$0xff]  ;;  %v13552_v6 = vld [vmem:[#allocation204_spill] sm:$0xff] }
 0x385   : > { %v6379_v34 = vpop.eup %6378  ;;  %v3386_v43 = vrot.slane %v6373_v38, 7  ;;  %v3385_v13 = vsel %vm861_vm3, %v3380_v18, %v3384_v46  ;;  %v2910_v40 = vmax.f32 %v2904_v58, 1e-16  ;;  %v2907_v37 = vmul.f32 %v2893_v14, %v13516_v19  ;;  %v13547_v14 = vld [vmem:[#allocation128_spill] sm:$0xff] }
 0x386   : > { %v6381_v51 = vpop.eup %6380  ;;  %v2734_v8 = vadd.f32 %v2733_v62, %v2732_v45  ;;  %v2735_v42 = vsel %vm2729_vm12, %v2699_v61, 0.0  ;;  %v2912_v44 = vmax.f32 %v2906_v11, 1e-16  ;;  %v2908_v53 = vmul.f32 %v2895_v60, %v13512_v63  ;;  %v13548_v60 = vld [vmem:[#allocation35_spill] sm:$0xff]  ;;  %v13549_v58 = vld [vmem:[#allocation236_spill] sm:$0xff] }
 0x387   : > { %v6383_v7 = vpop.eup %6382  ;;  %v3387_v5 = vsel %vm861_vm3, %v3382_v48, %v3386_v43  ;;  %v1131_v12 = vmul.f32 %v1121_v22, %v13546_v21  ;;  %v1125_v15 = vsel %vm637_vm2, %v1120_v27, %v1124_v17  ;;  %6386 = vrsqrt.f32 %v2909_v20  ;;  %v13550_v11 = vld [vmem:[#allocation271_spill] sm:$0xff]  ;;  %v13554_v20 = vld [vmem:[#allocation240_spill] sm:$0xff]  ;;  %v13560_v21 = vld [vmem:[#allocation273_spill] sm:$0xff] }
 0x388   : > { %v6385_v38 = vpop.eup %6384  ;;  %3398 = vrot.lane.b32.xlu0 %v3387_v5, %s6511_s13  ;;  %3396 = vrot.lane.b32.xlu1 %v3385_v13, %s6511_s13  ;;  %v1130_v18 = vmul.f32 %v1118_v23, %v13547_v14  ;;  %v1123_v61 = vsel %vm637_vm2, %v1117_v1, %v1122_v2  ;;  %6388 = vrsqrt.f32 %v2911_v25  ;;  %v2750_v46 = vadd.f32 %v2749_v56, %v2748_v50  ;;  %v13551_v1 = vld [vmem:[#allocation75_spill] sm:$0xff]  ;;  %v13553_v23 = vld [vmem:[#allocation40_spill] sm:$0xff] }
 0x389   : > { %v2706_v29 = vmul.f32 %v13549_v58, %v13548_v60  ;;  %v2751_v48 = vsel %vm2745_vm8, %v2700_v26, 0.0  ;;  %6390 = vrsqrt.f32 %v2910_v40  ;;  %v2913_v45 = vmax.f32 %v2907_v37, 1e-16  ;;  %v13558_v43 = vld [vmem:[#allocation243_spill] sm:$0xff] }
 0x38a   : > { %v2076_v27 = vadd.f32 %v9060_v39, %v9226_v9  ;;  %v9302_v17 = vadd.f32 %v9230_v0, %v9107_v36  ;;  %6392 = vrsqrt.f32 %v2912_v44  ;;  %v2914_v62 = vmax.f32 %v2908_v53, 1e-16  ;;  %v13555_v39 = vld [vmem:[#allocation206_spill] sm:$0xff]  ;;  %v13556_v9 = vld [vmem:[#allocation205_spill] sm:$0xff] }
 0x38b   : > { %v2230_v2 = vsel %vm541_vm1, %v13551_v1, %v13550_v11  ;;  %v2106_v22 = vadd.f32 %v13552_v6, %v9236_v30  ;;  %v2711_v25 = vmul.f32 %v13554_v20, %v13553_v23  ;;  %v2736_v41 = vadd.f32 %v2735_v42, %v2734_v8  ;;  %v13557_v30 = vld [vmem:[#allocation41_spill] sm:$0xff]  ;;  %v13559_v44 = vld [vmem:[#allocation214_spill] sm:$0xff]  ;;  %v13570_v11 = vld [vmem:[#allocation67_spill] sm:$0xff] }
 0x38c   : > { %3421 = vrot.lane.b32.xlu0 %v1131_v12, %s6510_s12  ;;  %3419 = vrot.lane.b32.xlu1 %v1130_v18, %s6510_s12  ;;  %v1133_v36 = vmul.f32 %v1125_v15, %v13555_v39  ;;  %v1132_v0 = vmul.f32 %v1123_v61, %v13556_v9  ;;  %v2737_v26 = vsel %vm2729_vm12, %v9250_v31, 0.0  ;;  %v2752_v50 = vadd.f32 %v2751_v48, %v2750_v46  ;;  %v13561_v12 = vld [vmem:[#allocation272_spill] sm:$0xff]  ;;  %v13565_v15 = vld [vmem:[#allocation258_spill] sm:$0xff]  ;;  %v13573_v9 = vld [vmem:[#allocation61_spill] sm:$0xff] }
 0x38d   : > { %v9318_v56 = vadd.f32 %v9241_v54, %v2106_v22  ;;  %v2712_v13 = vmul.f32 %v13558_v43, %v13557_v30  ;;  %v2753_v40 = vsel %vm2745_vm8, %v2706_v29, 0.0  ;;  %6394 = vrsqrt.f32 %v2913_v45  ;;  %v13568_v61 = vld [vmem:[#allocation52_spill] sm:$0xff]  ;;  %v13569_v46 = vld [vmem:[#allocation254_spill] sm:$0xff]  ;;  %v13575_v43 = vld [vmem:[#allocation129_spill] sm:$0xff] }
 0x38e   : > { %v1794_v37 = vmul.f32 %v6375_v55, %v13520_v10  ;;  %v9325_v8 = vmul.f32 %v6377_v57, %v13508_v47  ;;  %v1793_v42 = vmul.f32 %v6379_v34, %v13525_v59  ;;  %6396 = vrsqrt.f32 %v2914_v62  ;;  %v13562_v47 = vld [vmem:[#allocation49_spill] sm:$0xff]  ;;  %v13572_v39 = vld [vmem:[#allocation86_spill] sm:$0xff] }
 0x38f   : > { %v9330_v31 = vmul.f32 %v13551_v1, %v13559_v44  ;;  %v9333_v54 = vmul.f32 %v2230_v2, %v9198_v33  ;;  %v9336_v53 = vmul.f32 %v6381_v51, %v13510_v4  ;;  %v2738_v5 = vadd.f32 %v2737_v26, %v2736_v41  ;;  %v13563_v59 = vld [vmem:[#allocation253_spill] sm:$0xff]  ;;  %v13564_v33 = vld [vmem:[#allocation60_spill] sm:$0xff]  ;;  %v13566_v4 = vld [vmem:[#allocation127_spill] sm:$0xff] }
 0x390   : > { %v2231_v10 = vsel %vm541_vm1, %v13561_v12, %v13560_v21  ;;  %3425 = vrot.lane.b32.xlu0 %v1133_v36, %s6510_s12  ;;  %3423 = vrot.lane.b32.xlu1 %v1132_v0, %s6510_s12  ;;  %v2717_v55 = vmul.f32 %v13563_v59, %v13562_v47  ;;  %v2739_v57 = vsel %vm2729_vm12, %v2711_v25, 0.0  ;;  %v2754_v34 = vadd.f32 %v2753_v40, %v2752_v50  ;;  %v13567_v51 = vld [vmem:[#allocation132_spill] sm:$0xff]  ;;  %v13571_v41 = vld [vmem:[#allocation85_spill] sm:$0xff] }
 0x391   : > { %v2723_v14 = vmul.f32 %v13565_v15, %v13564_v33  ;;  %v2771_v18 = vadd.f32 %v13567_v51, %v13566_v4  ;;  %v2718_v58 = vmul.f32 %v13569_v46, %v13568_v61  ;;  %v2755_v29 = vsel %vm2745_vm8, %v2712_v13, 0.0  ;;  %v13574_v0 = vld [vmem:[#allocation260_spill] sm:$0xff]  ;;  %v13578_v21 = vld [vmem:[#allocation209_spill] sm:$0xff]  ;;  %v13581_v51 = vld [vmem:[#allocation210_spill] sm:$0xff] }
 0x392   : > { %v3467_v48 = vrot.slane %v1794_v37, 1  ;;  %v3468_v45 = vrot.slane %v9325_v8, 1  ;;  %v3464_v62 = vrot.slane %v1793_v42, 1  ;;  %v2772_v1 = vsel %vm525_vm0, %v13570_v11, 0.0  ;;  %v13577_v37 = vld [vmem:[#allocation134_spill] sm:$0xff]  ;;  %v13584_v11 = vld [vmem:[#allocation131_spill] sm:$0xff] }
 0x393   : > { %v3465_v2 = vrot.slane %v9336_v53, 1  ;;  %v1798_v6 = vmul.f32 %v6383_v7, %v13512_v63  ;;  %v1797_v22 = vmul.f32 %v6385_v38, %v13516_v19  ;;  %v2740_v20 = vadd.f32 %v2739_v57, %v2738_v5  ;;  %v13576_v63 = vld [vmem:[#allocation211_spill] sm:$0xff]  ;;  %v13579_v57 = vld [vmem:[#allocation62_spill] sm:$0xff] }
 0x394   : > { %v9359_v25 = vpop.eup %6386  ;;  %3437 = vrot.lane.b32.xlu0 %v13571_v41, %s6512_s14  ;;  %3435 = vrot.lane.b32.xlu1 %v13572_v39, %s6512_s14  ;;  %v2741_v36 = vsel %vm2729_vm12, %v2717_v55, 0.0  ;;  %v2724_v26 = vmul.f32 %v13574_v0, %v13573_v9  ;;  %v2756_v50 = vadd.f32 %v2755_v29, %v2754_v34  ;;  %v2786_v7 = vadd.f32 %v13576_v63, %v13575_v43  ;;  %v13580_v34 = vld [vmem:[#allocation135_spill] sm:$0xff]  ;;  %v13582_v29 = vld [vmem:[#allocation130_spill] sm:$0xff]  ;;  %v13586_v39 = vld [vmem:[#allocation137_spill] sm:$0xff] }
 0x395   : > { %v9370_v19 = vpop.eup %6388  ;;  %v9374_v38 = vmul.f32 %v13561_v12, %v9206_v52  ;;  %v9376_v13 = vmul.f32 %v2231_v10, %v2076_v27  ;;  %v2757_v40 = vsel %vm2745_vm8, %v2718_v58, 0.0  ;;  %v2787_v8 = vsel %vm541_vm1, %v13577_v37, 0.0  ;;  %v13587_v0 = vld [vmem:[#allocation68_spill] sm:$0xff]  ;;  %v13588_v43 = vld [vmem:[#allocation275_spill] sm:$0xff] }
 0x396   : > { %v6391_v42 = vpop.eup %6390  ;;  %v3469_v44 = vsel %vm637_vm2, %v3467_v48, %v3468_v45  ;;  %v2743_v53 = vsel %vm2729_vm12, %v2723_v14, 0.0  ;;  %v2773_v5 = vadd.f32 %v2772_v1, %v2771_v18  ;;  %v2774_v59 = vsel %vm525_vm0, %v13578_v21, 0.0  ;;  %v13583_v48 = vld [vmem:[#allocation212_spill] sm:$0xff]  ;;  %v13585_v1 = vld [vmem:[#allocation133_spill] sm:$0xff] }
 0x397   : > { %v6393_v55 = vpop.eup %6392  ;;  %v3466_v52 = vsel %vm637_vm2, %v3464_v62, %v3465_v2  ;;  %v3472_v12 = vrot.slane %v1798_v6, 1  ;;  %v3470_v27 = vrot.slane %v1797_v22, 1  ;;  %v2742_v10 = vadd.f32 %v2741_v36, %v2740_v20 }
 0x398   : > { %3441 = vrot.lane.b32.xlu0 %v13579_v57, %s6512_s14  ;;  %3439 = vrot.lane.b32.xlu1 %v13580_v34, %s6512_s14  ;;  %v2758_v15 = vadd.f32 %v2757_v40, %v2756_v50  ;;  %v2759_v4 = vsel %vm2745_vm8, %v2724_v26, 0.0  ;;  %v2788_v14 = vadd.f32 %v2787_v8, %v2786_v7  ;;  %v2789_v18 = vsel %vm541_vm1, %v13581_v51, 0.0  ;;  %v13590_v57 = vld [vmem:[#allocation219_spill] sm:$0xff]  ;;  %vm13634_vm8 = vmmov %vm13625_vm13 }
 0x399   : > { %v2927_v46 = vrot.slane %v9359_v25, 7  ;;  %v2929_v58 = vrot.slane %v9370_v19, 7  ;;  %v2802_v62 = vadd.f32 %v13583_v48, %v13582_v29  ;;  %v2818_v6 = vadd.f32 %v13585_v1, %v13584_v11  ;;  %v13589_v25 = vld [vmem:[#allocation274_spill] sm:$0xff] }
 0x39a   : > { %v6395_v22 = vpop.eup %6394  ;;  %v2928_v20 = vrot.slane %v6391_v42, 7  ;;  %v2931_v41 = vrot.slane %v6393_v55, 7  ;;  %v2803_v36 = vsel %vm2791_vm7, %v13586_v39, 0.0  ;;  %v2819_v26 = vsel %vm2807_vm6, %v13587_v0, 0.0 }
 0x39b   : > { %v6397_v50 = vpop.eup %6396  ;;  %v2232_v63 = vsel %vm541_vm1, %v13589_v25, %v13588_v43  ;;  %v3473_v7 = vsel %vm637_vm2, %v3468_v45, %v3472_v12  ;;  %v3471_v19 = vsel %vm637_vm2, %v3465_v2, %v3470_v27  ;;  %v2775_v40 = vadd.f32 %v2774_v59, %v2773_v5  ;;  %v13591_v12 = vld [vmem:[#allocation136_spill] sm:$0xff] }
 0x39c   : > { %3476 = vrot.lane.b32.xlu0 %v3469_v44, %s6510_s12  ;;  %3474 = vrot.lane.b32.xlu1 %v3466_v52, %s6510_s12  ;;  %v2744_v37 = vadd.f32 %v2743_v53, %v2742_v10  ;;  %v2760_v8 = vadd.f32 %v2759_v4, %v2758_v15  ;;  %v2790_v42 = vadd.f32 %v2789_v18, %v2788_v14  ;;  %v2805_v34 = vsel %vm2791_vm7, %v13590_v57, 0.0  ;;  %v13595_v57 = vld [vmem:[#allocation87_spill] sm:$0xff] }
 0x39d   : > { %v2930_v21 = vsel %vm861_vm3, %v2927_v46, %v2929_v58  ;;  %v2804_v55 = vadd.f32 %v2803_v36, %v2802_v62  ;;  %v2820_v51 = vadd.f32 %v2819_v26, %v2818_v6  ;;  %v2932_v29 = vsel %vm861_vm3, %v2928_v20, %v2931_v41 }
 0x39e   : > { %v2933_v45 = vrot.slane %v6395_v22, 7  ;;  %v2821_v2 = vsel %vm2807_vm6, %v13591_v12, 0.0  ;;  %v2935_v5 = vrot.slane %v6397_v50, 7  ;;  %v3493_v44 = vrot.slane %v9374_v38, 1 }
 0x39f   : > { %v3496_v53 = vrot.slane %v9376_v13, 1  ;;  %v2243_v59 = vmul.f32 %v13589_v25, %v9302_v17  ;;  %v2244_v52 = vmul.f32 %v2232_v63, %v9318_v56  ;;  %v3492_v27 = vrot.slane %v9330_v31, 1  ;;  %v13592_v25 = vld [vmem:[#allocation99_spill] sm:$0xff] }
 0x3a0   : > { %v3495_v10 = vrot.slane %v9333_v54, 1  ;;  %3480 = vrot.lane.b32.xlu0 %v3473_v7, %s6510_s12  ;;  %3478 = vrot.lane.b32.xlu1 %v3471_v19, %s6510_s12  ;;  %v2943_v15 = vmul.f32 %v2927_v46, %v2744_v37  ;;  %v2945_v4 = vmul.f32 %v2930_v21, %v2775_v40  ;;  %v2944_v14 = vmul.f32 %v2928_v20, %v2760_v8  ;;  %v9443_v19 = vpop.permute.xlu1 %5951  ;;  %v13593_v40 = vld [vmem:[#allocation89_spill] sm:$0xff] }
 0x3a1   : > { %v2946_v18 = vmul.f32 %v2932_v29, %v2790_v42  ;;  %v2806_v38 = vadd.f32 %v2805_v34, %v2804_v55  ;;  %v2822_v48 = vadd.f32 %v2821_v2, %v2820_v51  ;;  %v2934_v13 = vsel %vm861_vm3, %v2929_v58, %v2933_v45  ;;  %v13594_v42 = vld [vmem:[#allocation92_spill] sm:$0xff]  ;;  %v13596_v29 = vld [vmem:[#allocation105_spill] sm:$0xff]  ;;  %v9455_v2 = vpop.permute.xlu0 %5956 }
 0x3a2   : > { %v2936_v17 = vsel %vm861_vm3, %v2931_v41, %v2935_v5  ;;  %v3498_v62 = vrot.slane %v2243_v59, 1  ;;  %v3500_v56 = vrot.slane %v2244_v52, 1  ;;  %v3497_v31 = vsel %vm637_vm2, %v3495_v10, %v3496_v53 }
 0x3a3   : > { %v3494_v54 = vsel %vm637_vm2, %v3492_v27, %v3493_v44  ;;  %v3531_v46 = vrot.slane %v2943_v15, 2  ;;  %v3532_v11 = vrot.slane %v2945_v4, 2  ;;  %v3534_v1 = vrot.slane %v2944_v14, 2  ;;  %v13598_v27 = vld [vmem:[#allocation112_spill] sm:$0xff] }
 0x3a4   : > { %3504 = vrot.lane.b32.xlu0 %v3497_v31, %s6512_s14  ;;  %3502 = vrot.lane.b32.xlu1 %v3494_v54, %s6512_s14  ;;  %v3535_v6 = vrot.slane %v2946_v18, 2  ;;  %v2947_v22 = vmul.f32 %v2934_v13, %v2806_v38  ;;  %v2948_v20 = vmul.f32 %v2936_v17, %v2822_v48  ;;  %v3501_v58 = vsel %vm637_vm2, %v3496_v53, %v3500_v56  ;;  %v13599_v18 = vld [vmem:[#allocation103_spill] sm:$0xff]  ;;  %v9467_v13 = vpop.permute.xlu1 %5961  ;;  %v13600_v17 = vld [vmem:[#allocation8_spill] sm:$0xff] }
 0x3a5   : > { %v3499_v41 = vsel %vm637_vm2, %v3493_v44, %v3498_v62  ;;  %vm3517_vm0 = vcmask 1045504   ;;  %v5429_v63 = vunpack.i.h.bf16 %v13592_v25  ;;  %v5428_v7 = vunpack.i.l.bf16 %v13592_v25  ;;  %v13597_v44 = vld [vmem:[#allocation97_spill] sm:$0xff]  ;;  %v13601_v31 = vld [vmem:[#allocation12_spill] sm:$0xff] }
 0x3a6   : > { %v3533_v39 = vsel %vm3517_vm0, %v3531_v46, %v3532_v11  ;;  %v3536_v36 = vsel %vm3517_vm0, %v3534_v1, %v3535_v6  ;;  %v3537_v0 = vrot.slane %v2947_v22, 2  ;;  %v3539_v26 = vrot.slane %v2948_v20, 2  ;;  %v13603_v22 = vld [vmem:[#allocation6_spill] sm:$0xff] }
 0x3a7   : > { %v5419_v37 = vunpack.i.h.bf16 %v13593_v40  ;;  %v5418_v8 = vunpack.i.l.bf16 %v13593_v40  ;;  %v5424_v21 = vunpack.i.h.bf16 %v13594_v42  ;;  %v5423_v55 = vunpack.i.l.bf16 %v13594_v42  ;;  %v13606_v40 = vld [vmem:[#allocation24_spill] sm:$0xff] }
 0x3a8   : > { %3508 = vrot.lane.b32.xlu0 %v3501_v58, %s6512_s14  ;;  %3506 = vrot.lane.b32.xlu1 %v3499_v41, %s6512_s14  ;;  %v3538_v50 = vsel %vm3517_vm0, %v3532_v11, %v3537_v0  ;;  %v3540_v43 = vsel %vm3517_vm0, %v3535_v6, %v3539_v26  ;;  %v5414_v34 = vunpack.i.h.bf16 %v13595_v57  ;;  %v5413_v51 = vunpack.i.l.bf16 %v13595_v57  ;;  %v13602_v11 = vld [vmem:[#allocation118_spill] sm:$0xff]  ;;  %v9487_v42 = vpop.permute.xlu1 %5971 }
 0x3a9   : > { %v5439_v45 = vunpack.i.h.bf16 %v13596_v29  ;;  %v5438_v12 = vunpack.i.l.bf16 %v13596_v29  ;;  %v786_v5 = vsel %vm12799_vm11, %v5428_v7, %v5429_v63  ;;  %v5434_v53 = vunpack.i.h.bf16 %v13597_v44  ;;  %v13607_v29 = vld [vmem:[#allocation30_spill] sm:$0xff] }
 0x3aa   : > { %v5433_v59 = vunpack.i.l.bf16 %v13597_v44  ;;  %v784_v52 = vsel %vm12799_vm11, %v5418_v8, %v5419_v37  ;;  %v5449_v10 = vunpack.i.h.bf16 %v13598_v27  ;;  %v5448_v15 = vunpack.i.l.bf16 %v13598_v27 }
 0x3ab   : > { %v785_v4 = vsel %vm12799_vm11, %v5423_v55, %v5424_v21  ;;  %v783_v14 = vsel %vm12799_vm11, %v5413_v51, %v5414_v34  ;;  %v5444_v38 = vunpack.i.h.bf16 %v13599_v18  ;;  %v5443_v48 = vunpack.i.l.bf16 %v13599_v18 }
 0x3ac   : > { %3541 = vrot.lane.b32.xlu1 %v3533_v39, %s6510_s12  ;;  %3543 = vrot.lane.b32.xlu0 %v3536_v36, %s6510_s12  ;;  %v818_v62 = vmul.f32 %v786_v5, %v13600_v17  ;;  %v788_v56 = vsel %vm12799_vm11, %v5438_v12, %v5439_v45  ;;  %v816_v54 = vmul.f32 %v784_v52, %v13601_v31  ;;  %v5459_v1 = vunpack.i.h.bf16 %v13602_v11  ;;  %v9478_v39 = vpop.permute.xlu0 %5966  ;;  %v13604_v36 = vld [vmem:[#allocation18_spill] sm:$0xff]  ;;  %v13608_v12 = vld [vmem:[#allocation116_spill] sm:$0xff] }
 0x3ad   : > { %v787_v46 = vsel %vm12799_vm11, %v5433_v59, %v5434_v53  ;;  %v5458_v6 = vunpack.i.l.bf16 %v13602_v11  ;;  %v817_v20 = vmul.f32 %v785_v4, %v13603_v22  ;;  %v815_v58 = vmul.f32 %v783_v14, %v13431_v3  ;;  %v13610_v14 = vld [vmem:[#allocation226_spill] sm:$0xff] }
 0x3ae   : > { %v790_v41 = vsel %vm12799_vm11, %v5448_v15, %v5449_v10  ;;  %v820_v0 = vmul.f32 %v788_v56, %v13604_v36  ;;  %v789_v26 = vsel %vm12799_vm11, %v5443_v48, %v5444_v38  ;;  %v819_v63 = vmul.f32 %v787_v46, %v13447_v49  ;;  %v13609_v10 = vld [vmem:[#allocation215_spill] sm:$0xff]  ;;  %v13611_v48 = vld [vmem:[#allocation216_spill] sm:$0xff] }
 0x3af   : > { %v838_v7 = vadd.f32 %v818_v62, %v816_v54  ;;  %v822_v37 = vmul.f32 %v790_v41, %v13606_v40  ;;  %v792_v8 = vsel %vm12799_vm11, %v5458_v6, %v5459_v1  ;;  %v831_v21 = vadd.f32 %v817_v20, %v815_v58  ;;  %v9503_v54 = vpop.permute.xlu1 %5981  ;;  %v13613_v1 = vld [vmem:[#allocation230_spill] sm:$0xff]  ;;  %v13614_v58 = vld [vmem:[#allocation120_spill] sm:$0xff] }
 0x3b0   : > { %3545 = vrot.lane.b32.xlu1 %v3538_v50, %s6510_s12  ;;  %3547 = vrot.lane.b32.xlu0 %v3540_v43, %s6510_s12  ;;  %v13605_v50 = vld [vmem:[#allocation110_spill] sm:$0xff]  ;;  %v821_v55 = vmul.f32 %v789_v26, %v13452_v35  ;;  %v824_v45 = vmul.f32 %v792_v8, %v13607_v29  ;;  %v5464_v5 = vunpack.i.h.bf16 %v13608_v12  ;;  %v5463_v44 = vunpack.i.l.bf16 %v13608_v12  ;;  %v9494_v53 = vpop.permute.xlu0 %5976 }
 0x3b1   : > { %v5454_v43 = vunpack.i.h.bf16 %v13605_v50  ;;  %v5453_v25 = vunpack.i.l.bf16 %v13605_v50  ;;  %v839_v57 = vadd.f32 %v838_v7, %v820_v0  ;;  %v832_v51 = vadd.f32 %v831_v21, %v819_v63 }
 0x3b2   : > { %v5934_v15 = vunpack.i.h.bf16 %v13609_v10  ;;  %v5933_v4 = vunpack.i.l.bf16 %v13609_v10  ;;  %v5939_v18 = vunpack.i.h.bf16 %v13610_v14  ;;  %v5938_v38 = vunpack.i.l.bf16 %v13610_v14  ;;  %v13617_v10 = vld [vmem:[#allocation13_spill] sm:$0xff] }
 0x3b3   : > { %v791_v34 = vsel %vm12799_vm11, %v5453_v25, %v5454_v43  ;;  %v840_v59 = vadd.f32 %v839_v57, %v822_v37  ;;  %v833_v52 = vadd.f32 %v832_v51, %v821_v55  ;;  %v5944_v62 = vunpack.i.h.bf16 %v13611_v48 }
 0x3b4   : > { %v823_v27 = vmul.f32 %v791_v34, %v13459_v32  ;;  %v5943_v56 = vunpack.i.l.bf16 %v13611_v48  ;;  %v793_v46 = vsel %vm12799_vm11, %v5463_v44, %v5464_v5  ;;  %v5949_v6 = vunpack.i.h.bf16 %v13613_v1  ;;  %v9519_v37 = vpop.permute.xlu0 %5986  ;;  %v13616_v5 = vld [vmem:[#allocation119_spill] sm:$0xff] }
 0x3b5   : > { %v9506_v11 = vadd.f32 %v840_v59, %v824_v45  ;;  %v5948_v20 = vunpack.i.l.bf16 %v13613_v1  ;;  %v5954_v26 = vunpack.i.h.bf16 %v9443_v19  ;;  %v5953_v50 = vunpack.i.l.bf16 %v9443_v19  ;;  %v13615_v19 = vld [vmem:[#allocation122_spill] sm:$0xff]  ;;  %v13620_v1 = vld [vmem:[#allocation7_spill] sm:$0xff] }
 0x3b6   : > { %v9514_v43 = vadd.f32 %v833_v52, %v823_v27  ;;  %v3045_v25 = vsel %vm541_vm1, %v5933_v4, %v5934_v15  ;;  %v5959_v63 = vunpack.i.h.bf16 %v9455_v2  ;;  %v5958_v7 = vunpack.i.l.bf16 %v9455_v2  ;;  %v9535_v27 = vpop.permute.xlu1 %5991 }
 0x3b7   : > { %13612 = vst [vmem:[#allocation222_spill] sm:$0xff] %v9506_v11  ;;  %v9522_v8 = vmul.f32 %v793_v46, %v13553_v23  ;;  %v3046_v21 = vsel %vm541_vm1, %v5938_v38, %v5939_v18  ;;  %v3117_v55 = vmul.f32 %v5933_v4, %v13431_v3  ;;  %v3047_v57 = vsel %vm541_vm1, %v5943_v56, %v5944_v62  ;;  %v13618_v4 = vld [vmem:[#allocation16_spill] sm:$0xff]  ;;  %v13619_v18 = vld [vmem:[#allocation17_spill] sm:$0xff] }
 0x3b8   : > { %v3119_v51 = vmul.f32 %v5938_v38, %v13601_v31  ;;  %v3048_v45 = vsel %vm541_vm1, %v5948_v20, %v5949_v6  ;;  %v3123_v12 = vmul.f32 %v5948_v20, %v13603_v22  ;;  %v3118_v59 = vmul.f32 %v3045_v25, %v13438_v24  ;;  %v13621_v25 = vld [vmem:[#allocation14_spill] sm:$0xff]  ;;  %v9549_v44 = vpop.permute.xlu0 %5996 }
 0x3b9   : > { %v3049_v52 = vsel %vm541_vm1, %v5953_v50, %v5954_v26  ;;  %v3120_v15 = vmul.f32 %v3046_v21, %v13617_v10  ;;  %v3121_v14 = vmul.f32 %v5943_v56, %v13618_v4  ;;  %v3122_v38 = vmul.f32 %v3047_v57, %v13619_v18  ;;  %v13622_v10 = vld [vmem:[#allocation9_spill] sm:$0xff]  ;;  %v13623_v57 = vld [vmem:[#allocation15_spill] sm:$0xff] }
 0x3ba   : > { %v3050_v48 = vsel %vm541_vm1, %v5958_v7, %v5959_v63  ;;  %v3166_v46 = vsel %vm3165_vm10, %v3117_v55, 0.0  ;;  %v3124_v6 = vmul.f32 %v3048_v45, %v13620_v1  ;;  %v3125_v24 = vmul.f32 %v5953_v50, %v13600_v17 }
 0x3bb   : > { %v3197_v20 = vsel %vm1278_vm5, %v3119_v51, 0.0  ;;  %v3167_v26 = vsel %vm3165_vm10, %v3123_v12, 0.0  ;;  %v3127_v21 = vmul.f32 %v5958_v7, %v13621_v25  ;;  %v3126_v56 = vmul.f32 %v3049_v52, %v13622_v10 }
 0x3bc   : > { %v3182_v63 = vsel %vm3181_vm9, %v3118_v59, 0.0  ;;  %v3128_v18 = vmul.f32 %v3050_v48, %v13623_v57  ;;  %v5964_v55 = vunpack.i.h.bf16 %v9467_v13  ;;  %v5963_v45 = vunpack.i.l.bf16 %v9467_v13  ;;  %v9562_v48 = vpop.permute.xlu1 %6001  ;;  %v9574_v2 = vpop.permute.xlu0 %6006 }
 0x3bd   : > { %v3212_v50 = vsel %vm1294_vm4, %v3120_v15, 0.0  ;;  %vm13624_vm6 = vcmask 1041424   ;;  %v3244_v12 = vsel %vm13625_vm13, %v3122_v38, 0.0  ;;  %v5968_v7 = vunpack.i.l.bf16 %v9478_v39 }
 0x3be   : > { %v3228_v51 = vsel %vm13624_vm6, %v3121_v14, 0.0  ;;  %v3168_v1 = vadd.f32 %v3167_v26, %v3166_v46  ;;  %v3183_v52 = vsel %vm3181_vm9, %v3124_v6, 0.0  ;;  %v3198_v10 = vsel %vm1278_vm5, %v3125_v24, 0.0  ;;  %vm13626_vm14 = vmmov %vm13624_vm6 }
 0x3bf   : > { %v5969_v59 = vunpack.i.h.bf16 %v9478_v39  ;;  %v3229_v57 = vsel %vm13626_vm14, %v3127_v21, 0.0  ;;  %v3213_v13 = vsel %vm1294_vm4, %v3126_v56, 0.0  ;;  %v5979_v15 = vunpack.i.h.bf16 %v9494_v53  ;;  %vm13631_vm7 = vmmov %vm13624_vm6 }
 0x3c0   : > { %v5978_v14 = vunpack.i.l.bf16 %v9494_v53  ;;  %v3245_v38 = vsel %vm13627_vm15, %v3128_v18, 0.0  ;;  %v3051_v46 = vsel %vm541_vm1, %v5963_v45, %v5964_v55  ;;  %v5974_v6 = vunpack.i.h.bf16 %v9487_v42  ;;  %vm13636_vm12 = vmmov %vm13624_vm6 }
 0x3c1   : > { %v5973_v24 = vunpack.i.l.bf16 %v9487_v42  ;;  %v3184_v26 = vadd.f32 %v3183_v52, %v3182_v63  ;;  %v3199_v39 = vadd.f32 %v3198_v10, %v3197_v20  ;;  %v3131_v62 = vmul.f32 %v5968_v7, %v13604_v36  ;;  %v13628_v63 = vld [vmem:[#allocation20_spill] sm:$0xff]  ;;  %v9585_v10 = vpop.permute.xlu1 %6011  ;;  %vm13638_vm6 = vmmov %vm13634_vm8 }
 0x3c2   : > { %v3129_v21 = vmul.f32 %v5963_v45, %v13447_v49  ;;  %v3230_v56 = vadd.f32 %v3229_v57, %v3228_v51  ;;  %v3052_v34 = vsel %vm541_vm1, %v5968_v7, %v5969_v59  ;;  %v5984_v53 = vunpack.i.h.bf16 %v9503_v54  ;;  %v13629_v7 = vld [vmem:[#allocation19_spill] sm:$0xff]  ;;  %vm13640_vm13 = vmmov %vm13631_vm7 }
 0x3c3   : > { %v5983_v18 = vunpack.i.l.bf16 %v9503_v54  ;;  %v3246_v55 = vadd.f32 %v3245_v38, %v3244_v12  ;;  %v3214_v0 = vadd.f32 %v3213_v13, %v3212_v50  ;;  %v3130_v41 = vmul.f32 %v3051_v46, %v13448_v16  ;;  %v13630_v38 = vld [vmem:[#allocation21_spill] sm:$0xff]  ;;  %vm13647_vm14 = vmmov %vm13638_vm6 }
 0x3c4   : > { %v3054_v42 = vsel %vm541_vm1, %v5978_v14, %v5979_v15  ;;  %v3053_v20 = vsel %vm541_vm1, %v5973_v24, %v5974_v6  ;;  %v3133_v52 = vmul.f32 %v5973_v24, %v13628_v63  ;;  %v5989_v45 = vunpack.i.h.bf16 %v9519_v37  ;;  %v9599_v6 = vpop.permute.xlu0 %6016  ;;  %v13632_v24 = vld [vmem:[#allocation26_spill] sm:$0xff]  ;;  %vm13648_vm15 = vmmov %vm13631_vm7 }
 0x3c5   : > { %v5988_v51 = vunpack.i.l.bf16 %v9519_v37  ;;  %v3132_v59 = vmul.f32 %v3052_v34, %v13629_v7  ;;  %v3200_v54 = vsel %vm1278_vm5, %v3131_v62, 0.0  ;;  %v3169_v50 = vsel %vm3165_vm10, %v3129_v21, 0.0  ;;  %v13633_v7 = vld [vmem:[#allocation25_spill] sm:$0xff] }
 0x3c6   : > { %v3135_v16 = vmul.f32 %v5978_v14, %v13452_v35  ;;  %v3136_v12 = vmul.f32 %v3054_v42, %v13544_v28  ;;  %v3055_v57 = vsel %vm541_vm1, %v5983_v18, %v5984_v53  ;;  %v5999_v13 = vunpack.i.h.bf16 %v9549_v44 }
 0x3c7   : > { %v5998_v15 = vunpack.i.l.bf16 %v9549_v44  ;;  %v3185_v37 = vsel %vm3181_vm9, %v3130_v41, 0.0  ;;  %v3134_v46 = vmul.f32 %v3053_v20, %v13630_v38  ;;  %v5994_v34 = vunpack.i.h.bf16 %v9535_v27 }
 0x3c8   : > { %v5993_v62 = vunpack.i.l.bf16 %v9535_v27  ;;  %v3231_v14 = vsel %vm13631_vm7, %v3133_v52, 0.0  ;;  %v3056_v28 = vsel %vm541_vm1, %v5988_v51, %v5989_v45  ;;  %v3139_v21 = vmul.f32 %v5988_v51, %v13632_v24  ;;  %v9610_v52 = vpop.permute.xlu1 %6021  ;;  %v13635_v24 = vld [vmem:[#allocation27_spill] sm:$0xff]  ;;  %vm13649_vm7 = vmmov %vm13638_vm6 }
 0x3c9   : > { %v3137_v53 = vmul.f32 %v5983_v18, %v13606_v40  ;;  %v3201_v42 = vadd.f32 %v3200_v54, %v3199_v39  ;;  %v3215_v44 = vsel %vm1294_vm4, %v3132_v59, 0.0  ;;  %v3170_v41 = vadd.f32 %v3169_v50, %v3168_v1 }
 0x3ca   : > { %v3138_v20 = vmul.f32 %v3055_v57, %v13633_v7  ;;  %v3186_v38 = vadd.f32 %v3185_v37, %v3184_v26  ;;  %v3171_v11 = vsel %vm3165_vm10, %v3135_v16, 0.0  ;;  %v3187_v27 = vsel %vm3181_vm9, %v3136_v12, 0.0  ;;  %v13637_v16 = vld [vmem:[#allocation31_spill] sm:$0xff] }
 0x3cb   : > { %v3058_v35 = vsel %vm541_vm1, %v5998_v15, %v5999_v13  ;;  %v3232_v45 = vadd.f32 %v3231_v14, %v3230_v56  ;;  %v3247_v51 = vsel %vm13634_vm8, %v3134_v46, 0.0  ;;  %v3140_v18 = vmul.f32 %v3056_v28, %v13635_v24  ;;  %v6027_v13 = vpop.permute.xlu0 %6026 }
 0x3cc   : > { %v3057_v39 = vsel %vm541_vm1, %v5993_v62, %v5994_v34  ;;  %v3233_v1 = vsel %vm13636_vm12, %v3139_v21, 0.0  ;;  %v3202_v59 = vsel %vm1278_vm5, %v3137_v53, 0.0  ;;  %v3143_v26 = vmul.f32 %v5998_v15, %v13607_v29 }
 0x3cd   : > { %v6008_v54 = vunpack.i.l.bf16 %v9574_v2  ;;  %v3217_v50 = vsel %vm1294_vm4, %v3138_v20, 0.0  ;;  %v3144_v12 = vmul.f32 %v3058_v35, %v13637_v16  ;;  %v3141_v56 = vmul.f32 %v5993_v62, %v13459_v32  ;;  %v9628_v20 = vpop.permute.xlu1 %6031 }
 0x3ce   : > { %v6009_v57 = vunpack.i.h.bf16 %v9574_v2  ;;  %v3216_v37 = vadd.f32 %v3215_v44, %v3214_v0  ;;  %v3172_v46 = vadd.f32 %v3171_v11, %v3170_v41  ;;  %v3142_v34 = vmul.f32 %v3057_v39, %v13548_v60  ;;  %v13639_v44 = vld [vmem:[#allocation32_spill] sm:$0xff] }
 0x3cf   : > { %v6003_v14 = vunpack.i.l.bf16 %v9562_v48  ;;  %v3188_v28 = vadd.f32 %v3187_v27, %v3186_v38  ;;  %v3248_v24 = vadd.f32 %v3247_v51, %v3246_v55  ;;  %v3234_v15 = vadd.f32 %v3233_v1, %v3232_v45  ;;  %v6037_v39 = vpop.permute.xlu0 %6036 }
 0x3d0   : > { %v3249_v21 = vsel %vm13638_vm6, %v3140_v18, 0.0  ;;  %v3203_v53 = vadd.f32 %v3202_v59, %v3201_v42  ;;  %v3218_v7 = vadd.f32 %v3217_v50, %v3216_v37  ;;  %v3204_v35 = vsel %vm1278_vm5, %v3143_v26, 0.0 }
 0x3d1   : > { %v3147_v62 = vmul.f32 %v6008_v54, %v13553_v23  ;;  %v3219_v0 = vsel %vm1294_vm4, %v3144_v12, 0.0  ;;  %v3173_v11 = vsel %vm3165_vm10, %v3141_v56, 0.0  ;;  %v3060_v60 = vsel %vm541_vm1, %v6008_v54, %v6009_v57  ;;  %v6042_v37 = vpop.permute.xlu1 %6041 }
 0x3d2   : > { %v6004_v2 = vunpack.i.h.bf16 %v9562_v48  ;;  %v3189_v55 = vsel %vm3181_vm9, %v3142_v34, 0.0  ;;  %v3145_v41 = vmul.f32 %v6003_v14, %v13639_v44  ;;  %v6019_v42 = vunpack.i.h.bf16 %v9599_v6  ;;  %v13641_v34 = vld [vmem:[#allocation36_spill] sm:$0xff] }
 0x3d3   : > { %v6018_v38 = vunpack.i.l.bf16 %v9599_v6  ;;  %v9638_v27 = vadd.f32 %v3249_v21, %v3248_v24  ;;  %v3205_v45 = vadd.f32 %v3204_v35, %v3203_v53  ;;  %v6014_v51 = vunpack.i.h.bf16 %v9585_v10  ;;  %v13642_v53 = vld [vmem:[#allocation33_spill] sm:$0xff]  ;;  %v13643_v35 = vld [vmem:[#allocation38_spill] sm:$0xff] }
 0x3d4   : > { %v6013_v18 = vunpack.i.l.bf16 %v9585_v10  ;;  %v9642_v1 = vadd.f32 %v3219_v0, %v3218_v7  ;;  %v3174_v59 = vadd.f32 %v3173_v11, %v3172_v46  ;;  %v3148_v48 = vmul.f32 %v3060_v60, %v13557_v30  ;;  %v6047_v60 = vpop.permute.xlu0 %6046 }
 0x3d5   : > { %v3175_v26 = vsel %vm3165_vm10, %v3147_v62, 0.0  ;;  %v3190_v54 = vadd.f32 %v3189_v55, %v3188_v28  ;;  %v3059_v50 = vsel %vm541_vm1, %v6003_v14, %v6004_v2  ;;  %v6024_v6 = vunpack.i.h.bf16 %v9610_v52  ;;  %v13644_v62 = vld [vmem:[#allocation39_spill] sm:$0xff] }
 0x3d6   : > { %v6023_v16 = vunpack.i.l.bf16 %v9610_v52  ;;  %v3235_v12 = vsel %vm13640_vm13, %v3145_v41, 0.0  ;;  %v3062_v56 = vsel %vm541_vm1, %v6018_v38, %v6019_v42  ;;  %v6029_v10 = vunpack.i.h.bf16 %v6027_v13  ;;  %v13645_v41 = vld [vmem:[#allocation37_spill] sm:$0xff] }
 0x3d7   : > { %v6028_v57 = vunpack.i.l.bf16 %v6027_v13  ;;  %v3061_v46 = vsel %vm541_vm1, %v6013_v18, %v6014_v51  ;;  %v3149_v30 = vmul.f32 %v6013_v18, %v13641_v34  ;;  %v6039_v24 = vunpack.i.h.bf16 %v6037_v39 }
 0x3d8   : > { %v6038_v21 = vunpack.i.l.bf16 %v6037_v39  ;;  %v3176_v28 = vadd.f32 %v3175_v26, %v3174_v59  ;;  %v3191_v14 = vsel %vm3181_vm9, %v3148_v48, 0.0  ;;  %v3146_v7 = vmul.f32 %v3059_v50, %v13642_v53  ;;  %v13646_v26 = vld [vmem:[#allocation42_spill] sm:$0xff] }
 0x3d9   : > { %v3151_v52 = vmul.f32 %v6018_v38, %v13643_v35  ;;  %v3152_v0 = vmul.f32 %v3062_v56, %v13644_v62  ;;  %v3063_v11 = vsel %vm541_vm1, %v6023_v16, %v6024_v6  ;;  %v6044_v13 = vunpack.i.h.bf16 %v6042_v37 }
 0x3da   : > { %v6043_v2 = vunpack.i.l.bf16 %v6042_v37  ;;  %v3236_v55 = vadd.f32 %v3235_v12, %v3234_v15  ;;  %v3150_v42 = vmul.f32 %v3061_v46, %v13645_v41  ;;  %v6034_v51 = vunpack.i.h.bf16 %v9628_v20 }
 0x3db   : > { %v6033_v18 = vunpack.i.l.bf16 %v9628_v20  ;;  %v3206_v39 = vsel %vm1278_vm5, %v3149_v30, 0.0  ;;  %v3064_v59 = vsel %vm541_vm1, %v6028_v57, %v6029_v10  ;;  %v3153_v38 = vmul.f32 %v6023_v16, %v13562_v47  ;;  %v13650_v30 = vld [vmem:[#allocation43_spill] sm:$0xff] }
 0x3dc   : > { %v3066_v48 = vsel %vm541_vm1, %v6038_v21, %v6039_v24  ;;  %v3155_v50 = vmul.f32 %v6028_v57, %v13646_v26  ;;  %v3154_v6 = vmul.f32 %v3063_v11, %v13568_v61  ;;  %v6049_v56 = vunpack.i.h.bf16 %v6047_v60 }
 0x3dd   : > { %v6048_v15 = vunpack.i.l.bf16 %v6047_v60  ;;  %v3251_v12 = vsel %vm13647_vm14, %v3146_v7, 0.0  ;;  %v3237_v37 = vsel %vm13648_vm15, %v3151_v52, 0.0  ;;  %v3159_v20 = vmul.f32 %v6038_v21, %v13564_v33  ;;  %v13651_v7 = vld [vmem:[#allocation53_spill] sm:$0xff]  ;;  %v13652_v60 = vld [vmem:[#allocation55_spill] sm:$0xff] }
 0x3de   : > { %v3067_v46 = vsel %vm541_vm1, %v6043_v2, %v6044_v13  ;;  %v3253_v10 = vsel %vm13649_vm7, %v3152_v0, 0.0  ;;  %v3156_v16 = vmul.f32 %v3064_v59, %v13650_v30  ;;  %v3160_v24 = vmul.f32 %v3066_v48, %v13573_v9  ;;  %v13653_v59 = vld [vmem:[#allocation44_spill] sm:$0xff]  ;;  %v13654_v48 = vld [vmem:[#allocation45_spill] sm:$0xff] }
 0x3df   : > { %v3065_v57 = vsel %vm541_vm1, %v6033_v18, %v6034_v51  ;;  %v3207_v53 = vadd.f32 %v3206_v39, %v3205_v45  ;;  %v3221_v61 = vsel %vm1294_vm4, %v3150_v42, 0.0  ;;  %v3177_v62 = vsel %vm3165_vm10, %v3153_v38, 0.0  ;;  %v13655_v38 = vld [vmem:[#allocation56_spill] sm:$0xff] }
 0x3e0   : > { %v3161_v11 = vmul.f32 %v6043_v2, %v13651_v7  ;;  %v3208_v52 = vsel %vm1278_vm5, %v3155_v50, 0.0  ;;  %v3068_v21 = vsel %vm541_vm1, %v6048_v15, %v6049_v56  ;;  %v3162_v13 = vmul.f32 %v3067_v46, %v13652_v60  ;;  %v13656_v7 = vld [vmem:[#allocation58_spill] sm:$0xff] }
 0x3e1   : > { %v3193_v41 = vsel %vm3181_vm9, %v3154_v6, 0.0  ;;  %v3157_v9 = vmul.f32 %v6033_v18, %v13653_v59  ;;  %v3158_v51 = vmul.f32 %v3065_v57, %v13654_v48  ;;  %v3179_v45 = vsel %vm3165_vm10, %v3159_v20, 0.0  ;;  %vm13657_vm10 = vmmov %vm13636_vm12 }
 0x3e2   : > { %v3192_v39 = vadd.f32 %v3191_v14, %v3190_v54  ;;  %v3163_v30 = vmul.f32 %v6048_v15, %v13655_v38  ;;  %v3195_v2 = vsel %vm3181_vm9, %v3160_v24, 0.0  ;;  %v3178_v50 = vadd.f32 %v3177_v62, %v3176_v28  ;;  %vm13658_vm9 = vmmov %vm13638_vm6 }
 0x3e3   : > { %v3223_v56 = vsel %vm1294_vm4, %v3156_v16, 0.0  ;;  %v3164_v46 = vmul.f32 %v3068_v21, %v13656_v7  ;;  %v3210_v6 = vsel %vm1278_vm5, %v3161_v11, 0.0  ;;  %v3222_v18 = vadd.f32 %v3221_v61, %v9642_v1  ;;  %vm13659_vm5 = vmmov %vm13657_vm10 }
 0x3e4   : > { %v3194_v60 = vadd.f32 %v3193_v41, %v3192_v39  ;;  %v3180_v59 = vadd.f32 %v3179_v45, %v3178_v50  ;;  %v3209_v20 = vadd.f32 %v3208_v52, %v3207_v53  ;;  %v3225_v54 = vsel %vm1294_vm4, %v3162_v13, 0.0  ;;  %vm13660_vm4 = vmmov %vm13638_vm6 }
 0x3e5   : > { %v3252_v14 = vadd.f32 %v3251_v12, %v9638_v27  ;;  %v3239_v15 = vsel %vm13657_vm10, %v3157_v9, 0.0  ;;  %v3224_v24 = vadd.f32 %v3223_v56, %v3222_v18  ;;  %v3238_v16 = vadd.f32 %v3237_v37, %v3236_v55 }
 0x3e6   : > { %v3196_v28 = vadd.f32 %v3195_v2, %v3194_v60  ;;  %v3211_v21 = vadd.f32 %v3210_v6, %v3209_v20  ;;  %v3255_v11 = vsel %vm13658_vm9, %v3158_v51, 0.0  ;;  %v3241_v53 = vsel %vm13659_vm5, %v3163_v30, 0.0  ;;  %v409_v2 = vld [vmem:[%s6578_s7] sm:$0xff]  ;;  %v13683_v20 = vld [vmem:[#allocation146_spill] sm:$0xff] }
 0x3e7   : > { %v3226_v61 = vadd.f32 %v3225_v54, %v3224_v24  ;;  %v3254_v52 = vadd.f32 %v3253_v10, %v3252_v14  ;;  %v3257_v12 = vsel %vm13660_vm4, %v3164_v46, 0.0  ;;  %v13661_v55 = vunpack.i.h.bf16 %v13614_v58 }
 0x3e8   : > { %v13662_v37 = vunpack.i.l.bf16 %v13614_v58  ;;  %v9708_v9 = vadd.f32 %v9514_v43, %v9522_v8  ;;  %v13664_v51 = vunpack.i.h.bf16 %v13615_v19  ;;  %v13665_v45 = vunpack.i.l.bf16 %v13615_v19  ;;  %v410_v19 = vld [vmem:[%s6578_s7 + $0x8] sm:$0xff] }
 0x3e9   : > { %v3256_v10 = vadd.f32 %v3255_v11, %v3254_v52  ;;  %v13667_v50 = vunpack.i.h.bf16 %v13616_v5  ;;  %v13668_v56 = vunpack.i.l.bf16 %v13616_v5  ;;  %v9731_v24 = vunpack.c.l.bf16 %v409_v2 }
 0x3ea   : > { %v9737_v11 = vunpack.c.l.bf16 %v410_v19  ;;  %vm13760_vm10 = vcmask 1047554   ;;  %vm13764_vm5 = vcmask 1041408  }
 0x3eb   : > { %v9723_v43 = vsel %vm12799_vm11, %v13668_v56, %v13667_v50  ;;  %v3258_v18 = vadd.f32 %v3257_v12, %v3256_v10  ;;  %13670 = vst [vmem:[#allocation227_spill] sm:$0xff] %v9731_v24  ;;  %v413_v12 = vld [vmem:[%s6578_s7 + $0x20] sm:$0xff]  ;;  %vm13761_vm9 = vmmov %vm13760_vm10 }
 0x3ec   : > { %13672 = vst [vmem:[#allocation228_spill] sm:$0xff] %v9737_v11  ;;  %v9766_v56 = vunpack.c.l.bf16 %v413_v12  ;;  %vm13767_vm4 = vmmov %vm13761_vm9 }
 0x3ed   : > { %v3391_v0 = vpop.permute.xlu0 %3390 }
 0x3ee   : > { %v3389_v42 = vpop.permute.xlu1 %3388  ;;  %13677 = vst [vmem:[#allocation238_spill] sm:$0xff] %v9766_v56 }
 0x3ef   : > { %v3400_v57 = vsel %vm541_vm1, %v3389_v42, %v3391_v0  ;;  %v3409_v62 = vmul.f32 %v3389_v42, %v3180_v59  ;;  %v3240_v0 = vadd.f32 %v3239_v15, %v3238_v16  ;;  %v9704_v59 = vsel %vm12799_vm11, %v13662_v37, %v13661_v55  ;;  %v13674_v55 = vld [vmem:[#allocation121_spill] sm:$0xff] }
 0x3f0   : > { %v3410_v41 = vmul.f32 %v3400_v57, %v3196_v28  ;;  %13663 = vst [vmem:[#allocation221_spill] sm:$0xff] %v9704_v59  ;;  %v9715_v42 = vsel %vm12799_vm11, %v13665_v45, %v13664_v51  ;;  %v9733_v16 = vunpack.c.h.bf16 %v409_v2  ;;  %v5484_v37 = vunpack.i.h.bf16 %v13674_v55  ;;  %v13676_v2 = vld [vmem:[#allocation140_spill] sm:$0xff] }
 0x3f1   : > { %13666 = vst [vmem:[#allocation229_spill] sm:$0xff] %v9715_v42  ;;  %v3559_v39 = vrot.slane %v3409_v62, 2  ;;  %v3242_v58 = vadd.f32 %v3241_v53, %v3240_v0  ;;  %v13671_v62 = vld [vmem:[#allocation141_spill] sm:$0xff]  ;;  %v13673_v53 = vld [vmem:[#allocation142_spill] sm:$0xff]  ;;  %v5579_v50 = vunpack.i.h.bf16 %v13676_v2  ;;  %v5609_v42 = vunpack.i.h.bf16 %v13683_v20 }
 0x3f2   : > { %v3562_v8 = vrot.slane %v3410_v41, 2  ;;  %v9739_v41 = vunpack.c.h.bf16 %v410_v19  ;;  %v5589_v52 = vunpack.i.h.bf16 %v13673_v53  ;;  %v9754_v45 = vpack.i.bf16 %v9733_v16, %v9731_v24 }
 0x3f3   : > { %v5608_v57 = vunpack.i.l.bf16 %v13683_v20 }
 0x3f4   : > { %v3395_v7 = vpop.permute.xlu0 %3394 }
 0x3f6   : > { %v3393_v1 = vpop.permute.xlu1 %3392 }
 0x3f7   : > { %v3401_v13 = vsel %vm541_vm1, %v3393_v1, %v3395_v7  ;;  %v3411_v27 = vmul.f32 %v3393_v1, %v3211_v21  ;;  %v5574_v7 = vunpack.i.h.bf16 %v13671_v62  ;;  %v412_v1 = vld [vmem:[%s6578_s7 + $0x18] sm:$0xff] }
 0x3f8   : > { %v3412_v48 = vmul.f32 %v3401_v13, %v3226_v61  ;;  %v5573_v61 = vunpack.i.l.bf16 %v13671_v62  ;;  %v5588_v13 = vunpack.i.l.bf16 %v13673_v53  ;;  %v13680_v62 = vld [vmem:[#allocation144_spill] sm:$0xff]  ;;  %v5578_v53 = vunpack.i.l.bf16 %v13676_v2 }
 0x3f9   : > { %v3560_v30 = vrot.slane %v3411_v27, 2 }
 0x3fa   : > { %v3563_v46 = vrot.slane %v3412_v48, 2  ;;  %v3399_v60 = vpop.permute.xlu0 %3398  ;;  %v3397_v6 = vpop.permute.xlu1 %3396  ;;  %v5483_v48 = vunpack.i.l.bf16 %v13674_v55 }
 0x3fb   : > { %v3402_v54 = vsel %vm541_vm1, %v3397_v6, %v3399_v60  ;;  %v3413_v14 = vmul.f32 %v3397_v6, %v3242_v58  ;;  %v3561_v15 = vsel %vm3517_vm0, %v3559_v39, %v3560_v30  ;;  %v9756_v39 = vunpack.c.l.bf16 %v412_v1  ;;  %v13678_v6 = vld [vmem:[#allocation143_spill] sm:$0xff] }
 0x3fc   : > { %v3414_v28 = vmul.f32 %v3402_v54, %v3258_v18  ;;  %3569 = vrot.lane.b32.xlu1 %v3561_v15, %s6512_s14  ;;  %v3564_v5 = vsel %vm3517_vm0, %v3562_v8, %v3563_v46  ;;  %v9758_v58 = vunpack.c.h.bf16 %v412_v1  ;;  %v9768_v8 = vunpack.c.h.bf16 %v413_v12  ;;  %v13679_v15 = vld [vmem:[#allocation145_spill] sm:$0xff] }
 0x3fd   : > { %v3565_v21 = vrot.slane %v3413_v14, 2  ;;  %3571 = vrot.lane.b32.xlu0 %v3564_v5, %s6512_s14  ;;  %13675 = vst [vmem:[#allocation237_spill] sm:$0xff] %v9756_v39  ;;  %v1579_v60 = vsel %vm12799_vm11, %v5573_v61, %v5574_v7  ;;  %v5584_v18 = vunpack.i.h.bf16 %v13678_v6  ;;  %v5583_v19 = vunpack.i.l.bf16 %v13678_v6  ;;  %v416_v14 = vld [vmem:[%s6578_s7 + $0x38] sm:$0xff] }
 0x3fe   : > { %v3567_v27 = vrot.slane %v3414_v28, 2  ;;  %v1582_v54 = vsel %vm12799_vm11, %v5588_v13, %v5589_v52  ;;  %v5594_v28 = vunpack.i.h.bf16 %v13679_v15  ;;  %v5593_v5 = vunpack.i.l.bf16 %v13679_v15  ;;  %v419_v15 = vld [vmem:[%s6578_s7 + $0x50] sm:$0xff] }
 0x3ff   : > { %v3566_v10 = vsel %vm3517_vm0, %v3560_v30, %v3565_v21  ;;  %v9764_v30 = vpack.i.bf16 %v9739_v41, %v9737_v11  ;;  %v5599_v21 = vunpack.i.h.bf16 %v13680_v62  ;;  %v5598_v1 = vunpack.i.l.bf16 %v13680_v62 }
 0x400   : > { %3573 = vrot.lane.b32.xlu1 %v3566_v10, %s6512_s14  ;;  %v3568_v51 = vsel %vm3517_vm0, %v3563_v46, %v3567_v27  ;;  %v415_v46 = vld [vmem:[%s6578_s7 + $0x30] sm:$0xff]  ;;  %v9785_v7 = vpack.i.bf16 %v9758_v58, %v9756_v39  ;;  %v1627_v13 = vmul.f32 %v1579_v60, %v13431_v3  ;;  %v9796_v27 = vpack.i.bf16 %v9768_v8, %v9766_v56  ;;  %v418_v10 = vld [vmem:[%s6578_s7 + $0x48] sm:$0xff] }
 0x401   : > { %3575 = vrot.lane.b32.xlu0 %v3568_v51, %s6512_s14  ;;  %v9787_v61 = vunpack.c.l.bf16 %v415_v46  ;;  %v9789_v52 = vunpack.c.h.bf16 %v415_v46  ;;  %v9798_v12 = vunpack.c.l.bf16 %v416_v14  ;;  %v9800_v55 = vunpack.c.h.bf16 %v416_v14  ;;  %v13682_v46 = vld [vmem:[#allocation147_spill] sm:$0xff]  ;;  %v13690_v3 = vld [vmem:[#allocation150_spill] sm:$0xff] }
 0x402   : > { %v1581_v51 = vsel %vm12799_vm11, %v5583_v19, %v5584_v18  ;;  %v1630_v2 = vmul.f32 %v1582_v54, %v13603_v22  ;;  %v5604_v6 = vunpack.i.h.bf16 %v13682_v46  ;;  %v5603_v60 = vunpack.i.l.bf16 %v13682_v46  ;;  %v13684_v14 = vld [vmem:[#allocation151_spill] sm:$0xff] }
 0x403   : > { %13681 = vst [vmem:[#allocation232_spill] sm:$0xff] %v9798_v12  ;;  %v1583_v62 = vsel %vm12799_vm11, %v5593_v5, %v5594_v28  ;;  %v1584_v0 = vsel %vm12799_vm11, %v5598_v1, %v5599_v21  ;;  %v5614_v59 = vunpack.i.h.bf16 %v13684_v14  ;;  %v9817_v18 = vpack.i.bf16 %v9789_v52, %v9787_v61 }
 0x404   : > { %6051 = vrot.lane.b32.xlu1 %v9754_v45, %s6510_s12  ;;  %v9819_v19 = vunpack.c.l.bf16 %v418_v10  ;;  %v9821_v54 = vunpack.c.h.bf16 %v418_v10  ;;  %v5613_v28 = vunpack.i.l.bf16 %v13684_v14  ;;  %v9828_v20 = vpack.i.bf16 %v9800_v55, %v9798_v12 }
 0x405   : > { %6056 = vrot.lane.b32.xlu0 %v9764_v30, %s6510_s12  ;;  %v9830_v5 = vunpack.c.l.bf16 %v419_v15  ;;  %v9832_v21 = vunpack.c.h.bf16 %v419_v15  ;;  %v1580_v1 = vsel %vm12799_vm11, %v5578_v53, %v5579_v50  ;;  %v1585_v46 = vsel %vm12799_vm11, %v5603_v60, %v5604_v6 }
 0x406   : > { %13685 = vst [vmem:[#allocation231_spill] sm:$0xff] %v9819_v19  ;;  %13686 = vst [vmem:[#allocation234_spill] sm:$0xff] %v9821_v54  ;;  %v797_v10 = vsel %vm12799_vm11, %v5483_v48, %v5484_v37  ;;  %v827_v14 = vmul.f32 %v9723_v43, %v13562_v47  ;;  %vm13689_vm1 = vcmask 1047553   ;;  %v1629_v22 = vmul.f32 %v1581_v51, %v13618_v4  ;;  %v13713_v4 = vld [vmem:[#allocation167_spill] sm:$0xff] }
 0x407   : > { %13687 = vst [vmem:[#allocation233_spill] sm:$0xff] %v9830_v5  ;;  %13688 = vst [vmem:[#allocation242_spill] sm:$0xff] %v9832_v21  ;;  %v1652_v38 = vsel %vm13689_vm1, %v1627_v13, 0.0  ;;  %v5619_v35 = vunpack.i.h.bf16 %v13690_v3  ;;  %v5618_v26 = vunpack.i.l.bf16 %v13690_v3  ;;  %v1631_v34 = vmul.f32 %v1583_v62, %v13600_v17 }
 0x408   : > { %6061 = vrot.lane.b32.xlu1 %v9785_v7, %s6510_s12  ;;  %vm13691_vm8 = vmmov %vm13689_vm1  ;;  %v1632_v50 = vmul.f32 %v1584_v0, %v13621_v25  ;;  %v9850_v43 = vpack.i.bf16 %v9821_v54, %v9819_v19  ;;  %v1633_v37 = vmul.f32 %v1585_v46, %v13447_v49  ;;  %v1586_v48 = vsel %vm12799_vm11, %v5608_v57, %v5609_v42  ;;  %v13692_v0 = vld [vmem:[#allocation154_spill] sm:$0xff] }
 0x409   : > { %6066 = vrot.lane.b32.xlu0 %v9796_v27, %s6510_s12  ;;  %v1653_v15 = vsel %vm13691_vm8, %v1630_v2, 0.0  ;;  %v1587_v53 = vsel %vm12799_vm11, %v5613_v28, %v5614_v59  ;;  %v9859_v3 = vpack.i.bf16 %v9832_v21, %v9830_v5  ;;  %v5624_v13 = vunpack.i.h.bf16 %v13692_v0  ;;  %v13693_v2 = vld [vmem:[#allocation153_spill] sm:$0xff]  ;;  %vm13694_vm12 = vmmov %vm13689_vm1 }
 0x40a   : > { %v5623_v51 = vunpack.i.l.bf16 %v13692_v0  ;;  %v5629_v6 = vunpack.i.h.bf16 %v13693_v2  ;;  %v5628_v60 = vunpack.i.l.bf16 %v13693_v2  ;;  %v1628_v62 = vmul.f32 %v1580_v1, %v13601_v31  ;;  %vm13700_vm6 = vmmov %vm13689_vm1 }
 0x40b   : > { %v1588_v42 = vsel %vm12799_vm11, %v5618_v26, %v5619_v35  ;;  %v829_v59 = vmul.f32 %v797_v10, %v13564_v33  ;;  %v836_v57 = vadd.f32 %v9708_v9, %v827_v14  ;;  %v1674_v28 = vsel %vm861_vm3, %v1629_v22, 0.0  ;;  %v13695_v26 = vld [vmem:[#allocation28_spill] sm:$0xff]  ;;  %v13696_v10 = vld [vmem:[#allocation157_spill] sm:$0xff]  ;;  %vm13721_vm13 = vmmov %vm13689_vm1 }
 0x40c   : > { %6071 = vrot.lane.b32.xlu1 %v9817_v18, %s6510_s12  ;;  %v1654_v46 = vadd.f32 %v1653_v15, %v1652_v38  ;;  %v1635_v17 = vmul.f32 %v1587_v53, %v13628_v63  ;;  %v1667_v0 = vadd.f32 %v1631_v34, %v1628_v62  ;;  %v1675_v2 = vsel %vm861_vm3, %v1632_v50, 0.0  ;;  %v13697_v34 = vld [vmem:[#allocation156_spill] sm:$0xff]  ;;  %v9886_v53 = vld [vmem:[%s6578_s7 + $0x10] sm:$0x11]  ;;  %vm13723_vm14 = vmmov %vm13689_vm1 }
 0x40d   : > { %6076 = vrot.lane.b32.xlu0 %v9828_v20, %s6510_s12  ;;  %v1634_v1 = vmul.f32 %v1586_v48, %v13604_v36  ;;  %v1655_v35 = vsel %vm13694_vm12, %v1633_v37, 0.0  ;;  %v1636_v9 = vmul.f32 %v1588_v42, %v13695_v26  ;;  %v1589_v22 = vsel %vm12799_vm11, %v5623_v51, %v5624_v13  ;;  %vm13730_vm15 = vmmov %vm13689_vm1 }
 0x40e   : > { %v1590_v38 = vsel %vm12799_vm11, %v5628_v60, %v5629_v6  ;;  %v5634_v14 = vunpack.i.h.bf16 %v13696_v10  ;;  %v5633_v15 = vunpack.i.l.bf16 %v13696_v10  ;;  %v5639_v50 = vunpack.i.h.bf16 %v13697_v34  ;;  %v13699_v6 = vld [vmem:[#allocation26_spill] sm:$0xff]  ;;  %vm13732_vm7 = vmmov %vm13689_vm1 }
 0x40f   : > { %v5638_v48 = vunpack.i.l.bf16 %v13697_v34  ;;  %v1676_v62 = vadd.f32 %v1675_v2, %v1674_v28  ;;  %v1677_v37 = vsel %vm861_vm3, %v1635_v17, 0.0  ;;  %v9889_v63 = vadd.f32 %v836_v57, %v829_v59  ;;  %v9905_v57 = vld [vmem:[%s6578_s7 + $0x28] sm:$0x11]  ;;  %vm13772_vm1 = vmmov %vm13764_vm5 }
 0x410   : > { %6081 = vrot.lane.b32.xlu1 %v9850_v43, %s6510_s12  ;;  %v9893_v13 = vadd.f32 %v1655_v35, %v1654_v46  ;;  %v1668_v51 = vadd.f32 %v1667_v0, %v1634_v1  ;;  %v1638_v60 = vmul.f32 %v1590_v38, %v13699_v6  ;;  %v9899_v42 = vsel %vm13700_vm6, %v1636_v9, 0.0  ;;  %vm13778_vm8 = vmmov %vm13767_vm4 }
 0x411   : > { %6086 = vrot.lane.b32.xlu0 %v9859_v3, %s6510_s12  ;;  %13698 = vst [vmem:[#allocation246_spill] sm:$0xff] %v9889_v63  ;;  %v1637_v28 = vmul.f32 %v1589_v22, %v13606_v40  ;;  %v12721_v17 = vunpack.c.l.bf16 %v9886_v53  ;;  %v12720_v59 = vunpack.c.h.bf16 %v9886_v53  ;;  %v1591_v46 = vsel %vm12799_vm11, %v5633_v15, %v5634_v14  ;;  %vm13785_vm12 = vmmov %vm13772_vm1 }
 0x412   : > { %v1592_v0 = vsel %vm12799_vm11, %v5638_v48, %v5639_v50  ;;  %v4447_v2 = vrot.slane %v9731_v24, 1  ;;  %v4511_v1 = vrot.slane %v9733_v16, 1  ;;  %v4512_v35 = vrot.slane %v9739_v41, 1  ;;  %v13701_v50 = vld [vmem:[#allocation159_spill] sm:$0xff]  ;;  %vm13787_vm6 = vmmov %vm13767_vm4 }
 0x413   : > { %v9918_v9 = vsel %vm861_vm3, %v1638_v60, 0.0  ;;  %v12723_v22 = vunpack.c.l.bf16 %v9905_v57  ;;  %v12724_v38 = vunpack.c.h.bf16 %v9905_v57  ;;  %v9924_v10 = vadd.f32 %v1668_v51, %v1637_v28 }
 0x414   : > { %6091 = vrot.lane.b32.xlu1 %v9754_v45, %s6512_s14  ;;  %v9907_v45 = vadd.f32 %v1677_v37, %v1676_v62  ;;  %v4450_v14 = vrot.slane %v12721_v17, 1  ;;  %v4514_v15 = vrot.slane %v12720_v59, 1  ;;  %v9934_v34 = vmul.f32 %v1591_v46, %v13459_v32  ;;  %v9940_v37 = vld [vmem:[%s6578_s7 + $0x40] sm:$0x11] }
 0x415   : > { %6096 = vrot.lane.b32.xlu0 %v9764_v30, %s6512_s14  ;;  %v4448_v30 = vrot.slane %v9737_v11, 1  ;;  %v4452_v48 = vrot.slane %v9756_v39, 1  ;;  %v4453_v62 = vrot.slane %v9766_v56, 1  ;;  %v4513_v60 = vsel %vm637_vm2, %v4511_v1, %v4512_v35 }
 0x416   : > { %v4516_v28 = vrot.slane %v9758_v58, 1  ;;  %v4517_v46 = vrot.slane %v9768_v8, 1  ;;  %v4519_v59 = vrot.slane %v12724_v38, 1  ;;  %v12732_v1 = vunpack.c.l.bf16 %v9940_v37  ;;  %v9971_v38 = vld [vmem:[%s6578_s7 + $0x58] sm:$0x11] }
 0x417   : > { %v9945_v51 = vsel %vm637_vm2, %v4447_v2, %v4448_v30  ;;  %v4515_v2 = vsel %vm637_vm2, %v4512_v35, %v4514_v15  ;;  %v5648_v6 = vunpack.i.l.bf16 %v13701_v50  ;;  %13706 = vst [vmem:[#allocation244_spill] sm:$0xff] %v9971_v38  ;;  %v4458_v35 = vrot.slane %v9798_v12, 1 }
 0x418   : > { %6101 = vrot.lane.b32.xlu1 %v9785_v7, %s6512_s14  ;;  %v9927_v7 = vmul.f32 %v1592_v0, %v13607_v29  ;;  %13702 = vst [vmem:[#allocation241_spill] sm:$0xff] %v9945_v51  ;;  %v4455_v0 = vrot.slane %v12723_v22, 1  ;;  %v9965_v29 = vpack.i.bf16 %v4513_v60, %v9945_v51  ;;  %v9968_v22 = vsel %vm637_vm2, %v4452_v48, %v4453_v62 }
 0x419   : > { %6106 = vrot.lane.b32.xlu0 %v9796_v27, %s6512_s14  ;;  %v5649_v27 = vunpack.i.h.bf16 %v13701_v50  ;;  %13705 = vst [vmem:[#allocation245_spill] sm:$0xff] %v9968_v22  ;;  %v4522_v15 = vrot.slane %v9800_v55, 1  ;;  %v4518_v48 = vsel %vm637_vm2, %v4516_v28, %v4517_v46  ;;  %v4460_v17 = vrot.slane %v12732_v1, 1  ;;  %v13709_v28 = vld [vmem:[#allocation163_spill] sm:$0xff] }
 0x41a   : > { %v9986_v60 = vsel %vm637_vm2, %v4453_v62, %v4455_v0  ;;  %v13708_v51 = vunpack.c.h.bf16 %v9940_v37  ;;  %v12741_v40 = vunpack.c.l.bf16 %v9971_v38  ;;  %v5654_v36 = vunpack.i.h.bf16 %v13709_v28 }
 0x41b   : > { %13707 = vst [vmem:[#allocation248_spill] sm:$0xff] %v9986_v60  ;;  %v5653_v62 = vunpack.i.l.bf16 %v13709_v28  ;;  %v4462_v0 = vrot.slane %v9819_v19, 1  ;;  %v10018_v28 = vsel %vm637_vm2, %v4458_v35, %v4460_v17  ;;  %v5663_v17 = vunpack.i.l.bf16 %v13713_v4 }
 0x41c   : > { %6111 = vrot.lane.b32.xlu1 %v9817_v18, %s6512_s14  ;;  %v9957_v18 = vsel %vm637_vm2, %v4448_v30, %v4450_v14  ;;  %v4457_v30 = vrot.slane %v9787_v61, 1  ;;  %v4521_v14 = vrot.slane %v9789_v52, 1  ;;  %v4524_v32 = vrot.slane %v13708_v51, 1  ;;  %13711 = vst [vmem:[#allocation50_spill] sm:$0xff] %v10018_v28 }
 0x41d   : > { %6116 = vrot.lane.b32.xlu0 %v9828_v20, %s6512_s14  ;;  %13703 = vst [vmem:[#allocation239_spill] sm:$0xff] %v9957_v18  ;;  %v13704_v20 = vld [vmem:[#allocation160_spill] sm:$0xff]  ;;  %v9982_v50 = vpack.i.bf16 %v4515_v2, %v9957_v18  ;;  %v1594_v18 = vsel %vm12799_vm11, %v5648_v6, %v5649_v27  ;;  %v4463_v27 = vrot.slane %v9830_v5, 1 }
 0x41e   : > { %v5644_v63 = vunpack.i.h.bf16 %v13704_v20  ;;  %v5643_v2 = vunpack.i.l.bf16 %v13704_v20  ;;  %v10005_v51 = vsel %vm637_vm2, %v4457_v30, %v4458_v35  ;;  %v4526_v20 = vrot.slane %v9821_v54, 1  ;;  %v13714_v35 = vld [vmem:[#allocation170_spill] sm:$0xff] }
 0x41f   : > { %13710 = vst [vmem:[#allocation247_spill] sm:$0xff] %v10005_v51  ;;  %v4525_v30 = vsel %vm637_vm2, %v4522_v15, %v4524_v32  ;;  %v5679_v32 = vunpack.i.h.bf16 %v13714_v35 }
 0x420   : > { %6121 = vrot.lane.b32.xlu1 %v9850_v43, %s6512_s14  ;;  %v4520_v43 = vsel %vm637_vm2, %v4517_v46, %v4519_v59  ;;  %v10002_v59 = vpack.i.bf16 %v4518_v48, %v9968_v22  ;;  %v4523_v46 = vsel %vm637_vm2, %v4521_v14, %v4522_v15  ;;  %v4527_v48 = vrot.slane %v9832_v21, 1  ;;  %v13712_v22 = vld [vmem:[#allocation165_spill] sm:$0xff] }
 0x421   : > { %6126 = vrot.lane.b32.xlu0 %v9859_v3, %s6512_s14  ;;  %v12740_v3 = vunpack.c.h.bf16 %v9971_v38  ;;  %v10012_v6 = vpack.i.bf16 %v4520_v43, %v9986_v60  ;;  %v4465_v14 = vrot.slane %v12741_v40, 1  ;;  %v1593_v43 = vsel %vm12799_vm11, %v5643_v2, %v5644_v63  ;;  %v13717_v40 = vld [vmem:[#allocation162_spill] sm:$0xff] }
 0x422   : > { %v1642_v60 = vmul.f32 %v1594_v18, %v13553_v23  ;;  %v5669_v26 = vunpack.i.h.bf16 %v13712_v22  ;;  %v5668_v31 = vunpack.i.l.bf16 %v13712_v22  ;;  %v5664_v21 = vunpack.i.h.bf16 %v13713_v4 }
 0x423   : > { %v4529_v1 = vrot.slane %v12740_v3, 1  ;;  %v10035_v15 = vpack.i.bf16 %v4523_v46, %v10005_v51  ;;  %v5678_v63 = vunpack.i.l.bf16 %v13714_v35  ;;  %v10041_v18 = vpack.i.bf16 %v4525_v30, %v10018_v28  ;;  %v13718_v30 = vld [vmem:[#allocation171_spill] sm:$0xff] }
 0x424   : > { %6131 = vrot.lane.b32.xlu1 %v9965_v29, %s6510_s12  ;;  %v10044_v22 = vsel %vm637_vm2, %v4462_v0, %v4463_v27  ;;  %v4528_v4 = vsel %vm637_vm2, %v4526_v20, %v4527_v48  ;;  %v1641_v2 = vmul.f32 %v1593_v43, %v13639_v44  ;;  %v1595_v3 = vsel %vm12799_vm11, %v5653_v62, %v5654_v36  ;;  %v13719_v20 = vld [vmem:[#allocation173_spill] sm:$0xff] }
 0x425   : > { %6136 = vrot.lane.b32.xlu0 %v9982_v50, %s6510_s12  ;;  %13715 = vst [vmem:[#allocation255_spill] sm:$0xff] %v10044_v22  ;;  %v10050_v46 = vsel %vm637_vm2, %v4463_v27, %v4465_v14  ;;  %v4530_v35 = vsel %vm637_vm2, %v4527_v48, %v4529_v1  ;;  %v5659_v51 = vunpack.i.h.bf16 %v13717_v40  ;;  %v5658_v23 = vunpack.i.l.bf16 %v13717_v40  ;;  %v13720_v1 = vld [vmem:[#allocation36_spill] sm:$0xff] }
 0x426   : > { %13716 = vst [vmem:[#allocation48_spill] sm:$0xff] %v10050_v46  ;;  %v5674_v28 = vunpack.i.h.bf16 %v13718_v30  ;;  %v5673_v0 = vunpack.i.l.bf16 %v13718_v30  ;;  %v1597_v38 = vsel %vm12799_vm11, %v5663_v17, %v5664_v21  ;;  %v5684_v54 = vunpack.i.h.bf16 %v13719_v20  ;;  %v13727_v30 = vld [vmem:[#allocation44_spill] sm:$0xff] }
 0x427   : > { %v5683_v43 = vunpack.i.l.bf16 %v13719_v20  ;;  %v10063_v36 = vpack.i.bf16 %v4528_v4, %v10044_v22  ;;  %v1643_v62 = vmul.f32 %v1595_v3, %v13720_v1  ;;  %v1598_v40 = vsel %vm12799_vm11, %v5668_v31, %v5669_v26  ;;  %v13728_v20 = vld [vmem:[#allocation172_spill] sm:$0xff] }
 0x428   : > { %6141 = vrot.lane.b32.xlu1 %v10002_v59, %s6510_s12  ;;  %v1600_v27 = vsel %vm12799_vm11, %v5678_v63, %v5679_v32  ;;  %v10071_v21 = vpack.i.bf16 %v4530_v35, %v10050_v46  ;;  %v1658_v48 = vadd.f32 %v9899_v42, %v9893_v13  ;;  %v10077_v14 = vadd.f32 %v9918_v9, %v9907_v45  ;;  %v13722_v13 = vld [vmem:[#allocation42_spill] sm:$0xff] }
 0x429   : > { %6146 = vrot.lane.b32.xlu0 %v10012_v6, %s6510_s12  ;;  %v1659_v3 = vsel %vm13721_vm13, %v9934_v34, 0.0  ;;  %v10082_v31 = vsel %vm861_vm3, %v1641_v2, 0.0  ;;  %v1596_v26 = vsel %vm12799_vm11, %v5658_v23, %v5659_v51  ;;  %v1645_v17 = vmul.f32 %v1597_v38, %v13562_v47  ;;  %v13724_v38 = vld [vmem:[#allocation277_spill] sm:$0xff]  ;;  %v13726_v2 = vld [vmem:[#allocation38_spill] sm:$0xff]  ;;  %vm13794_vm13 = vmmov %vm13767_vm4 }
 0x42a   : > { %v1599_v32 = vsel %vm12799_vm11, %v5673_v0, %v5674_v28  ;;  %v1670_v63 = vadd.f32 %v9924_v10, %v9927_v7  ;;  %v1646_v42 = vmul.f32 %v1598_v40, %v13722_v13  ;;  %v1601_v45 = vsel %vm12799_vm11, %v5683_v43, %v5684_v54  ;;  %v13725_v7 = vld [vmem:[#allocation276_spill] sm:$0xff] }
 0x42b   : > { %v1648_v9 = vmul.f32 %v1600_v27, %v13564_v33  ;;  %v1660_v4 = vadd.f32 %v1659_v3, %v1658_v48  ;;  %v1661_v23 = vsel %vm13723_vm14, %v1642_v60, 0.0  ;;  %v5819_v51 = vunpack.i.h.bf16 %v13724_v38  ;;  %v10116_v3 = vpop.permute.xlu1 %3419  ;;  %v13736_v43 = vld [vmem:[#allocation280_spill] sm:$0xff]  ;;  %vm13798_vm14 = vmmov %vm13772_vm1 }
 0x42c   : > { %6151 = vrot.lane.b32.xlu1 %v10035_v15, %s6510_s12  ;;  %v1671_v34 = vadd.f32 %v1670_v63, %v1643_v62  ;;  %v5818_v10 = vunpack.i.l.bf16 %v13724_v38  ;;  %v5814_v28 = vunpack.i.h.bf16 %v13725_v7  ;;  %v5813_v54 = vunpack.i.l.bf16 %v13725_v7  ;;  %v13729_v62 = vld [vmem:[#allocation53_spill] sm:$0xff]  ;;  %v10125_v7 = vpop.permute.xlu0 %3421 }
 0x42d   : > { %6156 = vrot.lane.b32.xlu0 %v10041_v18, %s6510_s12  ;;  %v10102_v35 = vmul.f32 %v1596_v26, %v13726_v2  ;;  %v10105_v0 = vmul.f32 %v1599_v32, %v13727_v30  ;;  %v10110_v40 = vmul.f32 %v1601_v45, %v13729_v62  ;;  %v10114_v48 = vadd.f32 %v1661_v23, %v1660_v4  ;;  %v13731_v32 = vld [vmem:[#allocation279_spill] sm:$0xff] }
 0x42e   : > { %v10112_v27 = vadd.f32 %v1671_v34, %v1646_v42  ;;  %v10121_v26 = vsel %vm13730_vm15, %v1645_v17, 0.0  ;;  %v5829_v63 = vunpack.i.h.bf16 %v13731_v32  ;;  %v5828_v38 = vunpack.i.l.bf16 %v13731_v32  ;;  %v13733_v34 = vld [vmem:[#allocation278_spill] sm:$0xff]  ;;  %vm13799_vm15 = vmmov %vm13767_vm4 }
 0x42f   : > { %v10130_v42 = vsel %vm13732_vm7, %v1648_v9, 0.0  ;;  %v10133_v45 = vsel %vm12799_vm11, %v5818_v10, %v5819_v51  ;;  %v5824_v17 = vunpack.i.h.bf16 %v13733_v34  ;;  %v4691_v4 = vrot.slane %v9731_v24, 2  ;;  %v10157_v24 = vpop.permute.xlu1 %3423  ;;  %vm13804_vm7 = vmmov %vm13772_vm1 }
 0x430   : > { %6161 = vrot.lane.b32.xlu1 %v10063_v36, %s6510_s12  ;;  %v4692_v23 = vrot.slane %v9737_v11, 2  ;;  %v4751_v32 = vrot.slane %v9733_v16, 2  ;;  %v4752_v60 = vrot.slane %v9739_v41, 2  ;;  %v13734_v9 = vunpack.c.l.bf16 %v9886_v53  ;;  %v13737_v16 = vld [vmem:[#allocation281_spill] sm:$0xff]  ;;  %13739 = vst [vmem:[#allocation208_spill] sm:$0xff] %v10157_v24 }
 0x431   : > { %6166 = vrot.lane.b32.xlu0 %v10071_v21, %s6510_s12  ;;  %v13735_v10 = vunpack.c.h.bf16 %v9886_v53  ;;  %v5834_v46 = vunpack.i.h.bf16 %v13736_v43  ;;  %v5833_v22 = vunpack.i.l.bf16 %v13736_v43  ;;  %v5839_v41 = vunpack.i.h.bf16 %v13737_v16  ;;  %v10159_v53 = vpop.permute.xlu0 %3425 }
 0x432   : > { %v4694_v51 = vrot.slane %v13734_v9, 2  ;;  %13740 = vst [vmem:[#allocation251_spill] sm:$0xff] %v10159_v53  ;;  %v4753_v43 = vsel %vm3517_vm0, %v4751_v32, %v4752_v60  ;;  %v13743_v32 = vunpack.c.l.bf16 %v9905_v57 }
 0x434   : > { %6171 = vrot.lane.b32.xlu1 %v9965_v29, %s6512_s14  ;;  %v2421_v29 = vsel %vm12799_vm11, %v5813_v54, %v5814_v28  ;;  %v4754_v28 = vrot.slane %v13735_v10, 2  ;;  %v2424_v54 = vsel %vm12799_vm11, %v5828_v38, %v5829_v63  ;;  %v10162_v63 = vsel %vm3517_vm0, %v4691_v4, %v4692_v23 }
 0x435   : > { %6176 = vrot.lane.b32.xlu0 %v9982_v50, %s6512_s14  ;;  %v5823_v50 = vunpack.i.l.bf16 %v13733_v34  ;;  %v5838_v34 = vunpack.i.l.bf16 %v13737_v16  ;;  %13741 = vst [vmem:[#allocation207_spill] sm:$0xff] %v10162_v63  ;;  %v4696_v10 = vrot.slane %v9756_v39, 2  ;;  %v4697_v16 = vrot.slane %v9766_v56, 2 }
 0x436   : > { %v4755_v38 = vsel %vm3517_vm0, %v4752_v60, %v4754_v28  ;;  %v4756_v4 = vrot.slane %v9758_v58, 2  ;;  %v4699_v24 = vrot.slane %v13743_v32, 2  ;;  %v13746_v60 = vld [vmem:[#allocation6_spill] sm:$0xff]  ;;  %v2425_v56 = vsel %vm12799_vm11, %v5833_v22, %v5834_v46 }
 0x437   : > { %v2472_v28 = vmul.f32 %v2424_v54, %v13746_v60  ;;  %v2423_v39 = vsel %vm12799_vm11, %v5823_v50, %v5824_v17  ;;  %v4702_v17 = vrot.slane %v9798_v12, 2  ;;  %v4761_v22 = vrot.slane %v9789_v52, 2  ;;  %v13749_v52 = vld [vmem:[#allocation283_spill] sm:$0xff]  ;;  %v13754_v60 = vld [vmem:[#allocation234_spill] sm:$0xff] }
 0x438   : > { %6181 = vrot.lane.b32.xlu1 %v10002_v59, %s6512_s14  ;;  %v13738_v59 = vld [vmem:[#allocation282_spill] sm:$0xff]  ;;  %v4762_v46 = vrot.slane %v9800_v55, 2  ;;  %v10206_v50 = vsel %vm3517_vm0, %v4696_v10, %v4697_v16  ;;  %v13750_v55 = vunpack.c.l.bf16 %v9940_v37  ;;  %v5848_v10 = vunpack.i.l.bf16 %v13749_v52 }
 0x439   : > { %6186 = vrot.lane.b32.xlu0 %v10012_v6, %s6512_s14  ;;  %v5844_v11 = vunpack.i.h.bf16 %v13738_v59  ;;  %v5843_v9 = vunpack.i.l.bf16 %v13738_v59  ;;  %v10168_v6 = vsel %vm3517_vm0, %v4692_v23, %v4694_v51  ;;  %v4757_v59 = vrot.slane %v9768_v8, 2  ;;  %v13745_v51 = vld [vmem:[#allocation10_spill] sm:$0xff]  ;;  %13747 = vst [vmem:[#allocation250_spill] sm:$0xff] %v10206_v50 }
 0x43a   : > { %13742 = vst [vmem:[#allocation249_spill] sm:$0xff] %v10168_v6  ;;  %v2469_v53 = vmul.f32 %v2421_v29, %v13745_v51  ;;  %v10188_v8 = vpack.i.bf16 %v4753_v43, %v10162_v63  ;;  %v10191_v32 = vpack.i.bf16 %v4755_v38, %v10168_v6  ;;  %v4701_v29 = vrot.slane %v9787_v61, 2 }
 0x43b   : > { %v2427_v58 = vsel %vm12799_vm11, %v5843_v9, %v5844_v11  ;;  %v10201_v11 = vpop.permute.xlu0 %3437  ;;  %v4758_v54 = vsel %vm3517_vm0, %v4756_v4, %v4757_v59  ;;  %v5849_v9 = vunpack.i.h.bf16 %v13749_v52  ;;  %v4704_v43 = vrot.slane %v13750_v55, 2  ;;  %v13752_v4 = vld [vmem:[#allocation285_spill] sm:$0xff]  ;;  %v13757_v55 = vld [vmem:[#allocation244_spill] sm:$0xff] }
 0x43c   : > { %6191 = vrot.lane.b32.xlu1 %v10035_v15, %s6512_s14  ;;  %v13744_v15 = vunpack.c.h.bf16 %v9905_v57  ;;  %v10193_v57 = vpop.permute.xlu1 %3435  ;;  %v13751_v38 = vunpack.c.h.bf16 %v9940_v37  ;;  %v5859_v51 = vunpack.i.h.bf16 %v13752_v4  ;;  %v10232_v37 = vsel %vm3517_vm0, %v4701_v29, %v4702_v17 }
 0x43d   : > { %6196 = vrot.lane.b32.xlu0 %v10041_v18, %s6512_s14  ;;  %v2426_v18 = vsel %vm12799_vm11, %v5838_v34, %v5839_v41  ;;  %13753 = vst [vmem:[#allocation47_spill] sm:$0xff] %v10232_v37  ;;  %v2495_v6 = vsel %vm13761_vm9, %v2472_v28, 0.0  ;;  %vm12791_vm9 = vcmask 1031168  }
 0x43e   : > { %v4759_v23 = vrot.slane %v13744_v15, 2  ;;  %v2474_v34 = vmul.f32 %v2426_v18, %v13621_v25  ;;  %v2475_v15 = vmul.f32 %v2427_v58, %v13447_v49  ;;  %v10226_v25 = vpack.i.bf16 %v4758_v54, %v10206_v50  ;;  %v13755_v58 = vld [vmem:[#allocation242_spill] sm:$0xff] }
 0x43f   : > { %v4706_v49 = vrot.slane %v9819_v19, 2  ;;  %v4766_v18 = vrot.slane %v13754_v60, 2  ;;  %v4767_v54 = vrot.slane %v13755_v58, 2  ;;  %v2494_v50 = vsel %vm13760_vm10, %v2469_v53, 0.0  ;;  %v13762_v60 = vld [vmem:[#allocation16_spill] sm:$0xff]  ;;  %v10255_v19 = vpop.permute.xlu0 %3441  ;;  %vm13806_vm10 = vmmov %vm13767_vm4 }
 0x440   : > { %6201 = vrot.lane.b32.xlu1 %v10063_v36, %s6512_s14  ;;  %v10210_v36 = vsel %vm3517_vm0, %v4697_v16, %v4699_v24  ;;  %v4760_v41 = vsel %vm3517_vm0, %v4757_v59, %v4759_v23  ;;  %v5858_v24 = vunpack.i.l.bf16 %v13752_v4  ;;  %v4763_v59 = vsel %vm3517_vm0, %v4761_v22, %v4762_v46  ;;  %v10241_v52 = vpop.permute.xlu1 %3439  ;;  %v13763_v58 = vld [vmem:[#allocation8_spill] sm:$0xff] }
 0x441   : > { %6206 = vrot.lane.b32.xlu0 %v10071_v21, %s6512_s14  ;;  %13748 = vst [vmem:[#allocation252_spill] sm:$0xff] %v10210_v36  ;;  %v4764_v21 = vrot.slane %v13751_v38, 2  ;;  %v10229_v16 = vpack.i.bf16 %v4760_v41, %v10210_v36  ;;  %v4707_v23 = vrot.slane %v9830_v5, 2  ;;  %v10244_v41 = vsel %vm3517_vm0, %v4702_v17, %v4704_v43  ;;  %v13765_v43 = vld [vmem:[#allocation284_spill] sm:$0xff] }
 0x442   : > { %13756 = vst [vmem:[#allocation57_spill] sm:$0xff] %v10244_v41  ;;  %v13758_v22 = vunpack.c.l.bf16 %v13757_v55  ;;  %v13759_v4 = vunpack.c.h.bf16 %v13757_v55  ;;  %v2471_v63 = vmul.f32 %v2423_v39, %v13762_v60  ;;  %v2473_v5 = vmul.f32 %v2425_v56, %v13763_v58 }
 0x443   : > { %v4765_v29 = vsel %vm3517_vm0, %v4762_v46, %v4764_v21  ;;  %v2518_v17 = vsel %vm13764_vm5, %v2474_v34, 0.0  ;;  %v2428_v46 = vsel %vm12799_vm11, %v5848_v10, %v5849_v9  ;;  %v5854_v21 = vunpack.i.h.bf16 %v13765_v43  ;;  %vm13815_vm5 = vmmov %vm13772_vm1 }
 0x444   : > { %6211 = vrot.lane.b32.xlu1 %v10188_v8, %s6510_s12  ;;  %v4709_v38 = vrot.slane %v13758_v22, 2  ;;  %v4769_v36 = vrot.slane %v13759_v4, 2  ;;  %v10263_v55 = vpack.i.bf16 %v4763_v59, %v10232_v37  ;;  %v5853_v53 = vunpack.i.l.bf16 %v13765_v43  ;;  %v13769_v22 = vld [vmem:[#allocation286_spill] sm:$0xff] }
 0x445   : > { %6216 = vrot.lane.b32.xlu0 %v10191_v32, %s6510_s12  ;;  %v10269_v39 = vpack.i.bf16 %v4765_v29, %v10244_v41  ;;  %v10272_v56 = vsel %vm3517_vm0, %v4706_v49, %v4707_v23  ;;  %v4768_v28 = vsel %vm3517_vm0, %v4766_v18, %v4767_v54  ;;  %v2497_v34 = vsel %vm13767_vm4, %v2475_v15, 0.0  ;;  %v13770_v29 = vld [vmem:[#allocation288_spill] sm:$0xff]  ;;  %v13777_v41 = vld [vmem:[#allocation291_spill] sm:$0xff]  ;;  %vm13816_vm4 = vmmov %vm13772_vm1 }
 0x446   : > { %13766 = vst [vmem:[#allocation259_spill] sm:$0xff] %v10272_v56  ;;  %v2430_v9 = vsel %vm12799_vm11, %v5858_v24, %v5859_v51  ;;  %v10278_v10 = vsel %vm3517_vm0, %v4707_v23, %v4709_v38  ;;  %v4770_v59 = vsel %vm3517_vm0, %v4767_v54, %v4769_v36  ;;  %v5864_v4 = vunpack.i.h.bf16 %v13769_v22  ;;  %v13771_v15 = vld [vmem:[#allocation12_spill] sm:$0xff]  ;;  %v10291_v23 = vpop.permute.xlu1 %3474 }
 0x447   : > { %13768 = vst [vmem:[#allocation46_spill] sm:$0xff] %v10278_v10  ;;  %v5863_v60 = vunpack.i.l.bf16 %v13769_v22  ;;  %v5874_v58 = vunpack.i.h.bf16 %v13770_v29  ;;  %v5873_v49 = vunpack.i.l.bf16 %v13770_v29  ;;  %v10287_v18 = vadd.f32 %v10121_v26, %v10114_v48  ;;  %v13773_v38 = vld [vmem:[#allocation28_spill] sm:$0xff]  ;;  %v10301_v48 = vpop.permute.xlu0 %3476 }
 0x448   : > { %6221 = vrot.lane.b32.xlu1 %v10226_v25, %s6510_s12  ;;  %v2470_v51 = vmul.f32 %v10133_v45, %v13771_v15  ;;  %v2496_v24 = vadd.f32 %v2495_v6, %v2494_v50  ;;  %v10296_v36 = vpack.i.bf16 %v4768_v28, %v10272_v56  ;;  %v2517_v54 = vsel %vm13772_vm1, %v2471_v63, 0.0  ;;  %v13774_v50 = vld [vmem:[#allocation18_spill] sm:$0xff]  ;;  %v13775_v63 = vld [vmem:[#allocation289_spill] sm:$0xff] }
 0x449   : > { %6226 = vrot.lane.b32.xlu0 %v10229_v16, %s6510_s12  ;;  %v2478_v43 = vmul.f32 %v2430_v9, %v13773_v38  ;;  %v2429_v22 = vsel %vm12799_vm11, %v5853_v53, %v5854_v21  ;;  %v10306_v26 = vpack.i.bf16 %v4770_v59, %v10278_v10  ;;  %v2519_v45 = vadd.f32 %v2518_v17, %v2517_v54  ;;  %v13776_v53 = vld [vmem:[#allocation20_spill] sm:$0xff]  ;;  %v13779_v17 = vld [vmem:[#allocation287_spill] sm:$0xff] }
 0x44a   : > { %v2509_v6 = vadd.f32 %v2473_v5, %v2470_v51  ;;  %v2476_v29 = vmul.f32 %v2428_v46, %v13774_v50  ;;  %v2498_v28 = vadd.f32 %v2497_v34, %v2496_v24  ;;  %v2431_v15 = vsel %vm12799_vm11, %v5863_v60, %v5864_v4  ;;  %v13780_v4 = vld [vmem:[#allocation24_spill] sm:$0xff]  ;;  %v13782_v51 = vld [vmem:[#allocation290_spill] sm:$0xff]  ;;  %v10327_v54 = vpop.permute.xlu1 %3478 }
 0x44b   : > { %v5879_v56 = vunpack.i.h.bf16 %v13775_v63  ;;  %v5878_v9 = vunpack.i.l.bf16 %v13775_v63  ;;  %v2433_v21 = vsel %vm12799_vm11, %v5873_v49, %v5874_v58  ;;  %v2477_v38 = vmul.f32 %v2429_v22, %v13776_v53  ;;  %v13781_v58 = vld [vmem:[#allocation34_spill] sm:$0xff]  ;;  %v13783_v50 = vld [vmem:[#allocation292_spill] sm:$0xff] }
 0x44c   : > { %6231 = vrot.lane.b32.xlu1 %v10263_v55, %s6510_s12  ;;  %v5889_v37 = vunpack.i.h.bf16 %v13777_v41  ;;  %v5888_v59 = vunpack.i.l.bf16 %v13777_v41  ;;  %v2499_v5 = vsel %vm13778_vm8, %v2478_v43, 0.0  ;;  %v5869_v46 = vunpack.i.h.bf16 %v13779_v17 }
 0x44d   : > { %6236 = vrot.lane.b32.xlu0 %v10269_v39, %s6510_s12  ;;  %v5868_v34 = vunpack.i.l.bf16 %v13779_v17  ;;  %v2479_v60 = vmul.f32 %v2431_v15, %v13780_v4  ;;  %v2481_v49 = vmul.f32 %v2433_v21, %v13781_v58  ;;  %v5884_v24 = vunpack.i.h.bf16 %v13782_v51  ;;  %v10332_v17 = vpop.permute.xlu0 %3480  ;;  %v13784_v15 = vld [vmem:[#allocation294_spill] sm:$0xff] }
 0x44e   : > { %v5883_v41 = vunpack.i.l.bf16 %v13782_v51  ;;  %v2510_v22 = vadd.f32 %v2509_v6, %v2476_v29  ;;  %v2434_v43 = vsel %vm12799_vm11, %v5878_v9, %v5879_v56  ;;  %v5894_v63 = vunpack.i.h.bf16 %v13783_v50  ;;  %v13786_v9 = vld [vmem:[#allocation30_spill] sm:$0xff] }
 0x44f   : > { %v5893_v53 = vunpack.i.l.bf16 %v13783_v50  ;;  %v2436_v10 = vsel %vm12799_vm11, %v5888_v59, %v5889_v37  ;;  %v5904_v4 = vunpack.i.h.bf16 %v13784_v15  ;;  %v5903_v21 = vunpack.i.l.bf16 %v13784_v15  ;;  %v13788_v50 = vld [vmem:[#allocation40_spill] sm:$0xff] }
 0x450   : > { %6241 = vrot.lane.b32.xlu1 %v10296_v36, %s6510_s12  ;;  %v2500_v58 = vadd.f32 %v2499_v5, %v2498_v28  ;;  %v2520_v6 = vsel %vm13785_vm12, %v2477_v38, 0.0  ;;  %v2432_v56 = vsel %vm12799_vm11, %v5868_v34, %v5869_v46  ;;  %v2511_v29 = vadd.f32 %v2510_v22, %v2479_v60  ;;  %v13790_v46 = vld [vmem:[#allocation125_spill] sm:$0xff]  ;;  %v10353_v60 = vpop.permute.xlu1 %3502 }
 0x451   : > { %6246 = vrot.lane.b32.xlu0 %v10306_v26, %s6510_s12  ;;  %v2482_v51 = vmul.f32 %v2434_v43, %v13786_v9  ;;  %v2501_v37 = vsel %vm13787_vm6, %v2481_v49, 0.0  ;;  %v2435_v59 = vsel %vm12799_vm11, %v5883_v41, %v5884_v24  ;;  %v2484_v15 = vmul.f32 %v2436_v10, %v13788_v50  ;;  %v13791_v24 = vld [vmem:[#allocation124_spill] sm:$0xff]  ;;  %v10359_v22 = vpop.permute.xlu0 %3504  ;;  %v13792_v43 = vld [vmem:[#allocation26_spill] sm:$0xff]  ;;  %v13793_v50 = vld [vmem:[#allocation293_spill] sm:$0xff] }
 0x452   : > { %v2437_v12 = vsel %vm12799_vm11, %v5893_v53, %v5894_v63  ;;  %v2439_v5 = vsel %vm12799_vm11, %v5903_v21, %v5904_v4  ;;  %v5919_v34 = vunpack.i.h.bf16 %v13790_v46  ;;  %v2521_v49 = vadd.f32 %v2520_v6, %v2519_v45 }
 0x453   : > { %v5924_v10 = vunpack.i.h.bf16 %v13791_v24  ;;  %v5923_v41 = vunpack.i.l.bf16 %v13791_v24  ;;  %v2480_v63 = vmul.f32 %v2432_v56, %v13792_v43  ;;  %v2485_v53 = vmul.f32 %v2437_v12, %v13720_v1  ;;  %v13795_v12 = vld [vmem:[#allocation51_spill] sm:$0xff] }
 0x454   : > { %6251 = vrot.lane.b32.xlu1 %v10188_v8, %s6512_s14  ;;  %v13789_v8 = vld [vmem:[#allocation295_spill] sm:$0xff]  ;;  %v2502_v4 = vadd.f32 %v2501_v37, %v2500_v58  ;;  %v2512_v21 = vadd.f32 %v2511_v29, %v2482_v51  ;;  %v2483_v9 = vmul.f32 %v2435_v59, %v13639_v44  ;;  %v2487_v6 = vmul.f32 %v2439_v5, %v13562_v47 }
 0x455   : > { %6256 = vrot.lane.b32.xlu0 %v10191_v32, %s6512_s14  ;;  %v5909_v28 = vunpack.i.h.bf16 %v13789_v8  ;;  %v5908_v38 = vunpack.i.l.bf16 %v13789_v8  ;;  %v5918_v32 = vunpack.i.l.bf16 %v13790_v46  ;;  %v5898_v8 = vunpack.i.l.bf16 %v13793_v50 }
 0x456   : > { %v5914_v58 = vunpack.i.h.bf16 %v13795_v12  ;;  %v5913_v56 = vunpack.i.l.bf16 %v13795_v12  ;;  %v2443_v44 = vsel %vm12799_vm11, %v5923_v41, %v5924_v10  ;;  %v13796_v47 = vunpack.i.h.bf16 %v13728_v20 }
 0x457   : > { %v2440_v45 = vsel %vm12799_vm11, %v5908_v38, %v5909_v28  ;;  %v2442_v46 = vsel %vm12799_vm11, %v5918_v32, %v5919_v34  ;;  %v13797_v29 = vunpack.i.l.bf16 %v13728_v20  ;;  %v2522_v37 = vsel %vm13798_vm14, %v2480_v63, 0.0  ;;  %v10394_v20 = vpop.permute.xlu0 %3508  ;;  %v13800_v34 = vld [vmem:[#allocation94_spill] sm:$0xff]  ;;  %v13801_v32 = vld [vmem:[#allocation88_spill] sm:$0xff] }
 0x458   : > { %6261 = vrot.lane.b32.xlu1 %v10226_v25, %s6512_s14  ;;  %v5899_v25 = vunpack.i.h.bf16 %v13793_v50  ;;  %v2488_v59 = vmul.f32 %v2440_v45, %v13722_v13  ;;  %v1673_v28 = vadd.f32 %v10112_v27, %v10110_v40  ;;  %v1666_v38 = vadd.f32 %v10130_v42, %v10287_v18  ;;  %v13802_v40 = vld [vmem:[#allocation98_spill] sm:$0xff]  ;;  %v13803_v27 = vld [vmem:[#allocation93_spill] sm:$0xff] }
 0x459   : > { %6266 = vrot.lane.b32.xlu0 %v10229_v16, %s6512_s14  ;;  %v2503_v16 = vsel %vm13794_vm13, %v2484_v15, 0.0  ;;  %v1602_v51 = vsel %vm12799_vm11, %v13797_v29, %v13796_v47  ;;  %v10386_v15 = vpop.permute.xlu1 %3506  ;;  %v2490_v5 = vmul.f32 %v2442_v46, %v13564_v33  ;;  %v1767_v24 = vsel %vm12799_vm11, %v13801_v32, %v13800_v34  ;;  %v13809_v46 = vld [vmem:[#allocation96_spill] sm:$0xff]  ;;  %v13811_v47 = vld [vmem:[#allocation138_spill] sm:$0xff]  ;;  %v13812_v29 = vld [vmem:[#allocation139_spill] sm:$0xff] }
 0x45a   : > { %v2438_v10 = vsel %vm12799_vm11, %v5898_v8, %v5899_v25  ;;  %v2504_v41 = vadd.f32 %v2503_v16, %v2502_v4  ;;  %v2491_v43 = vmul.f32 %v2443_v44, %v13729_v62  ;;  %v1766_v42 = vsel %vm12799_vm11, %v13803_v27, %v13802_v40  ;;  %v13808_v8 = vld [vmem:[#allocation220_spill] sm:$0xff]  ;;  %v13810_v16 = vld [vmem:[#allocation102_spill] sm:$0xff] }
 0x45b   : > { %v2523_v18 = vadd.f32 %v2522_v37, %v2521_v49  ;;  %v2524_v33 = vsel %vm13804_vm7, %v2483_v9, 0.0  ;;  %v2441_v63 = vsel %vm12799_vm11, %v5913_v56, %v5914_v58  ;;  %v2507_v45 = vsel %vm13806_vm10, %v2490_v5, 0.0 }
 0x45c   : > { %6271 = vrot.lane.b32.xlu1 %v10263_v55, %s6512_s14  ;;  %v2513_v55 = vadd.f32 %v2512_v21, %v2485_v53  ;;  %v13805_v53 = vld [vmem:[#allocation59_spill] sm:$0xff]  ;;  %v1772_v9 = vmul.f32 %v1766_v42, %v1666_v38  ;;  %v1683_v12 = vsel %vm861_vm3, %v10102_v35, 0.0  ;;  %v10422_v44 = vmul.f32 %v1767_v24, %v1673_v28  ;;  %v13813_v28 = vld [vmem:[#allocation246_spill] sm:$0xff] }
 0x45d   : > { %6276 = vrot.lane.b32.xlu0 %v10269_v39, %s6512_s14  ;;  %v2505_v39 = vsel %vm13799_vm15, %v2487_v6, 0.0  ;;  %v5929_v21 = vunpack.i.h.bf16 %v13805_v53  ;;  %v5928_v4 = vunpack.i.l.bf16 %v13805_v53  ;;  %v13807_v6 = vld [vmem:[#allocation203_spill] sm:$0xff]  ;;  %v3542_v56 = vpop.permute.xlu1 %3541  ;;  %v2624_v37 = vsel %vm12799_vm11, %v13812_v29, %v13811_v47  ;;  %v13828_v29 = vld [vmem:[#allocation213_spill] sm:$0xff] }
 0x45e   : > { %v2506_v50 = vadd.f32 %v2505_v39, %v2504_v41  ;;  %v2514_v25 = vadd.f32 %v2513_v55, %v2488_v59  ;;  %v2625_v49 = vsel %vm12799_vm11, %v13808_v8, %v13807_v6  ;;  %v2525_v59 = vadd.f32 %v2524_v33, %v2523_v18  ;;  %v3544_v55 = vpop.permute.xlu0 %3543  ;;  %v13827_v47 = vld [vmem:[#allocation223_spill] sm:$0xff] }
 0x45f   : > { %v2444_v38 = vsel %vm12799_vm11, %v5928_v4, %v5929_v21  ;;  %v10434_v35 = vsel %vm12791_vm9, %v10193_v57, %v10201_v11  ;;  %v1682_v24 = vadd.f32 %v10082_v31, %v10077_v14  ;;  %v3451_v41 = vrot.slane %v1772_v9, 1  ;;  %v13821_v9 = vld [vmem:[#allocation221_spill] sm:$0xff] }
 0x460   : > { %6281 = vrot.lane.b32.xlu1 %v10296_v36, %s6512_s14  ;;  %v2486_v36 = vmul.f32 %v2438_v10, %v13726_v2  ;;  %v2515_v58 = vadd.f32 %v2514_v25, %v2491_v43  ;;  %v2489_v2 = vmul.f32 %v2441_v63, %v13727_v30  ;;  %v2508_v39 = vadd.f32 %v2507_v45, %v2506_v50  ;;  %v13814_v30 = vld [vmem:[#allocation56_spill] sm:$0xff] }
 0x461   : > { %6286 = vrot.lane.b32.xlu0 %v10306_v26, %s6512_s14  ;;  %v916_v26 = vsel %vm12799_vm11, %v13810_v16, %v13809_v46  ;;  %v1650_v32 = vmul.f32 %v1602_v51, %v13814_v30  ;;  %v1685_v43 = vsel %vm861_vm3, %v10105_v0, 0.0  ;;  %v10448_v57 = vsel %vm12799_vm11, %v10291_v23, %v10301_v48  ;;  %v10461_v23 = vpop.permute.xlu1 %3545 }
 0x462   : > { %v10429_v5 = vmul.f32 %v2625_v49, %v2515_v58  ;;  %v10437_v34 = vmul.f32 %v916_v26, %v13813_v28  ;;  %v2526_v10 = vsel %vm13815_vm5, %v2486_v36, 0.0  ;;  %v2630_v40 = vmul.f32 %v2624_v37, %v2508_v39  ;;  %v10467_v21 = vpop.permute.xlu0 %3547  ;;  %v13819_v36 = vld [vmem:[#allocation114_spill] sm:$0xff]  ;;  %v13829_v39 = vld [vmem:[#allocation229_spill] sm:$0xff] }
 0x463   : > { %v1684_v11 = vadd.f32 %v1683_v12, %v1682_v24  ;;  %v2528_v27 = vsel %vm13816_vm4, %v2489_v2, 0.0  ;;  %v2492_v51 = vmul.f32 %v2444_v38, %v13814_v30  ;;  %v3452_v31 = vrot.slane %v10422_v44, 1  ;;  %v13824_v12 = vld [vmem:[#allocation123_spill] sm:$0xff] }
 0x464   : > { %v3581_v14 = vmax.f32 %v10437_v34, %v10434_v35  ;;  %v3519_v42 = vrot.slane %v10429_v5, 2  ;;  %v2527_v18 = vadd.f32 %v2526_v10, %v2525_v59  ;;  %v10459_v0 = vsel %vm12799_vm11, %v10116_v3, %v10125_v7  ;;  %v13818_v7 = vld [vmem:[#allocation111_spill] sm:$0xff] }
 0x465   : > { %v1686_v48 = vadd.f32 %v1685_v43, %v1684_v11  ;;  %v1687_v33 = vsel %vm861_vm3, %v1650_v32, 0.0  ;;  %v3977_v63 = vmin.f32 %v10437_v34, %v10434_v35  ;;  %v10470_v4 = vsel %vm637_vm2, %v3451_v41, %v3452_v31  ;;  %vm13820_vm3 = vmmov %vm13772_vm1  ;;  %v13831_v43 = vld [vmem:[#allocation222_spill] sm:$0xff] }
 0x466   : > { %v3583_v53 = vmax.f32 %v3581_v14, %v10448_v57  ;;  %v3518_v50 = vrot.slane %v2630_v40, 2  ;;  %v2529_v25 = vadd.f32 %v2528_v27, %v2527_v18  ;;  %v10475_v3 = vsel %vm12791_vm9, %v10353_v60, %v10359_v22  ;;  %v13832_v18 = vld [vmem:[#allocation101_spill] sm:$0xff] }
 0x467   : > { %13817 = vst [vmem:[#allocation54_spill] sm:$0xff] %v10475_v3  ;;  %v1768_v45 = vsel %vm12799_vm11, %v13819_v36, %v13818_v7  ;;  %v2530_v6 = vsel %vm13820_vm3, %v2492_v51, 0.0  ;;  %v3582_v8 = vmax.f32 %v10459_v0, %v10470_v4  ;;  %v3979_v49 = vmin.f32 %v3977_v63, %v10448_v57 }
 0x468   : > { %v826_v46 = vmul.f32 %v13821_v9, %v13720_v1  ;;  %v1688_v16 = vadd.f32 %v1687_v33, %v1686_v48  ;;  %v10487_v26 = vsel %vm3517_vm0, %v3518_v50, %v3519_v42  ;;  %v10490_v60 = vsel %vm12799_vm11, %v3542_v56, %v3544_v55  ;;  %v13833_v48 = vld [vmem:[#allocation107_spill] sm:$0xff] }
 0x469   : > { %13822 = vst [vmem:[#allocation106_spill] sm:$0xff] %v10487_v26  ;;  %13823 = vst [vmem:[#allocation115_spill] sm:$0xff] %v10490_v60  ;;  %v13825_v58 = vunpack.i.h.bf16 %v13824_v12  ;;  %v13826_v44 = vunpack.i.l.bf16 %v13824_v12  ;;  %v2626_v37 = vsel %vm12799_vm11, %v13828_v29, %v13827_v47  ;;  %v3584_v1 = vmax.f32 %v3582_v8, %v10475_v3  ;;  %v13835_v9 = vld [vmem:[#allocation251_spill] sm:$0xff] }
 0x46a   : > { %v3585_v59 = vmax.f32 %v3583_v53, %v10487_v26  ;;  %v828_v56 = vmul.f32 %v13829_v39, %v13722_v13  ;;  %v1774_v55 = vmul.f32 %v1768_v45, %v1688_v16  ;;  %v2531_v5 = vadd.f32 %v2530_v6, %v2529_v25 }
 0x46b   : > { %v798_v2 = vsel %vm12799_vm11, %v13826_v44, %v13825_v58  ;;  %v3978_v30 = vmin.f32 %v10459_v0, %v10470_v4  ;;  %v3586_v32 = vmax.f32 %v3584_v1, %v10490_v60  ;;  %v3981_v24 = vmin.f32 %v3979_v49, %v10487_v26 }
 0x46c   : > { %v830_v41 = vmul.f32 %v798_v2, %v13729_v62  ;;  %v842_v40 = vadd.f32 %v13831_v43, %v826_v46  ;;  %v2632_v11 = vmul.f32 %v2626_v37, %v2531_v5  ;;  %v917_v33 = vsel %vm12799_vm11, %v13833_v48, %v13832_v18  ;;  %v13836_v46 = vld [vmem:[#allocation208_spill] sm:$0xff] }
 0x46d   : > { %v3980_v13 = vmin.f32 %v3978_v30, %v10475_v3  ;;  %v3454_v63 = vrot.slane %v1774_v55, 1  ;;  %v10529_v25 = vsel %vm12791_vm9, %v10241_v52, %v10255_v19  ;;  %v6513_v7 = vmov 9  }
 0x46e   : > { %v3570_v22 = vpop.permute.xlu1 %3569  ;;  %v843_v14 = vadd.f32 %v842_v40, %v828_v56  ;;  %v3521_v50 = vrot.slane %v2632_v11, 2  ;;  %v10543_v16 = vsel %vm12799_vm11, %v13836_v46, %v13835_v9  ;;  %v10548_v19 = vsel %vm12799_vm11, %v10327_v54, %v10332_v17 }
 0x46f   : > { %v3572_v38 = vpop.permute.xlu0 %3571  ;;  %v3982_v53 = vmin.f32 %v3980_v13, %v10490_v60  ;;  %v10538_v49 = vsel %vm637_vm2, %v3452_v31, %v3454_v63  ;;  %13837 = vst [vmem:[#allocation180_spill] sm:$0xff] %v10548_v19  ;;  %v10571_v12 = vsel %vm12791_vm9, %v10386_v15, %v10394_v20  ;;  %v10581_v29 = vsel %vm12799_vm11, %v10461_v23, %v10467_v21 }
 0x470   : > { %v10505_v28 = vsel %vm12791_vm9, %v3570_v22, %v3572_v38  ;;  %v844_v62 = vadd.f32 %v843_v14, %v830_v41  ;;  %13834 = vst [vmem:[#allocation178_spill] sm:$0xff] %v10538_v49  ;;  %v10551_v52 = vsel %vm3517_vm0, %v3519_v42, %v3521_v50  ;;  %v3590_v17 = vmax.f32 %v10543_v16, %v10538_v49 }
 0x471   : > { %13830 = vst [vmem:[#allocation177_spill] sm:$0xff] %v10505_v28  ;;  %v3587_v10 = vmax.f32 %v3585_v59, %v10505_v28  ;;  %v3983_v51 = vmin.f32 %v3981_v24, %v10505_v28  ;;  %13838 = vst [vmem:[#allocation263_spill] sm:$0xff] %v10551_v52  ;;  %v3986_v2 = vmin.f32 %v10543_v16, %v10538_v49 }
 0x472   : > { %v10535_v8 = vmul.f32 %v917_v33, %v844_v62  ;;  %13839 = vst [vmem:[#allocation264_spill] sm:$0xff] %v10571_v12  ;;  %v3574_v58 = vpop.permute.xlu1 %3573  ;;  %13840 = vst [vmem:[#allocation109_spill] sm:$0xff] %v10581_v29  ;;  %v3592_v59 = vmax.f32 %v3590_v17, %v10571_v12 }
 0x473   : > { %v10515_v27 = vmax.f32 %v3587_v10, %v3586_v32  ;;  %v10533_v6 = vmin.f32 %v3983_v51, %v3982_v53  ;;  %v3576_v44 = vpop.permute.xlu0 %3575  ;;  %v3988_v40 = vmin.f32 %v3986_v2, %v10571_v12 }
 0x474   : > { %v3589_v22 = vmax.f32 %v10535_v8, %v10529_v25  ;;  %v3985_v31 = vmin.f32 %v10535_v8, %v10529_v25  ;;  %v10592_v39 = vsel %vm12791_vm9, %v3574_v58, %v3576_v44  ;;  %v3594_v21 = vmax.f32 %v3592_v59, %v10581_v29 }
 0x475   : > { %vm3597_vm1 = vcmp.eq.f32.partialorder %v10437_v34, %v10515_v27  ;;  %vm3601_vm8 = vcmp.eq.f32.partialorder %v10434_v35, %v10515_v27  ;;  %vm3605_vm2 = vcmp.eq.f32.partialorder %v10448_v57, %v10515_v27  ;;  %vm3599_vm6 = vcmp.eq.f32.partialorder %v10459_v0, %v10515_v27  ;;  %13841 = vst [vmem:[#allocation176_spill] sm:$0xff] %v10592_v39 }
 0x476   : > { %v3615_v36 = vsel %vm3597_vm1, 0, %v6513_v7  ;;  %v3619_v45 = vsel %vm3601_vm8, 2, %v6513_v7  ;;  %vm3603_vm13 = vcmp.eq.f32.partialorder %v10470_v4, %v10515_v27  ;;  %vm3993_vm0 = vcmp.eq.f32.partialorder %v10437_v34, %v10533_v6 }
 0x477   : > { %vm3633_vm12 = vcmp.lt.s32.totalorder %v3615_v36, %v3619_v45  ;;  %v3591_v42 = vmax.f32 %v3589_v22, %v10548_v19  ;;  %vm3997_vm14 = vcmp.eq.f32.partialorder %v10434_v35, %v10533_v6  ;;  %v3987_v47 = vmin.f32 %v3985_v31, %v10548_v19 }
 0x478   : > { %v3634_v54 = vsel %vm3633_vm12, %v3615_v36, %v3619_v45  ;;  %v3623_v37 = vsel %vm3605_vm2, 4, %v6513_v7  ;;  %v3617_v15 = vsel %vm3599_vm6, 1, %v6513_v7  ;;  %v3621_v20 = vsel %vm3603_vm13, 3, %v6513_v7 }
 0x479   : > { %vm3637_vm15 = vcmp.lt.s32.totalorder %v3634_v54, %v3623_v37  ;;  %v4011_v1 = vsel %vm3993_vm0, 0, %v6513_v7  ;;  %vm4001_vm7 = vcmp.eq.f32.partialorder %v10448_v57, %v10533_v6  ;;  %v4015_v38 = vsel %vm3997_vm14, 2, %v6513_v7 }
 0x47a   : > { %vm3609_vm10 = vcmp.eq.f32.partialorder %v10487_v26, %v10515_v27  ;;  %vm3995_vm5 = vcmp.eq.f32.partialorder %v10459_v0, %v10533_v6  ;;  %vm3999_vm4 = vcmp.eq.f32.partialorder %v10470_v4, %v10533_v6  ;;  %v3593_v23 = vmax.f32 %v3591_v42, %v10551_v52 }
 0x47b   : > { %vm3635_vm3 = vcmp.lt.s32.totalorder %v3617_v15, %v3621_v20  ;;  %v3638_v56 = vsel %vm3637_vm15, %v3634_v54, %v3623_v37  ;;  %vm4029_vm1 = vcmp.lt.s32.totalorder %v4011_v1, %v4015_v38  ;;  %vm3607_vm8 = vcmp.eq.f32.partialorder %v10475_v3, %v10515_v27 }
 0x47c   : > { %v4019_v55 = vsel %vm4001_vm7, 4, %v6513_v7  ;;  %v4030_v5 = vsel %vm4029_vm1, %v4011_v1, %v4015_v38  ;;  %v3595_v30 = vmax.f32 %v3593_v23, %v10592_v39  ;;  %v3627_v32 = vsel %vm3609_vm10, 6, %v6513_v7 }
 0x47d   : > { %v4013_v24 = vsel %vm3995_vm5, 1, %v6513_v7  ;;  %v4017_v10 = vsel %vm3999_vm4, 3, %v6513_v7  ;;  %vm4033_vm12 = vcmp.lt.s32.totalorder %v4030_v5, %v4019_v55  ;;  %vm3611_vm2 = vcmp.eq.f32.partialorder %v10490_v60, %v10515_v27 }
 0x47e   : > { %v3636_v41 = vsel %vm3635_vm3, %v3617_v15, %v3621_v20  ;;  %vm3641_vm6 = vcmp.lt.s32.totalorder %v3638_v56, %v3627_v32  ;;  %v10611_v43 = vmax.f32 %v3595_v30, %v3594_v21  ;;  %vm3613_vm13 = vcmp.eq.f32.partialorder %v10505_v28, %v10515_v27 }
 0x47f   : > { %vm4005_vm0 = vcmp.eq.f32.partialorder %v10487_v26, %v10533_v6  ;;  %v3989_v11 = vmin.f32 %v3987_v47, %v10551_v52  ;;  %v3625_v13 = vsel %vm3607_vm8, 5, %v6513_v7  ;;  %vm4031_vm14 = vcmp.lt.s32.totalorder %v4013_v24, %v4017_v10 }
 0x480   : > { %v4034_v51 = vsel %vm4033_vm12, %v4030_v5, %v4019_v55  ;;  %vm3598_vm15 = vcmp.eq.f32.partialorder %v10535_v8, %v10611_v43  ;;  %v3629_v14 = vsel %vm3611_vm2, 7, %v6513_v7  ;;  %vm3639_vm7 = vcmp.lt.s32.totalorder %v3636_v41, %v3625_v13 }
 0x481   : > { %v3642_v18 = vsel %vm3641_vm6, %v3638_v56, %v3627_v32  ;;  %vm3602_vm10 = vcmp.eq.f32.partialorder %v10529_v25, %v10611_v43  ;;  %vm4003_vm5 = vcmp.eq.f32.partialorder %v10475_v3, %v10533_v6  ;;  %v4023_v48 = vsel %vm4005_vm0, 6, %v6513_v7 }
 0x482   : > { %vm3600_vm4 = vcmp.eq.f32.partialorder %v10543_v16, %v10611_v43  ;;  %vm3604_vm3 = vcmp.eq.f32.partialorder %v10538_v49, %v10611_v43  ;;  %v3631_v27 = vsel %vm3613_vm13, 8, %v6513_v7  ;;  %v4032_v33 = vsel %vm4031_vm14, %v4013_v24, %v4017_v10 }
 0x483   : > { %vm4037_vm1 = vcmp.lt.s32.totalorder %v4034_v51, %v4023_v48  ;;  %v3616_v63 = vsel %vm3598_vm15, 0, %v6513_v7  ;;  %v3640_v53 = vsel %vm3639_vm7, %v3636_v41, %v3625_v13  ;;  %vm3645_vm8 = vcmp.lt.s32.totalorder %v3642_v18, %v3631_v27 }
 0x484   : > { %vm4009_vm12 = vcmp.eq.f32.partialorder %v10505_v28, %v10533_v6  ;;  %v3620_v62 = vsel %vm3602_vm10, 2, %v6513_v7  ;;  %v4021_v50 = vsel %vm4003_vm5, 5, %v6513_v7  ;;  %v3618_v36 = vsel %vm3600_vm4, 1, %v6513_v7 }
 0x485   : > { %v3622_v45 = vsel %vm3604_vm3, 3, %v6513_v7  ;;  %v3991_v9 = vmin.f32 %v3989_v11, %v10592_v39  ;;  %vm4035_vm2 = vcmp.lt.s32.totalorder %v4032_v33, %v4021_v50  ;;  %v4038_v46 = vsel %vm4037_vm1, %v4034_v51, %v4023_v48 }
 0x486   : > { %vm3606_vm6 = vcmp.eq.f32.partialorder %v10548_v19, %v10611_v43  ;;  %vm3649_vm13 = vcmp.lt.s32.totalorder %v3616_v63, %v3620_v62  ;;  %v3990_v22 = vmin.f32 %v3988_v40, %v10581_v29  ;;  %vm3643_vm0 = vcmp.lt.s32.totalorder %v3640_v53, %v3629_v14 }
 0x487   : > { %v3650_v31 = vsel %vm3649_vm13, %v3616_v63, %v3620_v62  ;;  %v3646_v54 = vsel %vm3645_vm8, %v3642_v18, %v3631_v27  ;;  %vm4007_vm14 = vcmp.eq.f32.partialorder %v10490_v60, %v10533_v6  ;;  %v4027_v17 = vsel %vm4009_vm12, 8, %v6513_v7 }
 0x488   : > { %vm3651_vm15 = vcmp.lt.s32.totalorder %v3618_v36, %v3622_v45  ;;  %v4036_v42 = vsel %vm4035_vm2, %v4032_v33, %v4021_v50  ;;  %vm4041_vm7 = vcmp.lt.s32.totalorder %v4038_v46, %v4027_v17  ;;  %v3624_v58 = vsel %vm3606_vm6, 4, %v6513_v7 }
 0x489   : > { %v10651_v44 = vmin.f32 %v3991_v9, %v3990_v22  ;;  %v3644_v2 = vsel %vm3643_vm0, %v3640_v53, %v3629_v14  ;;  %vm3608_vm10 = vcmp.eq.f32.partialorder %v10571_v12, %v10611_v43  ;;  %vm3653_vm5 = vcmp.lt.s32.totalorder %v3650_v31, %v3624_v58 }
 0x48a   : > { %vm3647_vm4 = vcmp.lt.s32.totalorder %v3646_v54, %v3644_v2  ;;  %v4025_v47 = vsel %vm4007_vm14, 7, %v6513_v7  ;;  %v3652_v37 = vsel %vm3651_vm15, %v3618_v36, %v3622_v45  ;;  %v4042_v6 = vsel %vm4041_vm7, %v4038_v46, %v4027_v17 }
 0x48b   : > { %vm4039_vm3 = vcmp.lt.s32.totalorder %v4036_v42, %v4025_v47  ;;  %vm3610_vm1 = vcmp.eq.f32.partialorder %v10551_v52, %v10611_v43  ;;  %v3626_v15 = vsel %vm3608_vm10, 5, %v6513_v7  ;;  %v3654_v20 = vsel %vm3653_vm5, %v3650_v31, %v3624_v58 }
 0x48c   : > { %vm3994_vm8 = vcmp.eq.f32.partialorder %v10535_v8, %v10651_v44  ;;  %vm3998_vm12 = vcmp.eq.f32.partialorder %v10529_v25, %v10651_v44  ;;  %vm3655_vm2 = vcmp.lt.s32.totalorder %v3652_v37, %v3626_v15  ;;  %v10663_v1 = vsel %vm3647_vm4, %v3646_v54, %v3644_v2 }
 0x48d   : > { %v4040_v59 = vsel %vm4039_vm3, %v4036_v42, %v4025_v47  ;;  %vm3612_vm6 = vcmp.eq.f32.partialorder %v10581_v29, %v10611_v43  ;;  %vm3614_vm13 = vcmp.eq.f32.partialorder %v10592_v39, %v10611_v43  ;;  %v3628_v38 = vsel %vm3610_vm1, 6, %v6513_v7 }
 0x48e   : > { %vm4043_vm0 = vcmp.lt.s32.totalorder %v4042_v6, %v4040_v59  ;;  %vm3657_vm14 = vcmp.lt.s32.totalorder %v3654_v20, %v3628_v38  ;;  %v4012_v23 = vsel %vm3994_vm8, 0, %v6513_v7  ;;  %v4016_v21 = vsel %vm3998_vm12, 2, %v6513_v7 }
 0x48f   : > { %v3656_v56 = vsel %vm3655_vm2, %v3652_v37, %v3626_v15  ;;  %vm12798_vm15 = vcmp.eq.s32.totalorder %v10663_v1, 0  ;;  %vm12796_vm7 = vcmp.eq.s32.totalorder %v10663_v1, 1  ;;  %vm12793_vm10 = vcmp.eq.s32.totalorder %v10663_v1, 2 }
 0x490   : > { %v3630_v55 = vsel %vm3612_vm6, 7, %v6513_v7  ;;  %v3632_v5 = vsel %vm3614_vm13, 8, %v6513_v7  ;;  %vm3996_vm5 = vcmp.eq.f32.partialorder %v10543_v16, %v10651_v44  ;;  %vm12786_vm4 = vcmp.eq.s32.totalorder %v10663_v1, 3 }
 0x491   : > { %v3658_v30 = vsel %vm3657_vm14, %v3654_v20, %v3628_v38  ;;  %vm4000_vm3 = vcmp.eq.f32.partialorder %v10538_v49, %v10651_v44  ;;  %vm4002_vm1 = vcmp.eq.f32.partialorder %v10548_v19, %v10651_v44  ;;  %vm4045_vm8 = vcmp.lt.s32.totalorder %v4012_v23, %v4016_v21 }
 0x492   : > { %vm3659_vm12 = vcmp.lt.s32.totalorder %v3656_v56, %v3630_v55  ;;  %v10687_v32 = vsel %vm12798_vm15, -inf, %v10437_v34  ;;  %v10692_v24 = vsel %vm12796_vm7, -inf, %v10459_v0  ;;  %v10697_v10 = vsel %vm12793_vm10, -inf, %v10434_v35 }
 0x493   : > { %v4014_v41 = vsel %vm3996_vm5, 1, %v6513_v7  ;;  %vm12785_vm2 = vcmp.eq.s32.totalorder %v10663_v1, 4  ;;  %vm12784_vm6 = vcmp.eq.s32.totalorder %v10663_v1, 5  ;;  %v10705_v43 = vsel %vm12786_vm4, -inf, %v10470_v4 }
 0x494   : > { %vm3661_vm13 = vcmp.lt.s32.totalorder %v3658_v30, %v3632_v5  ;;  %v4018_v40 = vsel %vm4000_vm3, 3, %v6513_v7  ;;  %v4020_v11 = vsel %vm4002_vm1, 4, %v6513_v7  ;;  %v4046_v13 = vsel %vm4045_vm8, %v4012_v23, %v4016_v21 }
 0x495   : > { %vm12789_vm14 = vcmp.eq.s32.totalorder %v10663_v1, 6  ;;  %v3719_v51 = vmax.f32 %v10687_v32, %v10697_v10  ;;  %v3720_v14 = vmax.f32 %v10692_v24, %v10705_v43  ;;  %v10715_v18 = vsel %vm4043_vm0, %v4042_v6, %v4040_v59 }
 0x496   : > { %vm12788_vm5 = vcmp.eq.s32.totalorder %v10663_v1, 7  ;;  %v10721_v48 = vsel %vm12785_vm2, -inf, %v10448_v57  ;;  %v10726_v27 = vsel %vm12784_vm6, -inf, %v10475_v3  ;;  %vm12795_vm3 = vcmp.eq.s32.totalorder %v10715_v18, 0 }
 0x497   : > { %vm12787_vm1 = vcmp.eq.s32.totalorder %v10663_v1, 8  ;;  %v3721_v33 = vmax.f32 %v3719_v51, %v10721_v48  ;;  %v3722_v63 = vmax.f32 %v3720_v14, %v10726_v27  ;;  %vm12792_vm0 = vcmp.eq.s32.totalorder %v10715_v18, 2 }
 0x498   : > { %v10734_v53 = vsel %vm3661_vm13, %v3658_v30, %v3632_v5  ;;  %v10739_v62 = vsel %vm12789_vm14, -inf, %v10487_v26  ;;  %vm12794_vm8 = vcmp.eq.s32.totalorder %v10715_v18, 1  ;;  %vm12790_vm6 = vcmp.eq.s32.totalorder %v10715_v18, 3 }
 0x499   : > { %vm4047_vm2 = vcmp.lt.s32.totalorder %v4014_v41, %v4018_v40  ;;  %vm4049_vm4 = vcmp.lt.s32.totalorder %v4046_v13, %v4020_v11  ;;  %v3723_v50 = vmax.f32 %v3721_v33, %v10739_v62  ;;  %v10747_v36 = vsel %vm12795_vm3, inf, %v10437_v34 }
 0x49a   : > { %v10752_v45 = vsel %vm12788_vm5, -inf, %v10490_v60  ;;  %v10757_v9 = vsel %vm12787_vm1, -inf, %v10505_v28  ;;  %vm12797_vm13 = vcmp.eq.s32.totalorder %v10715_v18, 4  ;;  %v10763_v46 = vsel %vm12792_vm0, inf, %v10434_v35 }
 0x49b   : > { %v3724_v22 = vmax.f32 %v3722_v63, %v10752_v45  ;;  %v3725_v31 = vmax.f32 %v3723_v50, %v10757_v9  ;;  %v10770_v54 = vsel %vm12794_vm8, inf, %v10459_v0  ;;  %v10775_v17 = vsel %vm12790_vm6, inf, %v10470_v4 }
 0x49c   : > { %v3660_v42 = vsel %vm3659_vm12, %v3656_v56, %v3630_v55  ;;  %vm4004_vm1 = vcmp.eq.f32.partialorder %v10571_v12, %v10651_v44  ;;  %v10780_v58 = vsel %vm4047_vm2, %v4014_v41, %v4018_v40  ;;  %v4115_v2 = vmin.f32 %v10747_v36, %v10763_v46 }
 0x49d   : > { %vm4006_vm5 = vcmp.eq.f32.partialorder %v10551_v52, %v10651_v44  ;;  %v10787_v47 = vsel %vm4049_vm4, %v4046_v13, %v4020_v11  ;;  %v3726_v37 = vmax.f32 %v3725_v31, %v3724_v22  ;;  %vm12801_vm14 = vcmp.eq.s32.totalorder %v10715_v18, 5 }
 0x49e   : > { %vm12800_vm6 = vcmp.eq.s32.totalorder %v10715_v18, 6  ;;  %vm3663_vm12 = vcmp.lt.s32.totalorder %v10734_v53, %v3660_v42  ;;  %vm12803_vm9 = vcmp.eq.s32.totalorder %v10715_v18, 7  ;;  %vm12802_vm2 = vcmp.eq.s32.totalorder %v10715_v18, 8 }
 0x49f   : > { %v10797_v6 = vsel %vm12797_vm13, inf, %v10448_v57  ;;  %v4116_v15 = vmin.f32 %v10770_v54, %v10775_v17  ;;  %vm3735_vm4 = vcmp.eq.f32.partialorder %v10687_v32, %v3726_v37  ;;  %vm3737_vm0 = vcmp.eq.f32.partialorder %v10692_v24, %v3726_v37 }
 0x4a0   : > { %vm3739_vm10 = vcmp.eq.f32.partialorder %v10697_v10, %v3726_v37  ;;  %vm3741_vm8 = vcmp.eq.f32.partialorder %v10705_v43, %v3726_v37  ;;  %vm4008_vm3 = vcmp.eq.f32.partialorder %v10581_v29, %v10651_v44  ;;  %vm4010_vm7 = vcmp.eq.f32.partialorder %v10592_v39, %v10651_v44 }
 0x4a1   : > { %vm3743_vm13 = vcmp.eq.f32.partialorder %v10721_v48, %v3726_v37  ;;  %v10813_v20 = vsel %vm12801_vm14, inf, %v10475_v3  ;;  %v10818_v59 = vsel %vm12800_vm6, inf, %v10487_v26  ;;  %v4117_v38 = vmin.f32 %v4115_v2, %v10797_v6  ;;  %v10845_v2 = vpop.permute.xlu1 %6051 }
 0x4a2   : > { %vm3745_vm15 = vcmp.eq.f32.partialorder %v10726_v27, %v3726_v37  ;;  %v3753_v23 = vsel %vm3735_vm4, 0, %v6513_v7  ;;  %v3755_v21 = vsel %vm3737_vm0, 1, %v6513_v7  ;;  %v3757_v56 = vsel %vm3739_vm10, 2, %v6513_v7 }
 0x4a3   : > { %vm3747_vm11 = vcmp.eq.f32.partialorder %v10739_v62, %v3726_v37  ;;  %v3759_v55 = vsel %vm3741_vm8, 3, %v6513_v7  ;;  %v10830_v5 = vsel %vm12802_vm2, inf, %v10505_v28  ;;  %v4118_v30 = vmin.f32 %v4116_v15, %v10813_v20 }
 0x4a4   : > { %vm3749_vm6 = vcmp.eq.f32.partialorder %v10752_v45, %v3726_v37  ;;  %v3761_v41 = vsel %vm3743_vm13, 4, %v6513_v7  ;;  %vm3771_vm4 = vcmp.lt.s32.totalorder %v3753_v23, %v3757_v56  ;;  %vm3773_vm14 = vcmp.lt.s32.totalorder %v3755_v21, %v3759_v55 }
 0x4a5   : > { %v3763_v40 = vsel %vm3745_vm15, 5, %v6513_v7  ;;  %v3772_v11 = vsel %vm3771_vm4, %v3753_v23, %v3757_v56  ;;  %v3774_v13 = vsel %vm3773_vm14, %v3755_v21, %v3759_v55  ;;  %v4119_v51 = vmin.f32 %v4117_v38, %v10818_v59 }
 0x4a6   : > { %vm3751_vm10 = vcmp.eq.f32.partialorder %v10757_v9, %v3726_v37  ;;  %v3765_v14 = vsel %vm3747_vm11, 6, %v6513_v7  ;;  %vm3775_vm0 = vcmp.lt.s32.totalorder %v3772_v11, %v3761_v41  ;;  %vm3777_vm8 = vcmp.lt.s32.totalorder %v3774_v13, %v3763_v40 }
 0x4a7   : > { %v3767_v33 = vsel %vm3749_vm6, 7, %v6513_v7  ;;  %v3776_v63 = vsel %vm3775_vm0, %v3772_v11, %v3761_v41  ;;  %v3778_v50 = vsel %vm3777_vm8, %v3774_v13, %v3763_v40  ;;  %v4121_v22 = vmin.f32 %v4119_v51, %v10830_v5 }
 0x4a8   : > { %v4022_v31 = vsel %vm4004_vm1, 5, %v6513_v7  ;;  %vm3779_vm15 = vcmp.lt.s32.totalorder %v3776_v63, %v3765_v14  ;;  %vm3781_vm14 = vcmp.lt.s32.totalorder %v3778_v50, %v3767_v33  ;;  %v10850_v37 = vsel %vm12803_vm9, inf, %v10490_v60 }
 0x4a9   : > { %v4024_v15 = vsel %vm4006_vm5, 6, %v6513_v7  ;;  %v3769_v38 = vsel %vm3751_vm10, 8, %v6513_v7  ;;  %v3780_v23 = vsel %vm3779_vm15, %v3776_v63, %v3765_v14  ;;  %v4120_v21 = vmin.f32 %v4118_v30, %v10850_v37 }
 0x4aa   : > { %vm4051_vm11 = vcmp.lt.s32.totalorder %v10780_v58, %v4022_v31  ;;  %vm4053_vm6 = vcmp.lt.s32.totalorder %v10787_v47, %v4024_v15  ;;  %vm3783_vm1 = vcmp.lt.s32.totalorder %v3780_v23, %v3769_v38  ;;  %v10863_v56 = vsel %vm3663_vm12, %v10734_v53, %v3660_v42 }
 0x4ab   : > { %v6054_v55 = vunpack.i.h.bf16 %v10845_v2  ;;  %v3782_v41 = vsel %vm3781_vm14, %v3778_v50, %v3767_v33  ;;  %v3784_v40 = vsel %vm3783_vm1, %v3780_v23, %v3769_v38  ;;  %v10866_v11 = vmin.f32 %v4121_v22, %v4120_v21 }
 0x4ac   : > { %v10872_v30 = vsel %vm4008_vm3, 7, %v6513_v7  ;;  %v10878_v13 = vsel %vm4010_vm7, 8, %v6513_v7  ;;  %v6053_v53 = vunpack.i.l.bf16 %v10845_v2  ;;  %vm3785_vm5 = vcmp.lt.s32.totalorder %v3784_v40, %v3782_v41 }
 0x4ad   : > { %v10882_v42 = vsel %vm4051_vm11, %v10780_v58, %v4022_v31  ;;  %v10885_v51 = vsel %vm4053_vm6, %v10787_v47, %v4024_v15  ;;  %v10887_v14 = vsel %vm3785_vm5, %v3784_v40, %v3782_v41  ;;  %vm12817_vm3 = vcmp.eq.s32.totalorder %v10863_v56, 0 }
 0x4ae   : > { %vm12804_vm13 = vcmp.eq.s32.totalorder %v10887_v14, 0  ;;  %vm12805_vm12 = vcmp.eq.s32.totalorder %v10887_v14, 1  ;;  %vm12814_vm7 = vcmp.eq.s32.totalorder %v10887_v14, 2  ;;  %vm12808_vm4 = vcmp.eq.s32.totalorder %v10887_v14, 3 }
 0x4af   : > { %vm4131_vm10 = vcmp.eq.f32.partialorder %v10747_v36, %v10866_v11  ;;  %vm4133_vm0 = vcmp.eq.f32.partialorder %v10770_v54, %v10866_v11  ;;  %vm12815_vm8 = vcmp.eq.s32.totalorder %v10863_v56, 1  ;;  %vm12813_vm15 = vcmp.eq.s32.totalorder %v10863_v56, 2 }
 0x4b0   : > { %vm12812_vm14 = vcmp.eq.s32.totalorder %v10863_v56, 3  ;;  %vm12807_vm11 = vcmp.eq.s32.totalorder %v10887_v14, 4  ;;  %v10905_v44 = vsel %vm12804_vm13, -inf, %v10687_v32  ;;  %vm4135_vm6 = vcmp.eq.f32.partialorder %v10763_v46, %v10866_v11 }
 0x4b1   : > { %vm4137_vm1 = vcmp.eq.f32.partialorder %v10775_v17, %v10866_v11  ;;  %vm12806_vm5 = vcmp.eq.s32.totalorder %v10887_v14, 5  ;;  %v10915_v58 = vsel %vm12805_vm12, -inf, %v10692_v24  ;;  %v10920_v47 = vsel %vm12814_vm7, -inf, %v10697_v10 }
 0x4b2   : > { %v10925_v32 = vsel %vm12808_vm4, -inf, %v10705_v43  ;;  %vm12816_vm2 = vcmp.eq.s32.totalorder %v10863_v56, 4  ;;  %vm12809_vm9 = vcmp.eq.s32.totalorder %v10887_v14, 6  ;;  %vm4139_vm13 = vcmp.eq.f32.partialorder %v10797_v6, %v10866_v11 }
 0x4b3   : > { %vm4143_vm12 = vcmp.eq.f32.partialorder %v10818_v59, %v10866_v11  ;;  %v10936_v24 = vsel %vm12817_vm3, -inf, %v10535_v8  ;;  %v3857_v10 = vmax.f32 %v10905_v44, %v10920_v47  ;;  %v3858_v43 = vmax.f32 %v10915_v58, %v10925_v32 }
 0x4b4   : > { %v4149_v33 = vsel %vm4131_vm10, 0, %v6513_v7  ;;  %v4151_v63 = vsel %vm4133_vm0, 1, %v6513_v7  ;;  %v3847_v50 = vsel %vm12807_vm11, -inf, %v10721_v48  ;;  %v10956_v22 = vsel %vm12806_vm5, -inf, %v10726_v27 }
 0x4b5   : > { %v4153_v36 = vsel %vm4135_vm6, 2, %v6513_v7  ;;  %v4155_v54 = vsel %vm4137_vm1, 3, %v6513_v7  ;;  %vm12810_vm10 = vcmp.eq.s32.totalorder %v10887_v14, 7  ;;  %vm12811_vm0 = vcmp.eq.s32.totalorder %v10887_v14, 8 }
 0x4b6   : > { %v3859_v48 = vmax.f32 %v3857_v10, %v3847_v50  ;;  %v3860_v31 = vmax.f32 %v3858_v43, %v10956_v22  ;;  %vm12821_vm5 = vcmp.eq.s32.totalorder %v10863_v56, 5  ;;  %v3851_v27 = vsel %vm12809_vm9, -inf, %v10739_v62 }
 0x4b7   : > { %vm4167_vm11 = vcmp.lt.s32.totalorder %v4149_v33, %v4153_v36  ;;  %vm4169_vm6 = vcmp.lt.s32.totalorder %v4151_v63, %v4155_v54  ;;  %v10976_v46 = vsel %vm12813_vm15, -inf, %v10529_v25  ;;  %vm4141_vm1 = vcmp.eq.f32.partialorder %v10813_v20, %v10866_v11 }
 0x4b8   : > { %v3861_v17 = vmax.f32 %v3859_v48, %v3851_v27  ;;  %v4157_v15 = vsel %vm4139_vm13, 4, %v6513_v7  ;;  %v4168_v38 = vsel %vm4167_vm11, %v4149_v33, %v4153_v36  ;;  %vm12820_vm4 = vcmp.eq.s32.totalorder %v10863_v56, 6 }
 0x4b9   : > { %v10988_v62 = vsel %vm12810_vm10, -inf, %v10752_v45  ;;  %v10993_v23 = vsel %vm12811_vm0, -inf, %v10757_v9  ;;  %v4161_v21 = vsel %vm4143_vm12, 6, %v6513_v7  ;;  %vm4171_vm9 = vcmp.lt.s32.totalorder %v4168_v38, %v4157_v15 }
 0x4ba   : > { %v3862_v6 = vmax.f32 %v3860_v31, %v10988_v62  ;;  %v3863_v41 = vmax.f32 %v3861_v17, %v10993_v23  ;;  %v4170_v40 = vsel %vm4169_vm6, %v4151_v63, %v4155_v54  ;;  %v4172_v10 = vsel %vm4171_vm9, %v4168_v38, %v4157_v15 }
 0x4bb   : > { %vm4057_vm13 = vcmp.lt.s32.totalorder %v10885_v51, %v10878_v13  ;;  %vm4175_vm11 = vcmp.lt.s32.totalorder %v4172_v10, %v4161_v21  ;;  %vm12819_vm10 = vcmp.eq.s32.totalorder %v10863_v56, 7  ;;  %v11007_v45 = vsel %vm12815_vm8, -inf, %v10543_v16 }
 0x4bc   : > { %v11012_v9 = vsel %vm12812_vm14, -inf, %v10538_v49  ;;  %v3727_v59 = vmax.f32 %v10936_v24, %v10976_v46  ;;  %v3864_v43 = vmax.f32 %v3863_v41, %v3862_v6  ;;  %vm4145_vm9 = vcmp.eq.f32.partialorder %v10850_v37, %v10866_v11 }
 0x4bd   : > { %vm4147_vm12 = vcmp.eq.f32.partialorder %v10830_v5, %v10866_v11  ;;  %v4159_v33 = vsel %vm4141_vm1, 5, %v6513_v7  ;;  %v4176_v63 = vsel %vm4175_vm11, %v4172_v10, %v4161_v21  ;;  %vm12818_vm0 = vcmp.eq.s32.totalorder %v10863_v56, 8 }
 0x4be   : > { %vm4173_vm6 = vcmp.lt.s32.totalorder %v4170_v40, %v4159_v33  ;;  %v11028_v36 = vsel %vm12816_vm2, -inf, %v10548_v19  ;;  %vm3873_vm14 = vcmp.eq.f32.partialorder %v10905_v44, %v3864_v43  ;;  %vm3875_vm15 = vcmp.eq.f32.partialorder %v10915_v58, %v3864_v43 }
 0x4bf   : > { %vm3877_vm7 = vcmp.eq.f32.partialorder %v10920_v47, %v3864_v43  ;;  %vm3879_vm8 = vcmp.eq.f32.partialorder %v10925_v32, %v3864_v43  ;;  %v4163_v20 = vsel %vm4145_vm9, 7, %v6513_v7  ;;  %v4165_v5 = vsel %vm4147_vm12, 8, %v6513_v7 }
 0x4c0   : > { %v3728_v37 = vmax.f32 %v11007_v45, %v11012_v9  ;;  %v3729_v11 = vmax.f32 %v3727_v59, %v11028_v36  ;;  %vm3881_vm11 = vcmp.eq.f32.partialorder %v3847_v50, %v3864_v43  ;;  %v3891_v44 = vsel %vm3873_vm14, 0, %v6513_v7 }
 0x4c1   : > { %v3893_v58 = vsel %vm3875_vm15, 1, %v6513_v7  ;;  %v3895_v47 = vsel %vm3877_vm7, 2, %v6513_v7  ;;  %v3897_v32 = vsel %vm3879_vm8, 3, %v6513_v7  ;;  %v4174_v54 = vsel %vm4173_vm6, %v4170_v40, %v4159_v33 }
 0x4c2   : > { %vm4179_vm2 = vcmp.lt.s32.totalorder %v4176_v63, %v4165_v5  ;;  %v11049_v48 = vsel %vm12821_vm5, -inf, %v10571_v12  ;;  %vm3883_vm9 = vcmp.eq.f32.partialorder %v10956_v22, %v3864_v43  ;;  %vm3885_vm12 = vcmp.eq.f32.partialorder %v3851_v27, %v3864_v43 }
 0x4c3   : > { %vm3909_vm3 = vcmp.lt.s32.totalorder %v3891_v44, %v3895_v47  ;;  %vm3911_vm1 = vcmp.lt.s32.totalorder %v3893_v58, %v3897_v32  ;;  %v3899_v50 = vsel %vm3881_vm11, 4, %v6513_v7  ;;  %v11056_v15 = vsel %vm12820_vm4, -inf, %v10551_v52 }
 0x4c4   : > { %v3910_v31 = vsel %vm3909_vm3, %v3891_v44, %v3895_v47  ;;  %v3912_v17 = vsel %vm3911_vm1, %v3893_v58, %v3897_v32  ;;  %vm4177_vm8 = vcmp.lt.s32.totalorder %v4174_v54, %v4163_v20  ;;  %v3730_v38 = vmax.f32 %v3728_v37, %v11049_v48 }
 0x4c5   : > { %vm3913_vm7 = vcmp.lt.s32.totalorder %v3910_v31, %v3899_v50  ;;  %v3731_v21 = vmax.f32 %v3729_v11, %v11056_v15  ;;  %v3901_v22 = vsel %vm3883_vm9, 5, %v6513_v7  ;;  %v3903_v27 = vsel %vm3885_vm12, 6, %v6513_v7 }
 0x4c6   : > { %v3914_v6 = vsel %vm3913_vm7, %v3910_v31, %v3899_v50  ;;  %v4180_v41 = vsel %vm4179_vm2, %v4176_v63, %v4165_v5  ;;  %v4058_v40 = vsel %vm4057_vm13, %v10885_v51, %v10878_v13  ;;  %vm3915_vm3 = vcmp.lt.s32.totalorder %v3912_v17, %v3901_v22 }
 0x4c7   : > { %vm3917_vm15 = vcmp.lt.s32.totalorder %v3914_v6, %v3903_v27  ;;  %v11071_v10 = vsel %vm12819_vm10, -inf, %v10581_v29  ;;  %vm3887_vm14 = vcmp.eq.f32.partialorder %v10988_v62, %v3864_v43  ;;  %vm3889_vm6 = vcmp.eq.f32.partialorder %v10993_v23, %v3864_v43 }
 0x4c8   : > { %v4178_v59 = vsel %vm4177_vm8, %v4174_v54, %v4163_v20  ;;  %v11078_v33 = vsel %vm12818_vm0, -inf, %v10592_v39  ;;  %v3918_v63 = vsel %vm3917_vm15, %v3914_v6, %v3903_v27  ;;  %v3732_v13 = vmax.f32 %v3730_v38, %v11071_v10 }
 0x4c9   : > { %vm4181_vm2 = vcmp.lt.s32.totalorder %v4180_v41, %v4178_v59  ;;  %v3733_v51 = vmax.f32 %v3731_v21, %v11078_v33  ;;  %v3916_v5 = vsel %vm3915_vm3, %v3912_v17, %v3901_v22  ;;  %vm13842_vm13 = vcmp.lt.s32.totalorder %v10882_v42, %v10872_v30 }
 0x4ca   : > { %v4056_v62 = vsel %vm13842_vm13, %v10882_v42, %v10872_v30  ;;  %v3907_v23 = vsel %vm3889_vm6, 8, %v6513_v7  ;;  %vm13843_vm1 = vcmask 1039360   ;;  %v3905_v37 = vsel %vm3887_vm14, 7, %v6513_v7 }
 0x4cb   : > { %v11093_v43 = vsel %vm13843_vm1, %v6053_v53, %v6054_v55  ;;  %v3734_v20 = vmax.f32 %v3733_v51, %v3732_v13  ;;  %vm4059_vm11 = vcmp.lt.s32.totalorder %v4058_v40, %v4056_v62  ;;  %vm3921_vm9 = vcmp.lt.s32.totalorder %v3918_v63, %v3907_v23 }
 0x4cc   : > { %v11096_v11 = vsel %vm4181_vm2, %v4180_v41, %v4178_v59  ;;  %vm13844_vm12 = vcmp.eq.s32.totalorder %v10663_v1, 0  ;;  %vm13845_vm7 = vcmp.eq.s32.totalorder %v10663_v1, 1  ;;  %vm3919_vm8 = vcmp.lt.s32.totalorder %v3916_v5, %v3905_v37 }
 0x4cd   : > { %v3683_v30 = vsel %vm13844_vm12, %v10437_v34, 0.0  ;;  %v11104_v42 = vsel %vm13845_vm7, %v10459_v0, 0.0  ;;  %vm3736_vm3 = vcmp.eq.f32.partialorder %v10936_v24, %v3734_v20  ;;  %vm13846_vm15 = vcmp.eq.s32.totalorder %v10715_v18, 0 }
 0x4ce   : > { %v4079_v2 = vsel %vm13846_vm15, %v10437_v34, 0.0  ;;  %vm3738_vm14 = vcmp.eq.f32.partialorder %v11007_v45, %v3734_v20  ;;  %vm3740_vm6 = vcmp.eq.f32.partialorder %v10976_v46, %v3734_v20  ;;  %vm3742_vm2 = vcmp.eq.f32.partialorder %v11012_v9, %v3734_v20 }
 0x4cf   : > { %v3922_v55 = vsel %vm3921_vm9, %v3918_v63, %v3907_v23  ;;  %vm13847_vm13 = vcmp.eq.s32.totalorder %v10715_v18, 1  ;;  %v11117_v44 = vsel %vm4059_vm11, %v4058_v40, %v4056_v62  ;;  %v3920_v58 = vsel %vm3919_vm8, %v3916_v5, %v3905_v37 }
 0x4d0   : > { %v4081_v53 = vsel %vm13847_vm13, %v10459_v0, 0.0  ;;  %vm3744_vm7 = vcmp.eq.f32.partialorder %v11028_v36, %v3734_v20  ;;  %v3754_v47 = vsel %vm3736_vm3, 0, %v6513_v7  ;;  %vm3746_vm15 = vcmp.eq.f32.partialorder %v11049_v48, %v3734_v20 }
 0x4d1   : > { %v3756_v32 = vsel %vm3738_vm14, 1, %v6513_v7  ;;  %v3758_v54 = vsel %vm3740_vm6, 2, %v6513_v7  ;;  %v3760_v50 = vsel %vm3742_vm2, 3, %v6513_v7  ;;  %vm3923_vm9 = vcmp.lt.s32.totalorder %v3922_v55, %v3920_v58 }
 0x4d2   : > { %vm12839_vm13 = vcmp.eq.s32.totalorder %v11117_v44, 0  ;;  %vm12838_vm11 = vcmp.eq.s32.totalorder %v11117_v44, 1  ;;  %vm12834_vm8 = vcmp.eq.s32.totalorder %v11117_v44, 2  ;;  %vm3748_vm0 = vcmp.eq.f32.partialorder %v11056_v15, %v3734_v20 }
 0x4d3   : > { %vm3750_vm10 = vcmp.eq.f32.partialorder %v11071_v10, %v3734_v20  ;;  %vm3787_vm3 = vcmp.lt.s32.totalorder %v3754_v47, %v3758_v54  ;;  %vm3789_vm4 = vcmp.lt.s32.totalorder %v3756_v32, %v3760_v50  ;;  %v3762_v31 = vsel %vm3744_vm7, 4, %v6513_v7 }
 0x4d4   : > { %v3764_v17 = vsel %vm3746_vm15, 5, %v6513_v7  ;;  %v3788_v38 = vsel %vm3787_vm3, %v3754_v47, %v3758_v54  ;;  %v3790_v21 = vsel %vm3789_vm4, %v3756_v32, %v3760_v50  ;;  %vm3752_vm14 = vcmp.eq.f32.partialorder %v11078_v33, %v3734_v20 }
 0x4d5   : > { %vm3791_vm6 = vcmp.lt.s32.totalorder %v3788_v38, %v3762_v31  ;;  %vm3793_vm2 = vcmp.lt.s32.totalorder %v3790_v21, %v3764_v17  ;;  %vm12832_vm5 = vcmp.eq.s32.totalorder %v11117_v44, 3  ;;  %v3766_v22 = vsel %vm3748_vm0, 6, %v6513_v7 }
 0x4d6   : > { %v3768_v27 = vsel %vm3750_vm10, 7, %v6513_v7  ;;  %v3792_v6 = vsel %vm3791_vm6, %v3788_v38, %v3762_v31  ;;  %v3794_v41 = vsel %vm3793_vm2, %v3790_v21, %v3764_v17  ;;  %v11140_v40 = vsel %vm12839_vm13, inf, %v10535_v8 }
 0x4d7   : > { %vm3795_vm12 = vcmp.lt.s32.totalorder %v3792_v6, %v3766_v22  ;;  %vm3797_vm1 = vcmp.lt.s32.totalorder %v3794_v41, %v3768_v27  ;;  %v11145_v59 = vsel %vm12834_vm8, inf, %v10529_v25  ;;  %v3770_v63 = vsel %vm3752_vm14, 8, %v6513_v7 }
 0x4d8   : > { %v3796_v13 = vsel %vm3795_vm12, %v3792_v6, %v3766_v22  ;;  %v11151_v51 = vsel %vm12838_vm11, inf, %v10543_v16  ;;  %v11156_v5 = vsel %vm12832_vm5, inf, %v10538_v49  ;;  %vm13848_vm4 = vcmp.eq.s32.totalorder %v10887_v14, 0  ;;  %v13875_v49 = vld [vmem:[#allocation231_spill] sm:$0xff] }
 0x4d9   : > { %v3821_v62 = vsel %vm13848_vm4, %v10437_v34, %v3683_v30  ;;  %v11162_v23 = vsel %vm3923_vm9, %v3922_v55, %v3920_v58  ;;  %vm3799_vm10 = vcmp.lt.s32.totalorder %v3796_v13, %v3770_v63  ;;  %vm12822_vm0 = vcmp.eq.s32.totalorder %v11117_v44, 4 }
 0x4da   : > { %vm13849_vm12 = vcmp.eq.s32.totalorder %v11096_v11, 0  ;;  %v3798_v37 = vsel %vm3797_vm1, %v3794_v41, %v3768_v27  ;;  %v3800_v47 = vsel %vm3799_vm10, %v3796_v13, %v3770_v63  ;;  %v4123_v32 = vmin.f32 %v11140_v40, %v11145_v59 }
 0x4db   : > { %v11168_v20 = vsel %vm13849_vm12, %v10437_v34, %v4079_v2  ;;  %vm13850_vm7 = vcmp.eq.s32.totalorder %v11096_v11, 1  ;;  %vm3801_vm15 = vcmp.lt.s32.totalorder %v3800_v47, %v3798_v37  ;;  %vm12823_vm9 = vcmp.eq.s32.totalorder %v11117_v44, 5 }
 0x4dc   : > { %v11175_v30 = vsel %vm13850_vm7, %v10459_v0, %v4081_v53  ;;  %v4124_v55 = vmin.f32 %v11151_v51, %v11156_v5  ;;  %vm3941_vm3 = vcmp.eq.s32.totalorder %v11162_v23, 0  ;;  %v11181_v2 = vsel %vm3801_vm15, %v3800_v47, %v3798_v37 }
 0x4dd   : > { %vm12824_vm1 = vcmp.eq.s32.totalorder %v11117_v44, 6  ;;  %v11187_v58 = vsel %vm12822_vm0, inf, %v10548_v19  ;;  %vm12837_vm14 = vcmp.eq.s32.totalorder %v11181_v2, 0  ;;  %vm12836_vm6 = vcmp.eq.s32.totalorder %v11181_v2, 1 }
 0x4de   : > { %vm12835_vm2 = vcmp.eq.s32.totalorder %v11181_v2, 2  ;;  %vm12833_vm4 = vcmp.eq.s32.totalorder %v11181_v2, 3  ;;  %vm12826_vm10 = vcmp.eq.s32.totalorder %v11117_v44, 7  ;;  %vm12825_vm12 = vcmp.eq.s32.totalorder %v11117_v44, 8 }
 0x4df   : > { %v11198_v53 = vsel %vm12823_vm9, inf, %v10571_v12  ;;  %v4125_v54 = vmin.f32 %v4123_v32, %v11187_v58  ;;  %vm3943_vm7 = vcmp.eq.s32.totalorder %v11162_v23, 1  ;;  %vm12827_vm15 = vcmp.eq.s32.totalorder %v11181_v2, 4 }
 0x4e0   : > { %v11206_v50 = vsel %vm12837_vm14, -inf, %v10936_v24  ;;  %v4126_v31 = vmin.f32 %v4124_v55, %v11198_v53  ;;  %vm12831_vm0 = vcmp.eq.s32.totalorder %v11181_v2, 5  ;;  %v3842_v17 = vsel %vm12836_vm6, -inf, %v11007_v45 }
 0x4e1   : > { %v3844_v38 = vsel %vm12835_vm2, -inf, %v10976_v46  ;;  %v3846_v21 = vsel %vm12833_vm4, -inf, %v11012_v9  ;;  %v11222_v24 = vsel %vm3941_vm3, %v10437_v34, %v3821_v62  ;;  %v11227_v22 = vsel %vm12824_vm1, inf, %v10551_v52 }
 0x4e2   : > { %v11232_v45 = vsel %vm12826_vm10, inf, %v10581_v29  ;;  %v11237_v46 = vsel %vm12825_vm12, inf, %v10592_v39  ;;  %vm12830_vm9 = vcmp.eq.s32.totalorder %v11181_v2, 6  ;;  %v3865_v34 = vmax.f32 %v11206_v50, %v3844_v38 }
 0x4e3   : > { %v3866_v9 = vmax.f32 %v3842_v17, %v3846_v21  ;;  %v4127_v27 = vmin.f32 %v4125_v54, %v11227_v22  ;;  %vm12829_vm3 = vcmp.eq.s32.totalorder %v11181_v2, 7  ;;  %vm12828_vm1 = vcmp.eq.s32.totalorder %v11181_v2, 8 }
 0x4e4   : > { %v3848_v6 = vsel %vm12827_vm15, -inf, %v11028_v36  ;;  %v3850_v41 = vsel %vm12831_vm0, -inf, %v11049_v48  ;;  %v4128_v62 = vmin.f32 %v4126_v31, %v11232_v45  ;;  %vm13851_vm12 = vcmp.eq.s32.totalorder %v10887_v14, 1 }
 0x4e5   : > { %v3867_v63 = vmax.f32 %v3865_v34, %v3848_v6  ;;  %v3868_v13 = vmax.f32 %v3866_v9, %v3850_v41  ;;  %v4129_v37 = vmin.f32 %v4127_v27, %v11237_v46  ;;  %v3823_v47 = vsel %vm13851_vm12, %v10459_v0, %v11104_v42  ;;  %v13854_v42 = vld [vmem:[#allocation227_spill] sm:$0xff]  ;;  %v11280_v9 = vpop.permute.xlu1 %6061 }
 0x4e6   : > { %vm13852_vm10 = vcmp.eq.s32.totalorder %v10863_v56, 0  ;;  %vm13853_vm15 = vcmp.eq.s32.totalorder %v10863_v56, 1  ;;  %v3852_v48 = vsel %vm12830_vm9, -inf, %v11056_v15  ;;  %v11272_v55 = vsel %vm3943_vm7, %v10459_v0, %v3823_v47 }
 0x4e7   : > { %v11259_v32 = vsel %vm13852_vm10, %v10535_v8, 0.0  ;;  %v11264_v36 = vsel %vm13853_vm15, %v10543_v16, 0.0  ;;  %v11276_v54 = vmul.f32 %v11168_v20, %v13854_v42  ;;  %v3869_v31 = vmax.f32 %v3867_v63, %v3852_v48 }
 0x4e8   : > { %v11278_v34 = vmin.f32 %v4129_v37, %v4128_v62  ;;  %v11284_v27 = vmul.f32 %v11222_v24, %v13854_v42  ;;  %v11288_v15 = vmul.f32 %v11093_v43, %v11175_v30  ;;  %v3854_v0 = vsel %vm12829_vm3, -inf, %v11071_v10 }
 0x4e9   : > { %v3856_v63 = vsel %vm12828_vm1, -inf, %v11078_v33  ;;  %v3870_v62 = vmax.f32 %v3868_v13, %v3854_v0  ;;  %v11302_v47 = vmul.f32 %v11093_v43, %v11272_v55  ;;  %v11348_v42 = vpop.permute.xlu1 %6071 }
 0x4ea   : > { %v3871_v37 = vmax.f32 %v3869_v31, %v3856_v63  ;;  %vm4132_vm10 = vcmp.eq.f32.partialorder %v11140_v40, %v11278_v34  ;;  %vm4134_vm12 = vcmp.eq.f32.partialorder %v11151_v51, %v11278_v34  ;;  %vm4136_vm7 = vcmp.eq.f32.partialorder %v11145_v59, %v11278_v34  ;;  %v11314_v40 = vpop.permute.xlu0 %6056 }
 0x4eb   : > { %vm4138_vm15 = vcmp.eq.f32.partialorder %v11156_v5, %v11278_v34  ;;  %vm4140_vm1 = vcmp.eq.f32.partialorder %v11187_v58, %v11278_v34  ;;  %vm4142_vm3 = vcmp.eq.f32.partialorder %v11198_v53, %v11278_v34  ;;  %vm4144_vm9 = vcmp.eq.f32.partialorder %v11227_v22, %v11278_v34 }
 0x4ec   : > { %v3872_v33 = vmax.f32 %v3871_v37, %v3870_v62  ;;  %v4150_v43 = vsel %vm4132_vm10, 0, %v6513_v7  ;;  %v4152_v51 = vsel %vm4134_vm12, 1, %v6513_v7  ;;  %vm4148_vm13 = vcmp.eq.f32.partialorder %v11237_v46, %v11278_v34 }
 0x4ed   : > { %v4154_v13 = vsel %vm4136_vm7, 2, %v6513_v7  ;;  %v4158_v59 = vsel %vm4140_vm1, 4, %v6513_v7  ;;  %v4160_v10 = vsel %vm4142_vm3, 5, %v6513_v7  ;;  %vm13855_vm3 = vcmp.eq.f32.partialorder %v11232_v45, %v11278_v34 }
 0x4ee   : > { %vm3874_vm5 = vcmp.eq.f32.partialorder %v11206_v50, %v3872_v33  ;;  %vm3876_vm4 = vcmp.eq.f32.partialorder %v3842_v17, %v3872_v33  ;;  %vm3878_vm8 = vcmp.eq.f32.partialorder %v3844_v38, %v3872_v33  ;;  %vm3880_vm2 = vcmp.eq.f32.partialorder %v3846_v21, %v3872_v33 }
 0x4ef   : > { %vm3882_vm6 = vcmp.eq.f32.partialorder %v3848_v6, %v3872_v33  ;;  %vm3884_vm14 = vcmp.eq.f32.partialorder %v3850_v41, %v3872_v33  ;;  %vm3886_vm11 = vcmp.eq.f32.partialorder %v3852_v48, %v3872_v33  ;;  %vm3888_vm0 = vcmp.eq.f32.partialorder %v3854_v0, %v3872_v33  ;;  %v11343_v41 = vpop.permute.xlu0 %6066 }
 0x4f0   : > { %v3892_v31 = vsel %vm3874_vm5, 0, %v6513_v7  ;;  %v3894_v62 = vsel %vm3876_vm4, 1, %v6513_v7  ;;  %v3896_v50 = vsel %vm3878_vm8, 2, %v6513_v7  ;;  %vm3890_vm10 = vcmp.eq.f32.partialorder %v3856_v63, %v3872_v33 }
 0x4f1   : > { %v3898_v17 = vsel %vm3880_vm2, 3, %v6513_v7  ;;  %v4156_v38 = vsel %vm4138_vm15, 3, %v6513_v7  ;;  %v3900_v21 = vsel %vm3882_vm6, 4, %v6513_v7  ;;  %v3902_v6 = vsel %vm3884_vm14, 5, %v6513_v7 }
 0x4f2   : > { %vm3925_vm5 = vcmp.lt.s32.totalorder %v3892_v31, %v3896_v50  ;;  %vm3927_vm4 = vcmp.lt.s32.totalorder %v3894_v62, %v3898_v17  ;;  %v3904_v0 = vsel %vm3886_vm11, 6, %v6513_v7  ;;  %v3906_v63 = vsel %vm3888_vm0, 7, %v6513_v7 }
 0x4f3   : > { %v3926_v5 = vsel %vm3925_vm5, %v3892_v31, %v3896_v50  ;;  %v3928_v37 = vsel %vm3927_vm4, %v3894_v62, %v3898_v17  ;;  %v3908_v58 = vsel %vm3890_vm10, 8, %v6513_v7  ;;  %vm4183_vm14 = vcmp.lt.s32.totalorder %v4150_v43, %v4154_v13 }
 0x4f4   : > { %vm3929_vm8 = vcmp.lt.s32.totalorder %v3926_v5, %v3900_v21  ;;  %vm3931_vm1 = vcmp.lt.s32.totalorder %v3928_v37, %v3902_v6  ;;  %vm4185_vm6 = vcmp.lt.s32.totalorder %v4152_v51, %v4156_v38  ;;  %v4184_v48 = vsel %vm4183_vm14, %v4150_v43, %v4154_v13 }
 0x4f5   : > { %v3930_v39 = vsel %vm3929_vm8, %v3926_v5, %v3900_v21  ;;  %v3932_v28 = vsel %vm3931_vm1, %v3928_v37, %v3902_v6  ;;  %v4186_v33 = vsel %vm4185_vm6, %v4152_v51, %v4156_v38  ;;  %v4162_v62 = vsel %vm4144_vm9, 6, %v6513_v7  ;;  %v6077_v21 = vpop.permute.xlu0 %6076 }
 0x4f6   : > { %vm3933_vm11 = vcmp.lt.s32.totalorder %v3930_v39, %v3904_v0  ;;  %vm3935_vm2 = vcmp.lt.s32.totalorder %v3932_v28, %v3906_v63  ;;  %vm4187_vm0 = vcmp.lt.s32.totalorder %v4184_v48, %v4158_v59  ;;  %vm4189_vm12 = vcmp.lt.s32.totalorder %v4186_v33, %v4160_v10 }
 0x4f7   : > { %v3934_v31 = vsel %vm3933_vm11, %v3930_v39, %v3904_v0  ;;  %v4164_v53 = vsel %vm13855_vm3, 7, %v6513_v7  ;;  %v4188_v50 = vsel %vm4187_vm0, %v4184_v48, %v4158_v59  ;;  %v4190_v17 = vsel %vm4189_vm12, %v4186_v33, %v4160_v10  ;;  %v11363_v39 = vpop.permute.xlu1 %6081 }
 0x4f8   : > { %vm3937_vm7 = vcmp.lt.s32.totalorder %v3934_v31, %v3908_v58  ;;  %v3936_v6 = vsel %vm3935_vm2, %v3932_v28, %v3906_v63  ;;  %vm4191_vm15 = vcmp.lt.s32.totalorder %v4188_v50, %v4162_v62  ;;  %vm4193_vm10 = vcmp.lt.s32.totalorder %v4190_v17, %v4164_v53  ;;  %v13861_v63 = vld [vmem:[#allocation237_spill] sm:$0xff] }
 0x4f9   : > { %v3938_v43 = vsel %vm3937_vm7, %v3934_v31, %v3908_v58  ;;  %v4166_v22 = vsel %vm4148_vm13, 8, %v6513_v7  ;;  %v4192_v51 = vsel %vm4191_vm15, %v4188_v50, %v4162_v62  ;;  %v6059_v13 = vunpack.i.h.bf16 %v11314_v40  ;;  %v11399_v37 = vpop.permute.xlu0 %6086 }
 0x4fa   : > { %vm3939_vm5 = vcmp.lt.s32.totalorder %v3938_v43, %v3936_v6  ;;  %v11372_v45 = vadd.f32 %v11302_v47, %v11284_v27  ;;  %v11376_v28 = vadd.f32 %v11288_v15, %v11276_v54  ;;  %vm13856_vm9 = vcmp.eq.s32.totalorder %v11117_v44, 0 }
 0x4fb   : > { %v4080_v10 = vsel %vm13856_vm9, %v10535_v8, 0.0  ;;  %vm4195_vm4 = vcmp.lt.s32.totalorder %v4192_v51, %v4166_v22  ;;  %v4194_v38 = vsel %vm4193_vm10, %v4190_v17, %v4164_v53  ;;  %v6058_v7 = vunpack.i.l.bf16 %v11314_v40  ;;  %v6092_v31 = vpop.permute.xlu1 %6091 }
 0x4fc   : > { %v4196_v59 = vsel %vm4195_vm4, %v4192_v51, %v4166_v22  ;;  %v13857_v46 = vunpack.i.h.bf16 %v11280_v9  ;;  %v13858_v34 = vunpack.i.l.bf16 %v11280_v9  ;;  %vm13859_vm13 = vcmask 1039360  }
 0x4fd   : > { %v11387_v47 = vsel %vm3939_vm5, %v3938_v43, %v3936_v6  ;;  %vm4197_vm8 = vcmp.lt.s32.totalorder %v4196_v59, %v4194_v38  ;;  %v6069_v54 = vunpack.i.h.bf16 %v11343_v41  ;;  %v6068_v15 = vunpack.i.l.bf16 %v11343_v41  ;;  %vm13863_vm2 = vmmov %vm13859_vm13 }
 0x4fe   : > { %v4317_v27 = vsel %vm13859_vm13, %v13858_v34, %v13857_v46  ;;  %vm13860_vm1 = vcmp.eq.s32.totalorder %v11117_v44, 1  ;;  %v4237_v40 = vmul.f32 %v11222_v24, %v13861_v63  ;;  %v4253_v5 = vmul.f32 %v11168_v20, %v13861_v63  ;;  %vm13865_vm12 = vmmov %vm13863_vm2  ;;  %v11434_v46 = vpop.permute.xlu0 %6096 }
 0x4ff   : > { %v4082_v0 = vsel %vm13860_vm1, %v10543_v16, 0.0  ;;  %v4333_v9 = vmul.f32 %v4317_v27, %v11272_v55  ;;  %v11401_v58 = vsel %vm4197_vm8, %v4196_v59, %v4194_v38  ;;  %v4349_v48 = vmul.f32 %v4317_v27, %v11175_v30  ;;  %vm13866_vm15 = vmmov %vm13863_vm2  ;;  %v11439_v63 = vpop.permute.xlu1 %6101 }
 0x500   : > { %v6074_v41 = vunpack.i.h.bf16 %v11348_v42  ;;  %v6073_v33 = vunpack.i.l.bf16 %v11348_v42  ;;  %vm13862_vm14 = vcmp.eq.s32.totalorder %v11181_v2, 0  ;;  %vm3942_vm6 = vcmp.eq.s32.totalorder %v11387_v47, 0  ;;  %vm13867_vm10 = vmmov %vm13863_vm2 }
 0x501   : > { %v3822_v62 = vsel %vm13862_vm14, %v10535_v8, %v11259_v32  ;;  %vm3944_vm11 = vcmp.eq.s32.totalorder %v11387_v47, 1  ;;  %v4316_v53 = vsel %vm13863_vm2, %v6058_v7, %v6059_v13  ;;  %vm13864_vm0 = vcmp.eq.s32.totalorder %v11181_v2, 1  ;;  %vm13876_vm14 = vmmov %vm13863_vm2 }
 0x502   : > { %v3824_v50 = vsel %vm13864_vm0, %v10543_v16, %v11264_v36  ;;  %v4318_v17 = vsel %vm13865_vm12, %v6068_v15, %v6069_v54  ;;  %v6079_v42 = vunpack.i.h.bf16 %v6077_v21  ;;  %v6078_v6 = vunpack.i.l.bf16 %v6077_v21 }
 0x503   : > { %vm4200_vm7 = vcmp.eq.s32.totalorder %v11401_v58, 0  ;;  %vm4202_vm3 = vcmp.eq.s32.totalorder %v11401_v58, 1  ;;  %v11420_v32 = vadd.f32 %v4333_v9, %v4237_v40  ;;  %v4239_v43 = vmul.f32 %v11222_v24, %v9787_v61  ;;  %v13868_v40 = vld [vmem:[#allocation228_spill] sm:$0xff]  ;;  %v13869_v9 = vld [vmem:[#allocation238_spill] sm:$0xff]  ;;  %v6112_v3 = vpop.permute.xlu1 %6111 }
 0x504   : > { %v3960_v22 = vsel %vm3942_vm6, %v10535_v8, %v3822_v62  ;;  %v3962_v51 = vsel %vm3944_vm11, %v10543_v16, %v3824_v50  ;;  %v11426_v13 = vadd.f32 %v4349_v48, %v4253_v5  ;;  %v4319_v36 = vsel %vm13866_vm15, %v6073_v33, %v6074_v41  ;;  %v13870_v62 = vld [vmem:[#allocation232_spill] sm:$0xff]  ;;  %vm13878_vm6 = vmmov %vm13863_vm2 }
 0x505   : > { %v4255_v21 = vmul.f32 %v11168_v20, %v9787_v61  ;;  %v4335_v38 = vmul.f32 %v4319_v36, %v11272_v55  ;;  %v4351_v59 = vmul.f32 %v4319_v36, %v11175_v30  ;;  %v6084_v7 = vunpack.i.h.bf16 %v11363_v39 }
 0x506   : > { %v4218_v34 = vsel %vm4200_vm7, %v10535_v8, %v4080_v10  ;;  %v4220_v27 = vsel %vm4202_vm3, %v10543_v16, %v4082_v0  ;;  %v4320_v54 = vsel %vm13867_vm10, %v6078_v6, %v6079_v42  ;;  %v6094_v15 = vunpack.i.h.bf16 %v6092_v31 }
 0x507   : > { %v4236_v5 = vmul.f32 %v3960_v22, %v13868_v40  ;;  %v4332_v61 = vmul.f32 %v4316_v53, %v3962_v51  ;;  %v4238_v48 = vmul.f32 %v3960_v22, %v13869_v9  ;;  %v6093_v41 = vunpack.i.l.bf16 %v6092_v31 }
 0x508   : > { %v4334_v33 = vmul.f32 %v4318_v17, %v3962_v51  ;;  %v4240_v50 = vmul.f32 %v3960_v22, %v13870_v62  ;;  %vm13871_vm5 = vcmp.eq.s32.totalorder %v10663_v1, 2  ;;  %vm3945_vm9 = vcmp.eq.s32.totalorder %v11162_v23, 2 }
 0x509   : > { %v3687_v8 = vsel %vm13871_vm5, %v10434_v35, 0.0  ;;  %v4252_v16 = vmul.f32 %v4218_v34, %v13868_v40  ;;  %v4348_v10 = vmul.f32 %v4316_v53, %v4220_v27  ;;  %v4336_v0 = vmul.f32 %v4320_v54, %v3962_v51 }
 0x50a   : > { %vm13872_vm4 = vcmp.eq.s32.totalorder %v10887_v14, 2  ;;  %vm13873_vm13 = vcmp.eq.s32.totalorder %v10715_v18, 2  ;;  %vm4203_vm8 = vcmp.eq.s32.totalorder %v11096_v11, 2  ;;  %vm13874_vm1 = vcmask 1031168  }
 0x50b   : > { %v3825_v42 = vsel %vm13872_vm4, %v10434_v35, %v3687_v8  ;;  %v4083_v31 = vsel %vm13873_vm13, %v10434_v35, 0.0  ;;  %v4395_v36 = vsel %vm13874_vm1, %v6093_v41, %v6094_v15  ;;  %v4254_v29 = vmul.f32 %v4218_v34, %v13869_v9  ;;  %v6107_v8 = vpop.permute.xlu0 %6106  ;;  %vm13882_vm3 = vmmov %vm13874_vm1 }
 0x50c   : > { %v11453_v6 = vsel %vm3945_vm9, %v10434_v35, %v3825_v42  ;;  %v4350_v40 = vmul.f32 %v4318_v17, %v4220_v27  ;;  %v11462_v53 = vsel %vm4203_vm8, %v10434_v35, %v4083_v31  ;;  %v6083_v42 = vunpack.i.l.bf16 %v11363_v39  ;;  %vm13883_vm15 = vmmov %vm13874_vm1 }
 0x50d   : > { %v4411_v52 = vmul.f32 %v4395_v36, %v11453_v6  ;;  %v6089_v60 = vunpack.i.h.bf16 %v11399_v37  ;;  %v6088_v26 = vunpack.i.l.bf16 %v11399_v37  ;;  %v4427_v12 = vmul.f32 %v4395_v36, %v11462_v53  ;;  %vm13884_vm10 = vmmov %vm13874_vm1 }
 0x50e   : > { %v4340_v19 = vadd.f32 %v4332_v61, %v4236_v5  ;;  %v11469_v15 = vadd.f32 %v4335_v38, %v4239_v43  ;;  %v11471_v9 = vadd.f32 %v4351_v59, %v4255_v21  ;;  %v11476_v17 = vadd.f32 %v4334_v33, %v4238_v48  ;;  %vm13885_vm5 = vmmov %vm13874_vm1 }
 0x50f   : > { %v11474_v35 = vadd.f32 %v4411_v52, %v11372_v45  ;;  %v4256_v41 = vmul.f32 %v4218_v34, %v13870_v62  ;;  %v11479_v39 = vadd.f32 %v4336_v0, %v4240_v50  ;;  %v11482_v31 = vadd.f32 %v4427_v12, %v11376_v28  ;;  %v13877_v45 = vld [vmem:[#allocation233_spill] sm:$0xff]  ;;  %v6117_v48 = vpop.permute.xlu0 %6116  ;;  %vm13886_vm9 = vmmov %vm13874_vm1 }
 0x510   : > { %v4356_v37 = vadd.f32 %v4348_v10, %v4252_v16  ;;  %v4352_v36 = vmul.f32 %v4320_v54, %v4220_v27  ;;  %v4241_v43 = vmul.f32 %v11222_v24, %v13875_v49  ;;  %v4257_v21 = vmul.f32 %v11168_v20, %v13875_v49  ;;  %vm13887_vm4 = vmmov %vm13874_vm1 }
 0x511   : > { %v4358_v38 = vadd.f32 %v4350_v40, %v4254_v29  ;;  %v4321_v52 = vsel %vm13876_vm14, %v6083_v42, %v6084_v7  ;;  %v4242_v59 = vmul.f32 %v3960_v22, %v13877_v45  ;;  %v4322_v5 = vsel %vm13878_vm6, %v6088_v26, %v6089_v60  ;;  %v6122_v29 = vpop.permute.xlu1 %6121  ;;  %vm13888_vm13 = vmmov %vm13874_vm1 }
 0x512   : > { %v4337_v61 = vmul.f32 %v4321_v52, %v11272_v55  ;;  %v4353_v12 = vmul.f32 %v4321_v52, %v11175_v30  ;;  %v4258_v28 = vmul.f32 %v4218_v34, %v13877_v45  ;;  %v4338_v54 = vmul.f32 %v4322_v5, %v3962_v51 }
 0x513   : > { %v4354_v33 = vmul.f32 %v4322_v5, %v4220_v27  ;;  %vm13879_vm11 = vcmp.eq.s32.totalorder %v10863_v56, 2  ;;  %vm3946_vm2 = vcmp.eq.s32.totalorder %v11387_v47, 2  ;;  %vm4204_vm0 = vcmp.eq.s32.totalorder %v11401_v58, 2  ;;  %v6127_v45 = vpop.permute.xlu0 %6126 }
 0x514   : > { %v3688_v49 = vsel %vm13879_vm11, %v10529_v25, 0.0  ;;  %vm13880_vm12 = vcmp.eq.s32.totalorder %v11181_v2, 2  ;;  %vm13881_vm7 = vcmp.eq.s32.totalorder %v11117_v44, 2  ;;  %v6099_v20 = vunpack.i.h.bf16 %v11434_v46 }
 0x515   : > { %v3826_v26 = vsel %vm13880_vm12, %v10529_v25, %v3688_v49  ;;  %v4084_v60 = vsel %vm13881_vm7, %v10529_v25, 0.0  ;;  %v6098_v30 = vunpack.i.l.bf16 %v11434_v46  ;;  %v6104_v24 = vunpack.i.h.bf16 %v11439_v63 }
 0x516   : > { %v6103_v55 = vunpack.i.l.bf16 %v11439_v63  ;;  %v6109_v22 = vunpack.i.h.bf16 %v6107_v8  ;;  %v6108_v51 = vunpack.i.l.bf16 %v6107_v8  ;;  %v4360_v7 = vadd.f32 %v4352_v36, %v4256_v41  ;;  %v6132_v36 = vpop.permute.xlu1 %6131 }
 0x517   : > { %v4345_v34 = vadd.f32 %v4337_v61, %v4241_v43  ;;  %v3964_v27 = vsel %vm3946_vm2, %v10529_v25, %v3826_v26  ;;  %v4222_v62 = vsel %vm4204_vm0, %v10529_v25, %v4084_v60  ;;  %v6114_v50 = vunpack.i.h.bf16 %v6112_v3 }
 0x518   : > { %v6113_v16 = vunpack.i.l.bf16 %v6112_v3  ;;  %v6119_v10 = vunpack.i.h.bf16 %v6117_v48  ;;  %v6118_v0 = vunpack.i.l.bf16 %v6117_v48  ;;  %v4361_v40 = vadd.f32 %v4353_v12, %v4257_v21 }
 0x519   : > { %v4346_v42 = vadd.f32 %v4338_v54, %v4242_v59  ;;  %v4362_v52 = vadd.f32 %v4354_v33, %v4258_v28  ;;  %v4396_v46 = vsel %vm13882_vm3, %v6098_v30, %v6099_v20  ;;  %v4397_v8 = vsel %vm13883_vm15, %v6103_v55, %v6104_v24 }
 0x51a   : > { %v4412_v5 = vmul.f32 %v4396_v46, %v3964_v27  ;;  %v4428_v63 = vmul.f32 %v4396_v46, %v4222_v62  ;;  %v4398_v41 = vsel %vm13884_vm10, %v6108_v51, %v6109_v22  ;;  %v4413_v43 = vmul.f32 %v4397_v8, %v11453_v6 }
 0x51b   : > { %v4429_v25 = vmul.f32 %v4397_v8, %v11462_v53  ;;  %v4414_v3 = vmul.f32 %v4398_v41, %v3964_v27  ;;  %v4430_v61 = vmul.f32 %v4398_v41, %v4222_v62  ;;  %v4399_v59 = vsel %vm13885_vm5, %v6113_v16, %v6114_v50 }
 0x51c   : > { %v11516_v48 = vadd.f32 %v4412_v5, %v4340_v19  ;;  %v11518_v21 = vadd.f32 %v4428_v63, %v4356_v37  ;;  %v4400_v12 = vsel %vm13886_vm9, %v6118_v0, %v6119_v10  ;;  %v6124_v28 = vunpack.i.h.bf16 %v6122_v29 }
 0x51d   : > { %v6123_v54 = vunpack.i.l.bf16 %v6122_v29  ;;  %v6129_v33 = vunpack.i.h.bf16 %v6127_v45  ;;  %v6128_v49 = vunpack.i.l.bf16 %v6127_v45  ;;  %v4415_v26 = vmul.f32 %v4399_v59, %v11453_v6  ;;  %v11535_v29 = vpop.permute.xlu0 %6136 }
 0x51e   : > { %v4431_v60 = vmul.f32 %v4399_v59, %v11462_v53  ;;  %v4416_v20 = vmul.f32 %v4400_v12, %v3964_v27  ;;  %v4432_v30 = vmul.f32 %v4400_v12, %v4222_v62  ;;  %v11525_v24 = vadd.f32 %v4413_v43, %v11420_v32 }
 0x51f   : > { %v11528_v19 = vadd.f32 %v4429_v25, %v11426_v13  ;;  %v11531_v37 = vadd.f32 %v4414_v3, %v11476_v17  ;;  %v11533_v55 = vadd.f32 %v4430_v61, %v4358_v38  ;;  %v11538_v22 = vadd.f32 %v4415_v26, %v11469_v15  ;;  %v11548_v13 = vpop.permute.xlu1 %6141  ;;  %v13900_v26 = vld [vmem:[#allocation180_spill] sm:$0xff] }
 0x520   : > { %v11541_v51 = vadd.f32 %v4431_v60, %v11471_v9  ;;  %v11544_v50 = vadd.f32 %v4416_v20, %v11479_v39  ;;  %v11546_v32 = vadd.f32 %v4432_v30, %v4360_v7  ;;  %v4401_v17 = vsel %vm13887_vm4, %v6123_v54, %v6124_v28 }
 0x521   : > { %v4402_v38 = vsel %vm13888_vm13, %v6128_v49, %v6129_v33  ;;  %v6134_v16 = vunpack.i.h.bf16 %v6132_v36  ;;  %vm3947_vm8 = vcmp.eq.s32.totalorder %v11162_v23, 3  ;;  %v4417_v15 = vmul.f32 %v4401_v17, %v11453_v6  ;;  %v6147_v8 = vpop.permute.xlu0 %6146 }
 0x522   : > { %v6133_v10 = vunpack.i.l.bf16 %v6132_v36  ;;  %vm13889_vm1 = vcmp.eq.s32.totalorder %v10663_v1, 3  ;;  %vm4205_vm14 = vcmp.eq.s32.totalorder %v11096_v11, 3  ;;  %v4433_v39 = vmul.f32 %v4401_v17, %v11462_v53 }
 0x523   : > { %v3689_v9 = vsel %vm13889_vm1, %v10470_v4, 0.0  ;;  %v4418_v7 = vmul.f32 %v4402_v38, %v3964_v27  ;;  %vm13890_vm6 = vcmp.eq.s32.totalorder %v10887_v14, 3  ;;  %vm3949_vm11 = vcmp.eq.s32.totalorder %v11162_v23, 4 }
 0x524   : > { %v3827_v0 = vsel %vm13890_vm6, %v10470_v4, %v3689_v9  ;;  %v4434_v46 = vmul.f32 %v4402_v38, %v4222_v62  ;;  %vm13891_vm2 = vcmp.eq.s32.totalorder %v10663_v1, 4  ;;  %vm13892_vm0 = vcmp.eq.s32.totalorder %v10715_v18, 3  ;;  %v13904_v38 = vld [vmem:[#allocation239_spill] sm:$0xff] }
 0x525   : > { %v3691_v6 = vsel %vm13891_vm2, %v10448_v57, 0.0  ;;  %v11567_v45 = vsel %vm3947_vm8, %v10470_v4, %v3827_v0  ;;  %v4085_v5 = vsel %vm13892_vm0, %v10470_v4, 0.0  ;;  %v11572_v53 = vadd.f32 %v4417_v15, %v4345_v34  ;;  %v11589_v34 = vpop.permute.xlu1 %6151 }
 0x526   : > { %v11574_v27 = vadd.f32 %v4433_v39, %v4361_v40  ;;  %vm13893_vm12 = vcmp.eq.s32.totalorder %v10887_v14, 4  ;;  %v11580_v62 = vsel %vm4205_vm14, %v10470_v4, %v4085_v5  ;;  %v11582_v41 = vadd.f32 %v4418_v7, %v4346_v42  ;;  %v13895_v4 = vld [vmem:[#allocation241_spill] sm:$0xff]  ;;  %v13896_v42 = vld [vmem:[#allocation178_spill] sm:$0xff] }
 0x527   : > { %v3829_v63 = vsel %vm13893_vm12, %v10448_v57, %v3691_v6  ;;  %vm4207_vm7 = vcmp.eq.s32.totalorder %v11096_v11, 4  ;;  %vm3948_vm3 = vcmp.eq.s32.totalorder %v11387_v47, 3  ;;  %v11591_v40 = vadd.f32 %v4434_v46, %v4362_v52  ;;  %v13906_v5 = vld [vmem:[#allocation245_spill] sm:$0xff] }
 0x528   : > { %v11585_v36 = vsel %vm3949_vm11, %v10448_v57, %v3829_v63  ;;  %vm13894_vm15 = vcmp.eq.s32.totalorder %v10715_v18, 4  ;;  %v4475_v25 = vmul.f32 %v13895_v4, %v11567_v45  ;;  %vm13897_vm10 = vcmp.eq.s32.totalorder %v10863_v56, 3 }
 0x529   : > { %v4087_v43 = vsel %vm13894_vm15, %v10448_v57, 0.0  ;;  %v3690_v3 = vsel %vm13897_vm10, %v13896_v42, 0.0  ;;  %v4491_v61 = vmul.f32 %v13895_v4, %v11580_v62  ;;  %vm13898_vm5 = vcmask 1039360   ;;  %v6162_v9 = vpop.permute.xlu1 %6161 }
 0x52a   : > { %v4563_v59 = vsel %vm13898_vm5, %v6133_v10, %v6134_v16  ;;  %vm13899_vm9 = vcmp.eq.s32.totalorder %v11181_v2, 3  ;;  %vm4206_vm4 = vcmp.eq.s32.totalorder %v11401_v58, 3  ;;  %v11609_v12 = vsel %vm4207_vm7, %v10448_v57, %v4087_v43  ;;  %vm13907_vm2 = vmmov %vm13898_vm5 }
 0x52b   : > { %v3828_v52 = vsel %vm13899_vm9, %v13896_v42, %v3690_v3  ;;  %v4483_v28 = vadd.f32 %v4475_v25, %v11474_v35  ;;  %v4579_v54 = vmul.f32 %v4563_v59, %v11585_v36  ;;  %v4499_v49 = vadd.f32 %v4491_v61, %v11482_v31  ;;  %v6157_v31 = vpop.permute.xlu0 %6156  ;;  %vm13908_vm0 = vmmov %vm13907_vm2 }
 0x52c   : > { %v11614_v33 = vsel %vm3948_vm3, %v13896_v42, %v3828_v52  ;;  %vm13901_vm13 = vcmp.eq.s32.totalorder %v10863_v56, 4  ;;  %vm3950_vm8 = vcmp.eq.s32.totalorder %v11387_v47, 4  ;;  %vm13902_vm1 = vcmp.eq.s32.totalorder %v11117_v44, 3  ;;  %v13909_v52 = vld [vmem:[#allocation248_spill] sm:$0xff]  ;;  %vm13910_vm12 = vmmov %vm13908_vm0 }
 0x52d   : > { %v3692_v60 = vsel %vm13901_vm13, %v13900_v26, 0.0  ;;  %v4086_v57 = vsel %vm13902_vm1, %v13896_v42, 0.0  ;;  %vm4208_vm14 = vcmp.eq.s32.totalorder %v11401_v58, 4  ;;  %v6144_v20 = vunpack.i.h.bf16 %v11548_v13  ;;  %vm13912_vm7 = vmmov %vm13908_vm0 }
 0x52e   : > { %v11626_v35 = vsel %vm4206_vm4, %v13896_v42, %v4086_v57  ;;  %v6143_v30 = vunpack.i.l.bf16 %v11548_v13  ;;  %vm13903_vm6 = vcmp.eq.s32.totalorder %v11181_v2, 4  ;;  %v4476_v16 = vmul.f32 %v13904_v38, %v11614_v33  ;;  %vm13914_vm3 = vmmov %vm13908_vm0 }
 0x52f   : > { %v3830_v17 = vsel %vm13903_vm6, %v13900_v26, %v3692_v60  ;;  %v6139_v15 = vunpack.i.h.bf16 %v11535_v29  ;;  %v6138_v10 = vunpack.i.l.bf16 %v11535_v29  ;;  %v11637_v39 = vadd.f32 %v4579_v54, %v4483_v28  ;;  %v11667_v57 = vpop.permute.xlu0 %6166  ;;  %vm13915_vm15 = vmmov %vm13908_vm0 }
 0x530   : > { %v4595_v7 = vmul.f32 %v4563_v59, %v11609_v12  ;;  %v11641_v0 = vsel %vm3950_vm8, %v13900_v26, %v3830_v17  ;;  %vm13905_vm11 = vcmp.eq.s32.totalorder %v11117_v44, 4  ;;  %v4492_v6 = vmul.f32 %v13904_v38, %v11626_v35  ;;  %vm13920_vm5 = vmmov %vm13908_vm0 }
 0x531   : > { %v4088_v13 = vsel %vm13905_vm11, %v13900_v26, 0.0  ;;  %v4484_v29 = vadd.f32 %v4476_v16, %v11516_v48  ;;  %v4477_v63 = vmul.f32 %v13906_v5, %v11567_v45  ;;  %v4493_v43 = vmul.f32 %v13906_v5, %v11580_v62 }
 0x532   : > { %v11647_v46 = vsel %vm4208_vm14, %v13900_v26, %v4088_v13  ;;  %v4565_v4 = vsel %vm13907_vm2, %v6143_v30, %v6144_v20  ;;  %v6149_v25 = vunpack.i.h.bf16 %v6147_v8  ;;  %v6148_v42 = vunpack.i.l.bf16 %v6147_v8  ;;  %v11673_v30 = vpop.permute.xlu1 %6171 }
 0x533   : > { %v11657_v3 = vadd.f32 %v4595_v7, %v4499_v49  ;;  %v4500_v61 = vadd.f32 %v4492_v6, %v11518_v21  ;;  %v4564_v59 = vsel %vm13908_vm0, %v6138_v10, %v6139_v15  ;;  %v4478_v28 = vmul.f32 %v13909_v52, %v11614_v33 }
 0x534   : > { %v4580_v48 = vmul.f32 %v4564_v59, %v11641_v0  ;;  %v4596_v54 = vmul.f32 %v4564_v59, %v11647_v46  ;;  %v4485_v26 = vadd.f32 %v4477_v63, %v11525_v24  ;;  %v4501_v60 = vadd.f32 %v4493_v43, %v11528_v19  ;;  %v13911_v19 = vld [vmem:[#allocation247_spill] sm:$0xff] }
 0x535   : > { %v4581_v8 = vmul.f32 %v4565_v4, %v11585_v36  ;;  %v4597_v49 = vmul.f32 %v4565_v4, %v11609_v12  ;;  %v6154_v21 = vunpack.i.h.bf16 %v11589_v34  ;;  %v6153_v20 = vunpack.i.l.bf16 %v11589_v34 }
 0x536   : > { %v11675_v17 = vadd.f32 %v4580_v48, %v4484_v29  ;;  %v4494_v38 = vmul.f32 %v13909_v52, %v11626_v35  ;;  %v4566_v24 = vsel %vm13910_vm12, %v6148_v42, %v6149_v25  ;;  %v4479_v16 = vmul.f32 %v13911_v19, %v11567_v45  ;;  %v13913_v42 = vld [vmem:[#allocation50_spill] sm:$0xff]  ;;  %v6182_v48 = vpop.permute.xlu1 %6181 }
 0x537   : > { %v6159_v15 = vunpack.i.h.bf16 %v6157_v31  ;;  %v6158_v10 = vunpack.i.l.bf16 %v6157_v31  ;;  %v6164_v7 = vunpack.i.h.bf16 %v6162_v9  ;;  %v6163_v13 = vunpack.i.l.bf16 %v6162_v9 }
 0x538   : > { %v11682_v6 = vadd.f32 %v4596_v54, %v4500_v61  ;;  %v11684_v5 = vadd.f32 %v4581_v8, %v4485_v26  ;;  %v4486_v34 = vadd.f32 %v4478_v28, %v11531_v37  ;;  %v4502_v29 = vadd.f32 %v4494_v38, %v11533_v55  ;;  %v11700_v55 = vpop.permute.xlu0 %6176  ;;  %v13916_v8 = vld [vmem:[#allocation255_spill] sm:$0xff] }
 0x539   : > { %v11688_v63 = vadd.f32 %v4597_v49, %v4501_v60  ;;  %v4487_v43 = vadd.f32 %v4479_v16, %v11538_v22  ;;  %v4495_v4 = vmul.f32 %v13911_v19, %v11580_v62  ;;  %v4567_v25 = vsel %vm13912_vm7, %v6153_v20, %v6154_v21 }
 0x53a   : > { %v4582_v31 = vmul.f32 %v4566_v24, %v11641_v0  ;;  %v4598_v9 = vmul.f32 %v4566_v24, %v11647_v46  ;;  %v4480_v61 = vmul.f32 %v13913_v42, %v11614_v33  ;;  %v4496_v37 = vmul.f32 %v13913_v42, %v11626_v35 }
 0x53b   : > { %v4503_v59 = vadd.f32 %v4495_v4, %v11541_v51  ;;  %v4583_v22 = vmul.f32 %v4567_v25, %v11585_v36  ;;  %v4568_v52 = vsel %vm13914_vm3, %v6158_v10, %v6159_v15  ;;  %v4569_v28 = vsel %vm13915_vm15, %v6163_v13, %v6164_v7  ;;  %v13917_v10 = vld [vmem:[#allocation48_spill] sm:$0xff]  ;;  %v6192_v4 = vpop.permute.xlu1 %6191 }
 0x53c   : > { %v11706_v54 = vadd.f32 %v4582_v31, %v4486_v34  ;;  %v11708_v26 = vadd.f32 %v4598_v9, %v4502_v29  ;;  %v4599_v60 = vmul.f32 %v4567_v25, %v11609_v12  ;;  %v4481_v49 = vmul.f32 %v13916_v8, %v11567_v45  ;;  %v6187_v29 = vpop.permute.xlu0 %6186 }
 0x53d   : > { %v11713_v21 = vadd.f32 %v4583_v22, %v4487_v43  ;;  %v4488_v51 = vadd.f32 %v4480_v61, %v11544_v50  ;;  %v4504_v20 = vadd.f32 %v4496_v37, %v11546_v32  ;;  %v4497_v38 = vmul.f32 %v13916_v8, %v11580_v62 }
 0x53e   : > { %v4584_v24 = vmul.f32 %v4568_v52, %v11641_v0  ;;  %v4600_v19 = vmul.f32 %v4568_v52, %v11647_v46  ;;  %v4489_v16 = vadd.f32 %v4481_v49, %v11572_v53  ;;  %v4601_v15 = vmul.f32 %v4569_v28, %v11609_v12 }
 0x53f   : > { %v4482_v45 = vmul.f32 %v13917_v10, %v11614_v33  ;;  %v4498_v7 = vmul.f32 %v13917_v10, %v11626_v35  ;;  %v6169_v50 = vunpack.i.h.bf16 %v11667_v57  ;;  %v6168_v32 = vunpack.i.l.bf16 %v11667_v57 }
 0x540   : > { %v4505_v62 = vadd.f32 %v4497_v38, %v11574_v27  ;;  %v4585_v13 = vmul.f32 %v4569_v28, %v11585_v36  ;;  %v6174_v34 = vunpack.i.h.bf16 %v11673_v30  ;;  %v6173_v53 = vunpack.i.l.bf16 %v11673_v30  ;;  %v13918_v36 = vld [vmem:[#allocation54_spill] sm:$0xff]  ;;  %v13924_v28 = vld [vmem:[#allocation264_spill] sm:$0xff]  ;;  %v6197_v49 = vpop.permute.xlu0 %6196 }
 0x541   : > { %v11733_v12 = vadd.f32 %v4599_v60, %v4503_v59  ;;  %v11735_v43 = vadd.f32 %v4584_v24, %v4488_v51  ;;  %v11737_v33 = vadd.f32 %v4600_v19, %v4504_v20  ;;  %v4490_v35 = vadd.f32 %v4482_v45, %v11582_v41 }
 0x542   : > { %v11740_v25 = vadd.f32 %v4585_v13, %v4489_v16  ;;  %v11742_v57 = vadd.f32 %v4601_v15, %v4505_v62  ;;  %v4506_v27 = vadd.f32 %v4498_v7, %v11591_v40  ;;  %vm13919_vm10 = vcmp.eq.s32.totalorder %v10663_v1, 5 }
 0x543   : > { %v3693_v30 = vsel %vm13919_vm10, %v13918_v36, 0.0  ;;  %v4570_v31 = vsel %vm13920_vm5, %v6168_v32, %v6169_v50  ;;  %vm13921_vm9 = vcmp.eq.s32.totalorder %v10887_v14, 5  ;;  %vm3951_vm4 = vcmp.eq.s32.totalorder %v11162_v23, 5 }
 0x544   : > { %v3831_v9 = vsel %vm13921_vm9, %v13918_v36, %v3693_v30  ;;  %vm13922_vm13 = vcmp.eq.s32.totalorder %v10715_v18, 5  ;;  %v4586_v42 = vmul.f32 %v4570_v31, %v11641_v0  ;;  %vm4209_vm8 = vcmp.eq.s32.totalorder %v11096_v11, 5 }
 0x545   : > { %v4089_v41 = vsel %vm13922_vm13, %v13918_v36, 0.0  ;;  %vm13923_vm1 = vcmask 1031168   ;;  %vm3952_vm14 = vcmp.eq.s32.totalorder %v11387_v47, 5  ;;  %v6179_v61 = vunpack.i.h.bf16 %v11700_v55 }
 0x546   : > { %v4643_v40 = vsel %vm13923_vm1, %v6173_v53, %v6174_v34  ;;  %v6178_v37 = vunpack.i.l.bf16 %v11700_v55  ;;  %v6184_v59 = vunpack.i.h.bf16 %v6182_v48  ;;  %v6183_v22 = vunpack.i.l.bf16 %v6182_v48  ;;  %v6202_v55 = vpop.permute.xlu1 %6201  ;;  %vm13927_vm0 = vmmov %vm13923_vm1 }
 0x547   : > { %v3969_v52 = vsel %vm3951_vm4, %v13918_v36, %v3831_v9  ;;  %vm13925_vm6 = vcmp.eq.s32.totalorder %v10863_v56, 5  ;;  %v6189_v8 = vunpack.i.h.bf16 %v6187_v29  ;;  %v6188_v0 = vunpack.i.l.bf16 %v6187_v29  ;;  %vm13928_vm12 = vmmov %vm13927_vm0  ;;  %v6207_v9 = vpop.permute.xlu0 %6206 }
 0x548   : > { %v3694_v60 = vsel %vm13925_vm6, %v13924_v28, 0.0  ;;  %v4227_v51 = vsel %vm4209_vm8, %v13918_v36, %v4089_v41  ;;  %vm13926_vm11 = vcmp.eq.s32.totalorder %v11181_v2, 5  ;;  %v6194_v38 = vunpack.i.h.bf16 %v6192_v4  ;;  %vm13930_vm3 = vmmov %vm13927_vm0 }
 0x549   : > { %v3832_v20 = vsel %vm13926_vm11, %v13924_v28, %v3694_v60  ;;  %v6193_v24 = vunpack.i.l.bf16 %v6192_v4  ;;  %v4602_v48 = vmul.f32 %v4570_v31, %v11647_v46  ;;  %v4675_v19 = vmul.f32 %v4643_v40, %v4227_v51  ;;  %vm13931_vm15 = vmmov %vm13927_vm0 }
 0x54a   : > { %v3970_v16 = vsel %vm3952_vm14, %v13924_v28, %v3832_v20  ;;  %vm4210_vm2 = vcmp.eq.s32.totalorder %v11401_v58, 5  ;;  %v4644_v15 = vsel %vm13927_vm0, %v6178_v37, %v6179_v61  ;;  %v4645_v10 = vsel %vm13928_vm12, %v6183_v22, %v6184_v59  ;;  %vm13932_vm10 = vmmov %vm13927_vm0  ;;  %v6212_v61 = vpop.permute.xlu1 %6211 }
 0x54b   : > { %v6199_v45 = vunpack.i.h.bf16 %v6197_v49  ;;  %v6198_v7 = vunpack.i.l.bf16 %v6197_v49  ;;  %v4594_v50 = vadd.f32 %v4586_v42, %v4490_v35  ;;  %v4659_v32 = vmul.f32 %v4643_v40, %v3969_v52  ;;  %vm13933_vm5 = vmmov %vm13927_vm0 }
 0x54c   : > { %vm13929_vm7 = vcmp.eq.s32.totalorder %v11117_v44, 5  ;;  %v4646_v46 = vsel %vm13930_vm3, %v6188_v0, %v6189_v8  ;;  %v4647_v34 = vsel %vm13931_vm15, %v6193_v24, %v6194_v38  ;;  %v6204_v53 = vunpack.i.h.bf16 %v6202_v55  ;;  %vm13934_vm9 = vmmov %vm13927_vm0 }
 0x54d   : > { %v4090_v62 = vsel %vm13929_vm7, %v13924_v28, 0.0  ;;  %v6203_v29 = vunpack.i.l.bf16 %v6202_v55  ;;  %v11783_v4 = vadd.f32 %v4602_v48, %v4506_v27  ;;  %v4660_v36 = vmul.f32 %v4644_v15, %v3970_v16 }
 0x54e   : > { %v4228_v13 = vsel %vm4210_vm2, %v13924_v28, %v4090_v62  ;;  %v4677_v31 = vmul.f32 %v4645_v10, %v4227_v51  ;;  %v4667_v35 = vadd.f32 %v4659_v32, %v11637_v39  ;;  %v11787_v41 = vadd.f32 %v4675_v19, %v11657_v3 }
 0x54f   : > { %v4676_v30 = vmul.f32 %v4644_v15, %v4228_v13  ;;  %v4678_v42 = vmul.f32 %v4646_v46, %v4228_v13  ;;  %v4648_v40 = vsel %vm13932_vm10, %v6198_v7, %v6199_v45  ;;  %v11791_v37 = vadd.f32 %v4660_v36, %v11675_v17  ;;  %v6217_v15 = vpop.permute.xlu0 %6216  ;;  %v13939_v7 = vld [vmem:[#allocation115_spill] sm:$0xff] }
 0x550   : > { %v4661_v59 = vmul.f32 %v4645_v10, %v3969_v52  ;;  %v4662_v22 = vmul.f32 %v4646_v46, %v3970_v16  ;;  %v4679_v27 = vmul.f32 %v4647_v34, %v4227_v51  ;;  %v4663_v28 = vmul.f32 %v4647_v34, %v3969_v52 }
 0x551   : > { %v4649_v60 = vsel %vm13933_vm5, %v6203_v29, %v6204_v53  ;;  %v6209_v8 = vunpack.i.h.bf16 %v6207_v9  ;;  %v6208_v0 = vunpack.i.l.bf16 %v6207_v9  ;;  %v11795_v39 = vadd.f32 %v4676_v30, %v11682_v6  ;;  %v13944_v9 = vld [vmem:[#allocation207_spill] sm:$0xff] }
 0x552   : > { %v11798_v3 = vadd.f32 %v4661_v59, %v11684_v5  ;;  %v11801_v49 = vadd.f32 %v4677_v31, %v11688_v63  ;;  %v4680_v20 = vmul.f32 %v4648_v40, %v4228_v13  ;;  %v11804_v17 = vadd.f32 %v4662_v22, %v11706_v54  ;;  %v6222_v54 = vpop.permute.xlu1 %6221  ;;  %v13947_v22 = vld [vmem:[#allocation109_spill] sm:$0xff] }
 0x553   : > { %v11807_v38 = vadd.f32 %v4678_v42, %v11708_v26  ;;  %v11810_v24 = vadd.f32 %v4663_v28, %v11713_v21  ;;  %v4664_v55 = vmul.f32 %v4648_v40, %v3970_v16  ;;  %v11813_v6 = vadd.f32 %v4679_v27, %v11733_v12 }
 0x554   : > { %v4665_v48 = vmul.f32 %v4649_v60, %v3969_v52  ;;  %v4681_v5 = vmul.f32 %v4649_v60, %v4227_v51  ;;  %v6214_v19 = vunpack.i.h.bf16 %v6212_v61  ;;  %v4650_v63 = vsel %vm13934_vm9, %v6208_v0, %v6209_v8  ;;  %v13935_v52 = vld [vmem:[#allocation106_spill] sm:$0xff] }
 0x555   : > { %v6213_v10 = vunpack.i.l.bf16 %v6212_v61  ;;  %vm3953_vm4 = vcmp.eq.s32.totalorder %v11162_v23, 6  ;;  %vm4211_vm13 = vcmp.eq.s32.totalorder %v11096_v11, 6  ;;  %v11819_v26 = vadd.f32 %v4664_v55, %v11735_v43  ;;  %v13945_v61 = vld [vmem:[#allocation263_spill] sm:$0xff] }
 0x556   : > { %v11822_v21 = vadd.f32 %v4680_v20, %v11737_v33  ;;  %v11825_v12 = vadd.f32 %v4665_v48, %v11740_v25  ;;  %vm13936_vm8 = vcmp.eq.s32.totalorder %v10663_v1, 6  ;;  %vm13937_vm1 = vcmp.eq.s32.totalorder %v10887_v14, 6 }
 0x557   : > { %v3695_v51 = vsel %vm13936_vm8, %v13935_v52, 0.0  ;;  %vm3955_vm14 = vcmp.eq.s32.totalorder %v11162_v23, 7  ;;  %vm13938_vm6 = vcmp.eq.s32.totalorder %v10715_v18, 6  ;;  %vm4213_vm11 = vcmp.eq.s32.totalorder %v11096_v11, 7 }
 0x558   : > { %v3833_v45 = vsel %vm13937_vm1, %v13935_v52, %v3695_v51  ;;  %v4091_v43 = vsel %vm13938_vm6, %v13935_v52, 0.0  ;;  %v4666_v33 = vmul.f32 %v4650_v63, %v3970_v16  ;;  %vm13940_vm2 = vcmp.eq.s32.totalorder %v10663_v1, 7 }
 0x559   : > { %v3697_v25 = vsel %vm13940_vm2, %v13939_v7, 0.0  ;;  %v11842_v32 = vsel %vm3953_vm4, %v13935_v52, %v3833_v45  ;;  %v11845_v62 = vsel %vm4211_vm13, %v13935_v52, %v4091_v43  ;;  %v11848_v46 = vadd.f32 %v4681_v5, %v11742_v57  ;;  %v6227_v57 = vpop.permute.xlu0 %6226 }
 0x55a   : > { %vm13941_vm0 = vcmp.eq.s32.totalorder %v10887_v14, 7  ;;  %vm13942_vm12 = vcmp.eq.s32.totalorder %v10715_v18, 7  ;;  %vm13943_vm7 = vcmask 1039360   ;;  %v11857_v29 = vadd.f32 %v4666_v33, %v4594_v50  ;;  %v6232_v50 = vpop.permute.xlu1 %6231  ;;  %v13953_v33 = vld [vmem:[#allocation249_spill] sm:$0xff] }
 0x55b   : > { %v3835_v34 = vsel %vm13941_vm0, %v13939_v7, %v3697_v25  ;;  %v4093_v16 = vsel %vm13942_vm12, %v13939_v7, 0.0  ;;  %v4803_v53 = vsel %vm13943_vm7, %v6213_v10, %v6214_v19  ;;  %v4682_v36 = vmul.f32 %v4650_v63, %v4228_v13  ;;  %vm13954_vm6 = vmmov %vm13943_vm7 }
 0x55c   : > { %v11860_v30 = vsel %vm3955_vm14, %v13939_v7, %v3835_v34  ;;  %v11863_v31 = vsel %vm4213_vm11, %v13939_v7, %v4093_v16  ;;  %v4719_v42 = vmul.f32 %v13944_v9, %v11842_v32  ;;  %v4735_v40 = vmul.f32 %v13944_v9, %v11845_v62  ;;  %vm13955_vm11 = vmmov %vm13954_vm6 }
 0x55d   : > { %vm13946_vm3 = vcmp.eq.s32.totalorder %v10863_v56, 6  ;;  %vm3954_vm15 = vcmp.eq.s32.totalorder %v11387_v47, 6  ;;  %v4819_v13 = vmul.f32 %v4803_v53, %v11860_v30  ;;  %vm13948_vm10 = vcmp.eq.s32.totalorder %v10863_v56, 7  ;;  %v6237_v45 = vpop.permute.xlu0 %6236  ;;  %vm13957_vm2 = vmmov %vm13954_vm6 }
 0x55e   : > { %v3696_v59 = vsel %vm13946_vm3, %v13945_v61, 0.0  ;;  %v3698_v27 = vsel %vm13948_vm10, %v13947_v22, 0.0  ;;  %vm13949_vm5 = vcmp.eq.s32.totalorder %v11181_v2, 6  ;;  %vm4212_vm9 = vcmp.eq.s32.totalorder %v11401_v58, 6  ;;  %v6242_v25 = vpop.permute.xlu1 %6241  ;;  %vm13959_vm0 = vmmov %vm13957_vm2 }
 0x55f   : > { %v3834_v28 = vsel %vm13949_vm5, %v13945_v61, %v3696_v59  ;;  %v4727_v60 = vadd.f32 %v4719_v42, %v4667_v35  ;;  %vm3956_vm4 = vcmp.eq.s32.totalorder %v11387_v47, 7  ;;  %v6219_v8 = vunpack.i.h.bf16 %v6217_v15  ;;  %vm13962_vm12 = vmmov %vm13959_vm0 }
 0x560   : > { %v6218_v0 = vunpack.i.l.bf16 %v6217_v15  ;;  %v11883_v20 = vsel %vm3954_vm15, %v13945_v61, %v3834_v28  ;;  %vm13950_vm13 = vcmp.eq.s32.totalorder %v11117_v44, 6  ;;  %v6224_v48 = vunpack.i.h.bf16 %v6222_v54  ;;  %vm13963_vm7 = vmmov %vm13959_vm0 }
 0x561   : > { %v4092_v55 = vsel %vm13950_vm13, %v13945_v61, 0.0  ;;  %v6223_v5 = vunpack.i.l.bf16 %v6222_v54  ;;  %vm4214_vm8 = vcmp.eq.s32.totalorder %v11401_v58, 7  ;;  %v6229_v63 = vunpack.i.h.bf16 %v6227_v57  ;;  %vm13965_vm3 = vmmov %vm13959_vm0 }
 0x562   : > { %v11890_v19 = vsel %vm4212_vm9, %v13945_v61, %v4092_v55  ;;  %v6228_v35 = vunpack.i.l.bf16 %v6227_v57  ;;  %v11893_v10 = vadd.f32 %v4682_v36, %v11783_v4  ;;  %v4743_v15 = vadd.f32 %v4735_v40, %v11787_v41  ;;  %v13956_v57 = vld [vmem:[#allocation250_spill] sm:$0xff] }
 0x563   : > { %v4835_v52 = vmul.f32 %v4803_v53, %v11863_v31  ;;  %vm13951_vm1 = vcmp.eq.s32.totalorder %v11181_v2, 7  ;;  %v11900_v54 = vadd.f32 %v4819_v13, %v4727_v60  ;;  %vm13952_vm14 = vcmp.eq.s32.totalorder %v11117_v44, 7  ;;  %v13958_v13 = vld [vmem:[#allocation252_spill] sm:$0xff] }
 0x564   : > { %v3836_v51 = vsel %vm13951_vm1, %v13947_v22, %v3698_v27  ;;  %v4094_v43 = vsel %vm13952_vm14, %v13947_v22, 0.0  ;;  %v4720_v7 = vmul.f32 %v13953_v33, %v11883_v20  ;;  %v4804_v4 = vsel %vm13954_vm6, %v6218_v0, %v6219_v8 }
 0x565   : > { %v11911_v41 = vsel %vm3956_vm4, %v13947_v22, %v3836_v51  ;;  %v11914_v34 = vsel %vm4214_vm8, %v13947_v22, %v4094_v43  ;;  %v4736_v16 = vmul.f32 %v13953_v33, %v11890_v19  ;;  %v4805_v53 = vsel %vm13955_vm11, %v6223_v5, %v6224_v48  ;;  %v6247_v5 = vpop.permute.xlu0 %6246  ;;  %v6252_v33 = vpop.permute.xlu1 %6251 }
 0x566   : > { %v4728_v36 = vadd.f32 %v4720_v7, %v11791_v37  ;;  %v4721_v9 = vmul.f32 %v13956_v57, %v11842_v32  ;;  %v4737_v42 = vmul.f32 %v13956_v57, %v11845_v62  ;;  %v4806_v40 = vsel %vm13957_vm2, %v6228_v35, %v6229_v63 }
 0x567   : > { %v4744_v61 = vadd.f32 %v4736_v16, %v11795_v39  ;;  %v4836_v59 = vmul.f32 %v4804_v4, %v11914_v34  ;;  %v4722_v22 = vmul.f32 %v13958_v13, %v11883_v20  ;;  %v4738_v27 = vmul.f32 %v13958_v13, %v11890_v19 }
 0x568   : > { %v4729_v37 = vadd.f32 %v4721_v9, %v11798_v3  ;;  %v4821_v28 = vmul.f32 %v4805_v53, %v11860_v30  ;;  %v6234_v60 = vunpack.i.h.bf16 %v6232_v50  ;;  %v6233_v8 = vunpack.i.l.bf16 %v6232_v50 }
 0x569   : > { %v4820_v0 = vmul.f32 %v4804_v4, %v11911_v41  ;;  %v4837_v55 = vmul.f32 %v4805_v53, %v11863_v31  ;;  %v4730_v39 = vadd.f32 %v4722_v22, %v11804_v17  ;;  %v4838_v48 = vmul.f32 %v4806_v40, %v11914_v34 }
 0x56a   : > { %v6239_v63 = vunpack.i.h.bf16 %v6237_v45  ;;  %v6238_v35 = vunpack.i.l.bf16 %v6237_v45  ;;  %v6244_v51 = vunpack.i.h.bf16 %v6242_v25  ;;  %v6243_v43 = vunpack.i.l.bf16 %v6242_v25  ;;  %v13960_v25 = vld [vmem:[#allocation47_spill] sm:$0xff] }
 0x56b   : > { %v11937_v7 = vadd.f32 %v4835_v52, %v4743_v15  ;;  %v11939_v3 = vadd.f32 %v4820_v0, %v4728_v36  ;;  %v11941_v16 = vadd.f32 %v4836_v59, %v4744_v61  ;;  %v4745_v50 = vadd.f32 %v4737_v42, %v11801_v49  ;;  %v13961_v36 = vld [vmem:[#allocation57_spill] sm:$0xff]  ;;  %v11970_v0 = vpop.permute.xlu1 %6261 }
 0x56c   : > { %v11944_v4 = vadd.f32 %v4821_v28, %v4729_v37  ;;  %v4746_v17 = vadd.f32 %v4738_v27, %v11807_v38  ;;  %v4822_v53 = vmul.f32 %v4806_v40, %v11911_v41  ;;  %v4807_v57 = vsel %vm13959_vm0, %v6233_v8, %v6234_v60  ;;  %v6257_v27 = vpop.permute.xlu0 %6256 }
 0x56d   : > { %v11949_v45 = vadd.f32 %v4837_v55, %v4745_v50  ;;  %v4723_v15 = vmul.f32 %v13960_v25, %v11842_v32  ;;  %v4739_v52 = vmul.f32 %v13960_v25, %v11845_v62  ;;  %v4724_v9 = vmul.f32 %v13961_v36, %v11883_v20 }
 0x56e   : > { %v11957_v49 = vadd.f32 %v4822_v53, %v4730_v39  ;;  %v11959_v42 = vadd.f32 %v4838_v48, %v4746_v17  ;;  %v4808_v38 = vsel %vm13962_vm12, %v6238_v35, %v6239_v63  ;;  %v4809_v40 = vsel %vm13963_vm7, %v6243_v43, %v6244_v51  ;;  %v13964_v48 = vld [vmem:[#allocation259_spill] sm:$0xff] }
 0x56f   : > { %v4823_v61 = vmul.f32 %v4807_v57, %v11860_v30  ;;  %v4839_v59 = vmul.f32 %v4807_v57, %v11863_v31  ;;  %v6249_v13 = vunpack.i.h.bf16 %v6247_v5  ;;  %v6248_v22 = vunpack.i.l.bf16 %v6247_v5 }
 0x570   : > { %v4731_v37 = vadd.f32 %v4723_v15, %v11810_v24  ;;  %v4747_v28 = vadd.f32 %v4739_v52, %v11813_v6  ;;  %v4740_v60 = vmul.f32 %v13961_v36, %v11890_v19  ;;  %v4732_v8 = vadd.f32 %v4724_v9, %v11819_v26 }
 0x571   : > { %v4824_v55 = vmul.f32 %v4808_v38, %v11911_v41  ;;  %v4840_v39 = vmul.f32 %v4808_v38, %v11914_v34  ;;  %v4725_v63 = vmul.f32 %v13964_v48, %v11842_v32  ;;  %v4825_v5 = vmul.f32 %v4809_v40, %v11860_v30  ;;  %v13966_v30 = vld [vmem:[#allocation46_spill] sm:$0xff] }
 0x572   : > { %v4741_v24 = vmul.f32 %v13964_v48, %v11845_v62  ;;  %v4841_v6 = vmul.f32 %v4809_v40, %v11863_v31  ;;  %v6254_v35 = vunpack.i.h.bf16 %v6252_v33  ;;  %v6253_v51 = vunpack.i.l.bf16 %v6252_v33 }
 0x573   : > { %v11980_v43 = vadd.f32 %v4823_v61, %v4731_v37  ;;  %v4748_v26 = vadd.f32 %v4740_v60, %v11822_v21  ;;  %v4733_v50 = vadd.f32 %v4725_v63, %v11825_v12  ;;  %v4810_v17 = vsel %vm13965_vm3, %v6248_v22, %v6249_v13  ;;  %v6267_v21 = vpop.permute.xlu0 %6266  ;;  %v12047_v63 = vld [vmem:[%s6568_s26 + $0x10] sm:$0xff] }
 0x574   : > { %v11985_v53 = vadd.f32 %v4839_v59, %v4747_v28  ;;  %v4749_v32 = vadd.f32 %v4741_v24, %v11848_v46  ;;  %v4726_v57 = vmul.f32 %v13966_v30, %v11883_v20  ;;  %v4742_v62 = vmul.f32 %v13966_v30, %v11890_v19  ;;  %v13967_v46 = vld [vmem:[#allocation177_spill] sm:$0xff]  ;;  %v6272_v19 = vpop.permute.xlu1 %6271 }
 0x575   : > { %v11992_v31 = vadd.f32 %v4824_v55, %v4732_v8  ;;  %v11994_v33 = vadd.f32 %v4840_v39, %v4748_v26  ;;  %v11996_v25 = vadd.f32 %v4825_v5, %v4733_v50  ;;  %vm3957_vm15 = vcmp.eq.s32.totalorder %v11162_v23, 8  ;;  %v12034_v55 = vld [vmem:[%s6568_s26] sm:$0xff] }
 0x576   : > { %v11999_v12 = vadd.f32 %v4841_v6, %v4749_v32  ;;  %v4826_v15 = vmul.f32 %v4810_v17, %v11911_v41  ;;  %vm13968_vm10 = vcmp.eq.s32.totalorder %v10663_v1, 8  ;;  %vm13969_vm5 = vcmask 1031168  }
 0x577   : > { %v3699_v20 = vsel %vm13968_vm10, %v13967_v46, 0.0  ;;  %v4883_v52 = vsel %vm13969_vm5, %v6253_v51, %v6254_v35  ;;  %v4734_v36 = vadd.f32 %v4726_v57, %v11857_v29  ;;  %v4750_v9 = vadd.f32 %v4742_v62, %v11893_v10  ;;  %v6277_v37 = vpop.permute.xlu0 %6276  ;;  %vm13974_vm6 = vmmov %vm13969_vm5  ;;  %v12057_v35 = vld [vmem:[%s6583_s10] sm:$0xff] }
 0x578   : > { %v4842_v38 = vmul.f32 %v4810_v17, %v11914_v34  ;;  %vm13970_vm9 = vcmp.eq.s32.totalorder %v10887_v14, 8  ;;  %vm4215_vm4 = vcmp.eq.s32.totalorder %v11096_v11, 8  ;;  %v6259_v1 = vunpack.i.h.bf16 %v6257_v27  ;;  %v13972_v14 = vld [vmem:[#allocation176_spill] sm:$0xff]  ;;  %vm13977_vm0 = vmmov %vm13969_vm5  ;;  %v6282_v17 = vpop.permute.xlu1 %6281 }
 0x579   : > { %v3837_v23 = vsel %vm13970_vm9, %v13967_v46, %v3699_v20  ;;  %v6258_v41 = vunpack.i.l.bf16 %v6257_v27  ;;  %vm13971_vm13 = vcmp.eq.s32.totalorder %v10715_v18, 8  ;;  %v6274_v10 = vunpack.i.h.bf16 %v6272_v19  ;;  %vm13978_vm12 = vmmov %vm13977_vm0  ;;  %v12062_v51 = vld [vmem:[%s6568_s26 + $0x20] sm:$0xff] }
 0x57a   : > { %v12013_v40 = vsel %vm3957_vm15, %v13967_v46, %v3837_v23  ;;  %v4095_v61 = vsel %vm13971_vm13, %v13967_v46, 0.0  ;;  %v6273_v34 = vunpack.i.l.bf16 %v6272_v19  ;;  %v12020_v59 = vadd.f32 %v4826_v15, %v4734_v36  ;;  %vm13979_vm7 = vmmov %vm13977_vm0 }
 0x57b   : > { %v4899_v29 = vmul.f32 %v4883_v52, %v12013_v40  ;;  %vm13973_vm8 = vcmp.eq.s32.totalorder %v10863_v56, 8  ;;  %v6264_v22 = vunpack.i.h.bf16 %v11970_v0  ;;  %v6263_v11 = vunpack.i.l.bf16 %v11970_v0  ;;  %v5175_v0 = vld [vmem:[#allocation2 + $0x18] sm:$0xff]  ;;  %vm13980_vm3 = vmmov %vm13977_vm0 }
 0x57c   : > { %v3700_v13 = vsel %vm13973_vm8, %v13972_v14, 0.0  ;;  %v12027_v27 = vadd.f32 %v4842_v38, %v4750_v9  ;;  %v4233_v18 = vsel %vm4215_vm4, %v13967_v46, %v4095_v61  ;;  %vm3958_vm1 = vcmp.eq.s32.totalorder %v11387_v47, 8  ;;  %vm13981_vm15 = vmmov %vm13977_vm0 }
 0x57d   : > { %vm4216_vm14 = vcmp.eq.s32.totalorder %v11401_v58, 8  ;;  %v4915_v28 = vmul.f32 %v4883_v52, %v4233_v18  ;;  %v4884_v60 = vsel %vm13974_vm6, %v6258_v41, %v6259_v1  ;;  %v6269_v56 = vunpack.i.h.bf16 %v6267_v21  ;;  %v12083_v41 = vld [vmem:[%s6568_s26 + $0x30] sm:$0xff]  ;;  %vm13982_vm10 = vmmov %vm13977_vm0 }
 0x57e   : > { %v6268_v8 = vunpack.i.l.bf16 %v6267_v21  ;;  %v12037_v39 = vadd.f32 %v4899_v29, %v11900_v54  ;;  %vm13975_vm11 = vcmp.eq.s32.totalorder %v11181_v2, 8  ;;  %vm13976_vm2 = vcmp.eq.s32.totalorder %v11117_v44, 8 }
 0x57f   : > { %v3838_v47 = vsel %vm13975_vm11, %v13972_v14, %v3700_v13  ;;  %v4096_v58 = vsel %vm13976_vm2, %v13972_v14, 0.0  ;;  %v4887_v48 = vsel %vm13977_vm0, %v6273_v34, %v6274_v10  ;;  %v4885_v54 = vsel %vm13978_vm12, %v6263_v11, %v6264_v22  ;;  %v12094_v22 = vld [vmem:[%s6568_s26 + $0x8] sm:$0xff] }
 0x580   : > { %v12050_v5 = vsel %vm3958_vm1, %v13972_v14, %v3838_v47  ;;  %v12053_v24 = vsel %vm4216_vm14, %v13972_v14, %v4096_v58  ;;  %v6279_v6 = vunpack.i.h.bf16 %v6277_v37  ;;  %v5057_v26 = vand.u32 2147483647, %v12034_v55  ;;  %v12116_v47 = vld [vmem:[%s6568_s26 + $0x28] sm:$0xff] }
 0x581   : > { %v4900_v2 = vmul.f32 %v4884_v60, %v12050_v5  ;;  %v4916_v44 = vmul.f32 %v4884_v60, %v12053_v24  ;;  %v5177_v50 = vadd.f32 %v5175_v0, %v12057_v35  ;;  %v4886_v32 = vsel %vm13979_vm7, %v6268_v8, %v6269_v56  ;;  %v5176_v60 = vld [vmem:[#allocation2 + $0x20] sm:$0xff]  ;;  %v12111_v56 = vld [vmem:[%s6568_s26 + $0x18] sm:$0xff]  ;;  %v12119_v58 = vld [vmem:[%s6583_s10 + $0x8] sm:$0xff] }
 0x582   : > { %v4903_v30 = vmul.f32 %v4887_v48, %v12013_v40  ;;  %v6278_v57 = vunpack.i.l.bf16 %v6277_v37  ;;  %v5059_v62 = vand.u32 2147483647, %v12047_v63  ;;  %v12070_v21 = vadd.f32 %v4915_v28, %v11937_v7 }
 0x583   : > { %v4901_v15 = vmul.f32 %v4885_v54, %v12013_v40  ;;  %v4917_v46 = vmul.f32 %v4885_v54, %v4233_v18  ;;  %v4919_v20 = vmul.f32 %v4887_v48, %v4233_v18  ;;  %5179 = vst [vmem:[#allocation2 + $0x18] sm:$0xff] %v5177_v50  ;;  %v5061_v52 = vand.u32 2147483647, %v12062_v51  ;;  %v6287_v54 = vpop.permute.xlu0 %6286 }
 0x584   : > { %v5065_v19 = vsub.f32 0.0, %v5057_v26  ;;  %v6284_v36 = vunpack.i.h.bf16 %v6282_v17  ;;  %v6283_v9 = vunpack.i.l.bf16 %v6282_v17  ;;  %v12075_v38 = vadd.f32 %v4900_v2, %v11939_v3 }
 0x585   : > { %v12078_v23 = vadd.f32 %v4916_v44, %v11941_v16  ;;  %v4902_v7 = vmul.f32 %v4886_v32, %v12050_v5  ;;  %v4918_v1 = vmul.f32 %v4886_v32, %v12053_v24  ;;  %v4911_v61 = vadd.f32 %v4903_v30, %v11980_v43 }
 0x586   : > { %v4888_v29 = vsel %vm13980_vm3, %v6278_v57, %v6279_v6  ;;  %v5067_v10 = vsub.f32 0.0, %v5059_v62  ;;  %v4889_v34 = vsel %vm13981_vm15, %v6283_v9, %v6284_v36  ;;  %v4909_v3 = vadd.f32 %v4901_v15, %v11944_v4 }
 0x587   : > { %v12090_v14 = vadd.f32 %v4919_v20, %v11985_v53  ;;  %v4905_v16 = vmul.f32 %v4889_v34, %v12013_v40  ;;  %v4921_v13 = vmul.f32 %v4889_v34, %v4233_v18  ;;  %v12097_v43 = vadd.f32 %v4917_v46, %v11949_v45 }
 0x588   : > { %v5063_v11 = vand.u32 2147483647, %v12083_v41  ;;  %v5069_v37 = vsub.f32 0.0, %v5061_v52  ;;  %v5073_v28 = vmul.f32 1.442695, %v5065_v19  ;;  %v12101_v4 = vadd.f32 %v4902_v7, %v11957_v49  ;;  %v12132_v19 = vld [vmem:[%s6568_s26 + $0x38] sm:$0xff] }
 0x589   : > { %v12104_v53 = vadd.f32 %v4918_v1, %v11959_v42  ;;  %v4913_v40 = vadd.f32 %v4905_v16, %v11996_v25  ;;  %v12108_v18 = vadd.f32 %v4921_v13, %v11999_v12  ;;  %v4931_v45 = vmax.f32 %v12037_v39, %v4911_v61 }
 0x58a   : > { %v4904_v8 = vmul.f32 %v4888_v29, %v12050_v5  ;;  %v5077_v0 = vmul.f32 1.442695, %v5067_v10  ;;  %v5058_v49 = vand.u32 2147483647, %v12094_v22  ;;  %v4977_v42 = vmax.f32 %v12070_v21, %v12090_v14 }
 0x58b   : > { %v4932_v25 = vmax.f32 %v4909_v3, %v4913_v40  ;;  %v4978_v12 = vmax.f32 %v12097_v43, %v12108_v18  ;;  %v5178_v48 = vadd.f32 %v5176_v60, %v12119_v58  ;;  %v4920_v6 = vmul.f32 %v4888_v29, %v12053_v24 }
 0x58c   : > { %v5071_v2 = vsub.f32 0.0, %v5063_v11  ;;  %6398 = vpow2.f32 %v5073_v28  ;;  %v5081_v44 = vmul.f32 1.442695, %v5069_v37  ;;  %v5060_v17 = vand.u32 2147483647, %v12111_v56 }
 0x58d   : > { %v4933_v26 = vmax.f32 %v4931_v45, %v4932_v25  ;;  %v4979_v50 = vmax.f32 %v4977_v42, %v4978_v12  ;;  %v5062_v32 = vand.u32 2147483647, %v12116_v47  ;;  %5180 = vst [vmem:[#allocation2 + $0x20] sm:$0xff] %v5178_v48  ;;  %6400 = vpow2.f32 %v5077_v0 }
 0x58e   : > { %v5066_v30 = vsub.f32 0.0, %v5058_v49  ;;  %v6289_v57 = vunpack.i.h.bf16 %v6287_v54  ;;  %v6288_v62 = vunpack.i.l.bf16 %v6287_v54  ;;  %v12135_v36 = vadd.f32 %v4904_v8, %v11992_v31 }
 0x58f   : > { %v4937_v15 = vsub.f32 %v12037_v39, %v4933_v26  ;;  %v4939_v46 = vsub.f32 %v4909_v3, %v4933_v26  ;;  %v4941_v20 = vsub.f32 %v4911_v61, %v4933_v26  ;;  %v4943_v52 = vsub.f32 %v4913_v40, %v4933_v26 }
 0x590   : > { %v5085_v9 = vmul.f32 1.442695, %v5071_v2  ;;  %v4983_v7 = vsub.f32 %v12070_v21, %v4979_v50  ;;  %v4989_v1 = vsub.f32 %v12108_v18, %v4979_v50  ;;  %v5068_v34 = vsub.f32 0.0, %v5060_v17 }
 0x591   : > { %v4945_v29 = vmul.f32 1.442695, %v4937_v15  ;;  %v4949_v10 = vmul.f32 1.442695, %v4939_v46  ;;  %v5070_v16 = vsub.f32 0.0, %v5062_v32  ;;  %v12140_v13 = vadd.f32 %v4920_v6, %v11994_v33 }
 0x592   : > { %6402 = vpow2.f32 %v5081_v44  ;;  %v4953_v39 = vmul.f32 1.442695, %v4941_v20  ;;  %v5064_v61 = vand.u32 2147483647, %v12132_v19  ;;  %v4985_v31 = vsub.f32 %v12097_v43, %v4979_v50 }
 0x593   : > { %6404 = vpow2.f32 %v4945_v29  ;;  %v5075_v3 = vmul.f32 1.442695, %v5066_v30  ;;  %v4890_v11 = vsel %vm13982_vm10, %v6288_v62, %v6289_v57  ;;  %v4957_v21 = vmul.f32 1.442695, %v4943_v52 }
 0x594   : > { %6406 = vpow2.f32 %v4949_v10  ;;  %v4906_v37 = vmul.f32 %v4890_v11, %v12050_v5  ;;  %v4922_v28 = vmul.f32 %v4890_v11, %v12053_v24  ;;  %v4934_v33 = vmax.f32 %v12075_v38, %v12135_v36 }
 0x595   : > { %6408 = vpow2.f32 %v5085_v9  ;;  %v5079_v60 = vmul.f32 1.442695, %v5068_v34  ;;  %v5083_v40 = vmul.f32 1.442695, %v5070_v16  ;;  %v4987_v18 = vsub.f32 %v12090_v14, %v4979_v50 }
 0x596   : > { %6410 = vpow2.f32 %v4953_v39  ;;  %v4914_v43 = vadd.f32 %v4906_v37, %v12020_v59  ;;  %v12152_v45 = vadd.f32 %v4922_v28, %v12027_v27  ;;  %v4980_v8 = vmax.f32 %v12078_v23, %v12140_v13 }
 0x597   : > { %v4991_v5 = vmul.f32 1.442695, %v4983_v7  ;;  %v5072_v0 = vsub.f32 0.0, %v5064_v61  ;;  %6412 = vpow2.f32 %v5075_v3  ;;  %v4995_v24 = vmul.f32 1.442695, %v4985_v31 }
 0x598   : > { %6414 = vpow2.f32 %v4957_v21  ;;  %v4935_v49 = vmax.f32 %v12101_v4, %v4914_v43  ;;  %v4981_v42 = vmax.f32 %v12104_v53, %v12152_v45  ;;  %v4999_v14 = vmul.f32 1.442695, %v4987_v18 }
 0x599   : > { %v6399_v25 = vpop.eup %6398  ;;  %6416 = vpow2.f32 %v5079_v60  ;;  %v5087_v48 = vmul.f32 1.442695, %v5072_v0  ;;  %v5003_v54 = vmul.f32 1.442695, %v4989_v1 }
 0x59a   : > { %6418 = vpow2.f32 %v5083_v40  ;;  %v4936_v59 = vmax.f32 %v4934_v33, %v4935_v49  ;;  %v4982_v27 = vmax.f32 %v4980_v8, %v4981_v42  ;;  %v6401_v12 = vpop.eup %6400  ;;  %v5089_v44 = vadd.f32 1.0, %v6399_v25 }
 0x59b   : > { %6420 = vpow2.f32 %v4991_v5  ;;  %v5091_v32 = vadd.f32 1.0, %v6401_v12  ;;  %v5035_v12 = vmax.f32 %v12047_v63, 0.0 }
 0x59c   : > { %6422 = vpow2.f32 %v4995_v24  ;;  %v4938_v6 = vsub.f32 %v12075_v38, %v4936_v59  ;;  %v4940_v2 = vsub.f32 %v12101_v4, %v4936_v59  ;;  %v4942_v26 = vsub.f32 %v12135_v36, %v4936_v59 }
 0x59d   : > { %v4944_v50 = vsub.f32 %v4914_v43, %v4936_v59  ;;  %v4984_v17 = vsub.f32 %v12078_v23, %v4982_v27  ;;  %6424 = vpow2.f32 %v4999_v14  ;;  %v4990_v46 = vsub.f32 %v12152_v45, %v4982_v27 }
 0x59e   : > { %6426 = vpow2.f32 %v5087_v48  ;;  %v4947_v57 = vmul.f32 1.442695, %v4938_v6  ;;  %v4951_v15 = vmul.f32 1.442695, %v4940_v2  ;;  %v4955_v4 = vmul.f32 1.442695, %v4942_v26 }
 0x59f   : > { %v6403_v30 = vpop.eup %6402  ;;  %6428 = vpow2.f32 %v5003_v54  ;;  %v4986_v20 = vsub.f32 %v12104_v53, %v4982_v27  ;;  %v4959_v36 = vmul.f32 1.442695, %v4944_v50  ;;  %v4988_v7 = vsub.f32 %v12140_v13, %v4982_v27 }
 0x5a0   : > { %v12163_v62 = vpop.eup %6404  ;;  %6430 = vlog2.f32 %v5089_v44  ;;  %v4993_v1 = vmul.f32 1.442695, %v4984_v17  ;;  %v5093_v61 = vadd.f32 1.0, %v6403_v30  ;;  %v5005_v13 = vmul.f32 1.442695, %v4990_v46 }
 0x5a1   : > { %v6407_v38 = vpop.eup %6406  ;;  %6432 = vlog2.f32 %v5091_v32  ;;  %v4997_v16 = vmul.f32 1.442695, %v4986_v20  ;;  %v5001_v3 = vmul.f32 1.442695, %v4988_v7  ;;  %v5033_v27 = vmax.f32 %v12034_v55, 0.0 }
 0x5a2   : > { %v6409_v52 = vpop.eup %6408  ;;  %v4961_v23 = vadd.f32 %v6407_v38, %v12163_v62  ;;  %6434 = vpow2.f32 %v4947_v57  ;;  %v5037_v6 = vmax.f32 %v12062_v51, 0.0 }
 0x5a3   : > { %v6411_v9 = vpop.eup %6410  ;;  %6436 = vpow2.f32 %v4951_v15  ;;  %v5095_v21 = vadd.f32 1.0, %v6409_v52 }
 0x5a4   : > { %v6413_v29 = vpop.eup %6412  ;;  %v4962_v10 = vadd.f32 %v6411_v9, %v4961_v23  ;;  %6438 = vpow2.f32 %v4955_v4 }
 0x5a5   : > { %v6415_v34 = vpop.eup %6414  ;;  %6440 = vpow2.f32 %v4959_v36  ;;  %v5090_v24 = vadd.f32 1.0, %v6413_v29 }
 0x5a6   : > { %v6417_v39 = vpop.eup %6416  ;;  %v4963_v31 = vadd.f32 %v6415_v34, %v4962_v10  ;;  %6442 = vpow2.f32 %v4993_v1 }
 0x5a7   : > { %v6419_v53 = vpop.eup %6418  ;;  %v5092_v14 = vadd.f32 1.0, %v6417_v39 }
 0x5a8   : > { %v12169_v11 = vpop.eup %6420  ;;  %6444 = vrcp.f32 %v4963_v31  ;;  %v5094_v2 = vadd.f32 1.0, %v6419_v53 }
 0x5a9   : > { %v12171_v37 = vpop.eup %6422  ;;  %6446 = vpow2.f32 %v4997_v16 }
 0x5aa   : > { %6448 = vlog2.f32 %v5093_v61  ;;  %v5007_v28 = vadd.f32 %v12171_v37, %v12169_v11  ;;  %v12175_v33 = vpop.eup %6424 }
 0x5ab   : > { %6450 = vpow2.f32 %v5001_v3  ;;  %v6427_v60 = vpop.eup %6426 }
 0x5ac   : > { %6452 = vlog2.f32 %v5095_v21  ;;  %v5008_v40 = vadd.f32 %v12175_v33, %v5007_v28  ;;  %v6429_v18 = vpop.eup %6428  ;;  %v5096_v44 = vadd.f32 1.0, %v6427_v60 }
 0x5ad   : > { %6454 = vpow2.f32 %v5005_v13  ;;  %v6431_v43 = vpop.eup %6430 }
 0x5ae   : > { %v5009_v45 = vadd.f32 %v6429_v18, %v5008_v40  ;;  %v6433_v8 = vpop.eup %6432  ;;  %v5098_v15 = vmul.f32 0.6931472, %v6431_v43 }
 0x5af   : > { %v12178_v5 = vpop.eup %6434  ;;  %v5102_v52 = vmul.f32 0.6931472, %v6433_v8 }
 0x5b0   : > { %6456 = vrcp.f32 %v5009_v45  ;;  %v12180_v0 = vpop.eup %6436 }
 0x5b1   : > { %v12182_v49 = vpop.eup %6438  ;;  %v4964_v42 = vadd.f32 %v12180_v0, %v12178_v5  ;;  %6458 = vlog2.f32 %v5090_v24 }
 0x5b2   : > { %v12186_v25 = vpop.eup %6440  ;;  %6460 = vlog2.f32 %v5092_v14 }
 0x5b3   : > { %v12188_v59 = vpop.eup %6442  ;;  %v4965_v48 = vadd.f32 %v12182_v49, %v4964_v42 }
 0x5b5   : > { %v6445_v54 = vpop.eup %6444  ;;  %v4966_v46 = vadd.f32 %v12186_v25, %v4965_v48 }
 0x5b6   : > { %v12194_v26 = vpop.eup %6446  ;;  %v4968_v50 = vmul.f32 %v6445_v54, %v12163_v62  ;;  %v4971_v17 = vmul.f32 %v6445_v54, %v6407_v38  ;;  %v4973_v32 = vmul.f32 %v6445_v54, %v6411_v9  ;;  %v4975_v30 = vmul.f32 %v6445_v54, %v6415_v34 }
 0x5b7   : > { %v6449_v57 = vpop.eup %6448  ;;  %v5010_v4 = vadd.f32 %v12194_v26, %v12188_v59  ;;  %v5039_v9 = vmax.f32 %v12083_v41, 0.0  ;;  %6462 = vrcp.f32 %v4966_v46 }
 0x5b8   : > { %v12200_v20 = vpop.eup %6450  ;;  %v5041_v23 = vmul.f32 %v12034_v55, %v4968_v50  ;;  %v5043_v36 = vmul.f32 %v12047_v63, %v4971_v17  ;;  %v5045_v62 = vmul.f32 %v12062_v51, %v4973_v32  ;;  %v5047_v7 = vmul.f32 %v12083_v41, %v4975_v30 }
 0x5b9   : > { %v6453_v38 = vpop.eup %6452  ;;  %v5011_v1 = vadd.f32 %v12200_v20, %v5010_v4  ;;  %6464 = vlog2.f32 %v5094_v2  ;;  %v5106_v16 = vmul.f32 0.6931472, %v6449_v57 }
 0x5ba   : > { %v12208_v29 = vpop.eup %6454  ;;  %v5049_v10 = vsub.f32 %v5033_v27, %v5041_v23  ;;  %v5051_v34 = vsub.f32 %v5035_v12, %v5043_v36  ;;  %v5053_v39 = vsub.f32 %v5037_v6, %v5045_v62  ;;  %6466 = vlog2.f32 %v5096_v44 }
 0x5bb   : > { %v5012_v61 = vadd.f32 %v12208_v29, %v5011_v1  ;;  %v5110_v21 = vmul.f32 0.6931472, %v6453_v38  ;;  %v5055_v13 = vsub.f32 %v5039_v9, %v5047_v7  ;;  %v5038_v23 = vmax.f32 %v12116_v47, 0.0 }
 0x5bc   : > { %v5113_v31 = vadd.f32 %v5098_v15, %v5049_v10  ;;  %v5115_v53 = vadd.f32 %v5102_v52, %v5051_v34  ;;  %v5117_v45 = vadd.f32 %v5106_v16, %v5053_v39  ;;  %v5040_v38 = vmax.f32 %v12132_v19, 0.0 }
 0x5bd   : > { %v6457_v3 = vpop.eup %6456  ;;  %6468 = vrcp.f32 %v5012_v61  ;;  %v5119_v54 = vadd.f32 %v5110_v21, %v5055_v13 }
 0x5be   : > { %v5014_v28 = vmul.f32 %v6457_v3, %v12169_v11  ;;  %v5017_v60 = vmul.f32 %v6457_v3, %v12171_v37  ;;  %v5019_v40 = vmul.f32 %v6457_v3, %v12175_v33  ;;  %v5021_v43 = vmul.f32 %v6457_v3, %v6429_v18  ;;  %v6459_v44 = vpop.eup %6458  ;;  %v5161_v33 = vld [vmem:[#allocation2 + $0x28] sm:$0xff] }
 0x5bf   : > { %v5121_v8 = vadd.f32 %v5115_v53, %v5113_v31  ;;  %v6461_v32 = vpop.eup %6460  ;;  %v5100_v1 = vmul.f32 0.6931472, %v6459_v44  ;;  %v5168_v31 = vld [vmem:[#allocation2 + $0x8] sm:$0xff] }
 0x5c0   : > { %v5129_v24 = vmul.f32 %v12034_v55, %v5014_v28  ;;  %v5131_v42 = vmul.f32 %v12047_v63, %v5017_v60  ;;  %v5133_v14 = vmul.f32 %v12062_v51, %v5019_v40  ;;  %v5135_v48 = vmul.f32 %v12083_v41, %v5021_v43 }
 0x5c1   : > { %v5122_v2 = vadd.f32 %v5121_v8, %v5117_v45  ;;  %v5034_v63 = vmax.f32 %v12094_v22, 0.0  ;;  %v5036_v41 = vmax.f32 %v12111_v56, 0.0 }
 0x5c2   : > { %v5137_v50 = vsub.f32 %v5033_v27, %v5129_v24  ;;  %v5139_v11 = vsub.f32 %v5035_v12, %v5131_v42  ;;  %v5141_v17 = vsub.f32 %v5037_v6, %v5133_v14  ;;  %v5143_v18 = vsub.f32 %v5039_v9, %v5135_v48 }
 0x5c3   : > { %v5123_v37 = vadd.f32 %v5122_v2, %v5119_v54 }
 0x5c4   : > { %v5145_v30 = vadd.f32 %v5137_v50, %v5098_v15  ;;  %v5147_v57 = vadd.f32 %v5139_v11, %v5102_v52  ;;  %v6463_v46 = vpop.eup %6462  ;;  %v5149_v51 = vadd.f32 %v5141_v17, %v5106_v16  ;;  %v5151_v52 = vadd.f32 %v5143_v18, %v5110_v21 }
 0x5c5   : > { %v5127_v55 = vmul.f32 %v5123_v37, %v12057_v35  ;;  %v4970_v6 = vmul.f32 %v6463_v46, %v12178_v5  ;;  %v4972_v36 = vmul.f32 %v6463_v46, %v12180_v0  ;;  %v4974_v15 = vmul.f32 %v6463_v46, %v12182_v49 }
 0x5c6   : > { %v5153_v4 = vadd.f32 %v5147_v57, %v5145_v30  ;;  %v6465_v27 = vpop.eup %6464  ;;  %v4976_v9 = vmul.f32 %v6463_v46, %v12186_v25  ;;  %v5104_v0 = vmul.f32 0.6931472, %v6461_v32  ;;  %v5162_v32 = vld [vmem:[#allocation2 + $0x10] sm:$0xff]  ;;  %v5169_v57 = vld [vmem:[#allocation2] sm:$0xff] }
 0x5c7   : > { %v5163_v12 = vadd.f32 %v5161_v33, %v5127_v55  ;;  %v6467_v7 = vpop.eup %6466  ;;  %v5042_v10 = vmul.f32 %v12094_v22, %v4970_v6  ;;  %v5044_v34 = vmul.f32 %v12111_v56, %v4972_v36  ;;  %v5046_v16 = vmul.f32 %v12116_v47, %v4974_v15 }
 0x5c8   : > { %v5154_v62 = vadd.f32 %v5153_v4, %v5149_v51  ;;  %v5108_v61 = vmul.f32 0.6931472, %v6465_v27  ;;  %v5048_v49 = vmul.f32 %v12132_v19, %v4976_v9  ;;  %v5112_v43 = vmul.f32 0.6931472, %v6467_v7  ;;  %v5211_v51 = vld [vmem:[#allocation2 + $0x18] sm:$0xff] (%p320_p6)  ;;  %v5212_v4 = vld [vmem:[#allocation2 + $0x20] sm:$0xff] (%p320_p6) }
 0x5c9   : > { %5165 = vst [vmem:[#allocation2 + $0x28] sm:$0xff] %v5163_v12  ;;  %v5050_v28 = vsub.f32 %v5034_v63, %v5042_v10  ;;  %v5052_v60 = vsub.f32 %v5036_v41, %v5044_v34  ;;  %v5054_v40 = vsub.f32 %v5038_v23, %v5046_v16 }
 0x5ca   : > { %v6469_v5 = vpop.eup %6468  ;;  %v5155_v39 = vadd.f32 %v5154_v62, %v5151_v52 }
 0x5cb   : > { %v5016_v53 = vmul.f32 %v6469_v5, %v12188_v59  ;;  %v5018_v25 = vmul.f32 %v6469_v5, %v12194_v26  ;;  %v5020_v3 = vmul.f32 %v6469_v5, %v12200_v20  ;;  %v5022_v21 = vmul.f32 %v6469_v5, %v12208_v29 }
 0x5cc   : > { %v5159_v13 = vmul.f32 %v5155_v39, %v12057_v35  ;;  %v5056_v59 = vsub.f32 %v5040_v38, %v5048_v49  ;;  %v5114_v14 = vadd.f32 %v5100_v1, %v5050_v28  ;;  %v5116_v26 = vadd.f32 %v5104_v0, %v5052_v60 }
 0x5cd   : > { %v5130_v45 = vmul.f32 %v12094_v22, %v5016_v53  ;;  %v5132_v8 = vmul.f32 %v12111_v56, %v5018_v25  ;;  %v5134_v24 = vmul.f32 %v12116_v47, %v5020_v3  ;;  %v5136_v20 = vmul.f32 %v12132_v19, %v5022_v21 }
 0x5ce   : > { %v5170_v42 = vsub.f32 %v5168_v31, %v5159_v13  ;;  %v5118_v35 = vadd.f32 %v5108_v61, %v5054_v40  ;;  %v5124_v54 = vadd.f32 %v5116_v26, %v5114_v14  ;;  %v5120_v22 = vadd.f32 %v5112_v43, %v5056_v59 }
 0x5cf   : > { %v5138_v48 = vsub.f32 %v5034_v63, %v5130_v45  ;;  %v5140_v29 = vsub.f32 %v5036_v41, %v5132_v8  ;;  %v5142_v2 = vsub.f32 %v5038_v23, %v5134_v24  ;;  %v5144_v44 = vsub.f32 %v5040_v38, %v5136_v20 }
 0x5d0   : > { %5172 = vst [vmem:[#allocation2 + $0x8] sm:$0xff] %v5170_v42  ;;  %v5125_v17 = vadd.f32 %v5124_v54, %v5118_v35  ;;  %v5183_v41 = vld [vmem:[#allocation2 + $0x28] sm:$0xff] (%p320_p6)  ;;  %v5213_v23 = vadd.f32 (%p320_p6), %v5212_v4, %v5211_v51 }
 0x5d1   : > { %v5146_v50 = vadd.f32 %v5138_v48, %v5100_v1  ;;  %v5148_v11 = vadd.f32 %v5140_v29, %v5104_v0  ;;  %v5150_v56 = vadd.f32 %v5142_v2, %v5108_v61  ;;  %v5152_v33 = vadd.f32 %v5144_v44, %v5112_v43 }
 0x5d2   : > { %v5126_v47 = vadd.f32 %v5125_v17, %v5120_v22  ;;  %5214 = vadd.xlane.f32.xlu1 (%p320_p6), %v5213_v23 }
 0x5d3   : > { %v5156_v37 = vadd.f32 %v5148_v11, %v5146_v50 }
 0x5d4   : > { %v5128_v30 = vmul.f32 %v5126_v47, %v12119_v58 }
 0x5d5   : > { %v5157_v18 = vadd.f32 %v5156_v37, %v5150_v56 }
 0x5d6   : > { %v5164_v55 = vadd.f32 %v5162_v32, %v5128_v30 }
 0x5d7   : > { %v5158_v19 = vadd.f32 %v5157_v18, %v5152_v33  ;;  %v5197_v12 = vld [vmem:[#allocation2 + $0x8] sm:$0xff] (%p320_p6) }
 0x5d8   : > { %5166 = vst [vmem:[#allocation2 + $0x10] sm:$0xff] %v5164_v55 }
 0x5d9   : > { %v5160_v63 = vmul.f32 %v5158_v19, %v12119_v58  ;;  %5182 = sbr.rel (!%p320_p6) target bundleno = 1713 (0x6b1), region = 44 }
 0x5db   : > { %v5171_v46 = vsub.f32 %v5169_v57, %v5160_v63 }
 0x5dd   : > { %5173 = vst [vmem:[#allocation2] sm:$0xff] %v5171_v46 }
 0x5df   : > { %v5184_v27 = vld [vmem:[#allocation2 + $0x10] sm:$0xff] }
 0x5e0   : > { %v5185_v36 = vadd.f32 %v5184_v27, %v5183_v41 }
 0x5e2   : > { %5186 = vadd.xlane.f32.xlu0 %v5185_v36 }
 0x5e4   : > { %v5198_v6 = vld [vmem:[#allocation2] sm:$0xff] }
 0x5e5   : > { %v5199_v15 = vadd.f32 %v5198_v6, %v5197_v12 }
 0x5e7   : > { %5200 = vadd.xlane.f32.xlu0 %v5199_v15 }
 0x65b   : > { %v5215_v52 = vpop.xlane.xlu1 %5214 }
 0x65c   : > { %v5216_v58 = vrot.slane %v5215_v52, 4 }
 0x65e   : > { %v5217_v9 = vadd.f32 %v5216_v58, %v5215_v52 }
 0x660   : > { %v5218_v1 = vrot.slane %v5217_v9, 2 }
 0x662   : > { %v5219_v0 = vadd.f32 %v5218_v1, %v5217_v9 }
 0x664   : > { %v5220_v25 = vrot.slane %v5219_v0, 1 }
 0x666   : > { %v5221_v13 = vadd.f32 %v5220_v25, %v5219_v0 }
 0x66b   : > { %v5187_v62 = vpop.xlane.xlu0 %5186 }
 0x66c   : > { %v5188_v38 = vrot.slane %v5187_v62, 4 }
 0x66e   : > { %v5189_v7 = vadd.f32 %v5188_v38, %v5187_v62 }
 0x670   : > { %v5201_v10 = vpop.xlane.xlu0 %5200  ;;  %v5190_v34 = vrot.slane %v5189_v7, 2 }
 0x671   : > { %v5202_v16 = vrot.slane %v5201_v10, 4 }
 0x672   : > { %v5191_v39 = vadd.f32 %v5190_v34, %v5189_v7 }
 0x673   : > { %v5203_v5 = vadd.f32 %v5202_v16, %v5201_v10 }
 0x674   : > { %v5192_v49 = vrot.slane %v5191_v39, 1 }
 0x675   : > { %v5204_v61 = vrot.slane %v5203_v5, 2 }
 0x676   : > { %v5193_v53 = vadd.f32 %v5192_v49, %v5191_v39 }
 0x677   : > { %v5205_v31 = vadd.f32 %v5204_v61, %v5203_v5 }
 0x678   : > { %5367 = vpush %v5193_v53 }
 0x679   : > { %v5206_v3 = vrot.slane %v5205_v31, 1 }
 0x67b   : > { %v5207_v21 = vadd.f32 %v5206_v3, %v5205_v31 }
 0x67d   : > { %5369 = vpush %v5207_v21 }
 0x67e   : > { %5371 = vpush %v5221_v13 }
 0x6a9   : > { %s5368_s15 = spop %5367 }
 0x6aa   : > { %5196 = sst [smem:[#allocation3]] %s5368_s15 }
 0x6ae   : > { %s5370_s20 = spop %5369 }
 0x6af   : > { %5210 = sst [smem:[#allocation3 + $0x1]] %s5370_s20  ;;  %s5372_s21 = spop %5371 }
 0x6b0   : > { %5224 = sst [smem:[#allocation3 + $0x2]] %s5372_s21 }
 0x6b1 PF: > { %p5377_p7 = scmp.eq.s32.totalorder %s5345_s18, 1  ;;  %s6514_s22 = smov [#allocation3]  }
 0x6b3   : > { %5374 = dma.smem_to_hbm (%p5377_p7), %s6514_s22, 16, %s12262_s4, [#allocation4]  }
 0x6b4   : > { %6493 = dma.done.wait (%p5377_p7), [#allocation4], 16  }
 0x6b5   : > { %6495 = vsyncadd (%p5377_p7), [#allocation4], 4294967280 }
 0x6b6   : > { %5238 = sfence }
 0x6b7 PF: > { %s15_s17 = sadd.s32 1, %s6506_s17   ;;  %s13983_s15 = smov %s6502_s16 }
 0x6b8   : > { %p12_p8 = scmp.ge.s32.totalorder %s15_s17, 4   ;;  %s13984_s16 = smov %s13986_s19 }
 0x6ba   :  { %14 = sbr.rel (!%p12_p8) target bundleno = 2 (0x2), region = 88 }
 0x6bf   :  { %5244 = vsyncpa [#allocation4], 1 }
 0x6c0   :  { %5246 = vsyncpa [#allocation4 + $0x1], 1 }

</bundles_post_ra>
